<compile_context>
chip_gen: v6e
topology: v6e:2x2x1
jax: 0.10.0
libtpu: 0.0.40
codegen_flags: <defaults>
</compile_context>

<pallas_src>
import functools

import numpy as np
import jax
import jax.numpy as jnp
from jax.experimental import pallas as pl
from jax.experimental.pallas import tpu as pltpu

_IMAGENET_MEAN = np.array([0.485, 0.456, 0.406], np.float32)
_IMAGENET_STD = np.array([0.229, 0.224, 0.225], np.float32)

TM_HARD_CAP = 2048   # max rows per M tile (keeps per-step DMA chunks pipeline-friendly)


def _round_up(x, m):
    return (x + m - 1) // m * m


def _detect_tpu():
    """Generation-gated VMEM budgets and TensorCore count (safe conservative fallback)."""
    try:
        kind = jax.devices()[0].device_kind.lower()
    except Exception:
        kind = ""
    if ("v5" in kind) or ("v6" in kind):
        # 128 MiB physical VMEM, 1 TensorCore per chip
        return 96 * 2**20, 32 * 2**20, 1
    # v7x (64 MiB VMEM per TC, 2 TCs) or unknown device: conservative, safe everywhere
    return 40 * 2**20, 12 * 2**20, 2


VMEM_LIMIT, VMEM_TILE_BUDGET, _NUM_TC = _detect_tpu()


# ---------------------------------------------------------------------------
# Pallas matmul kernel: y = [relu]((x @ w) + bias [+ residual]) or (y > 0) mask
# ---------------------------------------------------------------------------
def _mm_kernel(*refs, k_steps, has_bias, has_res, relu, emit_mask):
    it = iter(refs)
    x_ref = next(it)
    w_ref = next(it)
    b_ref = next(it) if has_bias else None
    r_ref = next(it) if has_res else None
    o_ref = next(it)
    acc_ref = next(it) if k_steps > 1 else None

    def finish(acc):
        y = acc
        if has_bias:
            y = y + b_ref[...]
        if has_res:
            y = y + r_ref[...].astype(jnp.float32)
        if relu:
            y = jnp.maximum(y, 0.0)
        if emit_mask:
            o_ref[...] = jnp.where(y > 0.0, 1, 0).astype(o_ref.dtype)
        else:
            o_ref[...] = y.astype(o_ref.dtype)

    if k_steps == 1:
        finish(jnp.dot(x_ref[...], w_ref[...], preferred_element_type=jnp.float32))
    else:
        @pl.when(pl.program_id(1) == 0)
        def _():
            acc_ref[...] = jnp.zeros_like(acc_ref)

        acc_ref[...] += jnp.dot(x_ref[...], w_ref[...], preferred_element_type=jnp.float32)

        @pl.when(pl.program_id(1) == k_steps - 1)
        def _():
            finish(acc_ref[...])


def _choose_tiles(M, K, N, has_res, out_itemsize):
    """Pick (TM, TK, Kp): TM = largest divisor of M (multiple of 8, <= cap) fitting the VMEM
    budget (even block counts preferred on 2-TC chips); TK = full K if it fits, else the largest
    256/128-multiple divisor of K (no K padding), padded fallback only as a last resort."""
    def tile_bytes(tm, tk):
        b = 2 * 2 * tm * tk                  # x bf16, double-buffered
        b += 2 * 2 * tk * N                  # w bf16, double-buffered
        b += 2 * out_itemsize * tm * N       # out, double-buffered
        if has_res:
            b += 2 * 2 * tm * N              # residual bf16, double-buffered
        if tk < K:
            b += 4 * tm * N                  # f32 accumulator scratch (single)
        b += 2 * 2 * 4 * N                   # bias row(s), generous
        return b

    tk_probe = K if K <= 512 else 512        # assume K can be split this far when sizing TM

    if M % 8 != 0:
        tm = M                               # single full-M block (block dim == full dim is legal)
    else:
        cands = [d for d in range(8, min(M, TM_HARD_CAP) + 1, 8)
                 if M % d == 0 and tile_bytes(d, tk_probe) <= VMEM_TILE_BUDGET]
        if not cands:
            tm = 8
        else:
            def key(d):
                blocks = M // d
                rounds = -(-blocks // _NUM_TC)
                uneven = 1 if (_NUM_TC > 1 and d >= 64 and blocks % _NUM_TC != 0) else 0
                return (rounds, uneven, blocks)
            tm = min(cands, key=key)

    if tile_bytes(tm, K) <= VMEM_TILE_BUDGET:
        return tm, K, K
    for step in (256, 128):
        divs = [d for d in range(step, K, step)
                if K % d == 0 and tile_bytes(tm, d) <= VMEM_TILE_BUDGET]
        if divs:
            return tm, max(divs), K
    tk = 512
    while tk > 128 and tile_bytes(tm, tk) > VMEM_TILE_BUDGET:
        tk //= 2
    return tm, tk, _round_up(K, tk)


def matmul_fused(x, w, bias=None, residual=None, relu=False, emit_mask=False,
                 out_dtype=jnp.bfloat16):
    """(M,K)@(K,N) on the MXU with fused per-column bias, residual add, ReLU, and optional
    '>0' int32 mask emission.  Inputs cast to bf16, f32 accumulation.  N is never tiled."""
    M, K = x.shape
    K2, N = w.shape
    assert K == K2
    if emit_mask:
        out_dtype = jnp.int32
    xb = x.astype(jnp.bfloat16)
    wb = w.astype(jnp.bfloat16)              # weights are jit constants -> cast folds at compile time

    has_bias = bias is not None
    has_res = residual is not None
    out_isz = jnp.dtype(out_dtype).itemsize

    TM, TK, Kp = _choose_tiles(M, K, N, has_res, out_isz)
    if Kp != K:                              # rare fallback: no clean divisor of K fit the budget
        xb = jnp.pad(xb, ((0, 0), (0, Kp - K)))
        wb = jnp.pad(wb, ((0, Kp - K), (0, 0)))
    m_blocks = M // TM
    k_steps = Kp // TK

    b2 = None if not has_bias else jnp.asarray(bias, jnp.float32).reshape(1, N)
    res = None if not has_res else residual.astype(jnp.bfloat16)

    if k_steps == 1:
        grid = (m_blocks,)
        im_x = lambda i: (i, 0)
        im_w = lambda i: (0, 0)
        im_v = lambda i: (0, 0)
        im_o = lambda i: (i, 0)
        sem = ("parallel",)
        scratch = []
    else:
        grid = (m_blocks, k_steps)           # reduction axis last
        im_x = lambda i, k: (i, k)
        im_w = lambda i, k: (k, 0)
        im_v = lambda i, k: (0, 0)
        im_o = lambda i, k: (i, 0)
        sem = ("parallel", "arbitrary")
        scratch = [pltpu.VMEM((TM, N), jnp.float32)]

    in_specs = [pl.BlockSpec((TM, TK), im_x),
                pl.BlockSpec((TK, N), im_w)]
    args = [xb, wb]
    if has_bias:
        in_specs.append(pl.BlockSpec((1, N), im_v))
        args.append(b2)
    if has_res:
        in_specs.append(pl.BlockSpec((TM, N), im_o))
        args.append(res)

    kern = functools.partial(_mm_kernel, k_steps=k_steps, has_bias=has_bias,
                             has_res=has_res, relu=relu, emit_mask=emit_mask)

    # advisory cost hint so XLA can overlap the surrounding glue with the custom call
    flops = 2 * M * Kp * N
    bytes_accessed = M * Kp * 2 + Kp * N * 2 * m_blocks + M * N * out_isz
    if has_bias:
        bytes_accessed += 4 * N
    if has_res:
        bytes_accessed += M * N * 2

    return pl.pallas_call(
        kern,
        out_shape=jax.ShapeDtypeStruct((M, N), out_dtype),
        grid_spec=pltpu.PrefetchScalarGridSpec(
            num_scalar_prefetch=0, grid=grid,
            in_specs=in_specs,
            out_specs=pl.BlockSpec((TM, N), im_o),
            scratch_shapes=scratch),
        compiler_params=pltpu.CompilerParams(
            dimension_semantics=sem, vmem_limit_bytes=VMEM_LIMIT),
        cost_estimate=pl.CostEstimate(flops=flops, transcendentals=0,
                                      bytes_accessed=bytes_accessed),
    )(*args)


# ---------------------------------------------------------------------------
# Conv / pool / resize / mask built on the fused Pallas matmul
# ---------------------------------------------------------------------------
def conv2d(x_hwc, w, b, stride=1, padding=0, dilation=1, relu=False, residual=None,
           out_dtype=jnp.bfloat16):
    """w: (kh, kw, Cin, Cout). im2col (free reshape for 1x1) + one fused Pallas matmul."""
    kh, kw, cin, cout = w.shape
    H, W, C = x_hwc.shape
    assert C == cin
    Ho = (H + 2 * padding - dilation * (kh - 1) - 1) // stride + 1
    Wo = (W + 2 * padding - dilation * (kw - 1) - 1) // stride + 1
    if kh == 1 and kw == 1 and stride == 1 and padding == 0:
        xmat = x_hwc.reshape(H * W, cin)
    else:
        xp = jnp.pad(x_hwc, ((padding, padding), (padding, padding), (0, 0))) if padding else x_hwc
        # TODO(synk): 3x3/7x7 im2col is still materialized by XLA glue (bf16 halves its HBM cost);
        #             a fully fused implicit-GEMM conv would need shifted-window DMA in the kernel.
        cols = []
        for i in range(kh):
            for j in range(kw):
                r0, c0 = i * dilation, j * dilation
                cols.append(xp[r0:r0 + stride * (Ho - 1) + 1:stride,
                               c0:c0 + stride * (Wo - 1) + 1:stride, :])
        xmat = (cols[0] if len(cols) == 1
                else jnp.concatenate(cols, axis=-1)).reshape(Ho * Wo, kh * kw * cin)
    wmat = w.reshape(kh * kw * cin, cout)
    rmat = None if residual is None else residual.reshape(Ho * Wo, cout)
    y = matmul_fused(xmat, wmat, bias=b, residual=rmat, relu=relu, out_dtype=out_dtype)
    return y.reshape(Ho, Wo, cout)


def maxpool2d(x_hwc, k=3, stride=2, padding=1):
    H, W, C = x_hwc.shape
    xp = jnp.pad(x_hwc, ((padding, padding), (padding, padding), (0, 0)),
                 constant_values=-jnp.inf)
    Ho = (H + 2 * padding - k) // stride + 1
    Wo = (W + 2 * padding - k) // stride + 1
    out = None
    for i in range(k):
        for j in range(k):
            patch = xp[i:i + stride * (Ho - 1) + 1:stride,
                       j:j + stride * (Wo - 1) + 1:stride, :]
            out = patch if out is None else jnp.maximum(out, patch)
    return out


def _bilinear_matrix(n_in, n_out):
    # F.interpolate / T.Resize (mode='bilinear', align_corners=False)
    # TODO(synk): T.Resize with antialias=True would additionally low-pass when heavily downscaling.
    scale = n_in / n_out
    src = (np.arange(n_out) + 0.5) * scale - 0.5
    src = np.clip(src, 0.0, n_in - 1)
    i0 = np.floor(src).astype(np.int64)
    i1 = np.minimum(i0 + 1, n_in - 1)
    w1 = (src - i0).astype(np.float32)
    w0 = 1.0 - w1
    m = np.zeros((n_out, n_in), np.float32)
    m[np.arange(n_out), i0] += w0
    m[np.arange(n_out), i1] += w1
    return m


def resize_normalize(x_hwc, out_hw, ch_scale, ch_bias, out_dtype=jnp.bfloat16):
    """Separable bilinear resize as two transpose-free Pallas matmuls that emit HWC directly.
    Stage 2 right-multiplies by the channel-interleaved constant kron(Aw^T, I_C); the /255 +
    Normalize per-channel scale is folded into that constant's columns and the shift into the
    fused bias (exact: bilinear rows sum to 1, so the affine commutes with the resize)."""
    H, W, C = x_hwc.shape
    Ho, Wo = out_hw
    Ah = _bilinear_matrix(H, Ho)                                       # (Ho, H)
    Awc = np.kron(_bilinear_matrix(W, Wo).T, np.eye(C, dtype=np.float32))   # (W*C, Wo*C)
    Awc = Awc * np.tile(np.asarray(ch_scale, np.float32), Wo)[None, :]
    bias = jnp.asarray(np.tile(np.asarray(ch_bias, np.float32), Wo))
    t = matmul_fused(jnp.asarray(Ah), x_hwc.reshape(H, W * C))         # (Ho, W*C)
    o = matmul_fused(t, jnp.asarray(Awc), bias=bias, out_dtype=out_dtype)   # (Ho, Wo*C)
    return o.reshape(Ho, Wo, C)


def upsample_mask(d_hw, out_hw):
    """F.interpolate(bilinear, align_corners=False) of the 2-class logit difference to out_hw,
    thresholded at 0 inside the last matmul's epilogue (== torch.argmax over 2 classes, with the
    same first-max tie-break), already in (H, W, 1) layout.  No transposes, no argmax kernel."""
    h, w = d_hw.shape
    Ho, Wo = out_hw
    Ah = _bilinear_matrix(h, Ho)                       # (Ho, h)
    AwT = _bilinear_matrix(w, Wo).T                    # (w, Wo)
    t = matmul_fused(jnp.asarray(Ah), d_hw)                            # (Ho, w)
    mask = matmul_fused(t, jnp.asarray(AwT), emit_mask=True)           # (Ho, Wo) int32
    # TODO(synk): torch.argmax emits int64; int32 is kept here (sufficient for a class mask).
    return mask[:, :, None]                                            # (Ho, Wo, 1)


# ---------------------------------------------------------------------------
# Model definition (FCN w/ bottleneck-ResNet backbone, BN folded into conv+bias)
# ---------------------------------------------------------------------------
def build_model(key, width=16, blocks=(2, 2, 2, 2), num_classes=2):
    exp = 4

    def conv_init(k, kh, kw, cin, cout):
        kw_, kb_ = jax.random.split(k)
        w = jax.random.normal(kw_, (kh, kw, cin, cout), jnp.float32) * np.sqrt(2.0 / (kh * kw * cin))
        b = jax.random.normal(kb_, (cout,), jnp.float32) * 0.05
        return {'w': w, 'b': b}

    model = {}
    key, k1 = jax.random.split(key)
    model['conv1'] = conv_init(k1, 7, 7, 3, width)

    inplanes, dilation = width, 1
    layer_cfg = [(blocks[0], width, 1, False),
                 (blocks[1], width * 2, 2, False),
                 (blocks[2], width * 4, 2, True),    # replace_stride_with_dilation
                 (blocks[3], width * 8, 2, True)]
    layers = []
    for nb, planes, stride, dilate in layer_cfg:
        prev_dilation = dilation
        if dilate:
            dilation *= stride
            stride = 1
        blks = []
        for bi in range(nb):
            key, ka, kb, kc, kd = jax.random.split(key, 5)
            s = stride if bi == 0 else 1
            d = prev_dilation if bi == 0 else dilation
            blk = {'stride': s, 'dilation': d,
                   'conv1': conv_init(ka, 1, 1, inplanes, planes),
                   'conv2': conv_init(kb, 3, 3, planes, planes),
                   'conv3': conv_init(kc, 1, 1, planes, planes * exp),
                   'down': None}
            if bi == 0 and (s != 1 or inplanes != planes * exp):
                blk['down'] = conv_init(kd, 1, 1, inplanes, planes * exp)
            blks.append(blk)
            inplanes = planes * exp
        layers.append(blks)
    model['layers'] = layers

    key, kh1, kh2 = jax.random.split(key, 3)
    model['head'] = conv_init(kh1, 3, 3, inplanes, inplanes // 4)
    model['cls'] = conv_init(kh2, 1, 1, inplanes // 4, num_classes)  # classifier[4] -> 2 classes
    return model


def bottleneck(x, blk):
    s, d = blk['stride'], blk['dilation']
    out = conv2d(x, blk['conv1']['w'], blk['conv1']['b'], relu=True)
    out = conv2d(out, blk['conv2']['w'], blk['conv2']['b'],
                 stride=s, padding=d, dilation=d, relu=True)
    if blk['down'] is not None:
        identity = conv2d(x, blk['down']['w'], blk['down']['b'], stride=s, relu=False)
    else:
        identity = x
    # conv3 with the residual add + ReLU fused into its matmul epilogue
    return conv2d(out, blk['conv3']['w'], blk['conv3']['b'], relu=True, residual=identity)


def fcn_forward(model, x_hwc, resize_hw):
    # --- preprocessing transform: unsqueeze/permute is a layout choice; /255 + Normalize are
    #     folded into the bilinear-resize matmul (scale into its constant weights, shift into
    #     the fused bias) -- exact. ---
    ch_scale = 1.0 / (255.0 * _IMAGENET_STD)
    ch_bias = -_IMAGENET_MEAN / _IMAGENET_STD
    x = resize_normalize(x_hwc, resize_hw, ch_scale, ch_bias)
    Hr, Wr, _ = x.shape

    # --- backbone ---
    c = model['conv1']
    x = conv2d(x, c['w'], c['b'], stride=2, padding=3, relu=True)
    x = maxpool2d(x, 3, 2, 1)
    for layer in model['layers']:
        for blk in layer:
            x = bottleneck(x, blk)

    # --- FCN head ---
    c = model['head']
    x = conv2d(x, c['w'], c['b'], stride=1, padding=1, relu=True)
    # nn.Dropout(0.1) is identity in eval mode.

    # --- classifier + upsample + argmax: with 2 classes, argmax == (logit1 - logit0 > 0), and
    #     bilinear upsampling commutes with the difference, so only one logit-difference channel
    #     is computed, upsampled, and thresholded (removes the lane-sparse N=2 matmul, the
    #     class-major transposes and the separate argmax kernel). ---
    c = model['cls']
    assert c['w'].shape[-1] == 2
    wd = c['w'][..., 1:2] - c['w'][..., 0:1]        # (1,1,Cmid,1)
    bd = c['b'][1:2] - c['b'][0:1]                  # (1,)
    d = conv2d(x, wd, bd, relu=False)[:, :, 0]      # (h, w) logit difference
    return upsample_mask(d, (Hr, Wr))               # (Hr, Wr, 1) int32


if __name__ == "__main__":
    key = jax.random.PRNGKey(0)
    kx, kp = jax.random.split(key)

    # small stand-ins for the module's (480, 640, 3) input and (192, 256) resize target
    H_IN, W_IN = 48, 64
    RESIZE = (24, 32)

    x = jax.random.normal(kx, (H_IN, W_IN, 3), jnp.float32)
    model = build_model(kp, width=16, blocks=(2, 2, 2, 2), num_classes=2)

    run = jax.jit(lambda img: fcn_forward(model, img, RESIZE))
    out = run(x)
    jax.block_until_ready(out)

    assert out.shape == (RESIZE[0], RESIZE[1], 1), out.shape
    assert out.dtype == jnp.int32
    print("KERNEL_OK")
</pallas_src>

<mosaic_0001>
module attributes {stable_mosaic.version = 11 : i64} {
  func.func @_mm_kernel(%arg0: i32, %arg1: memref<24x48xbf16, #tpu.memory_space<vmem>>, %arg2: memref<48x192xbf16, #tpu.memory_space<vmem>>, %arg3: memref<24x192xbf16, #tpu.memory_space<vmem>>) attributes {dimension_semantics = [#tpu.dimension_semantics<parallel>], iteration_bounds = array<i64: 1>, scalar_prefetch = 0 : i64, scratch_operands = 0 : i64, tpu.core_type = #tpu.core_type<tc>, window_params = [{transform_indices = @transform_0, window_bounds = array<i64: 24, 48>}, {pipeline_mode = #tpu.pipeline_mode<synchronous>, transform_indices = @transform_1, window_bounds = array<i64: 48, 192>}, {transform_indices = @transform_2, window_bounds = array<i64: 24, 192>}]} {
    %c0 = arith.constant 0 : index
    %c0_0 = arith.constant 0 : index
    %0 = vector.load %arg1[%c0, %c0_0] : memref<24x48xbf16, #tpu.memory_space<vmem>>, vector<24x48xbf16>
    %c0_1 = arith.constant 0 : index
    %c0_2 = arith.constant 0 : index
    %1 = vector.load %arg2[%c0_1, %c0_2] : memref<48x192xbf16, #tpu.memory_space<vmem>>, vector<48x192xbf16>
    %cst = arith.constant dense<0.000000e+00> : vector<24x192xf32>
    %2 = tpu.matmul %0, %1, %cst {dimension_numbers = #tpu.dot_dimension_numbers<[1], [0], [0], [1], [0, 0, 1, 1], [], []>} : vector<24x48xbf16>, vector<48x192xbf16>, vector<24x192xf32> -> vector<24x192xf32>
    %3 = arith.truncf %2 : vector<24x192xf32> to vector<24x192xbf16>
    %c0_3 = arith.constant 0 : index
    %c0_4 = arith.constant 0 : index
    %4 = vector.load %arg3[%c0_3, %c0_4] : memref<24x192xbf16, #tpu.memory_space<vmem>>, vector<24x192xbf16>
    tpu.vector_store %arg3[%c0_3, %c0_4], %3 {strides = array<i32>} : memref<24x192xbf16, #tpu.memory_space<vmem>>, vector<24x192xbf16>,
    return
  }
  func.func @transform_0(%arg0: i32) -> (i32, i32) {
    %c0_i32 = arith.constant 0 : i32
    %c0_i32_0 = arith.constant 0 : i32
    return %arg0, %c0_i32 : i32, i32
  }
  func.func @transform_1(%arg0: i32) -> (i32, i32) {
    %c0_i32 = arith.constant 0 : i32
    %c0_i32_0 = arith.constant 0 : i32
    %c0_i32_1 = arith.constant 0 : i32
    return %c0_i32, %c0_i32_0 : i32, i32
  }
  func.func @transform_2(%arg0: i32) -> (i32, i32) {
    %c0_i32 = arith.constant 0 : i32
    %c0_i32_0 = arith.constant 0 : i32
    return %arg0, %c0_i32 : i32, i32
  }
}

module attributes {stable_mosaic.version = 11 : i64} {
  func.func @_mm_kernel(%arg0: i32, %arg1: memref<24x192xbf16, #tpu.memory_space<vmem>>, %arg2: memref<192x96xbf16, #tpu.memory_space<vmem>>, %arg3: memref<1x96xf32, #tpu.memory_space<vmem>>, %arg4: memref<24x96xbf16, #tpu.memory_space<vmem>>) attributes {dimension_semantics = [#tpu.dimension_semantics<parallel>], iteration_bounds = array<i64: 1>, scalar_prefetch = 0 : i64, scratch_operands = 0 : i64, tpu.core_type = #tpu.core_type<tc>, window_params = [{transform_indices = @transform_0, window_bounds = array<i64: 24, 192>}, {pipeline_mode = #tpu.pipeline_mode<synchronous>, transform_indices = @transform_1, window_bounds = array<i64: 192, 96>}, {pipeline_mode = #tpu.pipeline_mode<synchronous>, transform_indices = @transform_2, window_bounds = array<i64: 1, 96>}, {transform_indices = @transform_3, window_bounds = array<i64: 24, 96>}]} {
    %c0 = arith.constant 0 : index
    %c0_0 = arith.constant 0 : index
    %0 = vector.load %arg1[%c0, %c0_0] : memref<24x192xbf16, #tpu.memory_space<vmem>>, vector<24x192xbf16>
    %c0_1 = arith.constant 0 : index
    %c0_2 = arith.constant 0 : index
    %1 = vector.load %arg2[%c0_1, %c0_2] : memref<192x96xbf16, #tpu.memory_space<vmem>>, vector<192x96xbf16>
    %cst = arith.constant dense<0.000000e+00> : vector<24x96xf32>
    %2 = tpu.matmul %0, %1, %cst {dimension_numbers = #tpu.dot_dimension_numbers<[1], [0], [0], [1], [0, 0, 1, 1], [], []>} : vector<24x192xbf16>, vector<192x96xbf16>, vector<24x96xf32> -> vector<24x96xf32>
    %c0_3 = arith.constant 0 : index
    %c0_4 = arith.constant 0 : index
    %3 = vector.load %arg3[%c0_3, %c0_4] : memref<1x96xf32, #tpu.memory_space<vmem>>, vector<1x96xf32>
    %4 = vector.broadcast %3 : vector<1x96xf32> to vector<24x96xf32>
    %5 = arith.addf %2, %4 : vector<24x96xf32>
    %6 = arith.truncf %5 : vector<24x96xf32> to vector<24x96xbf16>
    %c0_5 = arith.constant 0 : index
    %c0_6 = arith.constant 0 : index
    %7 = vector.load %arg4[%c0_5, %c0_6] : memref<24x96xbf16, #tpu.memory_space<vmem>>, vector<24x96xbf16>
    tpu.vector_store %arg4[%c0_5, %c0_6], %6 {strides = array<i32>} : memref<24x96xbf16, #tpu.memory_space<vmem>>, vector<24x96xbf16>,
    return
  }
  func.func @transform_0(%arg0: i32) -> (i32, i32) {
    %c0_i32 = arith.constant 0 : i32
    %c0_i32_0 = arith.constant 0 : i32
    return %arg0, %c0_i32 : i32, i32
  }
  func.func @transform_1(%arg0: i32) -> (i32, i32) {
    %c0_i32 = arith.constant 0 : i32
    %c0_i32_0 = arith.constant 0 : i32
    %c0_i32_1 = arith.constant 0 : i32
    return %c0_i32, %c0_i32_0 : i32, i32
  }
  func.func @transform_2(%arg0: i32) -> (i32, i32) {
    %c0_i32 = arith.constant 0 : i32
    %c0_i32_0 = arith.constant 0 : i32
    %c0_i32_1 = arith.constant 0 : i32
    return %c0_i32, %c0_i32_0 : i32, i32
  }
  func.func @transform_3(%arg0: i32) -> (i32, i32) {
    %c0_i32 = arith.constant 0 : i32
    %c0_i32_0 = arith.constant 0 : i32
    return %arg0, %c0_i32 : i32, i32
  }
}

module attributes {stable_mosaic.version = 11 : i64} {
  func.func @_mm_kernel(%arg0: i32, %arg1: memref<96x147xbf16, #tpu.memory_space<vmem>>, %arg2: memref<147x16xbf16, #tpu.memory_space<vmem>>, %arg3: memref<1x16xf32, #tpu.memory_space<vmem>>, %arg4: memref<96x16xbf16, #tpu.memory_space<vmem>>) attributes {dimension_semantics = [#tpu.dimension_semantics<parallel>], iteration_bounds = array<i64: 2>, scalar_prefetch = 0 : i64, scratch_operands = 0 : i64, tpu.core_type = #tpu.core_type<tc>, window_params = [{transform_indices = @transform_0, window_bounds = array<i64: 96, 147>}, {pipeline_mode = #tpu.pipeline_mode<synchronous>, transform_indices = @transform_1, window_bounds = array<i64: 147, 16>}, {pipeline_mode = #tpu.pipeline_mode<synchronous>, transform_indices = @transform_2, window_bounds = array<i64: 1, 16>}, {transform_indices = @transform_3, window_bounds = array<i64: 96, 16>}]} {
    %c0 = arith.constant 0 : index
    %c0_0 = arith.constant 0 : index
    %0 = vector.load %arg1[%c0, %c0_0] : memref<96x147xbf16, #tpu.memory_space<vmem>>, vector<96x147xbf16>
    %c0_1 = arith.constant 0 : index
    %c0_2 = arith.constant 0 : index
    %1 = vector.load %arg2[%c0_1, %c0_2] : memref<147x16xbf16, #tpu.memory_space<vmem>>, vector<147x16xbf16>
    %cst = arith.constant dense<0.000000e+00> : vector<96x16xf32>
    %2 = tpu.matmul %0, %1, %cst {dimension_numbers = #tpu.dot_dimension_numbers<[1], [0], [0], [1], [0, 0, 1, 1], [], []>} : vector<96x147xbf16>, vector<147x16xbf16>, vector<96x16xf32> -> vector<96x16xf32>
    %c0_3 = arith.constant 0 : index
    %c0_4 = arith.constant 0 : index
    %3 = vector.load %arg3[%c0_3, %c0_4] : memref<1x16xf32, #tpu.memory_space<vmem>>, vector<1x16xf32>
    %4 = vector.broadcast %3 : vector<1x16xf32> to vector<96x16xf32>
    %5 = arith.addf %2, %4 : vector<96x16xf32>
    %cst_5 = arith.constant 0.000000e+00 : f32
    %6 = vector.broadcast %cst_5 : f32 to vector<96x16xf32>
    %7 = arith.maximumf %5, %6 : vector<96x16xf32>
    %8 = arith.truncf %7 : vector<96x16xf32> to vector<96x16xbf16>
    %c0_6 = arith.constant 0 : index
    %c0_7 = arith.constant 0 : index
    %9 = vector.load %arg4[%c0_6, %c0_7] : memref<96x16xbf16, #tpu.memory_space<vmem>>, vector<96x16xbf16>
    tpu.vector_store %arg4[%c0_6, %c0_7], %8 {strides = array<i32>} : memref<96x16xbf16, #tpu.memory_space<vmem>>, vector<96x16xbf16>,
    return
  }
  func.func @transform_0(%arg0: i32) -> (i32, i32) {
    %c0_i32 = arith.constant 0 : i32
    %c0_i32_0 = arith.constant 0 : i32
    return %arg0, %c0_i32 : i32, i32
  }
  func.func @transform_1(%arg0: i32) -> (i32, i32) {
    %c0_i32 = arith.constant 0 : i32
    %c0_i32_0 = arith.constant 0 : i32
    %c0_i32_1 = arith.constant 0 : i32
    return %c0_i32, %c0_i32_0 : i32, i32
  }
  func.func @transform_2(%arg0: i32) -> (i32, i32) {
    %c0_i32 = arith.constant 0 : i32
    %c0_i32_0 = arith.constant 0 : i32
    %c0_i32_1 = arith.constant 0 : i32
    return %c0_i32, %c0_i32_0 : i32, i32
  }
  func.func @transform_3(%arg0: i32) -> (i32, i32) {
    %c0_i32 = arith.constant 0 : i32
    %c0_i32_0 = arith.constant 0 : i32
    return %arg0, %c0_i32 : i32, i32
  }
}

module attributes {stable_mosaic.version = 11 : i64} {
  func.func @_mm_kernel(%arg0: i32, %arg1: memref<48x16xbf16, #tpu.memory_space<vmem>>, %arg2: memref<16x16xbf16, #tpu.memory_space<vmem>>, %arg3: memref<1x16xf32, #tpu.memory_space<vmem>>, %arg4: memref<48x16xbf16, #tpu.memory_space<vmem>>) attributes {dimension_semantics = [#tpu.dimension_semantics<parallel>], iteration_bounds = array<i64: 1>, scalar_prefetch = 0 : i64, scratch_operands = 0 : i64, tpu.core_type = #tpu.core_type<tc>, window_params = [{transform_indices = @transform_0, window_bounds = array<i64: 48, 16>}, {pipeline_mode = #tpu.pipeline_mode<synchronous>, transform_indices = @transform_1, window_bounds = array<i64: 16, 16>}, {pipeline_mode = #tpu.pipeline_mode<synchronous>, transform_indices = @transform_2, window_bounds = array<i64: 1, 16>}, {transform_indices = @transform_3, window_bounds = array<i64: 48, 16>}]} {
    %c0 = arith.constant 0 : index
    %c0_0 = arith.constant 0 : index
    %0 = vector.load %arg1[%c0, %c0_0] : memref<48x16xbf16, #tpu.memory_space<vmem>>, vector<48x16xbf16>
    %c0_1 = arith.constant 0 : index
    %c0_2 = arith.constant 0 : index
    %1 = vector.load %arg2[%c0_1, %c0_2] : memref<16x16xbf16, #tpu.memory_space<vmem>>, vector<16x16xbf16>
    %cst = arith.constant dense<0.000000e+00> : vector<48x16xf32>
    %2 = tpu.matmul %0, %1, %cst {dimension_numbers = #tpu.dot_dimension_numbers<[1], [0], [0], [1], [0, 0, 1, 1], [], []>} : vector<48x16xbf16>, vector<16x16xbf16>, vector<48x16xf32> -> vector<48x16xf32>
    %c0_3 = arith.constant 0 : index
    %c0_4 = arith.constant 0 : index
    %3 = vector.load %arg3[%c0_3, %c0_4] : memref<1x16xf32, #tpu.memory_space<vmem>>, vector<1x16xf32>
    %4 = vector.broadcast %3 : vector<1x16xf32> to vector<48x16xf32>
    %5 = arith.addf %2, %4 : vector<48x16xf32>
    %cst_5 = arith.constant 0.000000e+00 : f32
    %6 = vector.broadcast %cst_5 : f32 to vector<48x16xf32>
    %7 = arith.maximumf %5, %6 : vector<48x16xf32>
    %8 = arith.truncf %7 : vector<48x16xf32> to vector<48x16xbf16>
    %c0_6 = arith.constant 0 : index
    %c0_7 = arith.constant 0 : index
    %9 = vector.load %arg4[%c0_6, %c0_7] : memref<48x16xbf16, #tpu.memory_space<vmem>>, vector<48x16xbf16>
    tpu.vector_store %arg4[%c0_6, %c0_7], %8 {strides = array<i32>} : memref<48x16xbf16, #tpu.memory_space<vmem>>, vector<48x16xbf16>,
    return
  }
  func.func @transform_0(%arg0: i32) -> (i32, i32) {
    %c0_i32 = arith.constant 0 : i32
    %c0_i32_0 = arith.constant 0 : i32
    return %arg0, %c0_i32 : i32, i32
  }
  func.func @transform_1(%arg0: i32) -> (i32, i32) {
    %c0_i32 = arith.constant 0 : i32
    %c0_i32_0 = arith.constant 0 : i32
    %c0_i32_1 = arith.constant 0 : i32
    return %c0_i32, %c0_i32_0 : i32, i32
  }
  func.func @transform_2(%arg0: i32) -> (i32, i32) {
    %c0_i32 = arith.constant 0 : i32
    %c0_i32_0 = arith.constant 0 : i32
    %c0_i32_1 = arith.constant 0 : i32
    return %c0_i32, %c0_i32_0 : i32, i32
  }
  func.func @transform_3(%arg0: i32) -> (i32, i32) {
    %c0_i32 = arith.constant 0 : i32
    %c0_i32_0 = arith.constant 0 : i32
    return %arg0, %c0_i32 : i32, i32
  }
}

module attributes {stable_mosaic.version = 11 : i64} {
  func.func @_mm_kernel(%arg0: i32, %arg1: memref<48x16xbf16, #tpu.memory_space<vmem>>, %arg2: memref<16x64xbf16, #tpu.memory_space<vmem>>, %arg3: memref<1x64xf32, #tpu.memory_space<vmem>>, %arg4: memref<48x64xbf16, #tpu.memory_space<vmem>>) attributes {dimension_semantics = [#tpu.dimension_semantics<parallel>], iteration_bounds = array<i64: 1>, scalar_prefetch = 0 : i64, scratch_operands = 0 : i64, tpu.core_type = #tpu.core_type<tc>, window_params = [{transform_indices = @transform_0, window_bounds = array<i64: 48, 16>}, {pipeline_mode = #tpu.pipeline_mode<synchronous>, transform_indices = @transform_1, window_bounds = array<i64: 16, 64>}, {pipeline_mode = #tpu.pipeline_mode<synchronous>, transform_indices = @transform_2, window_bounds = array<i64: 1, 64>}, {transform_indices = @transform_3, window_bounds = array<i64: 48, 64>}]} {
    %c0 = arith.constant 0 : index
    %c0_0 = arith.constant 0 : index
    %0 = vector.load %arg1[%c0, %c0_0] : memref<48x16xbf16, #tpu.memory_space<vmem>>, vector<48x16xbf16>
    %c0_1 = arith.constant 0 : index
    %c0_2 = arith.constant 0 : index
    %1 = vector.load %arg2[%c0_1, %c0_2] : memref<16x64xbf16, #tpu.memory_space<vmem>>, vector<16x64xbf16>
    %cst = arith.constant dense<0.000000e+00> : vector<48x64xf32>
    %2 = tpu.matmul %0, %1, %cst {dimension_numbers = #tpu.dot_dimension_numbers<[1], [0], [0], [1], [0, 0, 1, 1], [], []>} : vector<48x16xbf16>, vector<16x64xbf16>, vector<48x64xf32> -> vector<48x64xf32>
    %c0_3 = arith.constant 0 : index
    %c0_4 = arith.constant 0 : index
    %3 = vector.load %arg3[%c0_3, %c0_4] : memref<1x64xf32, #tpu.memory_space<vmem>>, vector<1x64xf32>
    %4 = vector.broadcast %3 : vector<1x64xf32> to vector<48x64xf32>
    %5 = arith.addf %2, %4 : vector<48x64xf32>
    %6 = arith.truncf %5 : vector<48x64xf32> to vector<48x64xbf16>
    %c0_5 = arith.constant 0 : index
    %c0_6 = arith.constant 0 : index
    %7 = vector.load %arg4[%c0_5, %c0_6] : memref<48x64xbf16, #tpu.memory_space<vmem>>, vector<48x64xbf16>
    tpu.vector_store %arg4[%c0_5, %c0_6], %6 {strides = array<i32>} : memref<48x64xbf16, #tpu.memory_space<vmem>>, vector<48x64xbf16>,
    return
  }
  func.func @transform_0(%arg0: i32) -> (i32, i32) {
    %c0_i32 = arith.constant 0 : i32
    %c0_i32_0 = arith.constant 0 : i32
    return %arg0, %c0_i32 : i32, i32
  }
  func.func @transform_1(%arg0: i32) -> (i32, i32) {
    %c0_i32 = arith.constant 0 : i32
    %c0_i32_0 = arith.constant 0 : i32
    %c0_i32_1 = arith.constant 0 : i32
    return %c0_i32, %c0_i32_0 : i32, i32
  }
  func.func @transform_2(%arg0: i32) -> (i32, i32) {
    %c0_i32 = arith.constant 0 : i32
    %c0_i32_0 = arith.constant 0 : i32
    %c0_i32_1 = arith.constant 0 : i32
    return %c0_i32, %c0_i32_0 : i32, i32
  }
  func.func @transform_3(%arg0: i32) -> (i32, i32) {
    %c0_i32 = arith.constant 0 : i32
    %c0_i32_0 = arith.constant 0 : i32
    return %arg0, %c0_i32 : i32, i32
  }
}

module attributes {stable_mosaic.version = 11 : i64} {
  func.func @_mm_kernel(%arg0: i32, %arg1: memref<48x144xbf16, #tpu.memory_space<vmem>>, %arg2: memref<144x16xbf16, #tpu.memory_space<vmem>>, %arg3: memref<1x16xf32, #tpu.memory_space<vmem>>, %arg4: memref<48x16xbf16, #tpu.memory_space<vmem>>) attributes {dimension_semantics = [#tpu.dimension_semantics<parallel>], iteration_bounds = array<i64: 1>, scalar_prefetch = 0 : i64, scratch_operands = 0 : i64, tpu.core_type = #tpu.core_type<tc>, window_params = [{transform_indices = @transform_0, window_bounds = array<i64: 48, 144>}, {pipeline_mode = #tpu.pipeline_mode<synchronous>, transform_indices = @transform_1, window_bounds = array<i64: 144, 16>}, {pipeline_mode = #tpu.pipeline_mode<synchronous>, transform_indices = @transform_2, window_bounds = array<i64: 1, 16>}, {transform_indices = @transform_3, window_bounds = array<i64: 48, 16>}]} {
    %c0 = arith.constant 0 : index
    %c0_0 = arith.constant 0 : index
    %0 = vector.load %arg1[%c0, %c0_0] : memref<48x144xbf16, #tpu.memory_space<vmem>>, vector<48x144xbf16>
    %c0_1 = arith.constant 0 : index
    %c0_2 = arith.constant 0 : index
    %1 = vector.load %arg2[%c0_1, %c0_2] : memref<144x16xbf16, #tpu.memory_space<vmem>>, vector<144x16xbf16>
    %cst = arith.constant dense<0.000000e+00> : vector<48x16xf32>
    %2 = tpu.matmul %0, %1, %cst {dimension_numbers = #tpu.dot_dimension_numbers<[1], [0], [0], [1], [0, 0, 1, 1], [], []>} : vector<48x144xbf16>, vector<144x16xbf16>, vector<48x16xf32> -> vector<48x16xf32>
    %c0_3 = arith.constant 0 : index
    %c0_4 = arith.constant 0 : index
    %3 = vector.load %arg3[%c0_3, %c0_4] : memref<1x16xf32, #tpu.memory_space<vmem>>, vector<1x16xf32>
    %4 = vector.broadcast %3 : vector<1x16xf32> to vector<48x16xf32>
    %5 = arith.addf %2, %4 : vector<48x16xf32>
    %cst_5 = arith.constant 0.000000e+00 : f32
    %6 = vector.broadcast %cst_5 : f32 to vector<48x16xf32>
    %7 = arith.maximumf %5, %6 : vector<48x16xf32>
    %8 = arith.truncf %7 : vector<48x16xf32> to vector<48x16xbf16>
    %c0_6 = arith.constant 0 : index
    %c0_7 = arith.constant 0 : index
    %9 = vector.load %arg4[%c0_6, %c0_7] : memref<48x16xbf16, #tpu.memory_space<vmem>>, vector<48x16xbf16>
    tpu.vector_store %arg4[%c0_6, %c0_7], %8 {strides = array<i32>} : memref<48x16xbf16, #tpu.memory_space<vmem>>, vector<48x16xbf16>,
    return
  }
  func.func @transform_0(%arg0: i32) -> (i32, i32) {
    %c0_i32 = arith.constant 0 : i32
    %c0_i32_0 = arith.constant 0 : i32
    return %arg0, %c0_i32 : i32, i32
  }
  func.func @transform_1(%arg0: i32) -> (i32, i32) {
    %c0_i32 = arith.constant 0 : i32
    %c0_i32_0 = arith.constant 0 : i32
    %c0_i32_1 = arith.constant 0 : i32
    return %c0_i32, %c0_i32_0 : i32, i32
  }
  func.func @transform_2(%arg0: i32) -> (i32, i32) {
    %c0_i32 = arith.constant 0 : i32
    %c0_i32_0 = arith.constant 0 : i32
    %c0_i32_1 = arith.constant 0 : i32
    return %c0_i32, %c0_i32_0 : i32, i32
  }
  func.func @transform_3(%arg0: i32) -> (i32, i32) {
    %c0_i32 = arith.constant 0 : i32
    %c0_i32_0 = arith.constant 0 : i32
    return %arg0, %c0_i32 : i32, i32
  }
}

module attributes {stable_mosaic.version = 11 : i64} {
  func.func @_mm_kernel(%arg0: i32, %arg1: memref<48x144xbf16, #tpu.memory_space<vmem>>, %arg2: memref<144x16xbf16, #tpu.memory_space<vmem>>, %arg3: memref<1x16xf32, #tpu.memory_space<vmem>>, %arg4: memref<48x16xbf16, #tpu.memory_space<vmem>>) attributes {dimension_semantics = [#tpu.dimension_semantics<parallel>], iteration_bounds = array<i64: 1>, scalar_prefetch = 0 : i64, scratch_operands = 0 : i64, tpu.core_type = #tpu.core_type<tc>, window_params = [{transform_indices = @transform_0, window_bounds = array<i64: 48, 144>}, {pipeline_mode = #tpu.pipeline_mode<synchronous>, transform_indices = @transform_1, window_bounds = array<i64: 144, 16>}, {pipeline_mode = #tpu.pipeline_mode<synchronous>, transform_indices = @transform_2, window_bounds = array<i64: 1, 16>}, {transform_indices = @transform_3, window_bounds = array<i64: 48, 16>}]} {
    %c0 = arith.constant 0 : index
    %c0_0 = arith.constant 0 : index
    %0 = vector.load %arg1[%c0, %c0_0] : memref<48x144xbf16, #tpu.memory_space<vmem>>, vector<48x144xbf16>
    %c0_1 = arith.constant 0 : index
    %c0_2 = arith.constant 0 : index
    %1 = vector.load %arg2[%c0_1, %c0_2] : memref<144x16xbf16, #tpu.memory_space<vmem>>, vector<144x16xbf16>
    %cst = arith.constant dense<0.000000e+00> : vector<48x16xf32>
    %2 = tpu.matmul %0, %1, %cst {dimension_numbers = #tpu.dot_dimension_numbers<[1], [0], [0], [1], [0, 0, 1, 1], [], []>} : vector<48x144xbf16>, vector<144x16xbf16>, vector<48x16xf32> -> vector<48x16xf32>
    %c0_3 = arith.constant 0 : index
    %c0_4 = arith.constant 0 : index
    %3 = vector.load %arg3[%c0_3, %c0_4] : memref<1x16xf32, #tpu.memory_space<vmem>>, vector<1x16xf32>
    %4 = vector.broadcast %3 : vector<1x16xf32> to vector<48x16xf32>
    %5 = arith.addf %2, %4 : vector<48x16xf32>
    %cst_5 = arith.constant 0.000000e+00 : f32
    %6 = vector.broadcast %cst_5 : f32 to vector<48x16xf32>
    %7 = arith.maximumf %5, %6 : vector<48x16xf32>
    %8 = arith.truncf %7 : vector<48x16xf32> to vector<48x16xbf16>
    %c0_6 = arith.constant 0 : index
    %c0_7 = arith.constant 0 : index
    %9 = vector.load %arg4[%c0_6, %c0_7] : memref<48x16xbf16, #tpu.memory_space<vmem>>, vector<48x16xbf16>
    tpu.vector_store %arg4[%c0_6, %c0_7], %8 {strides = array<i32>} : memref<48x16xbf16, #tpu.memory_space<vmem>>, vector<48x16xbf16>,
    return
  }
  func.func @transform_0(%arg0: i32) -> (i32, i32) {
    %c0_i32 = arith.constant 0 : i32
    %c0_i32_0 = arith.constant 0 : i32
    return %arg0, %c0_i32 : i32, i32
  }
  func.func @transform_1(%arg0: i32) -> (i32, i32) {
    %c0_i32 = arith.constant 0 : i32
    %c0_i32_0 = arith.constant 0 : i32
    %c0_i32_1 = arith.constant 0 : i32
    return %c0_i32, %c0_i32_0 : i32, i32
  }
  func.func @transform_2(%arg0: i32) -> (i32, i32) {
    %c0_i32 = arith.constant 0 : i32
    %c0_i32_0 = arith.constant 0 : i32
    %c0_i32_1 = arith.constant 0 : i32
    return %c0_i32, %c0_i32_0 : i32, i32
  }
  func.func @transform_3(%arg0: i32) -> (i32, i32) {
    %c0_i32 = arith.constant 0 : i32
    %c0_i32_0 = arith.constant 0 : i32
    return %arg0, %c0_i32 : i32, i32
  }
}

module attributes {stable_mosaic.version = 11 : i64} {
  func.func @_mm_kernel(%arg0: i32, %arg1: memref<48x16xbf16, #tpu.memory_space<vmem>>, %arg2: memref<16x64xbf16, #tpu.memory_space<vmem>>, %arg3: memref<1x64xf32, #tpu.memory_space<vmem>>, %arg4: memref<48x64xbf16, #tpu.memory_space<vmem>>, %arg5: memref<48x64xbf16, #tpu.memory_space<vmem>>) attributes {dimension_semantics = [#tpu.dimension_semantics<parallel>], iteration_bounds = array<i64: 1>, scalar_prefetch = 0 : i64, scratch_operands = 0 : i64, tpu.core_type = #tpu.core_type<tc>, window_params = [{transform_indices = @transform_0, window_bounds = array<i64: 48, 16>}, {pipeline_mode = #tpu.pipeline_mode<synchronous>, transform_indices = @transform_1, window_bounds = array<i64: 16, 64>}, {pipeline_mode = #tpu.pipeline_mode<synchronous>, transform_indices = @transform_2, window_bounds = array<i64: 1, 64>}, {transform_indices = @transform_3, window_bounds = array<i64: 48, 64>}, {transform_indices = @transform_4, window_bounds = array<i64: 48, 64>}]} {
    %c0 = arith.constant 0 : index
    %c0_0 = arith.constant 0 : index
    %0 = vector.load %arg1[%c0, %c0_0] : memref<48x16xbf16, #tpu.memory_space<vmem>>, vector<48x16xbf16>
    %c0_1 = arith.constant 0 : index
    %c0_2 = arith.constant 0 : index
    %1 = vector.load %arg2[%c0_1, %c0_2] : memref<16x64xbf16, #tpu.memory_space<vmem>>, vector<16x64xbf16>
    %cst = arith.constant dense<0.000000e+00> : vector<48x64xf32>
    %2 = tpu.matmul %0, %1, %cst {dimension_numbers = #tpu.dot_dimension_numbers<[1], [0], [0], [1], [0, 0, 1, 1], [], []>} : vector<48x16xbf16>, vector<16x64xbf16>, vector<48x64xf32> -> vector<48x64xf32>
    %c0_3 = arith.constant 0 : index
    %c0_4 = arith.constant 0 : index
    %3 = vector.load %arg3[%c0_3, %c0_4] : memref<1x64xf32, #tpu.memory_space<vmem>>, vector<1x64xf32>
    %4 = vector.broadcast %3 : vector<1x64xf32> to vector<48x64xf32>
    %5 = arith.addf %2, %4 : vector<48x64xf32>
    %c0_5 = arith.constant 0 : index
    %c0_6 = arith.constant 0 : index
    %6 = vector.load %arg4[%c0_5, %c0_6] : memref<48x64xbf16, #tpu.memory_space<vmem>>, vector<48x64xbf16>
    %7 = arith.extf %6 : vector<48x64xbf16> to vector<48x64xf32>
    %8 = arith.addf %5, %7 : vector<48x64xf32>
    %cst_7 = arith.constant 0.000000e+00 : f32
    %9 = vector.broadcast %cst_7 : f32 to vector<48x64xf32>
    %10 = arith.maximumf %8, %9 : vector<48x64xf32>
    %11 = arith.truncf %10 : vector<48x64xf32> to vector<48x64xbf16>
    %c0_8 = arith.constant 0 : index
    %c0_9 = arith.constant 0 : index
    %12 = vector.load %arg5[%c0_8, %c0_9] : memref<48x64xbf16, #tpu.memory_space<vmem>>, vector<48x64xbf16>
    tpu.vector_store %arg5[%c0_8, %c0_9], %11 {strides = array<i32>} : memref<48x64xbf16, #tpu.memory_space<vmem>>, vector<48x64xbf16>,
    return
  }
  func.func @transform_0(%arg0: i32) -> (i32, i32) {
    %c0_i32 = arith.constant 0 : i32
    %c0_i32_0 = arith.constant 0 : i32
    return %arg0, %c0_i32 : i32, i32
  }
  func.func @transform_1(%arg0: i32) -> (i32, i32) {
    %c0_i32 = arith.constant 0 : i32
    %c0_i32_0 = arith.constant 0 : i32
    %c0_i32_1 = arith.constant 0 : i32
    return %c0_i32, %c0_i32_0 : i32, i32
  }
  func.func @transform_2(%arg0: i32) -> (i32, i32) {
    %c0_i32 = arith.constant 0 : i32
    %c0_i32_0 = arith.constant 0 : i32
    %c0_i32_1 = arith.constant 0 : i32
    return %c0_i32, %c0_i32_0 : i32, i32
  }
  func.func @transform_3(%arg0: i32) -> (i32, i32) {
    %c0_i32 = arith.constant 0 : i32
    %c0_i32_0 = arith.constant 0 : i32
    return %arg0, %c0_i32 : i32, i32
  }
  func.func @transform_4(%arg0: i32) -> (i32, i32) {
    %c0_i32 = arith.constant 0 : i32
    %c0_i32_0 = arith.constant 0 : i32
    return %arg0, %c0_i32 : i32, i32
  }
}

module attributes {stable_mosaic.version = 11 : i64} {
  func.func @_mm_kernel(%arg0: i32, %arg1: memref<48x64xbf16, #tpu.memory_space<vmem>>, %arg2: memref<64x16xbf16, #tpu.memory_space<vmem>>, %arg3: memref<1x16xf32, #tpu.memory_space<vmem>>, %arg4: memref<48x16xbf16, #tpu.memory_space<vmem>>) attributes {dimension_semantics = [#tpu.dimension_semantics<parallel>], iteration_bounds = array<i64: 1>, scalar_prefetch = 0 : i64, scratch_operands = 0 : i64, tpu.core_type = #tpu.core_type<tc>, window_params = [{transform_indices = @transform_0, window_bounds = array<i64: 48, 64>}, {pipeline_mode = #tpu.pipeline_mode<synchronous>, transform_indices = @transform_1, window_bounds = array<i64: 64, 16>}, {pipeline_mode = #tpu.pipeline_mode<synchronous>, transform_indices = @transform_2, window_bounds = array<i64: 1, 16>}, {transform_indices = @transform_3, window_bounds = array<i64: 48, 16>}]} {
    %c0 = arith.constant 0 : index
    %c0_0 = arith.constant 0 : index
    %0 = vector.load %arg1[%c0, %c0_0] : memref<48x64xbf16, #tpu.memory_space<vmem>>, vector<48x64xbf16>
    %c0_1 = arith.constant 0 : index
    %c0_2 = arith.constant 0 : index
    %1 = vector.load %arg2[%c0_1, %c0_2] : memref<64x16xbf16, #tpu.memory_space<vmem>>, vector<64x16xbf16>
    %cst = arith.constant dense<0.000000e+00> : vector<48x16xf32>
    %2 = tpu.matmul %0, %1, %cst {dimension_numbers = #tpu.dot_dimension_numbers<[1], [0], [0], [1], [0, 0, 1, 1], [], []>} : vector<48x64xbf16>, vector<64x16xbf16>, vector<48x16xf32> -> vector<48x16xf32>
    %c0_3 = arith.constant 0 : index
    %c0_4 = arith.constant 0 : index
    %3 = vector.load %arg3[%c0_3, %c0_4] : memref<1x16xf32, #tpu.memory_space<vmem>>, vector<1x16xf32>
    %4 = vector.broadcast %3 : vector<1x16xf32> to vector<48x16xf32>
    %5 = arith.addf %2, %4 : vector<48x16xf32>
    %cst_5 = arith.constant 0.000000e+00 : f32
    %6 = vector.broadcast %cst_5 : f32 to vector<48x16xf32>
    %7 = arith.maximumf %5, %6 : vector<48x16xf32>
    %8 = arith.truncf %7 : vector<48x16xf32> to vector<48x16xbf16>
    %c0_6 = arith.constant 0 : index
    %c0_7 = arith.constant 0 : index
    %9 = vector.load %arg4[%c0_6, %c0_7] : memref<48x16xbf16, #tpu.memory_space<vmem>>, vector<48x16xbf16>
    tpu.vector_store %arg4[%c0_6, %c0_7], %8 {strides = array<i32>} : memref<48x16xbf16, #tpu.memory_space<vmem>>, vector<48x16xbf16>,
    return
  }
  func.func @transform_0(%arg0: i32) -> (i32, i32) {
    %c0_i32 = arith.constant 0 : i32
    %c0_i32_0 = arith.constant 0 : i32
    return %arg0, %c0_i32 : i32, i32
  }
  func.func @transform_1(%arg0: i32) -> (i32, i32) {
    %c0_i32 = arith.constant 0 : i32
    %c0_i32_0 = arith.constant 0 : i32
    %c0_i32_1 = arith.constant 0 : i32
    return %c0_i32, %c0_i32_0 : i32, i32
  }
  func.func @transform_2(%arg0: i32) -> (i32, i32) {
    %c0_i32 = arith.constant 0 : i32
    %c0_i32_0 = arith.constant 0 : i32
    %c0_i32_1 = arith.constant 0 : i32
    return %c0_i32, %c0_i32_0 : i32, i32
  }
  func.func @transform_3(%arg0: i32) -> (i32, i32) {
    %c0_i32 = arith.constant 0 : i32
    %c0_i32_0 = arith.constant 0 : i32
    return %arg0, %c0_i32 : i32, i32
  }
}

module attributes {stable_mosaic.version = 11 : i64} {
  func.func @_mm_kernel(%arg0: i32, %arg1: memref<48x16xbf16, #tpu.memory_space<vmem>>, %arg2: memref<16x64xbf16, #tpu.memory_space<vmem>>, %arg3: memref<1x64xf32, #tpu.memory_space<vmem>>, %arg4: memref<48x64xbf16, #tpu.memory_space<vmem>>, %arg5: memref<48x64xbf16, #tpu.memory_space<vmem>>) attributes {dimension_semantics = [#tpu.dimension_semantics<parallel>], iteration_bounds = array<i64: 1>, scalar_prefetch = 0 : i64, scratch_operands = 0 : i64, tpu.core_type = #tpu.core_type<tc>, window_params = [{transform_indices = @transform_0, window_bounds = array<i64: 48, 16>}, {pipeline_mode = #tpu.pipeline_mode<synchronous>, transform_indices = @transform_1, window_bounds = array<i64: 16, 64>}, {pipeline_mode = #tpu.pipeline_mode<synchronous>, transform_indices = @transform_2, window_bounds = array<i64: 1, 64>}, {transform_indices = @transform_3, window_bounds = array<i64: 48, 64>}, {transform_indices = @transform_4, window_bounds = array<i64: 48, 64>}]} {
    %c0 = arith.constant 0 : index
    %c0_0 = arith.constant 0 : index
    %0 = vector.load %arg1[%c0, %c0_0] : memref<48x16xbf16, #tpu.memory_space<vmem>>, vector<48x16xbf16>
    %c0_1 = arith.constant 0 : index
    %c0_2 = arith.constant 0 : index
    %1 = vector.load %arg2[%c0_1, %c0_2] : memref<16x64xbf16, #tpu.memory_space<vmem>>, vector<16x64xbf16>
    %cst = arith.constant dense<0.000000e+00> : vector<48x64xf32>
    %2 = tpu.matmul %0, %1, %cst {dimension_numbers = #tpu.dot_dimension_numbers<[1], [0], [0], [1], [0, 0, 1, 1], [], []>} : vector<48x16xbf16>, vector<16x64xbf16>, vector<48x64xf32> -> vector<48x64xf32>
    %c0_3 = arith.constant 0 : index
    %c0_4 = arith.constant 0 : index
    %3 = vector.load %arg3[%c0_3, %c0_4] : memref<1x64xf32, #tpu.memory_space<vmem>>, vector<1x64xf32>
    %4 = vector.broadcast %3 : vector<1x64xf32> to vector<48x64xf32>
    %5 = arith.addf %2, %4 : vector<48x64xf32>
    %c0_5 = arith.constant 0 : index
    %c0_6 = arith.constant 0 : index
    %6 = vector.load %arg4[%c0_5, %c0_6] : memref<48x64xbf16, #tpu.memory_space<vmem>>, vector<48x64xbf16>
    %7 = arith.extf %6 : vector<48x64xbf16> to vector<48x64xf32>
    %8 = arith.addf %5, %7 : vector<48x64xf32>
    %cst_7 = arith.constant 0.000000e+00 : f32
    %9 = vector.broadcast %cst_7 : f32 to vector<48x64xf32>
    %10 = arith.maximumf %8, %9 : vector<48x64xf32>
    %11 = arith.truncf %10 : vector<48x64xf32> to vector<48x64xbf16>
    %c0_8 = arith.constant 0 : index
    %c0_9 = arith.constant 0 : index
    %12 = vector.load %arg5[%c0_8, %c0_9] : memref<48x64xbf16, #tpu.memory_space<vmem>>, vector<48x64xbf16>
    tpu.vector_store %arg5[%c0_8, %c0_9], %11 {strides = array<i32>} : memref<48x64xbf16, #tpu.memory_space<vmem>>, vector<48x64xbf16>,
    return
  }
  func.func @transform_0(%arg0: i32) -> (i32, i32) {
    %c0_i32 = arith.constant 0 : i32
    %c0_i32_0 = arith.constant 0 : i32
    return %arg0, %c0_i32 : i32, i32
  }
  func.func @transform_1(%arg0: i32) -> (i32, i32) {
    %c0_i32 = arith.constant 0 : i32
    %c0_i32_0 = arith.constant 0 : i32
    %c0_i32_1 = arith.constant 0 : i32
    return %c0_i32, %c0_i32_0 : i32, i32
  }
  func.func @transform_2(%arg0: i32) -> (i32, i32) {
    %c0_i32 = arith.constant 0 : i32
    %c0_i32_0 = arith.constant 0 : i32
    %c0_i32_1 = arith.constant 0 : i32
    return %c0_i32, %c0_i32_0 : i32, i32
  }
  func.func @transform_3(%arg0: i32) -> (i32, i32) {
    %c0_i32 = arith.constant 0 : i32
    %c0_i32_0 = arith.constant 0 : i32
    return %arg0, %c0_i32 : i32, i32
  }
  func.func @transform_4(%arg0: i32) -> (i32, i32) {
    %c0_i32 = arith.constant 0 : i32
    %c0_i32_0 = arith.constant 0 : i32
    return %arg0, %c0_i32 : i32, i32
  }
}

module attributes {stable_mosaic.version = 11 : i64} {
  func.func @_mm_kernel(%arg0: i32, %arg1: memref<48x64xbf16, #tpu.memory_space<vmem>>, %arg2: memref<64x32xbf16, #tpu.memory_space<vmem>>, %arg3: memref<1x32xf32, #tpu.memory_space<vmem>>, %arg4: memref<48x32xbf16, #tpu.memory_space<vmem>>) attributes {dimension_semantics = [#tpu.dimension_semantics<parallel>], iteration_bounds = array<i64: 1>, scalar_prefetch = 0 : i64, scratch_operands = 0 : i64, tpu.core_type = #tpu.core_type<tc>, window_params = [{transform_indices = @transform_0, window_bounds = array<i64: 48, 64>}, {pipeline_mode = #tpu.pipeline_mode<synchronous>, transform_indices = @transform_1, window_bounds = array<i64: 64, 32>}, {pipeline_mode = #tpu.pipeline_mode<synchronous>, transform_indices = @transform_2, window_bounds = array<i64: 1, 32>}, {transform_indices = @transform_3, window_bounds = array<i64: 48, 32>}]} {
    %c0 = arith.constant 0 : index
    %c0_0 = arith.constant 0 : index
    %0 = vector.load %arg1[%c0, %c0_0] : memref<48x64xbf16, #tpu.memory_space<vmem>>, vector<48x64xbf16>
    %c0_1 = arith.constant 0 : index
    %c0_2 = arith.constant 0 : index
    %1 = vector.load %arg2[%c0_1, %c0_2] : memref<64x32xbf16, #tpu.memory_space<vmem>>, vector<64x32xbf16>
    %cst = arith.constant dense<0.000000e+00> : vector<48x32xf32>
    %2 = tpu.matmul %0, %1, %cst {dimension_numbers = #tpu.dot_dimension_numbers<[1], [0], [0], [1], [0, 0, 1, 1], [], []>} : vector<48x64xbf16>, vector<64x32xbf16>, vector<48x32xf32> -> vector<48x32xf32>
    %c0_3 = arith.constant 0 : index
    %c0_4 = arith.constant 0 : index
    %3 = vector.load %arg3[%c0_3, %c0_4] : memref<1x32xf32, #tpu.memory_space<vmem>>, vector<1x32xf32>
    %4 = vector.broadcast %3 : vector<1x32xf32> to vector<48x32xf32>
    %5 = arith.addf %2, %4 : vector<48x32xf32>
    %cst_5 = arith.constant 0.000000e+00 : f32
    %6 = vector.broadcast %cst_5 : f32 to vector<48x32xf32>
    %7 = arith.maximumf %5, %6 : vector<48x32xf32>
    %8 = arith.truncf %7 : vector<48x32xf32> to vector<48x32xbf16>
    %c0_6 = arith.constant 0 : index
    %c0_7 = arith.constant 0 : index
    %9 = vector.load %arg4[%c0_6, %c0_7] : memref<48x32xbf16, #tpu.memory_space<vmem>>, vector<48x32xbf16>
    tpu.vector_store %arg4[%c0_6, %c0_7], %8 {strides = array<i32>} : memref<48x32xbf16, #tpu.memory_space<vmem>>, vector<48x32xbf16>,
    return
  }
  func.func @transform_0(%arg0: i32) -> (i32, i32) {
    %c0_i32 = arith.constant 0 : i32
    %c0_i32_0 = arith.constant 0 : i32
    return %arg0, %c0_i32 : i32, i32
  }
  func.func @transform_1(%arg0: i32) -> (i32, i32) {
    %c0_i32 = arith.constant 0 : i32
    %c0_i32_0 = arith.constant 0 : i32
    %c0_i32_1 = arith.constant 0 : i32
    return %c0_i32, %c0_i32_0 : i32, i32
  }
  func.func @transform_2(%arg0: i32) -> (i32, i32) {
    %c0_i32 = arith.constant 0 : i32
    %c0_i32_0 = arith.constant 0 : i32
    %c0_i32_1 = arith.constant 0 : i32
    return %c0_i32, %c0_i32_0 : i32, i32
  }
  func.func @transform_3(%arg0: i32) -> (i32, i32) {
    %c0_i32 = arith.constant 0 : i32
    %c0_i32_0 = arith.constant 0 : i32
    return %arg0, %c0_i32 : i32, i32
  }
}

module attributes {stable_mosaic.version = 11 : i64} {
  func.func @_mm_kernel(%arg0: i32, %arg1: memref<12x64xbf16, #tpu.memory_space<vmem>>, %arg2: memref<64x128xbf16, #tpu.memory_space<vmem>>, %arg3: memref<1x128xf32, #tpu.memory_space<vmem>>, %arg4: memref<12x128xbf16, #tpu.memory_space<vmem>>) attributes {dimension_semantics = [#tpu.dimension_semantics<parallel>], iteration_bounds = array<i64: 1>, scalar_prefetch = 0 : i64, scratch_operands = 0 : i64, tpu.core_type = #tpu.core_type<tc>, window_params = [{transform_indices = @transform_0, window_bounds = array<i64: 12, 64>}, {pipeline_mode = #tpu.pipeline_mode<synchronous>, transform_indices = @transform_1, window_bounds = array<i64: 64, 128>}, {pipeline_mode = #tpu.pipeline_mode<synchronous>, transform_indices = @transform_2, window_bounds = array<i64: 1, 128>}, {transform_indices = @transform_3, window_bounds = array<i64: 12, 128>}]} {
    %c0 = arith.constant 0 : index
    %c0_0 = arith.constant 0 : index
    %0 = vector.load %arg1[%c0, %c0_0] : memref<12x64xbf16, #tpu.memory_space<vmem>>, vector<12x64xbf16>
    %c0_1 = arith.constant 0 : index
    %c0_2 = arith.constant 0 : index
    %1 = vector.load %arg2[%c0_1, %c0_2] : memref<64x128xbf16, #tpu.memory_space<vmem>>, vector<64x128xbf16>
    %cst = arith.constant dense<0.000000e+00> : vector<12x128xf32>
    %2 = tpu.matmul %0, %1, %cst {dimension_numbers = #tpu.dot_dimension_numbers<[1], [0], [0], [1], [0, 0, 1, 1], [], []>} : vector<12x64xbf16>, vector<64x128xbf16>, vector<12x128xf32> -> vector<12x128xf32>
    %c0_3 = arith.constant 0 : index
    %c0_4 = arith.constant 0 : index
    %3 = vector.load %arg3[%c0_3, %c0_4] : memref<1x128xf32, #tpu.memory_space<vmem>>, vector<1x128xf32>
    %4 = vector.broadcast %3 : vector<1x128xf32> to vector<12x128xf32>
    %5 = arith.addf %2, %4 : vector<12x128xf32>
    %6 = arith.truncf %5 : vector<12x128xf32> to vector<12x128xbf16>
    %c0_5 = arith.constant 0 : index
    %c0_6 = arith.constant 0 : index
    %7 = vector.load %arg4[%c0_5, %c0_6] : memref<12x128xbf16, #tpu.memory_space<vmem>>, vector<12x128xbf16>
    tpu.vector_store %arg4[%c0_5, %c0_6], %6 {strides = array<i32>} : memref<12x128xbf16, #tpu.memory_space<vmem>>, vector<12x128xbf16>,
    return
  }
  func.func @transform_0(%arg0: i32) -> (i32, i32) {
    %c0_i32 = arith.constant 0 : i32
    %c0_i32_0 = arith.constant 0 : i32
    return %arg0, %c0_i32 : i32, i32
  }
  func.func @transform_1(%arg0: i32) -> (i32, i32) {
    %c0_i32 = arith.constant 0 : i32
    %c0_i32_0 = arith.constant 0 : i32
    %c0_i32_1 = arith.constant 0 : i32
    return %c0_i32, %c0_i32_0 : i32, i32
  }
  func.func @transform_2(%arg0: i32) -> (i32, i32) {
    %c0_i32 = arith.constant 0 : i32
    %c0_i32_0 = arith.constant 0 : i32
    %c0_i32_1 = arith.constant 0 : i32
    return %c0_i32, %c0_i32_0 : i32, i32
  }
  func.func @transform_3(%arg0: i32) -> (i32, i32) {
    %c0_i32 = arith.constant 0 : i32
    %c0_i32_0 = arith.constant 0 : i32
    return %arg0, %c0_i32 : i32, i32
  }
}

module attributes {stable_mosaic.version = 11 : i64} {
  func.func @_mm_kernel(%arg0: i32, %arg1: memref<12x32xbf16, #tpu.memory_space<vmem>>, %arg2: memref<32x128xbf16, #tpu.memory_space<vmem>>, %arg3: memref<1x128xf32, #tpu.memory_space<vmem>>, %arg4: memref<12x128xbf16, #tpu.memory_space<vmem>>, %arg5: memref<12x128xbf16, #tpu.memory_space<vmem>>) attributes {dimension_semantics = [#tpu.dimension_semantics<parallel>], iteration_bounds = array<i64: 1>, scalar_prefetch = 0 : i64, scratch_operands = 0 : i64, tpu.core_type = #tpu.core_type<tc>, window_params = [{transform_indices = @transform_0, window_bounds = array<i64: 12, 32>}, {pipeline_mode = #tpu.pipeline_mode<synchronous>, transform_indices = @transform_1, window_bounds = array<i64: 32, 128>}, {pipeline_mode = #tpu.pipeline_mode<synchronous>, transform_indices = @transform_2, window_bounds = array<i64: 1, 128>}, {transform_indices = @transform_3, window_bounds = array<i64: 12, 128>}, {transform_indices = @transform_4, window_bounds = array<i64: 12, 128>}]} {
    %c0 = arith.constant 0 : index
    %c0_0 = arith.constant 0 : index
    %0 = vector.load %arg1[%c0, %c0_0] : memref<12x32xbf16, #tpu.memory_space<vmem>>, vector<12x32xbf16>
    %c0_1 = arith.constant 0 : index
    %c0_2 = arith.constant 0 : index
    %1 = vector.load %arg2[%c0_1, %c0_2] : memref<32x128xbf16, #tpu.memory_space<vmem>>, vector<32x128xbf16>
    %cst = arith.constant dense<0.000000e+00> : vector<12x128xf32>
    %2 = tpu.matmul %0, %1, %cst {dimension_numbers = #tpu.dot_dimension_numbers<[1], [0], [0], [1], [0, 0, 1, 1], [], []>} : vector<12x32xbf16>, vector<32x128xbf16>, vector<12x128xf32> -> vector<12x128xf32>
    %c0_3 = arith.constant 0 : index
    %c0_4 = arith.constant 0 : index
    %3 = vector.load %arg3[%c0_3, %c0_4] : memref<1x128xf32, #tpu.memory_space<vmem>>, vector<1x128xf32>
    %4 = vector.broadcast %3 : vector<1x128xf32> to vector<12x128xf32>
    %5 = arith.addf %2, %4 : vector<12x128xf32>
    %c0_5 = arith.constant 0 : index
    %c0_6 = arith.constant 0 : index
    %6 = vector.load %arg4[%c0_5, %c0_6] : memref<12x128xbf16, #tpu.memory_space<vmem>>, vector<12x128xbf16>
    %7 = arith.extf %6 : vector<12x128xbf16> to vector<12x128xf32>
    %8 = arith.addf %5, %7 : vector<12x128xf32>
    %cst_7 = arith.constant 0.000000e+00 : f32
    %9 = vector.broadcast %cst_7 : f32 to vector<12x128xf32>
    %10 = arith.maximumf %8, %9 : vector<12x128xf32>
    %11 = arith.truncf %10 : vector<12x128xf32> to vector<12x128xbf16>
    %c0_8 = arith.constant 0 : index
    %c0_9 = arith.constant 0 : index
    %12 = vector.load %arg5[%c0_8, %c0_9] : memref<12x128xbf16, #tpu.memory_space<vmem>>, vector<12x128xbf16>
    tpu.vector_store %arg5[%c0_8, %c0_9], %11 {strides = array<i32>} : memref<12x128xbf16, #tpu.memory_space<vmem>>, vector<12x128xbf16>,
    return
  }
  func.func @transform_0(%arg0: i32) -> (i32, i32) {
    %c0_i32 = arith.constant 0 : i32
    %c0_i32_0 = arith.constant 0 : i32
    return %arg0, %c0_i32 : i32, i32
  }
  func.func @transform_1(%arg0: i32) -> (i32, i32) {
    %c0_i32 = arith.constant 0 : i32
    %c0_i32_0 = arith.constant 0 : i32
    %c0_i32_1 = arith.constant 0 : i32
    return %c0_i32, %c0_i32_0 : i32, i32
  }
  func.func @transform_2(%arg0: i32) -> (i32, i32) {
    %c0_i32 = arith.constant 0 : i32
    %c0_i32_0 = arith.constant 0 : i32
    %c0_i32_1 = arith.constant 0 : i32
    return %c0_i32, %c0_i32_0 : i32, i32
  }
  func.func @transform_3(%arg0: i32) -> (i32, i32) {
    %c0_i32 = arith.constant 0 : i32
    %c0_i32_0 = arith.constant 0 : i32
    return %arg0, %c0_i32 : i32, i32
  }
  func.func @transform_4(%arg0: i32) -> (i32, i32) {
    %c0_i32 = arith.constant 0 : i32
    %c0_i32_0 = arith.constant 0 : i32
    return %arg0, %c0_i32 : i32, i32
  }
}

module attributes {stable_mosaic.version = 11 : i64} {
  func.func @_mm_kernel(%arg0: i32, %arg1: memref<12x288xbf16, #tpu.memory_space<vmem>>, %arg2: memref<288x32xbf16, #tpu.memory_space<vmem>>, %arg3: memref<1x32xf32, #tpu.memory_space<vmem>>, %arg4: memref<12x32xbf16, #tpu.memory_space<vmem>>) attributes {dimension_semantics = [#tpu.dimension_semantics<parallel>], iteration_bounds = array<i64: 1>, scalar_prefetch = 0 : i64, scratch_operands = 0 : i64, tpu.core_type = #tpu.core_type<tc>, window_params = [{transform_indices = @transform_0, window_bounds = array<i64: 12, 288>}, {pipeline_mode = #tpu.pipeline_mode<synchronous>, transform_indices = @transform_1, window_bounds = array<i64: 288, 32>}, {pipeline_mode = #tpu.pipeline_mode<synchronous>, transform_indices = @transform_2, window_bounds = array<i64: 1, 32>}, {transform_indices = @transform_3, window_bounds = array<i64: 12, 32>}]} {
    %c0 = arith.constant 0 : index
    %c0_0 = arith.constant 0 : index
    %0 = vector.load %arg1[%c0, %c0_0] : memref<12x288xbf16, #tpu.memory_space<vmem>>, vector<12x288xbf16>
    %c0_1 = arith.constant 0 : index
    %c0_2 = arith.constant 0 : index
    %1 = vector.load %arg2[%c0_1, %c0_2] : memref<288x32xbf16, #tpu.memory_space<vmem>>, vector<288x32xbf16>
    %cst = arith.constant dense<0.000000e+00> : vector<12x32xf32>
    %2 = tpu.matmul %0, %1, %cst {dimension_numbers = #tpu.dot_dimension_numbers<[1], [0], [0], [1], [0, 0, 1, 1], [], []>} : vector<12x288xbf16>, vector<288x32xbf16>, vector<12x32xf32> -> vector<12x32xf32>
    %c0_3 = arith.constant 0 : index
    %c0_4 = arith.constant 0 : index
    %3 = vector.load %arg3[%c0_3, %c0_4] : memref<1x32xf32, #tpu.memory_space<vmem>>, vector<1x32xf32>
    %4 = vector.broadcast %3 : vector<1x32xf32> to vector<12x32xf32>
    %5 = arith.addf %2, %4 : vector<12x32xf32>
    %cst_5 = arith.constant 0.000000e+00 : f32
    %6 = vector.broadcast %cst_5 : f32 to vector<12x32xf32>
    %7 = arith.maximumf %5, %6 : vector<12x32xf32>
    %8 = arith.truncf %7 : vector<12x32xf32> to vector<12x32xbf16>
    %c0_6 = arith.constant 0 : index
    %c0_7 = arith.constant 0 : index
    %9 = vector.load %arg4[%c0_6, %c0_7] : memref<12x32xbf16, #tpu.memory_space<vmem>>, vector<12x32xbf16>
    tpu.vector_store %arg4[%c0_6, %c0_7], %8 {strides = array<i32>} : memref<12x32xbf16, #tpu.memory_space<vmem>>, vector<12x32xbf16>,
    return
  }
  func.func @transform_0(%arg0: i32) -> (i32, i32) {
    %c0_i32 = arith.constant 0 : i32
    %c0_i32_0 = arith.constant 0 : i32
    return %arg0, %c0_i32 : i32, i32
  }
  func.func @transform_1(%arg0: i32) -> (i32, i32) {
    %c0_i32 = arith.constant 0 : i32
    %c0_i32_0 = arith.constant 0 : i32
    %c0_i32_1 = arith.constant 0 : i32
    return %c0_i32, %c0_i32_0 : i32, i32
  }
  func.func @transform_2(%arg0: i32) -> (i32, i32) {
    %c0_i32 = arith.constant 0 : i32
    %c0_i32_0 = arith.constant 0 : i32
    %c0_i32_1 = arith.constant 0 : i32
    return %c0_i32, %c0_i32_0 : i32, i32
  }
  func.func @transform_3(%arg0: i32) -> (i32, i32) {
    %c0_i32 = arith.constant 0 : i32
    %c0_i32_0 = arith.constant 0 : i32
    return %arg0, %c0_i32 : i32, i32
  }
}

module attributes {stable_mosaic.version = 11 : i64} {
  func.func @_mm_kernel(%arg0: i32, %arg1: memref<12x128xbf16, #tpu.memory_space<vmem>>, %arg2: memref<128x32xbf16, #tpu.memory_space<vmem>>, %arg3: memref<1x32xf32, #tpu.memory_space<vmem>>, %arg4: memref<12x32xbf16, #tpu.memory_space<vmem>>) attributes {dimension_semantics = [#tpu.dimension_semantics<parallel>], iteration_bounds = array<i64: 1>, scalar_prefetch = 0 : i64, scratch_operands = 0 : i64, tpu.core_type = #tpu.core_type<tc>, window_params = [{transform_indices = @transform_0, window_bounds = array<i64: 12, 128>}, {pipeline_mode = #tpu.pipeline_mode<synchronous>, transform_indices = @transform_1, window_bounds = array<i64: 128, 32>}, {pipeline_mode = #tpu.pipeline_mode<synchronous>, transform_indices = @transform_2, window_bounds = array<i64: 1, 32>}, {transform_indices = @transform_3, window_bounds = array<i64: 12, 32>}]} {
    %c0 = arith.constant 0 : index
    %c0_0 = arith.constant 0 : index
    %0 = vector.load %arg1[%c0, %c0_0] : memref<12x128xbf16, #tpu.memory_space<vmem>>, vector<12x128xbf16>
    %c0_1 = arith.constant 0 : index
    %c0_2 = arith.constant 0 : index
    %1 = vector.load %arg2[%c0_1, %c0_2] : memref<128x32xbf16, #tpu.memory_space<vmem>>, vector<128x32xbf16>
    %cst = arith.constant dense<0.000000e+00> : vector<12x32xf32>
    %2 = tpu.matmul %0, %1, %cst {dimension_numbers = #tpu.dot_dimension_numbers<[1], [0], [0], [1], [0, 0, 1, 1], [], []>} : vector<12x128xbf16>, vector<128x32xbf16>, vector<12x32xf32> -> vector<12x32xf32>
    %c0_3 = arith.constant 0 : index
    %c0_4 = arith.constant 0 : index
    %3 = vector.load %arg3[%c0_3, %c0_4] : memref<1x32xf32, #tpu.memory_space<vmem>>, vector<1x32xf32>
    %4 = vector.broadcast %3 : vector<1x32xf32> to vector<12x32xf32>
    %5 = arith.addf %2, %4 : vector<12x32xf32>
    %cst_5 = arith.constant 0.000000e+00 : f32
    %6 = vector.broadcast %cst_5 : f32 to vector<12x32xf32>
    %7 = arith.maximumf %5, %6 : vector<12x32xf32>
    %8 = arith.truncf %7 : vector<12x32xf32> to vector<12x32xbf16>
    %c0_6 = arith.constant 0 : index
    %c0_7 = arith.constant 0 : index
    %9 = vector.load %arg4[%c0_6, %c0_7] : memref<12x32xbf16, #tpu.memory_space<vmem>>, vector<12x32xbf16>
    tpu.vector_store %arg4[%c0_6, %c0_7], %8 {strides = array<i32>} : memref<12x32xbf16, #tpu.memory_space<vmem>>, vector<12x32xbf16>,
    return
  }
  func.func @transform_0(%arg0: i32) -> (i32, i32) {
    %c0_i32 = arith.constant 0 : i32
    %c0_i32_0 = arith.constant 0 : i32
    return %arg0, %c0_i32 : i32, i32
  }
  func.func @transform_1(%arg0: i32) -> (i32, i32) {
    %c0_i32 = arith.constant 0 : i32
    %c0_i32_0 = arith.constant 0 : i32
    %c0_i32_1 = arith.constant 0 : i32
    return %c0_i32, %c0_i32_0 : i32, i32
  }
  func.func @transform_2(%arg0: i32) -> (i32, i32) {
    %c0_i32 = arith.constant 0 : i32
    %c0_i32_0 = arith.constant 0 : i32
    %c0_i32_1 = arith.constant 0 : i32
    return %c0_i32, %c0_i32_0 : i32, i32
  }
  func.func @transform_3(%arg0: i32) -> (i32, i32) {
    %c0_i32 = arith.constant 0 : i32
    %c0_i32_0 = arith.constant 0 : i32
    return %arg0, %c0_i32 : i32, i32
  }
}

module attributes {stable_mosaic.version = 11 : i64} {
  func.func @_mm_kernel(%arg0: i32, %arg1: memref<12x32xbf16, #tpu.memory_space<vmem>>, %arg2: memref<32x128xbf16, #tpu.memory_space<vmem>>, %arg3: memref<1x128xf32, #tpu.memory_space<vmem>>, %arg4: memref<12x128xbf16, #tpu.memory_space<vmem>>, %arg5: memref<12x128xbf16, #tpu.memory_space<vmem>>) attributes {dimension_semantics = [#tpu.dimension_semantics<parallel>], iteration_bounds = array<i64: 1>, scalar_prefetch = 0 : i64, scratch_operands = 0 : i64, tpu.core_type = #tpu.core_type<tc>, window_params = [{transform_indices = @transform_0, window_bounds = array<i64: 12, 32>}, {pipeline_mode = #tpu.pipeline_mode<synchronous>, transform_indices = @transform_1, window_bounds = array<i64: 32, 128>}, {pipeline_mode = #tpu.pipeline_mode<synchronous>, transform_indices = @transform_2, window_bounds = array<i64: 1, 128>}, {transform_indices = @transform_3, window_bounds = array<i64: 12, 128>}, {transform_indices = @transform_4, window_bounds = array<i64: 12, 128>}]} {
    %c0 = arith.constant 0 : index
    %c0_0 = arith.constant 0 : index
    %0 = vector.load %arg1[%c0, %c0_0] : memref<12x32xbf16, #tpu.memory_space<vmem>>, vector<12x32xbf16>
    %c0_1 = arith.constant 0 : index
    %c0_2 = arith.constant 0 : index
    %1 = vector.load %arg2[%c0_1, %c0_2] : memref<32x128xbf16, #tpu.memory_space<vmem>>, vector<32x128xbf16>
    %cst = arith.constant dense<0.000000e+00> : vector<12x128xf32>
    %2 = tpu.matmul %0, %1, %cst {dimension_numbers = #tpu.dot_dimension_numbers<[1], [0], [0], [1], [0, 0, 1, 1], [], []>} : vector<12x32xbf16>, vector<32x128xbf16>, vector<12x128xf32> -> vector<12x128xf32>
    %c0_3 = arith.constant 0 : index
    %c0_4 = arith.constant 0 : index
    %3 = vector.load %arg3[%c0_3, %c0_4] : memref<1x128xf32, #tpu.memory_space<vmem>>, vector<1x128xf32>
    %4 = vector.broadcast %3 : vector<1x128xf32> to vector<12x128xf32>
    %5 = arith.addf %2, %4 : vector<12x128xf32>
    %c0_5 = arith.constant 0 : index
    %c0_6 = arith.constant 0 : index
    %6 = vector.load %arg4[%c0_5, %c0_6] : memref<12x128xbf16, #tpu.memory_space<vmem>>, vector<12x128xbf16>
    %7 = arith.extf %6 : vector<12x128xbf16> to vector<12x128xf32>
    %8 = arith.addf %5, %7 : vector<12x128xf32>
    %cst_7 = arith.constant 0.000000e+00 : f32
    %9 = vector.broadcast %cst_7 : f32 to vector<12x128xf32>
    %10 = arith.maximumf %8, %9 : vector<12x128xf32>
    %11 = arith.truncf %10 : vector<12x128xf32> to vector<12x128xbf16>
    %c0_8 = arith.constant 0 : index
    %c0_9 = arith.constant 0 : index
    %12 = vector.load %arg5[%c0_8, %c0_9] : memref<12x128xbf16, #tpu.memory_space<vmem>>, vector<12x128xbf16>
    tpu.vector_store %arg5[%c0_8, %c0_9], %11 {strides = array<i32>} : memref<12x128xbf16, #tpu.memory_space<vmem>>, vector<12x128xbf16>,
    return
  }
  func.func @transform_0(%arg0: i32) -> (i32, i32) {
    %c0_i32 = arith.constant 0 : i32
    %c0_i32_0 = arith.constant 0 : i32
    return %arg0, %c0_i32 : i32, i32
  }
  func.func @transform_1(%arg0: i32) -> (i32, i32) {
    %c0_i32 = arith.constant 0 : i32
    %c0_i32_0 = arith.constant 0 : i32
    %c0_i32_1 = arith.constant 0 : i32
    return %c0_i32, %c0_i32_0 : i32, i32
  }
  func.func @transform_2(%arg0: i32) -> (i32, i32) {
    %c0_i32 = arith.constant 0 : i32
    %c0_i32_0 = arith.constant 0 : i32
    %c0_i32_1 = arith.constant 0 : i32
    return %c0_i32, %c0_i32_0 : i32, i32
  }
  func.func @transform_3(%arg0: i32) -> (i32, i32) {
    %c0_i32 = arith.constant 0 : i32
    %c0_i32_0 = arith.constant 0 : i32
    return %arg0, %c0_i32 : i32, i32
  }
  func.func @transform_4(%arg0: i32) -> (i32, i32) {
    %c0_i32 = arith.constant 0 : i32
    %c0_i32_0 = arith.constant 0 : i32
    return %arg0, %c0_i32 : i32, i32
  }
}

module attributes {stable_mosaic.version = 11 : i64} {
  func.func @_mm_kernel(%arg0: i32, %arg1: memref<12x128xbf16, #tpu.memory_space<vmem>>, %arg2: memref<128x64xbf16, #tpu.memory_space<vmem>>, %arg3: memref<1x64xf32, #tpu.memory_space<vmem>>, %arg4: memref<12x64xbf16, #tpu.memory_space<vmem>>) attributes {dimension_semantics = [#tpu.dimension_semantics<parallel>], iteration_bounds = array<i64: 1>, scalar_prefetch = 0 : i64, scratch_operands = 0 : i64, tpu.core_type = #tpu.core_type<tc>, window_params = [{transform_indices = @transform_0, window_bounds = array<i64: 12, 128>}, {pipeline_mode = #tpu.pipeline_mode<synchronous>, transform_indices = @transform_1, window_bounds = array<i64: 128, 64>}, {pipeline_mode = #tpu.pipeline_mode<synchronous>, transform_indices = @transform_2, window_bounds = array<i64: 1, 64>}, {transform_indices = @transform_3, window_bounds = array<i64: 12, 64>}]} {
    %c0 = arith.constant 0 : index
    %c0_0 = arith.constant 0 : index
    %0 = vector.load %arg1[%c0, %c0_0] : memref<12x128xbf16, #tpu.memory_space<vmem>>, vector<12x128xbf16>
    %c0_1 = arith.constant 0 : index
    %c0_2 = arith.constant 0 : index
    %1 = vector.load %arg2[%c0_1, %c0_2] : memref<128x64xbf16, #tpu.memory_space<vmem>>, vector<128x64xbf16>
    %cst = arith.constant dense<0.000000e+00> : vector<12x64xf32>
    %2 = tpu.matmul %0, %1, %cst {dimension_numbers = #tpu.dot_dimension_numbers<[1], [0], [0], [1], [0, 0, 1, 1], [], []>} : vector<12x128xbf16>, vector<128x64xbf16>, vector<12x64xf32> -> vector<12x64xf32>
    %c0_3 = arith.constant 0 : index
    %c0_4 = arith.constant 0 : index
    %3 = vector.load %arg3[%c0_3, %c0_4] : memref<1x64xf32, #tpu.memory_space<vmem>>, vector<1x64xf32>
    %4 = vector.broadcast %3 : vector<1x64xf32> to vector<12x64xf32>
    %5 = arith.addf %2, %4 : vector<12x64xf32>
    %cst_5 = arith.constant 0.000000e+00 : f32
    %6 = vector.broadcast %cst_5 : f32 to vector<12x64xf32>
    %7 = arith.maximumf %5, %6 : vector<12x64xf32>
    %8 = arith.truncf %7 : vector<12x64xf32> to vector<12x64xbf16>
    %c0_6 = arith.constant 0 : index
    %c0_7 = arith.constant 0 : index
    %9 = vector.load %arg4[%c0_6, %c0_7] : memref<12x64xbf16, #tpu.memory_space<vmem>>, vector<12x64xbf16>
    tpu.vector_store %arg4[%c0_6, %c0_7], %8 {strides = array<i32>} : memref<12x64xbf16, #tpu.memory_space<vmem>>, vector<12x64xbf16>,
    return
  }
  func.func @transform_0(%arg0: i32) -> (i32, i32) {
    %c0_i32 = arith.constant 0 : i32
    %c0_i32_0 = arith.constant 0 : i32
    return %arg0, %c0_i32 : i32, i32
  }
  func.func @transform_1(%arg0: i32) -> (i32, i32) {
    %c0_i32 = arith.constant 0 : i32
    %c0_i32_0 = arith.constant 0 : i32
    %c0_i32_1 = arith.constant 0 : i32
    return %c0_i32, %c0_i32_0 : i32, i32
  }
  func.func @transform_2(%arg0: i32) -> (i32, i32) {
    %c0_i32 = arith.constant 0 : i32
    %c0_i32_0 = arith.constant 0 : i32
    %c0_i32_1 = arith.constant 0 : i32
    return %c0_i32, %c0_i32_0 : i32, i32
  }
  func.func @transform_3(%arg0: i32) -> (i32, i32) {
    %c0_i32 = arith.constant 0 : i32
    %c0_i32_0 = arith.constant 0 : i32
    return %arg0, %c0_i32 : i32, i32
  }
}

module attributes {stable_mosaic.version = 11 : i64} {
  func.func @_mm_kernel(%arg0: i32, %arg1: memref<12x128xbf16, #tpu.memory_space<vmem>>, %arg2: memref<128x256xbf16, #tpu.memory_space<vmem>>, %arg3: memref<1x256xf32, #tpu.memory_space<vmem>>, %arg4: memref<12x256xbf16, #tpu.memory_space<vmem>>) attributes {dimension_semantics = [#tpu.dimension_semantics<parallel>], iteration_bounds = array<i64: 1>, scalar_prefetch = 0 : i64, scratch_operands = 0 : i64, tpu.core_type = #tpu.core_type<tc>, window_params = [{transform_indices = @transform_0, window_bounds = array<i64: 12, 128>}, {pipeline_mode = #tpu.pipeline_mode<synchronous>, transform_indices = @transform_1, window_bounds = array<i64: 128, 256>}, {pipeline_mode = #tpu.pipeline_mode<synchronous>, transform_indices = @transform_2, window_bounds = array<i64: 1, 256>}, {transform_indices = @transform_3, window_bounds = array<i64: 12, 256>}]} {
    %c0 = arith.constant 0 : index
    %c0_0 = arith.constant 0 : index
    %0 = vector.load %arg1[%c0, %c0_0] : memref<12x128xbf16, #tpu.memory_space<vmem>>, vector<12x128xbf16>
    %c0_1 = arith.constant 0 : index
    %c0_2 = arith.constant 0 : index
    %1 = vector.load %arg2[%c0_1, %c0_2] : memref<128x256xbf16, #tpu.memory_space<vmem>>, vector<128x256xbf16>
    %cst = arith.constant dense<0.000000e+00> : vector<12x256xf32>
    %2 = tpu.matmul %0, %1, %cst {dimension_numbers = #tpu.dot_dimension_numbers<[1], [0], [0], [1], [0, 0, 1, 1], [], []>} : vector<12x128xbf16>, vector<128x256xbf16>, vector<12x256xf32> -> vector<12x256xf32>
    %c0_3 = arith.constant 0 : index
    %c0_4 = arith.constant 0 : index
    %3 = vector.load %arg3[%c0_3, %c0_4] : memref<1x256xf32, #tpu.memory_space<vmem>>, vector<1x256xf32>
    %4 = vector.broadcast %3 : vector<1x256xf32> to vector<12x256xf32>
    %5 = arith.addf %2, %4 : vector<12x256xf32>
    %6 = arith.truncf %5 : vector<12x256xf32> to vector<12x256xbf16>
    %c0_5 = arith.constant 0 : index
    %c0_6 = arith.constant 0 : index
    %7 = vector.load %arg4[%c0_5, %c0_6] : memref<12x256xbf16, #tpu.memory_space<vmem>>, vector<12x256xbf16>
    tpu.vector_store %arg4[%c0_5, %c0_6], %6 {strides = array<i32>} : memref<12x256xbf16, #tpu.memory_space<vmem>>, vector<12x256xbf16>,
    return
  }
  func.func @transform_0(%arg0: i32) -> (i32, i32) {
    %c0_i32 = arith.constant 0 : i32
    %c0_i32_0 = arith.constant 0 : i32
    return %arg0, %c0_i32 : i32, i32
  }
  func.func @transform_1(%arg0: i32) -> (i32, i32) {
    %c0_i32 = arith.constant 0 : i32
    %c0_i32_0 = arith.constant 0 : i32
    %c0_i32_1 = arith.constant 0 : i32
    return %c0_i32, %c0_i32_0 : i32, i32
  }
  func.func @transform_2(%arg0: i32) -> (i32, i32) {
    %c0_i32 = arith.constant 0 : i32
    %c0_i32_0 = arith.constant 0 : i32
    %c0_i32_1 = arith.constant 0 : i32
    return %c0_i32, %c0_i32_0 : i32, i32
  }
  func.func @transform_3(%arg0: i32) -> (i32, i32) {
    %c0_i32 = arith.constant 0 : i32
    %c0_i32_0 = arith.constant 0 : i32
    return %arg0, %c0_i32 : i32, i32
  }
}

module attributes {stable_mosaic.version = 11 : i64} {
  func.func @_mm_kernel(%arg0: i32, %arg1: memref<12x576xbf16, #tpu.memory_space<vmem>>, %arg2: memref<576x64xbf16, #tpu.memory_space<vmem>>, %arg3: memref<1x64xf32, #tpu.memory_space<vmem>>, %arg4: memref<12x64xbf16, #tpu.memory_space<vmem>>) attributes {dimension_semantics = [#tpu.dimension_semantics<parallel>], iteration_bounds = array<i64: 1>, scalar_prefetch = 0 : i64, scratch_operands = 0 : i64, tpu.core_type = #tpu.core_type<tc>, window_params = [{transform_indices = @transform_0, window_bounds = array<i64: 12, 576>}, {pipeline_mode = #tpu.pipeline_mode<synchronous>, transform_indices = @transform_1, window_bounds = array<i64: 576, 64>}, {pipeline_mode = #tpu.pipeline_mode<synchronous>, transform_indices = @transform_2, window_bounds = array<i64: 1, 64>}, {transform_indices = @transform_3, window_bounds = array<i64: 12, 64>}]} {
    %c0 = arith.constant 0 : index
    %c0_0 = arith.constant 0 : index
    %0 = vector.load %arg1[%c0, %c0_0] : memref<12x576xbf16, #tpu.memory_space<vmem>>, vector<12x576xbf16>
    %c0_1 = arith.constant 0 : index
    %c0_2 = arith.constant 0 : index
    %1 = vector.load %arg2[%c0_1, %c0_2] : memref<576x64xbf16, #tpu.memory_space<vmem>>, vector<576x64xbf16>
    %cst = arith.constant dense<0.000000e+00> : vector<12x64xf32>
    %2 = tpu.matmul %0, %1, %cst {dimension_numbers = #tpu.dot_dimension_numbers<[1], [0], [0], [1], [0, 0, 1, 1], [], []>} : vector<12x576xbf16>, vector<576x64xbf16>, vector<12x64xf32> -> vector<12x64xf32>
    %c0_3 = arith.constant 0 : index
    %c0_4 = arith.constant 0 : index
    %3 = vector.load %arg3[%c0_3, %c0_4] : memref<1x64xf32, #tpu.memory_space<vmem>>, vector<1x64xf32>
    %4 = vector.broadcast %3 : vector<1x64xf32> to vector<12x64xf32>
    %5 = arith.addf %2, %4 : vector<12x64xf32>
    %cst_5 = arith.constant 0.000000e+00 : f32
    %6 = vector.broadcast %cst_5 : f32 to vector<12x64xf32>
    %7 = arith.maximumf %5, %6 : vector<12x64xf32>
    %8 = arith.truncf %7 : vector<12x64xf32> to vector<12x64xbf16>
    %c0_6 = arith.constant 0 : index
    %c0_7 = arith.constant 0 : index
    %9 = vector.load %arg4[%c0_6, %c0_7] : memref<12x64xbf16, #tpu.memory_space<vmem>>, vector<12x64xbf16>
    tpu.vector_store %arg4[%c0_6, %c0_7], %8 {strides = array<i32>} : memref<12x64xbf16, #tpu.memory_space<vmem>>, vector<12x64xbf16>,
    return
  }
  func.func @transform_0(%arg0: i32) -> (i32, i32) {
    %c0_i32 = arith.constant 0 : i32
    %c0_i32_0 = arith.constant 0 : i32
    return %arg0, %c0_i32 : i32, i32
  }
  func.func @transform_1(%arg0: i32) -> (i32, i32) {
    %c0_i32 = arith.constant 0 : i32
    %c0_i32_0 = arith.constant 0 : i32
    %c0_i32_1 = arith.constant 0 : i32
    return %c0_i32, %c0_i32_0 : i32, i32
  }
  func.func @transform_2(%arg0: i32) -> (i32, i32) {
    %c0_i32 = arith.constant 0 : i32
    %c0_i32_0 = arith.constant 0 : i32
    %c0_i32_1 = arith.constant 0 : i32
    return %c0_i32, %c0_i32_0 : i32, i32
  }
  func.func @transform_3(%arg0: i32) -> (i32, i32) {
    %c0_i32 = arith.constant 0 : i32
    %c0_i32_0 = arith.constant 0 : i32
    return %arg0, %c0_i32 : i32, i32
  }
}

module attributes {stable_mosaic.version = 11 : i64} {
  func.func @_mm_kernel(%arg0: i32, %arg1: memref<12x64xbf16, #tpu.memory_space<vmem>>, %arg2: memref<64x256xbf16, #tpu.memory_space<vmem>>, %arg3: memref<1x256xf32, #tpu.memory_space<vmem>>, %arg4: memref<12x256xbf16, #tpu.memory_space<vmem>>, %arg5: memref<12x256xbf16, #tpu.memory_space<vmem>>) attributes {dimension_semantics = [#tpu.dimension_semantics<parallel>], iteration_bounds = array<i64: 1>, scalar_prefetch = 0 : i64, scratch_operands = 0 : i64, tpu.core_type = #tpu.core_type<tc>, window_params = [{transform_indices = @transform_0, window_bounds = array<i64: 12, 64>}, {pipeline_mode = #tpu.pipeline_mode<synchronous>, transform_indices = @transform_1, window_bounds = array<i64: 64, 256>}, {pipeline_mode = #tpu.pipeline_mode<synchronous>, transform_indices = @transform_2, window_bounds = array<i64: 1, 256>}, {transform_indices = @transform_3, window_bounds = array<i64: 12, 256>}, {transform_indices = @transform_4, window_bounds = array<i64: 12, 256>}]} {
    %c0 = arith.constant 0 : index
    %c0_0 = arith.constant 0 : index
    %0 = vector.load %arg1[%c0, %c0_0] : memref<12x64xbf16, #tpu.memory_space<vmem>>, vector<12x64xbf16>
    %c0_1 = arith.constant 0 : index
    %c0_2 = arith.constant 0 : index
    %1 = vector.load %arg2[%c0_1, %c0_2] : memref<64x256xbf16, #tpu.memory_space<vmem>>, vector<64x256xbf16>
    %cst = arith.constant dense<0.000000e+00> : vector<12x256xf32>
    %2 = tpu.matmul %0, %1, %cst {dimension_numbers = #tpu.dot_dimension_numbers<[1], [0], [0], [1], [0, 0, 1, 1], [], []>} : vector<12x64xbf16>, vector<64x256xbf16>, vector<12x256xf32> -> vector<12x256xf32>
    %c0_3 = arith.constant 0 : index
    %c0_4 = arith.constant 0 : index
    %3 = vector.load %arg3[%c0_3, %c0_4] : memref<1x256xf32, #tpu.memory_space<vmem>>, vector<1x256xf32>
    %4 = vector.broadcast %3 : vector<1x256xf32> to vector<12x256xf32>
    %5 = arith.addf %2, %4 : vector<12x256xf32>
    %c0_5 = arith.constant 0 : index
    %c0_6 = arith.constant 0 : index
    %6 = vector.load %arg4[%c0_5, %c0_6] : memref<12x256xbf16, #tpu.memory_space<vmem>>, vector<12x256xbf16>
    %7 = arith.extf %6 : vector<12x256xbf16> to vector<12x256xf32>
    %8 = arith.addf %5, %7 : vector<12x256xf32>
    %cst_7 = arith.constant 0.000000e+00 : f32
    %9 = vector.broadcast %cst_7 : f32 to vector<12x256xf32>
    %10 = arith.maximumf %8, %9 : vector<12x256xf32>
    %11 = arith.truncf %10 : vector<12x256xf32> to vector<12x256xbf16>
    %c0_8 = arith.constant 0 : index
    %c0_9 = arith.constant 0 : index
    %12 = vector.load %arg5[%c0_8, %c0_9] : memref<12x256xbf16, #tpu.memory_space<vmem>>, vector<12x256xbf16>
    tpu.vector_store %arg5[%c0_8, %c0_9], %11 {strides = array<i32>} : memref<12x256xbf16, #tpu.memory_space<vmem>>, vector<12x256xbf16>,
    return
  }
  func.func @transform_0(%arg0: i32) -> (i32, i32) {
    %c0_i32 = arith.constant 0 : i32
    %c0_i32_0 = arith.constant 0 : i32
    return %arg0, %c0_i32 : i32, i32
  }
  func.func @transform_1(%arg0: i32) -> (i32, i32) {
    %c0_i32 = arith.constant 0 : i32
    %c0_i32_0 = arith.constant 0 : i32
    %c0_i32_1 = arith.constant 0 : i32
    return %c0_i32, %c0_i32_0 : i32, i32
  }
  func.func @transform_2(%arg0: i32) -> (i32, i32) {
    %c0_i32 = arith.constant 0 : i32
    %c0_i32_0 = arith.constant 0 : i32
    %c0_i32_1 = arith.constant 0 : i32
    return %c0_i32, %c0_i32_0 : i32, i32
  }
  func.func @transform_3(%arg0: i32) -> (i32, i32) {
    %c0_i32 = arith.constant 0 : i32
    %c0_i32_0 = arith.constant 0 : i32
    return %arg0, %c0_i32 : i32, i32
  }
  func.func @transform_4(%arg0: i32) -> (i32, i32) {
    %c0_i32 = arith.constant 0 : i32
    %c0_i32_0 = arith.constant 0 : i32
    return %arg0, %c0_i32 : i32, i32
  }
}

module attributes {stable_mosaic.version = 11 : i64} {
  func.func @_mm_kernel(%arg0: i32, %arg1: memref<12x256xbf16, #tpu.memory_space<vmem>>, %arg2: memref<256x64xbf16, #tpu.memory_space<vmem>>, %arg3: memref<1x64xf32, #tpu.memory_space<vmem>>, %arg4: memref<12x64xbf16, #tpu.memory_space<vmem>>) attributes {dimension_semantics = [#tpu.dimension_semantics<parallel>], iteration_bounds = array<i64: 1>, scalar_prefetch = 0 : i64, scratch_operands = 0 : i64, tpu.core_type = #tpu.core_type<tc>, window_params = [{transform_indices = @transform_0, window_bounds = array<i64: 12, 256>}, {pipeline_mode = #tpu.pipeline_mode<synchronous>, transform_indices = @transform_1, window_bounds = array<i64: 256, 64>}, {pipeline_mode = #tpu.pipeline_mode<synchronous>, transform_indices = @transform_2, window_bounds = array<i64: 1, 64>}, {transform_indices = @transform_3, window_bounds = array<i64: 12, 64>}]} {
    %c0 = arith.constant 0 : index
    %c0_0 = arith.constant 0 : index
    %0 = vector.load %arg1[%c0, %c0_0] : memref<12x256xbf16, #tpu.memory_space<vmem>>, vector<12x256xbf16>
    %c0_1 = arith.constant 0 : index
    %c0_2 = arith.constant 0 : index
    %1 = vector.load %arg2[%c0_1, %c0_2] : memref<256x64xbf16, #tpu.memory_space<vmem>>, vector<256x64xbf16>
    %cst = arith.constant dense<0.000000e+00> : vector<12x64xf32>
    %2 = tpu.matmul %0, %1, %cst {dimension_numbers = #tpu.dot_dimension_numbers<[1], [0], [0], [1], [0, 0, 1, 1], [], []>} : vector<12x256xbf16>, vector<256x64xbf16>, vector<12x64xf32> -> vector<12x64xf32>
    %c0_3 = arith.constant 0 : index
    %c0_4 = arith.constant 0 : index
    %3 = vector.load %arg3[%c0_3, %c0_4] : memref<1x64xf32, #tpu.memory_space<vmem>>, vector<1x64xf32>
    %4 = vector.broadcast %3 : vector<1x64xf32> to vector<12x64xf32>
    %5 = arith.addf %2, %4 : vector<12x64xf32>
    %cst_5 = arith.constant 0.000000e+00 : f32
    %6 = vector.broadcast %cst_5 : f32 to vector<12x64xf32>
    %7 = arith.maximumf %5, %6 : vector<12x64xf32>
    %8 = arith.truncf %7 : vector<12x64xf32> to vector<12x64xbf16>
    %c0_6 = arith.constant 0 : index
    %c0_7 = arith.constant 0 : index
    %9 = vector.load %arg4[%c0_6, %c0_7] : memref<12x64xbf16, #tpu.memory_space<vmem>>, vector<12x64xbf16>
    tpu.vector_store %arg4[%c0_6, %c0_7], %8 {strides = array<i32>} : memref<12x64xbf16, #tpu.memory_space<vmem>>, vector<12x64xbf16>,
    return
  }
  func.func @transform_0(%arg0: i32) -> (i32, i32) {
    %c0_i32 = arith.constant 0 : i32
    %c0_i32_0 = arith.constant 0 : i32
    return %arg0, %c0_i32 : i32, i32
  }
  func.func @transform_1(%arg0: i32) -> (i32, i32) {
    %c0_i32 = arith.constant 0 : i32
    %c0_i32_0 = arith.constant 0 : i32
    %c0_i32_1 = arith.constant 0 : i32
    return %c0_i32, %c0_i32_0 : i32, i32
  }
  func.func @transform_2(%arg0: i32) -> (i32, i32) {
    %c0_i32 = arith.constant 0 : i32
    %c0_i32_0 = arith.constant 0 : i32
    %c0_i32_1 = arith.constant 0 : i32
    return %c0_i32, %c0_i32_0 : i32, i32
  }
  func.func @transform_3(%arg0: i32) -> (i32, i32) {
    %c0_i32 = arith.constant 0 : i32
    %c0_i32_0 = arith.constant 0 : i32
    return %arg0, %c0_i32 : i32, i32
  }
}

module attributes {stable_mosaic.version = 11 : i64} {
  func.func @_mm_kernel(%arg0: i32, %arg1: memref<12x256xbf16, #tpu.memory_space<vmem>>, %arg2: memref<256x128xbf16, #tpu.memory_space<vmem>>, %arg3: memref<1x128xf32, #tpu.memory_space<vmem>>, %arg4: memref<12x128xbf16, #tpu.memory_space<vmem>>) attributes {dimension_semantics = [#tpu.dimension_semantics<parallel>], iteration_bounds = array<i64: 1>, scalar_prefetch = 0 : i64, scratch_operands = 0 : i64, tpu.core_type = #tpu.core_type<tc>, window_params = [{transform_indices = @transform_0, window_bounds = array<i64: 12, 256>}, {pipeline_mode = #tpu.pipeline_mode<synchronous>, transform_indices = @transform_1, window_bounds = array<i64: 256, 128>}, {pipeline_mode = #tpu.pipeline_mode<synchronous>, transform_indices = @transform_2, window_bounds = array<i64: 1, 128>}, {transform_indices = @transform_3, window_bounds = array<i64: 12, 128>}]} {
    %c0 = arith.constant 0 : index
    %c0_0 = arith.constant 0 : index
    %0 = vector.load %arg1[%c0, %c0_0] : memref<12x256xbf16, #tpu.memory_space<vmem>>, vector<12x256xbf16>
    %c0_1 = arith.constant 0 : index
    %c0_2 = arith.constant 0 : index
    %1 = vector.load %arg2[%c0_1, %c0_2] : memref<256x128xbf16, #tpu.memory_space<vmem>>, vector<256x128xbf16>
    %cst = arith.constant dense<0.000000e+00> : vector<12x128xf32>
    %2 = tpu.matmul %0, %1, %cst {dimension_numbers = #tpu.dot_dimension_numbers<[1], [0], [0], [1], [0, 0, 1, 1], [], []>} : vector<12x256xbf16>, vector<256x128xbf16>, vector<12x128xf32> -> vector<12x128xf32>
    %c0_3 = arith.constant 0 : index
    %c0_4 = arith.constant 0 : index
    %3 = vector.load %arg3[%c0_3, %c0_4] : memref<1x128xf32, #tpu.memory_space<vmem>>, vector<1x128xf32>
    %4 = vector.broadcast %3 : vector<1x128xf32> to vector<12x128xf32>
    %5 = arith.addf %2, %4 : vector<12x128xf32>
    %cst_5 = arith.constant 0.000000e+00 : f32
    %6 = vector.broadcast %cst_5 : f32 to vector<12x128xf32>
    %7 = arith.maximumf %5, %6 : vector<12x128xf32>
    %8 = arith.truncf %7 : vector<12x128xf32> to vector<12x128xbf16>
    %c0_6 = arith.constant 0 : index
    %c0_7 = arith.constant 0 : index
    %9 = vector.load %arg4[%c0_6, %c0_7] : memref<12x128xbf16, #tpu.memory_space<vmem>>, vector<12x128xbf16>
    tpu.vector_store %arg4[%c0_6, %c0_7], %8 {strides = array<i32>} : memref<12x128xbf16, #tpu.memory_space<vmem>>, vector<12x128xbf16>,
    return
  }
  func.func @transform_0(%arg0: i32) -> (i32, i32) {
    %c0_i32 = arith.constant 0 : i32
    %c0_i32_0 = arith.constant 0 : i32
    return %arg0, %c0_i32 : i32, i32
  }
  func.func @transform_1(%arg0: i32) -> (i32, i32) {
    %c0_i32 = arith.constant 0 : i32
    %c0_i32_0 = arith.constant 0 : i32
    %c0_i32_1 = arith.constant 0 : i32
    return %c0_i32, %c0_i32_0 : i32, i32
  }
  func.func @transform_2(%arg0: i32) -> (i32, i32) {
    %c0_i32 = arith.constant 0 : i32
    %c0_i32_0 = arith.constant 0 : i32
    %c0_i32_1 = arith.constant 0 : i32
    return %c0_i32, %c0_i32_0 : i32, i32
  }
  func.func @transform_3(%arg0: i32) -> (i32, i32) {
    %c0_i32 = arith.constant 0 : i32
    %c0_i32_0 = arith.constant 0 : i32
    return %arg0, %c0_i32 : i32, i32
  }
}

module attributes {stable_mosaic.version = 11 : i64} {
  func.func @_mm_kernel(%arg0: i32, %arg1: memref<12x256xbf16, #tpu.memory_space<vmem>>, %arg2: memref<256x512xbf16, #tpu.memory_space<vmem>>, %arg3: memref<1x512xf32, #tpu.memory_space<vmem>>, %arg4: memref<12x512xbf16, #tpu.memory_space<vmem>>) attributes {dimension_semantics = [#tpu.dimension_semantics<parallel>], iteration_bounds = array<i64: 1>, scalar_prefetch = 0 : i64, scratch_operands = 0 : i64, tpu.core_type = #tpu.core_type<tc>, window_params = [{transform_indices = @transform_0, window_bounds = array<i64: 12, 256>}, {pipeline_mode = #tpu.pipeline_mode<synchronous>, transform_indices = @transform_1, window_bounds = array<i64: 256, 512>}, {pipeline_mode = #tpu.pipeline_mode<synchronous>, transform_indices = @transform_2, window_bounds = array<i64: 1, 512>}, {transform_indices = @transform_3, window_bounds = array<i64: 12, 512>}]} {
    %c0 = arith.constant 0 : index
    %c0_0 = arith.constant 0 : index
    %0 = vector.load %arg1[%c0, %c0_0] : memref<12x256xbf16, #tpu.memory_space<vmem>>, vector<12x256xbf16>
    %c0_1 = arith.constant 0 : index
    %c0_2 = arith.constant 0 : index
    %1 = vector.load %arg2[%c0_1, %c0_2] : memref<256x512xbf16, #tpu.memory_space<vmem>>, vector<256x512xbf16>
    %cst = arith.constant dense<0.000000e+00> : vector<12x512xf32>
    %2 = tpu.matmul %0, %1, %cst {dimension_numbers = #tpu.dot_dimension_numbers<[1], [0], [0], [1], [0, 0, 1, 1], [], []>} : vector<12x256xbf16>, vector<256x512xbf16>, vector<12x512xf32> -> vector<12x512xf32>
    %c0_3 = arith.constant 0 : index
    %c0_4 = arith.constant 0 : index
    %3 = vector.load %arg3[%c0_3, %c0_4] : memref<1x512xf32, #tpu.memory_space<vmem>>, vector<1x512xf32>
    %4 = vector.broadcast %3 : vector<1x512xf32> to vector<12x512xf32>
    %5 = arith.addf %2, %4 : vector<12x512xf32>
    %6 = arith.truncf %5 : vector<12x512xf32> to vector<12x512xbf16>
    %c0_5 = arith.constant 0 : index
    %c0_6 = arith.constant 0 : index
    %7 = vector.load %arg4[%c0_5, %c0_6] : memref<12x512xbf16, #tpu.memory_space<vmem>>, vector<12x512xbf16>
    tpu.vector_store %arg4[%c0_5, %c0_6], %6 {strides = array<i32>} : memref<12x512xbf16, #tpu.memory_space<vmem>>, vector<12x512xbf16>,
    return
  }
  func.func @transform_0(%arg0: i32) -> (i32, i32) {
    %c0_i32 = arith.constant 0 : i32
    %c0_i32_0 = arith.constant 0 : i32
    return %arg0, %c0_i32 : i32, i32
  }
  func.func @transform_1(%arg0: i32) -> (i32, i32) {
    %c0_i32 = arith.constant 0 : i32
    %c0_i32_0 = arith.constant 0 : i32
    %c0_i32_1 = arith.constant 0 : i32
    return %c0_i32, %c0_i32_0 : i32, i32
  }
  func.func @transform_2(%arg0: i32) -> (i32, i32) {
    %c0_i32 = arith.constant 0 : i32
    %c0_i32_0 = arith.constant 0 : i32
    %c0_i32_1 = arith.constant 0 : i32
    return %c0_i32, %c0_i32_0 : i32, i32
  }
  func.func @transform_3(%arg0: i32) -> (i32, i32) {
    %c0_i32 = arith.constant 0 : i32
    %c0_i32_0 = arith.constant 0 : i32
    return %arg0, %c0_i32 : i32, i32
  }
}

module attributes {stable_mosaic.version = 11 : i64} {
  func.func @_mm_kernel(%arg0: i32, %arg1: memref<12x1152xbf16, #tpu.memory_space<vmem>>, %arg2: memref<1152x128xbf16, #tpu.memory_space<vmem>>, %arg3: memref<1x128xf32, #tpu.memory_space<vmem>>, %arg4: memref<12x128xbf16, #tpu.memory_space<vmem>>) attributes {dimension_semantics = [#tpu.dimension_semantics<parallel>], iteration_bounds = array<i64: 1>, scalar_prefetch = 0 : i64, scratch_operands = 0 : i64, tpu.core_type = #tpu.core_type<tc>, window_params = [{transform_indices = @transform_0, window_bounds = array<i64: 12, 1152>}, {pipeline_mode = #tpu.pipeline_mode<synchronous>, transform_indices = @transform_1, window_bounds = array<i64: 1152, 128>}, {pipeline_mode = #tpu.pipeline_mode<synchronous>, transform_indices = @transform_2, window_bounds = array<i64: 1, 128>}, {transform_indices = @transform_3, window_bounds = array<i64: 12, 128>}]} {
    %c0 = arith.constant 0 : index
    %c0_0 = arith.constant 0 : index
    %0 = vector.load %arg1[%c0, %c0_0] : memref<12x1152xbf16, #tpu.memory_space<vmem>>, vector<12x1152xbf16>
    %c0_1 = arith.constant 0 : index
    %c0_2 = arith.constant 0 : index
    %1 = vector.load %arg2[%c0_1, %c0_2] : memref<1152x128xbf16, #tpu.memory_space<vmem>>, vector<1152x128xbf16>
    %cst = arith.constant dense<0.000000e+00> : vector<12x128xf32>
    %2 = tpu.matmul %0, %1, %cst {dimension_numbers = #tpu.dot_dimension_numbers<[1], [0], [0], [1], [0, 0, 1, 1], [], []>} : vector<12x1152xbf16>, vector<1152x128xbf16>, vector<12x128xf32> -> vector<12x128xf32>
    %c0_3 = arith.constant 0 : index
    %c0_4 = arith.constant 0 : index
    %3 = vector.load %arg3[%c0_3, %c0_4] : memref<1x128xf32, #tpu.memory_space<vmem>>, vector<1x128xf32>
    %4 = vector.broadcast %3 : vector<1x128xf32> to vector<12x128xf32>
    %5 = arith.addf %2, %4 : vector<12x128xf32>
    %cst_5 = arith.constant 0.000000e+00 : f32
    %6 = vector.broadcast %cst_5 : f32 to vector<12x128xf32>
    %7 = arith.maximumf %5, %6 : vector<12x128xf32>
    %8 = arith.truncf %7 : vector<12x128xf32> to vector<12x128xbf16>
    %c0_6 = arith.constant 0 : index
    %c0_7 = arith.constant 0 : index
    %9 = vector.load %arg4[%c0_6, %c0_7] : memref<12x128xbf16, #tpu.memory_space<vmem>>, vector<12x128xbf16>
    tpu.vector_store %arg4[%c0_6, %c0_7], %8 {strides = array<i32>} : memref<12x128xbf16, #tpu.memory_space<vmem>>, vector<12x128xbf16>,
    return
  }
  func.func @transform_0(%arg0: i32) -> (i32, i32) {
    %c0_i32 = arith.constant 0 : i32
    %c0_i32_0 = arith.constant 0 : i32
    return %arg0, %c0_i32 : i32, i32
  }
  func.func @transform_1(%arg0: i32) -> (i32, i32) {
    %c0_i32 = arith.constant 0 : i32
    %c0_i32_0 = arith.constant 0 : i32
    %c0_i32_1 = arith.constant 0 : i32
    return %c0_i32, %c0_i32_0 : i32, i32
  }
  func.func @transform_2(%arg0: i32) -> (i32, i32) {
    %c0_i32 = arith.constant 0 : i32
    %c0_i32_0 = arith.constant 0 : i32
    %c0_i32_1 = arith.constant 0 : i32
    return %c0_i32, %c0_i32_0 : i32, i32
  }
  func.func @transform_3(%arg0: i32) -> (i32, i32) {
    %c0_i32 = arith.constant 0 : i32
    %c0_i32_0 = arith.constant 0 : i32
    return %arg0, %c0_i32 : i32, i32
  }
}

module attributes {stable_mosaic.version = 11 : i64} {
  func.func @_mm_kernel(%arg0: i32, %arg1: memref<12x512xbf16, #tpu.memory_space<vmem>>, %arg2: memref<512x128xbf16, #tpu.memory_space<vmem>>, %arg3: memref<1x128xf32, #tpu.memory_space<vmem>>, %arg4: memref<12x128xbf16, #tpu.memory_space<vmem>>) attributes {dimension_semantics = [#tpu.dimension_semantics<parallel>], iteration_bounds = array<i64: 1>, scalar_prefetch = 0 : i64, scratch_operands = 0 : i64, tpu.core_type = #tpu.core_type<tc>, window_params = [{transform_indices = @transform_0, window_bounds = array<i64: 12, 512>}, {pipeline_mode = #tpu.pipeline_mode<synchronous>, transform_indices = @transform_1, window_bounds = array<i64: 512, 128>}, {pipeline_mode = #tpu.pipeline_mode<synchronous>, transform_indices = @transform_2, window_bounds = array<i64: 1, 128>}, {transform_indices = @transform_3, window_bounds = array<i64: 12, 128>}]} {
    %c0 = arith.constant 0 : index
    %c0_0 = arith.constant 0 : index
    %0 = vector.load %arg1[%c0, %c0_0] : memref<12x512xbf16, #tpu.memory_space<vmem>>, vector<12x512xbf16>
    %c0_1 = arith.constant 0 : index
    %c0_2 = arith.constant 0 : index
    %1 = vector.load %arg2[%c0_1, %c0_2] : memref<512x128xbf16, #tpu.memory_space<vmem>>, vector<512x128xbf16>
    %cst = arith.constant dense<0.000000e+00> : vector<12x128xf32>
    %2 = tpu.matmul %0, %1, %cst {dimension_numbers = #tpu.dot_dimension_numbers<[1], [0], [0], [1], [0, 0, 1, 1], [], []>} : vector<12x512xbf16>, vector<512x128xbf16>, vector<12x128xf32> -> vector<12x128xf32>
    %c0_3 = arith.constant 0 : index
    %c0_4 = arith.constant 0 : index
    %3 = vector.load %arg3[%c0_3, %c0_4] : memref<1x128xf32, #tpu.memory_space<vmem>>, vector<1x128xf32>
    %4 = vector.broadcast %3 : vector<1x128xf32> to vector<12x128xf32>
    %5 = arith.addf %2, %4 : vector<12x128xf32>
    %cst_5 = arith.constant 0.000000e+00 : f32
    %6 = vector.broadcast %cst_5 : f32 to vector<12x128xf32>
    %7 = arith.maximumf %5, %6 : vector<12x128xf32>
    %8 = arith.truncf %7 : vector<12x128xf32> to vector<12x128xbf16>
    %c0_6 = arith.constant 0 : index
    %c0_7 = arith.constant 0 : index
    %9 = vector.load %arg4[%c0_6, %c0_7] : memref<12x128xbf16, #tpu.memory_space<vmem>>, vector<12x128xbf16>
    tpu.vector_store %arg4[%c0_6, %c0_7], %8 {strides = array<i32>} : memref<12x128xbf16, #tpu.memory_space<vmem>>, vector<12x128xbf16>,
    return
  }
  func.func @transform_0(%arg0: i32) -> (i32, i32) {
    %c0_i32 = arith.constant 0 : i32
    %c0_i32_0 = arith.constant 0 : i32
    return %arg0, %c0_i32 : i32, i32
  }
  func.func @transform_1(%arg0: i32) -> (i32, i32) {
    %c0_i32 = arith.constant 0 : i32
    %c0_i32_0 = arith.constant 0 : i32
    %c0_i32_1 = arith.constant 0 : i32
    return %c0_i32, %c0_i32_0 : i32, i32
  }
  func.func @transform_2(%arg0: i32) -> (i32, i32) {
    %c0_i32 = arith.constant 0 : i32
    %c0_i32_0 = arith.constant 0 : i32
    %c0_i32_1 = arith.constant 0 : i32
    return %c0_i32, %c0_i32_0 : i32, i32
  }
  func.func @transform_3(%arg0: i32) -> (i32, i32) {
    %c0_i32 = arith.constant 0 : i32
    %c0_i32_0 = arith.constant 0 : i32
    return %arg0, %c0_i32 : i32, i32
  }
}

module attributes {stable_mosaic.version = 11 : i64} {
  func.func @_mm_kernel(%arg0: i32, %arg1: memref<12x128xbf16, #tpu.memory_space<vmem>>, %arg2: memref<128x512xbf16, #tpu.memory_space<vmem>>, %arg3: memref<1x512xf32, #tpu.memory_space<vmem>>, %arg4: memref<12x512xbf16, #tpu.memory_space<vmem>>, %arg5: memref<12x512xbf16, #tpu.memory_space<vmem>>) attributes {dimension_semantics = [#tpu.dimension_semantics<parallel>], iteration_bounds = array<i64: 1>, scalar_prefetch = 0 : i64, scratch_operands = 0 : i64, tpu.core_type = #tpu.core_type<tc>, window_params = [{transform_indices = @transform_0, window_bounds = array<i64: 12, 128>}, {pipeline_mode = #tpu.pipeline_mode<synchronous>, transform_indices = @transform_1, window_bounds = array<i64: 128, 512>}, {pipeline_mode = #tpu.pipeline_mode<synchronous>, transform_indices = @transform_2, window_bounds = array<i64: 1, 512>}, {transform_indices = @transform_3, window_bounds = array<i64: 12, 512>}, {transform_indices = @transform_4, window_bounds = array<i64: 12, 512>}]} {
    %c0 = arith.constant 0 : index
    %c0_0 = arith.constant 0 : index
    %0 = vector.load %arg1[%c0, %c0_0] : memref<12x128xbf16, #tpu.memory_space<vmem>>, vector<12x128xbf16>
    %c0_1 = arith.constant 0 : index
    %c0_2 = arith.constant 0 : index
    %1 = vector.load %arg2[%c0_1, %c0_2] : memref<128x512xbf16, #tpu.memory_space<vmem>>, vector<128x512xbf16>
    %cst = arith.constant dense<0.000000e+00> : vector<12x512xf32>
    %2 = tpu.matmul %0, %1, %cst {dimension_numbers = #tpu.dot_dimension_numbers<[1], [0], [0], [1], [0, 0, 1, 1], [], []>} : vector<12x128xbf16>, vector<128x512xbf16>, vector<12x512xf32> -> vector<12x512xf32>
    %c0_3 = arith.constant 0 : index
    %c0_4 = arith.constant 0 : index
    %3 = vector.load %arg3[%c0_3, %c0_4] : memref<1x512xf32, #tpu.memory_space<vmem>>, vector<1x512xf32>
    %4 = vector.broadcast %3 : vector<1x512xf32> to vector<12x512xf32>
    %5 = arith.addf %2, %4 : vector<12x512xf32>
    %c0_5 = arith.constant 0 : index
    %c0_6 = arith.constant 0 : index
    %6 = vector.load %arg4[%c0_5, %c0_6] : memref<12x512xbf16, #tpu.memory_space<vmem>>, vector<12x512xbf16>
    %7 = arith.extf %6 : vector<12x512xbf16> to vector<12x512xf32>
    %8 = arith.addf %5, %7 : vector<12x512xf32>
    %cst_7 = arith.constant 0.000000e+00 : f32
    %9 = vector.broadcast %cst_7 : f32 to vector<12x512xf32>
    %10 = arith.maximumf %8, %9 : vector<12x512xf32>
    %11 = arith.truncf %10 : vector<12x512xf32> to vector<12x512xbf16>
    %c0_8 = arith.constant 0 : index
    %c0_9 = arith.constant 0 : index
    %12 = vector.load %arg5[%c0_8, %c0_9] : memref<12x512xbf16, #tpu.memory_space<vmem>>, vector<12x512xbf16>
    tpu.vector_store %arg5[%c0_8, %c0_9], %11 {strides = array<i32>} : memref<12x512xbf16, #tpu.memory_space<vmem>>, vector<12x512xbf16>,
    return
  }
  func.func @transform_0(%arg0: i32) -> (i32, i32) {
    %c0_i32 = arith.constant 0 : i32
    %c0_i32_0 = arith.constant 0 : i32
    return %arg0, %c0_i32 : i32, i32
  }
  func.func @transform_1(%arg0: i32) -> (i32, i32) {
    %c0_i32 = arith.constant 0 : i32
    %c0_i32_0 = arith.constant 0 : i32
    %c0_i32_1 = arith.constant 0 : i32
    return %c0_i32, %c0_i32_0 : i32, i32
  }
  func.func @transform_2(%arg0: i32) -> (i32, i32) {
    %c0_i32 = arith.constant 0 : i32
    %c0_i32_0 = arith.constant 0 : i32
    %c0_i32_1 = arith.constant 0 : i32
    return %c0_i32, %c0_i32_0 : i32, i32
  }
  func.func @transform_3(%arg0: i32) -> (i32, i32) {
    %c0_i32 = arith.constant 0 : i32
    %c0_i32_0 = arith.constant 0 : i32
    return %arg0, %c0_i32 : i32, i32
  }
  func.func @transform_4(%arg0: i32) -> (i32, i32) {
    %c0_i32 = arith.constant 0 : i32
    %c0_i32_0 = arith.constant 0 : i32
    return %arg0, %c0_i32 : i32, i32
  }
}

module attributes {stable_mosaic.version = 11 : i64} {
  func.func @_mm_kernel(%arg0: i32, %arg1: memref<12x128xbf16, #tpu.memory_space<vmem>>, %arg2: memref<128x1xbf16, #tpu.memory_space<vmem>>, %arg3: memref<1x1xf32, #tpu.memory_space<vmem>>, %arg4: memref<12x1xbf16, #tpu.memory_space<vmem>>) attributes {dimension_semantics = [#tpu.dimension_semantics<parallel>], iteration_bounds = array<i64: 1>, scalar_prefetch = 0 : i64, scratch_operands = 0 : i64, tpu.core_type = #tpu.core_type<tc>, window_params = [{transform_indices = @transform_0, window_bounds = array<i64: 12, 128>}, {pipeline_mode = #tpu.pipeline_mode<synchronous>, transform_indices = @transform_1, window_bounds = array<i64: 128, 1>}, {pipeline_mode = #tpu.pipeline_mode<synchronous>, transform_indices = @transform_2, window_bounds = array<i64: 1, 1>}, {transform_indices = @transform_3, window_bounds = array<i64: 12, 1>}]} {
    %c0 = arith.constant 0 : index
    %c0_0 = arith.constant 0 : index
    %0 = vector.load %arg1[%c0, %c0_0] : memref<12x128xbf16, #tpu.memory_space<vmem>>, vector<12x128xbf16>
    %c0_1 = arith.constant 0 : index
    %c0_2 = arith.constant 0 : index
    %1 = vector.load %arg2[%c0_1, %c0_2] : memref<128x1xbf16, #tpu.memory_space<vmem>>, vector<128x1xbf16>
    %cst = arith.constant dense<0.000000e+00> : vector<12x1xf32>
    %2 = tpu.matmul %0, %1, %cst {dimension_numbers = #tpu.dot_dimension_numbers<[1], [0], [0], [1], [0, 0, 1, 1], [], []>} : vector<12x128xbf16>, vector<128x1xbf16>, vector<12x1xf32> -> vector<12x1xf32>
    %c0_3 = arith.constant 0 : index
    %c0_4 = arith.constant 0 : index
    %3 = vector.load %arg3[%c0_3, %c0_4] : memref<1x1xf32, #tpu.memory_space<vmem>>, vector<1x1xf32>
    %4 = vector.broadcast %3 : vector<1x1xf32> to vector<12x1xf32>
    %5 = arith.addf %2, %4 : vector<12x1xf32>
    %6 = arith.truncf %5 : vector<12x1xf32> to vector<12x1xbf16>
    %c0_5 = arith.constant 0 : index
    %c0_6 = arith.constant 0 : index
    %7 = vector.load %arg4[%c0_5, %c0_6] : memref<12x1xbf16, #tpu.memory_space<vmem>>, vector<12x1xbf16>
    tpu.vector_store %arg4[%c0_5, %c0_6], %6 {strides = array<i32>} : memref<12x1xbf16, #tpu.memory_space<vmem>>, vector<12x1xbf16>,
    return
  }
  func.func @transform_0(%arg0: i32) -> (i32, i32) {
    %c0_i32 = arith.constant 0 : i32
    %c0_i32_0 = arith.constant 0 : i32
    return %arg0, %c0_i32 : i32, i32
  }
  func.func @transform_1(%arg0: i32) -> (i32, i32) {
    %c0_i32 = arith.constant 0 : i32
    %c0_i32_0 = arith.constant 0 : i32
    %c0_i32_1 = arith.constant 0 : i32
    return %c0_i32, %c0_i32_0 : i32, i32
  }
  func.func @transform_2(%arg0: i32) -> (i32, i32) {
    %c0_i32 = arith.constant 0 : i32
    %c0_i32_0 = arith.constant 0 : i32
    %c0_i32_1 = arith.constant 0 : i32
    return %c0_i32, %c0_i32_0 : i32, i32
  }
  func.func @transform_3(%arg0: i32) -> (i32, i32) {
    %c0_i32 = arith.constant 0 : i32
    %c0_i32_0 = arith.constant 0 : i32
    return %arg0, %c0_i32 : i32, i32
  }
}

module attributes {stable_mosaic.version = 11 : i64} {
  func.func @_mm_kernel(%arg0: i32, %arg1: memref<12x4608xbf16, #tpu.memory_space<vmem>>, %arg2: memref<4608x128xbf16, #tpu.memory_space<vmem>>, %arg3: memref<1x128xf32, #tpu.memory_space<vmem>>, %arg4: memref<12x128xbf16, #tpu.memory_space<vmem>>) attributes {dimension_semantics = [#tpu.dimension_semantics<parallel>], iteration_bounds = array<i64: 1>, scalar_prefetch = 0 : i64, scratch_operands = 0 : i64, tpu.core_type = #tpu.core_type<tc>, window_params = [{transform_indices = @transform_0, window_bounds = array<i64: 12, 4608>}, {pipeline_mode = #tpu.pipeline_mode<synchronous>, transform_indices = @transform_1, window_bounds = array<i64: 4608, 128>}, {pipeline_mode = #tpu.pipeline_mode<synchronous>, transform_indices = @transform_2, window_bounds = array<i64: 1, 128>}, {transform_indices = @transform_3, window_bounds = array<i64: 12, 128>}]} {
    %c0 = arith.constant 0 : index
    %c0_0 = arith.constant 0 : index
    %0 = vector.load %arg1[%c0, %c0_0] : memref<12x4608xbf16, #tpu.memory_space<vmem>>, vector<12x4608xbf16>
    %c0_1 = arith.constant 0 : index
    %c0_2 = arith.constant 0 : index
    %1 = vector.load %arg2[%c0_1, %c0_2] : memref<4608x128xbf16, #tpu.memory_space<vmem>>, vector<4608x128xbf16>
    %cst = arith.constant dense<0.000000e+00> : vector<12x128xf32>
    %2 = tpu.matmul %0, %1, %cst {dimension_numbers = #tpu.dot_dimension_numbers<[1], [0], [0], [1], [0, 0, 1, 1], [], []>} : vector<12x4608xbf16>, vector<4608x128xbf16>, vector<12x128xf32> -> vector<12x128xf32>
    %c0_3 = arith.constant 0 : index
    %c0_4 = arith.constant 0 : index
    %3 = vector.load %arg3[%c0_3, %c0_4] : memref<1x128xf32, #tpu.memory_space<vmem>>, vector<1x128xf32>
    %4 = vector.broadcast %3 : vector<1x128xf32> to vector<12x128xf32>
    %5 = arith.addf %2, %4 : vector<12x128xf32>
    %cst_5 = arith.constant 0.000000e+00 : f32
    %6 = vector.broadcast %cst_5 : f32 to vector<12x128xf32>
    %7 = arith.maximumf %5, %6 : vector<12x128xf32>
    %8 = arith.truncf %7 : vector<12x128xf32> to vector<12x128xbf16>
    %c0_6 = arith.constant 0 : index
    %c0_7 = arith.constant 0 : index
    %9 = vector.load %arg4[%c0_6, %c0_7] : memref<12x128xbf16, #tpu.memory_space<vmem>>, vector<12x128xbf16>
    tpu.vector_store %arg4[%c0_6, %c0_7], %8 {strides = array<i32>} : memref<12x128xbf16, #tpu.memory_space<vmem>>, vector<12x128xbf16>,
    return
  }
  func.func @transform_0(%arg0: i32) -> (i32, i32) {
    %c0_i32 = arith.constant 0 : i32
    %c0_i32_0 = arith.constant 0 : i32
    return %arg0, %c0_i32 : i32, i32
  }
  func.func @transform_1(%arg0: i32) -> (i32, i32) {
    %c0_i32 = arith.constant 0 : i32
    %c0_i32_0 = arith.constant 0 : i32
    %c0_i32_1 = arith.constant 0 : i32
    return %c0_i32, %c0_i32_0 : i32, i32
  }
  func.func @transform_2(%arg0: i32) -> (i32, i32) {
    %c0_i32 = arith.constant 0 : i32
    %c0_i32_0 = arith.constant 0 : i32
    %c0_i32_1 = arith.constant 0 : i32
    return %c0_i32, %c0_i32_0 : i32, i32
  }
  func.func @transform_3(%arg0: i32) -> (i32, i32) {
    %c0_i32 = arith.constant 0 : i32
    %c0_i32_0 = arith.constant 0 : i32
    return %arg0, %c0_i32 : i32, i32
  }
}

module attributes {stable_mosaic.version = 11 : i64} {
  func.func @_mm_kernel(%arg0: i32, %arg1: memref<24x3xbf16, #tpu.memory_space<vmem>>, %arg2: memref<3x4xbf16, #tpu.memory_space<vmem>>, %arg3: memref<24x4xbf16, #tpu.memory_space<vmem>>) attributes {dimension_semantics = [#tpu.dimension_semantics<parallel>], iteration_bounds = array<i64: 1>, scalar_prefetch = 0 : i64, scratch_operands = 0 : i64, tpu.core_type = #tpu.core_type<tc>, window_params = [{transform_indices = @transform_0, window_bounds = array<i64: 24, 3>}, {pipeline_mode = #tpu.pipeline_mode<synchronous>, transform_indices = @transform_1, window_bounds = array<i64: 3, 4>}, {transform_indices = @transform_2, window_bounds = array<i64: 24, 4>}]} {
    %c0 = arith.constant 0 : index
    %c0_0 = arith.constant 0 : index
    %0 = vector.load %arg1[%c0, %c0_0] : memref<24x3xbf16, #tpu.memory_space<vmem>>, vector<24x3xbf16>
    %c0_1 = arith.constant 0 : index
    %c0_2 = arith.constant 0 : index
    %1 = vector.load %arg2[%c0_1, %c0_2] : memref<3x4xbf16, #tpu.memory_space<vmem>>, vector<3x4xbf16>
    %cst = arith.constant dense<0.000000e+00> : vector<24x4xf32>
    %2 = tpu.matmul %0, %1, %cst {dimension_numbers = #tpu.dot_dimension_numbers<[1], [0], [0], [1], [0, 0, 1, 1], [], []>} : vector<24x3xbf16>, vector<3x4xbf16>, vector<24x4xf32> -> vector<24x4xf32>
    %3 = arith.truncf %2 : vector<24x4xf32> to vector<24x4xbf16>
    %c0_3 = arith.constant 0 : index
    %c0_4 = arith.constant 0 : index
    %4 = vector.load %arg3[%c0_3, %c0_4] : memref<24x4xbf16, #tpu.memory_space<vmem>>, vector<24x4xbf16>
    tpu.vector_store %arg3[%c0_3, %c0_4], %3 {strides = array<i32>} : memref<24x4xbf16, #tpu.memory_space<vmem>>, vector<24x4xbf16>,
    return
  }
  func.func @transform_0(%arg0: i32) -> (i32, i32) {
    %c0_i32 = arith.constant 0 : i32
    %c0_i32_0 = arith.constant 0 : i32
    return %arg0, %c0_i32 : i32, i32
  }
  func.func @transform_1(%arg0: i32) -> (i32, i32) {
    %c0_i32 = arith.constant 0 : i32
    %c0_i32_0 = arith.constant 0 : i32
    %c0_i32_1 = arith.constant 0 : i32
    return %c0_i32, %c0_i32_0 : i32, i32
  }
  func.func @transform_2(%arg0: i32) -> (i32, i32) {
    %c0_i32 = arith.constant 0 : i32
    %c0_i32_0 = arith.constant 0 : i32
    return %arg0, %c0_i32 : i32, i32
  }
}

module attributes {stable_mosaic.version = 11 : i64} {
  func.func @_mm_kernel(%arg0: i32, %arg1: memref<24x4xbf16, #tpu.memory_space<vmem>>, %arg2: memref<4x32xbf16, #tpu.memory_space<vmem>>, %arg3: memref<24x32xi32, #tpu.memory_space<vmem>>) attributes {dimension_semantics = [#tpu.dimension_semantics<parallel>], iteration_bounds = array<i64: 1>, scalar_prefetch = 0 : i64, scratch_operands = 0 : i64, tpu.core_type = #tpu.core_type<tc>, window_params = [{transform_indices = @transform_0, window_bounds = array<i64: 24, 4>}, {pipeline_mode = #tpu.pipeline_mode<synchronous>, transform_indices = @transform_1, window_bounds = array<i64: 4, 32>}, {transform_indices = @transform_2, window_bounds = array<i64: 24, 32>}]} {
    %c0 = arith.constant 0 : index
    %c0_0 = arith.constant 0 : index
    %0 = vector.load %arg1[%c0, %c0_0] : memref<24x4xbf16, #tpu.memory_space<vmem>>, vector<24x4xbf16>
    %c0_1 = arith.constant 0 : index
    %c0_2 = arith.constant 0 : index
    %1 = vector.load %arg2[%c0_1, %c0_2] : memref<4x32xbf16, #tpu.memory_space<vmem>>, vector<4x32xbf16>
    %cst = arith.constant dense<0.000000e+00> : vector<24x32xf32>
    %2 = tpu.matmul %0, %1, %cst {dimension_numbers = #tpu.dot_dimension_numbers<[1], [0], [0], [1], [0, 0, 1, 1], [], []>} : vector<24x4xbf16>, vector<4x32xbf16>, vector<24x32xf32> -> vector<24x32xf32>
    %cst_3 = arith.constant 0.000000e+00 : f32
    %3 = vector.broadcast %cst_3 : f32 to vector<24x32xf32>
    %4 = arith.cmpf ogt, %2, %3 : vector<24x32xf32>
    %c1_i32 = arith.constant 1 : i32
    %c0_i32 = arith.constant 0 : i32
    %5 = vector.broadcast %c1_i32 : i32 to vector<24x32xi32>
    %6 = vector.broadcast %c0_i32 : i32 to vector<24x32xi32>
    %7 = arith.select %4, %5, %6 : vector<24x32xi1>, vector<24x32xi32>
    %c0_4 = arith.constant 0 : index
    %c0_5 = arith.constant 0 : index
    %8 = vector.load %arg3[%c0_4, %c0_5] : memref<24x32xi32, #tpu.memory_space<vmem>>, vector<24x32xi32>
    tpu.vector_store %arg3[%c0_4, %c0_5], %7 {strides = array<i32>} : memref<24x32xi32, #tpu.memory_space<vmem>>, vector<24x32xi32>,
    return
  }
  func.func @transform_0(%arg0: i32) -> (i32, i32) {
    %c0_i32 = arith.constant 0 : i32
    %c0_i32_0 = arith.constant 0 : i32
    return %arg0, %c0_i32 : i32, i32
  }
  func.func @transform_1(%arg0: i32) -> (i32, i32) {
    %c0_i32 = arith.constant 0 : i32
    %c0_i32_0 = arith.constant 0 : i32
    %c0_i32_1 = arith.constant 0 : i32
    return %c0_i32, %c0_i32_0 : i32, i32
  }
  func.func @transform_2(%arg0: i32) -> (i32, i32) {
    %c0_i32 = arith.constant 0 : i32
    %c0_i32_0 = arith.constant 0 : i32
    return %arg0, %c0_i32 : i32, i32
  }
}

</mosaic_0001>

<bundles_post_ra>
// kernel: _lambda_.35
= control target key start
LH: loop header
LB: loop body
LE: loop exit
PB: predicated region body
PF: predicated region fallthrough
CT: control target
= control target key end

     0   :  { %7 = vsyncpa [#allocation3], 0  ;;  %s221_s9 = smov [#allocation2]   ;;  %s270_s0 = inlined_call_operand.hbm [shape: bf16[24,48], index: 0, kind: input, shape index: {}]   ;;  %s271_s1 = inlined_call_operand.vmem [shape: bf16[48,192], index: 1, kind: input, shape index: {}]   ;;  %s272_s2 = inlined_call_operand.vmem [shape: bf16[24,192], index: 2, kind: output, shape index: {}]  }
   0x1   :  { %s13_s10 = sshll.u32 %s221_s9, 4  ;;  %s14_s10 = int_to_ptr.vmem [resolvable:$true] %s13_s10 }
   0x2   :  { %s207_s11 = scalar_lea.vmem %s14_s10, 192  ;;  %p212_p1 = scmp.lt.s32.totalorder %s14_s10, %s14_s10 }
   0x3   :  { %p208_p0 = scmp.ne.s32.totalorder %s14_s10, %s207_s11  ;;  %p213_p2 = scmp.lt.s32.totalorder %s207_s11, %s207_s11 }
   0x5   :  { %p214_p3 = por %p213_p2, %p212_p1 }
   0x7   :  { %p215_p4 = pnand %p214_p3, %p208_p0 }
   0x9   :  { %218 = shalt.err (!%p215_p4)
}
   0xa   :  { %s222_s12 = smov 64   ;;  %s223_s13 = smov 4  }
   0xb   :  { %19 = dma.hbm_to_vmem [thread:$0]  %s270_s0, 192, %s14_s10, [#allocation3], %s222_s12, %s222_s12, %s223_s13  }
   0xc   :  { %219 = dma.done.wait [#allocation3], 192  }
   0xd   :  { %220 = vsyncadd [#allocation3], 4294967104  ;;  %v224_v0 = vmov 0   ;;  %v188_v1 = vld [vmem:[%s271_s1 + $0x24] ss:$8 sps:$4 sm:$0xff]   ;;  %vm73_vm0 = vcmask 392192  }
   0xe   :  { %112 = vmatprep.mubr.bf16.mxu0 %v224_v0  ;;  %122 = vmatprep.mubr.bf16.mxu1 %v224_v0  ;;  %v190_v2 = vld [vmem:[%s271_s1 + $0x20] ss:$8 sps:$4 sm:$0xff]   ;;  %v191_v3 = vld [vmem:[%s271_s1 + $0x14] ss:$8 sps:$4 sm:$0xff]   ;;  %v193_v4 = vld [vmem:[%s271_s1 + $0x10] ss:$8 sps:$4 sm:$0xff]  }
   0xf   :  { %90 = vmatprep.subr.bf16.mxu0 %v188_v1  ;;  %178 = vmatprep.subr.bf16.mxu1 %v188_v1  ;;  %v194_v5 = vld [vmem:[%s271_s1 + $0x4] ss:$8 sps:$4 sm:$0xff]   ;;  %v196_v6 = vld [vmem:[%s271_s1] ss:$8 sps:$4 sm:$0xff]   ;;  %vm151_vm1 = vcmask 1043456   ;;  %vm152_vm2 = vcmask 523268  }
  0x10   :  { %91 = vmatpush1.bf16.msra.mxu0 %v190_v2  ;;  %181 = vmatpush1.bf16.msra.mxu1 %v190_v2  ;;  %v197_v7 = vld [vmem:[#allocation2] sm:$0xff]   ;;  %v198_v8 = vld [vmem:[#allocation2 + $0x8] ss:$0 sps:$4 sm:$0xff]   ;;  %vm153_vm3 = vmor %vm152_vm2, %vm151_vm1 }
  0x11   :  { %92 = vmatprep.subr.bf16.mxu0 %v191_v3  ;;  %179 = vmatprep.subr.bf16.mxu1 %v191_v3 }
  0x14   :  { %93 = vmatpush1.bf16.msra.mxu0 %v193_v4  ;;  %182 = vmatpush1.bf16.msra.mxu1 %v193_v4 }
  0x15   :  { %94 = vmatprep.subr.bf16.mxu0 %v194_v5  ;;  %180 = vmatprep.subr.bf16.mxu1 %v194_v5 }
  0x18   :  { %95 = vmatpush1.bf16.msra.mxu0 %v196_v6  ;;  %183 = vmatpush1.bf16.msra.mxu1 %v196_v6 }
  0x1b   :  { %170 = vmatmul.mubr.msk.bf16.vlgmr.msra.gmra.mxu0 %vm73_vm0, %v197_v7  ;;  %171 = vmatmul.mubr.msk.bf16.vlgmr.msra.gmra.mxu1 %vm73_vm0, %v198_v8 }
  0xdb   :  { %v114_v9 = vpop.f32.mrf.mxu0  ;;  %v124_v10 = vpop.f32.mrf.mxu1 }
  0xdd   :  { %v116_v11 = vpop.f32.mrf.mxu0  ;;  %v126_v12 = vpop.f32.mrf.mxu1 }
  0xde   :  { %v175_v13 = vpack.c.bf16 %v116_v11, %v114_v9  ;;  %v177_v14 = vpack.c.bf16 %v126_v12, %v124_v10 }
  0xdf   :  { %v118_v15 = vpop.f32.mrf.mxu0  ;;  %v128_v16 = vpop.f32.mrf.mxu1 }
  0xe0   :  { %154 = vst.msk [vmem:[%s272_s2] sm:$0xff] %vm153_vm3, %v175_v13  ;;  %156 = vst.msk [vmem:[%s272_s2 + $0x10] sm:$0xff] %vm153_vm3, %v177_v14 }
  0xe1   :  { %v120_v17 = vpop.f32.mrf.mxu0  ;;  %v129_v18 = vpop.f32.mrf.mxu1 }
  0xe2   :  { %v176_v19 = vpack.c.bf16 %v120_v17, %v118_v15 }
  0xe4   :  { %155 = vst.msk [vmem:[%s272_s2 + $0x8] sm:$0xff] %vm153_vm3, %v176_v19 }
  0xe5   :  { %161 = vsyncpa [#allocation3], 1 }

// kernel: _lambda_.36
= control target key start
LH: loop header
LB: loop body
LE: loop exit
PB: predicated region body
PF: predicated region fallthrough
CT: control target
= control target key end

     0   :  { %8 = vsyncpa [#allocation3], 0  ;;  %s428_s0 = inlined_call_operand.vmem [shape: bf16[24,192], index: 0, kind: input, shape index: {}]   ;;  %s429_s1 = inlined_call_operand.hbm [shape: bf16[192,96], index: 1, kind: input, shape index: {}]   ;;  %s430_s2 = inlined_call_operand.hbm [shape: f32[1,96], index: 2, kind: input, shape index: {}]   ;;  %s431_s3 = inlined_call_operand.vmem [shape: bf16[24,96], index: 3, kind: output, shape index: {}]  }
   0x1   :  { %9 = vsyncpa [#allocation5], 0  ;;  %s355_s12 = smov [#allocation2]  }
   0x2   :  { %s17_s13 = sshll.u32 %s355_s12, 4  ;;  %s18_s13 = int_to_ptr.vmem [resolvable:$true] %s17_s13 }
   0x3   :  { %s319_s14 = scalar_lea.vmem %s18_s13, 1536  ;;  %p324_p1 = scmp.lt.s32.totalorder %s18_s13, %s18_s13 }
   0x4   :  { %p320_p0 = scmp.ne.s32.totalorder %s18_s13, %s319_s14  ;;  %p325_p2 = scmp.lt.s32.totalorder %s319_s14, %s319_s14 }
   0x6   :  { %p326_p3 = por %p325_p2, %p324_p1 }
   0x8   :  { %p327_p4 = pnand %p326_p3, %p320_p0 }
   0xa   :  { %330 = shalt.err (!%p327_p4)
}
   0xb   :  { %s356_s15 = smov 64   ;;  %s357_s16 = smov 4  }
   0xc   :  { %23 = dma.hbm_to_vmem [thread:$0]  %s429_s1, 1536, %s18_s13, [#allocation3], %s356_s15, %s356_s15, %s357_s16  }
   0xd   :  { %s358_s19 = smov [#allocation4]  }
   0xe   :  { %s30_s20 = sshll.u32 %s358_s19, 4  ;;  %s31_s20 = int_to_ptr.vmem [resolvable:$true] %s30_s20 }
   0xf   :  { %s339_s21 = scalar_lea.vmem %s31_s20, 16  ;;  %s343_s22 = scalar_lea.vmem %s31_s20, 32 }
  0x10   :  { %p340_p5 = scmp.ne.s32.totalorder %s31_s20, %s339_s21  ;;  %p344_p6 = scmp.lt.s32.totalorder %s31_s20, %s31_s20 }
  0x11   :  { %p345_p7 = scmp.lt.s32.totalorder %s343_s22, %s339_s21 }
  0x13   :  { %p346_p8 = por %p345_p7, %p344_p6 }
  0x15   :  { %p347_p9 = pnand %p346_p8, %p340_p5 }
  0x17   :  { %350 = shalt.err (!%p347_p9)
}
  0x18   :  { %33 = dma.hbm_to_vmem [thread:$0]  %s430_s2, 16, %s31_s20, [#allocation5]  }
  0x19   :  { %351 = dma.done.wait [#allocation3], 1536  }
  0x1a   :  { %352 = vsyncadd [#allocation3], 4294965760 }
  0x1b   :  { %353 = dma.done.wait [#allocation5], 16  }
  0x1c   :  { %354 = vsyncadd [#allocation5], 4294967280  ;;  %v359_v0 = vmov 0   ;;  %v294_v1 = vld [vmem:[#allocation2 + $0x38] sm:$0xff]   ;;  %v295_v2 = vld [vmem:[#allocation2 + $0x30] sm:$0xff]   ;;  %vm162_vm0 = vcmask 523264  }
  0x1d   :  { %169 = vmatprep.subr.bf16.mxu0 %v359_v0  ;;  %265 = vmatprep.subr.bf16.mxu1 %v359_v0  ;;  %v296_v3 = vld [vmem:[#allocation2 + $0x28] sm:$0xff]   ;;  %v297_v4 = vld [vmem:[#allocation2 + $0x20] sm:$0xff]   ;;  %v43_v6 = vld [vmem:[%s428_s0 + $0x10] sm:$0xff]  ;;  %vm230_vm1 = vcmask 781312  }
  0x1e   :  { %170 = vmatpush1.bf16.msra.mxu0 %v294_v1  ;;  %277 = vmatpush1.bf16.msra.mxu1 %v294_v1  ;;  %v308_v5 = vld [vmem:[%s428_s0 + $0x4] ss:$8 sps:$4 sm:$0xff]   ;;  %v298_v7 = vld [vmem:[#allocation2 + $0x18] sm:$0xff]   ;;  %v244_v8 = vcombine.high %v43_v6, %v43_v6  ;;  %v299_v9 = vld [vmem:[#allocation2 + $0x10] sm:$0xff]   ;;  %v243_v17 = vcombine.low %v43_v6, %v43_v6 }
  0x1f   :  { %171 = vmatprep.subr.bf16.mxu0 %v359_v0  ;;  %266 = vmatprep.subr.bf16.mxu1 %v359_v0  ;;  %v300_v10 = vld [vmem:[#allocation2 + $0x8] sm:$0xff]   ;;  %v301_v11 = vld [vmem:[#allocation2] sm:$0xff]   ;;  %v302_v12 = vld [vmem:[#allocation2 + $0x58] sm:$0xff]  }
  0x20   :  { %257 = vmatprep.mubr.msk.bf16.mxu0 %vm162_vm0, %v308_v5  ;;  %258 = vmatprep.mubr.msk.bf16.mxu1 %vm162_vm0, %v244_v8  ;;  %v303_v13 = vld [vmem:[#allocation2 + $0x50] sm:$0xff]   ;;  %v304_v14 = vld [vmem:[#allocation2 + $0x48] sm:$0xff]   ;;  %v305_v15 = vld [vmem:[#allocation2 + $0x40] sm:$0xff]  }
  0x21   :  { %v306_v16 = vld [vmem:[%s428_s0] ss:$8 sps:$4 sm:$0xff]  }
  0x22   :  { %172 = vmatpush1.bf16.msra.mxu0 %v295_v2  ;;  %278 = vmatpush1.bf16.msra.mxu1 %v295_v2  ;;  %v240_v18 = vld [vmem:[#allocation4] ss:$0 sm:$0xff] }
  0x23   :  { %173 = vmatprep.subr.bf16.mxu0 %v359_v0  ;;  %267 = vmatprep.subr.bf16.mxu1 %v359_v0 }
  0x26   :  { %174 = vmatpush1.bf16.msra.mxu0 %v296_v3  ;;  %279 = vmatpush1.bf16.msra.mxu1 %v296_v3 }
  0x27   :  { %175 = vmatprep.subr.bf16.mxu0 %v359_v0  ;;  %268 = vmatprep.subr.bf16.mxu1 %v359_v0 }
  0x2a   :  { %176 = vmatpush1.bf16.msra.mxu0 %v297_v4  ;;  %280 = vmatpush1.bf16.msra.mxu1 %v297_v4 }
  0x2b   :  { %177 = vmatprep.subr.bf16.mxu0 %v359_v0  ;;  %269 = vmatprep.subr.bf16.mxu1 %v359_v0 }
  0x2e   :  { %178 = vmatpush1.bf16.msra.mxu0 %v298_v7  ;;  %281 = vmatpush1.bf16.msra.mxu1 %v298_v7 }
  0x2f   :  { %179 = vmatprep.subr.bf16.mxu0 %v359_v0  ;;  %270 = vmatprep.subr.bf16.mxu1 %v359_v0 }
  0x32   :  { %180 = vmatpush1.bf16.msra.mxu0 %v299_v9  ;;  %282 = vmatpush1.bf16.msra.mxu1 %v299_v9 }
  0x33   :  { %181 = vmatprep.subr.bf16.mxu0 %v359_v0  ;;  %271 = vmatprep.subr.bf16.mxu1 %v359_v0 }
  0x36   :  { %182 = vmatpush1.bf16.msra.mxu0 %v300_v10  ;;  %283 = vmatpush1.bf16.msra.mxu1 %v300_v10 }
  0x37   :  { %183 = vmatprep.subr.bf16.mxu0 %v359_v0  ;;  %272 = vmatprep.subr.bf16.mxu1 %v359_v0 }
  0x3a   :  { %184 = vmatpush1.bf16.msra.mxu0 %v301_v11  ;;  %284 = vmatpush1.bf16.msra.mxu1 %v301_v11 }
  0x3b   :  { %193 = vmatprep.subr.bf16.mxu0 %v359_v0  ;;  %273 = vmatprep.subr.bf16.mxu1 %v359_v0 }
  0x3e   :  { %194 = vmatpush2.bf16.msra.mxu0 %v302_v12  ;;  %285 = vmatpush2.bf16.msra.mxu1 %v302_v12 }
  0x3f   :  { %195 = vmatprep.subr.bf16.mxu0 %v359_v0  ;;  %274 = vmatprep.subr.bf16.mxu1 %v359_v0 }
  0x42   :  { %196 = vmatpush2.bf16.msra.mxu0 %v303_v13  ;;  %286 = vmatpush2.bf16.msra.mxu1 %v303_v13 }
  0x43   :  { %197 = vmatprep.subr.bf16.mxu0 %v359_v0  ;;  %275 = vmatprep.subr.bf16.mxu1 %v359_v0 }
  0x46   :  { %198 = vmatpush2.bf16.msra.mxu0 %v304_v14  ;;  %287 = vmatpush2.bf16.msra.mxu1 %v304_v14 }
  0x47   :  { %199 = vmatprep.subr.bf16.mxu0 %v359_v0  ;;  %276 = vmatprep.subr.bf16.mxu1 %v359_v0 }
  0x4a   :  { %200 = vmatpush2.bf16.msra.mxu0 %v305_v15  ;;  %288 = vmatpush2.bf16.msra.mxu1 %v305_v15 }
  0x4d   :  { %202 = vmatmul.mubr.bf16.vlgmr.msra.gmra.mxu0 %v306_v16  ;;  %210 = vmatmul.mubr.bf16.vlgmr.msra.gmra.mxu1 %v243_v17 }
 0x10d   :  { %v203_v19 = vpop.f32.mrf.mxu0  ;;  %v211_v20 = vpop.f32.mrf.mxu1 }
 0x10e   :  { %v204_v21 = vadd.f32 %v240_v18, %v203_v19  ;;  %v212_v22 = vadd.f32 %v240_v18, %v211_v20 }
 0x10f   :  { %v205_v23 = vpop.f32.mrf.mxu0  ;;  %v213_v24 = vpop.f32.mrf.mxu1 }
 0x110   :  { %v262_v25 = vpack.c.bf16 %v204_v21, %v204_v21  ;;  %v264_v26 = vpack.c.bf16 %v212_v22, %v212_v22 }
 0x111   :  { %v206_v27 = vpop.f32.mrf.mxu0  ;;  %v214_v28 = vpop.f32.mrf.mxu1 }
 0x112   :  { %231 = vst.msk [vmem:[%s431_s3] sm:$0xf] %vm230_vm1, %v262_v25  ;;  %233 = vst.msk [vmem:[%s431_s3 + $0x8] sm:$0xf] %vm230_vm1, %v264_v26  ;;  %v207_v29 = vadd.f32 %v240_v18, %v206_v27 }
 0x113   :  { %v208_v30 = vpop.f32.mrf.mxu0  ;;  %v215_v31 = vpop.f32.mrf.mxu1 }
 0x114   :  { %v263_v32 = vpack.c.bf16 %v207_v29, %v207_v29 }
 0x116   :  { %232 = vst.msk [vmem:[%s431_s3 + $0x4] sm:$0xf] %vm230_vm1, %v263_v32 }
 0x117   :  { %238 = vsyncpa [#allocation3], 1 }
 0x118   :  { %239 = vsyncpa [#allocation5], 1 }

// kernel: _lambda_.37
= control target key start
LH: loop header
LB: loop body
LE: loop exit
PB: predicated region body
PF: predicated region fallthrough
CT: control target
= control target key end

     0   :  { %s715_s12 = smov 0   ;;  %s829_s0 = inlined_call_operand.vmem [shape: bf16[192,147], index: 0, kind: input, shape index: {}]   ;;  %s830_s1 = inlined_call_operand.vmem [shape: bf16[147,16], index: 1, kind: input, shape index: {}]   ;;  %s831_s2 = inlined_call_operand.vmem [shape: f32[1,16], index: 2, kind: input, shape index: {}]   ;;  %s832_s3 = inlined_call_operand.vmem [shape: bf16[192,16], index: 3, kind: output, shape index: {}]  }
   0x1 LB: > { %s563_s13 = sadd.s32 4294967295, %s691_s12   ;;  %p567_p0 = scmp.ge.s32.totalorder %s691_s12, 1  ;;  %s691_s12 = sphi %s715_s12, %s13_s12  }
   0x2   : > { %p139_p1 = scmp.lt.s32.totalorder %s691_s12, 3 }
   0x4   : > { %p140_p2 = pnand %p567_p0, %p139_p1 }
   0x5   : > { %s164_s20 = smul.u32 (!%p140_p2), 12, %s563_s13 }
   0x6   : > { %143 = sbr.rel (%p140_p2) target bundleno = 272 (0x110), region = 32 }
   0x7   : > { %p165_p3 = scmp.lt.s32.totalorder (!%p140_p2), %s164_s20, 23 }
   0xb   : > { %v657_v0 = vld [vmem:[%s830_s1 + $0x38] sm:$0xff]   ;;  %v693_v1 = vmov 0   ;;  %v658_v2 = vld [vmem:[%s830_s1 + $0x30] sm:$0xff]   ;;  %v659_v3 = vld [vmem:[%s830_s1 + $0x28] sm:$0xff]   ;;  %s834_s20 = smov (!%p165_p3, %s164_s20), 23  ;;  %vm327_vm0 = vcmask 154624  }
   0xc   : > { %353 = vmatprep.subr.bf16.mxu0 %v693_v1  ;;  %627 = vmatprep.subr.bf16.mxu1 %v693_v1  ;;  %v660_v4 = vld [vmem:[%s830_s1 + $0x20] sm:$0xff]   ;;  %s614_s23 = sshll.u32 %s834_s20, 3  ;;  %v661_v5 = vld [vmem:[%s830_s1 + $0x18] sm:$0xff]   ;;  %v662_v8 = vld [vmem:[%s830_s1 + $0x10] sm:$0xff]   ;;  %vm346_vm1 = vcmask 1040384   ;;  %vm347_vm2 = vcmask 1041408  }
   0xd   : > { %354 = vmatpush1.bf16.msra.mxu0 %v657_v0  ;;  %637 = vmatpush1.bf16.msra.mxu1 %v657_v0  ;;  %s744_s28 = scalar_lea.vmem %s829_s0, %s614_s23  ;;  %v663_v9 = vld [vmem:[%s830_s1 + $0x8] sm:$0xff]   ;;  %v694_v10 = vmov 65535   ;;  %v664_v12 = vld [vmem:[%s830_s1] sm:$0xff]   ;;  %s570_s15 = sshll.u32 %s834_s20, 2  ;;  %vm494_vm3 = vcmask 125952  }
   0xe   : > { %355 = vmatprep.subr.bf16.mxu0 %v693_v1  ;;  %628 = vmatprep.subr.bf16.mxu1 %v693_v1  ;;  %v669_v6 = vld [vmem:[%s744_s28 + $0x4] ss:$8 sps:$4 sm:$0xff]   ;;  %v672_v7 = vld [vmem:[%s744_s28 + $0x34] ss:$8 sps:$4 sm:$0xff]   ;;  %v348_v11 = vsel %vm346_vm1, 4294967295, %v694_v10  ;;  %s790_s18 = scalar_lea.vmem %s832_s3, %s570_s15 }
   0xf   : > { %594 = vmatprep.mubr.msk.bf16.mxu0 %vm327_vm0, %v669_v6  ;;  %597 = vmatprep.mubr.msk.bf16.mxu1 %vm327_vm0, %v672_v7  ;;  %v665_v13 = vld [vmem:[%s830_s1 + $0x48] ss:$0 sps:$4 sm:$0x33]   ;;  %v349_v14 = vsel %vm347_vm2, %v348_v11, 0  ;;  %v666_v16 = vld [vmem:[%s830_s1 + $0x40] sm:$0xff]  }
  0x10   : > { %v351_v15 = vand.u32 %v665_v13, %v349_v14  ;;  %v667_v17 = vld [vmem:[%s744_s28] ss:$8 sps:$4 sm:$0xff]   ;;  %v670_v18 = vld [vmem:[%s744_s28 + $0x30] ss:$8 sps:$4 sm:$0xff]   ;;  %v673_v19 = vld [vmem:[%s744_s28 + $0x14] ss:$8 sps:$4 sm:$0xff]  }
  0x11   : > { %356 = vmatpush1.bf16.msra.mxu0 %v658_v2  ;;  %638 = vmatpush1.bf16.msra.mxu1 %v658_v2  ;;  %v675_v20 = vld [vmem:[%s744_s28 + $0x44] ss:$8 sps:$4 sm:$0xff]   ;;  %v677_v21 = vld [vmem:[%s744_s28 + $0x10] ss:$8 sps:$4 sm:$0xff]   ;;  %v678_v22 = vld [vmem:[%s744_s28 + $0x40] ss:$8 sps:$4 sm:$0xff]  }
  0x12   : > { %357 = vmatprep.subr.bf16.mxu0 %v693_v1  ;;  %629 = vmatprep.subr.bf16.mxu1 %v693_v1  ;;  %v679_v23 = vld [vmem:[%s744_s28 + $0x24] ss:$8 sps:$4 sm:$0xff]   ;;  %v681_v24 = vld [vmem:[%s744_s28 + $0x54] ss:$8 sps:$4 sm:$0xff]   ;;  %v683_v25 = vld [vmem:[%s744_s28 + $0x20] ss:$8 sps:$4 sm:$0xff]  }
  0x13   : > { %v684_v26 = vld [vmem:[%s744_s28 + $0x50] ss:$8 sps:$4 sm:$0xff]   ;;  %v782_v27 = vld [vmem:[%s831_s2] ss:$0 sm:$0xff] }
  0x15   : > { %358 = vmatpush1.bf16.msra.mxu0 %v659_v3  ;;  %639 = vmatpush1.bf16.msra.mxu1 %v659_v3 }
  0x16   : > { %359 = vmatprep.subr.bf16.mxu0 %v693_v1  ;;  %630 = vmatprep.subr.bf16.mxu1 %v693_v1 }
  0x19   : > { %360 = vmatpush1.bf16.msra.mxu0 %v660_v4  ;;  %640 = vmatpush1.bf16.msra.mxu1 %v660_v4 }
  0x1a   : > { %361 = vmatprep.subr.bf16.mxu0 %v693_v1  ;;  %631 = vmatprep.subr.bf16.mxu1 %v693_v1 }
  0x1d   : > { %362 = vmatpush1.bf16.msra.mxu0 %v661_v5  ;;  %641 = vmatpush1.bf16.msra.mxu1 %v661_v5 }
  0x1e   : > { %363 = vmatprep.subr.bf16.mxu0 %v693_v1  ;;  %632 = vmatprep.subr.bf16.mxu1 %v693_v1 }
  0x21   : > { %364 = vmatpush1.bf16.msra.mxu0 %v662_v8  ;;  %642 = vmatpush1.bf16.msra.mxu1 %v662_v8 }
  0x22   : > { %365 = vmatprep.subr.bf16.mxu0 %v693_v1  ;;  %633 = vmatprep.subr.bf16.mxu1 %v693_v1 }
  0x25   : > { %366 = vmatpush1.bf16.msra.mxu0 %v663_v9  ;;  %643 = vmatpush1.bf16.msra.mxu1 %v663_v9 }
  0x26   : > { %367 = vmatprep.subr.bf16.mxu0 %v693_v1  ;;  %634 = vmatprep.subr.bf16.mxu1 %v693_v1 }
  0x29   : > { %368 = vmatpush1.bf16.msra.mxu0 %v664_v12  ;;  %644 = vmatpush1.bf16.msra.mxu1 %v664_v12 }
  0x2a   : > { %381 = vmatprep.subr.bf16.mxu0 %v693_v1  ;;  %635 = vmatprep.subr.bf16.mxu1 %v693_v1 }
  0x2d   : > { %382 = vmatpush2.bf16.msra.mxu0 %v351_v15  ;;  %645 = vmatpush2.bf16.msra.mxu1 %v351_v15 }
  0x2e   : > { %383 = vmatprep.subr.bf16.mxu0 %v693_v1  ;;  %636 = vmatprep.subr.bf16.mxu1 %v693_v1 }
  0x31   : > { %384 = vmatpush2.bf16.msra.mxu0 %v666_v16  ;;  %646 = vmatpush2.bf16.msra.mxu1 %v666_v16 }
  0x34   : > { %386 = vmatmul.mubr.bf16.vlgmr.msra.gmra.mxu0 %v667_v17  ;;  %410 = vmatmul.mubr.bf16.vlgmr.msra.gmra.mxu1 %v670_v18 }
  0x35   : > { %595 = vmatprep.mubr.msk.bf16.mxu0 %vm327_vm0, %v673_v19  ;;  %598 = vmatprep.mubr.msk.bf16.mxu1 %vm327_vm0, %v675_v20 }
  0x3c   : > { %394 = vmatmul.mubr.bf16.gmra.mxu0 %v677_v21  ;;  %418 = vmatmul.mubr.bf16.gmra.mxu1 %v678_v22 }
  0x3d   : > { %596 = vmatprep.mubr.msk.bf16.mxu0 %vm327_vm0, %v679_v23  ;;  %599 = vmatprep.mubr.msk.bf16.mxu1 %vm327_vm0, %v681_v24 }
  0x44   : > { %402 = vmatmul.mubr.bf16.gmra.mxu0 %v683_v25  ;;  %426 = vmatmul.mubr.bf16.gmra.mxu1 %v684_v26 }
  0xf4   : > { %v387_v28 = vpop.f32.mrf.mxu0  ;;  %v411_v29 = vpop.f32.mrf.mxu1 }
  0xf5   : > { %v388_v30 = vadd.f32 %v782_v27, %v387_v28  ;;  %v412_v31 = vadd.f32 %v782_v27, %v411_v29 }
  0xf6   : > { %v389_v32 = vpop.f32.mrf.mxu0  ;;  %v413_v33 = vpop.f32.mrf.mxu1 }
  0xf7   : > { %v434_v34 = vmax.f32 %v388_v30, 0.0  ;;  %v440_v35 = vmax.f32 %v412_v31, 0.0 }
  0xf8   : > { %v390_v36 = vpop.f32.mrf.mxu0  ;;  %v414_v37 = vpop.f32.mrf.mxu1 }
  0xf9   : > { %v615_v38 = vpack.c.bf16 %v434_v34, %v434_v34  ;;  %v621_v39 = vpack.c.bf16 %v440_v35, %v440_v35  ;;  %v391_v40 = vadd.f32 %v782_v27, %v390_v36  ;;  %v415_v41 = vadd.f32 %v782_v27, %v414_v37 }
  0xfa   : > { %v392_v42 = vpop.f32.mrf.mxu0  ;;  %v416_v43 = vpop.f32.mrf.mxu1 }
  0xfb   : > { %495 = vst.msk [vmem:[%s790_s18] sm:$0xf] %vm494_vm3, %v615_v38  ;;  %501 = vst.msk [vmem:[%s790_s18 + $0x18] sm:$0xf] %vm494_vm3, %v621_v39  ;;  %v435_v44 = vmax.f32 %v391_v40, 0.0  ;;  %v441_v45 = vmax.f32 %v415_v41, 0.0 }
  0xfc   : > { %v395_v46 = vpop.f32.mrf.mxu0  ;;  %v419_v47 = vpop.f32.mrf.mxu1 }
  0xfd   : > { %v616_v48 = vpack.c.bf16 %v435_v44, %v435_v44  ;;  %v622_v49 = vpack.c.bf16 %v441_v45, %v441_v45  ;;  %v396_v50 = vadd.f32 %v782_v27, %v395_v46  ;;  %v420_v51 = vadd.f32 %v782_v27, %v419_v47 }
  0xfe   : > { %v397_v52 = vpop.f32.mrf.mxu0  ;;  %v421_v53 = vpop.f32.mrf.mxu1 }
  0xff   : > { %496 = vst.msk [vmem:[%s790_s18 + $0x4] sm:$0xf] %vm494_vm3, %v616_v48  ;;  %502 = vst.msk [vmem:[%s790_s18 + $0x1c] sm:$0xf] %vm494_vm3, %v622_v49  ;;  %v436_v54 = vmax.f32 %v396_v50, 0.0  ;;  %v442_v55 = vmax.f32 %v420_v51, 0.0 }
 0x100   : > { %v398_v56 = vpop.f32.mrf.mxu0  ;;  %v422_v57 = vpop.f32.mrf.mxu1 }
 0x101   : > { %v617_v58 = vpack.c.bf16 %v436_v54, %v436_v54  ;;  %v623_v59 = vpack.c.bf16 %v442_v55, %v442_v55  ;;  %v399_v60 = vadd.f32 %v782_v27, %v398_v56  ;;  %v423_v61 = vadd.f32 %v782_v27, %v422_v57 }
 0x102   : > { %v400_v62 = vpop.f32.mrf.mxu0  ;;  %v424_v63 = vpop.f32.mrf.mxu1 }
 0x103   : > { %497 = vst.msk [vmem:[%s790_s18 + $0x8] sm:$0xf] %vm494_vm3, %v617_v58  ;;  %503 = vst.msk [vmem:[%s790_s18 + $0x20] sm:$0xf] %vm494_vm3, %v623_v59  ;;  %v437_v0 = vmax.f32 %v399_v60, 0.0  ;;  %v443_v1 = vmax.f32 %v423_v61, 0.0 }
 0x104   : > { %v403_v2 = vpop.f32.mrf.mxu0  ;;  %v427_v3 = vpop.f32.mrf.mxu1 }
 0x105   : > { %v618_v4 = vpack.c.bf16 %v437_v0, %v437_v0  ;;  %v624_v5 = vpack.c.bf16 %v443_v1, %v443_v1  ;;  %v404_v6 = vadd.f32 %v782_v27, %v403_v2  ;;  %v428_v7 = vadd.f32 %v782_v27, %v427_v3 }
 0x106   : > { %v405_v8 = vpop.f32.mrf.mxu0  ;;  %v429_v9 = vpop.f32.mrf.mxu1 }
 0x107   : > { %498 = vst.msk [vmem:[%s790_s18 + $0xc] sm:$0xf] %vm494_vm3, %v618_v4  ;;  %504 = vst.msk [vmem:[%s790_s18 + $0x24] sm:$0xf] %vm494_vm3, %v624_v5  ;;  %v438_v10 = vmax.f32 %v404_v6, 0.0  ;;  %v444_v11 = vmax.f32 %v428_v7, 0.0 }
 0x108   : > { %v406_v12 = vpop.f32.mrf.mxu0  ;;  %v430_v13 = vpop.f32.mrf.mxu1 }
 0x109   : > { %v619_v14 = vpack.c.bf16 %v438_v10, %v438_v10  ;;  %v625_v15 = vpack.c.bf16 %v444_v11, %v444_v11  ;;  %v407_v16 = vadd.f32 %v782_v27, %v406_v12  ;;  %v431_v17 = vadd.f32 %v782_v27, %v430_v13 }
 0x10a   : > { %v408_v18 = vpop.f32.mrf.mxu0  ;;  %v432_v19 = vpop.f32.mrf.mxu1 }
 0x10b   : > { %499 = vst.msk [vmem:[%s790_s18 + $0x10] sm:$0xf] %vm494_vm3, %v619_v14  ;;  %505 = vst.msk [vmem:[%s790_s18 + $0x28] sm:$0xf] %vm494_vm3, %v625_v15  ;;  %v439_v20 = vmax.f32 %v407_v16, 0.0  ;;  %v445_v21 = vmax.f32 %v431_v17, 0.0 }
 0x10d   : > { %v620_v22 = vpack.c.bf16 %v439_v20, %v439_v20  ;;  %v626_v23 = vpack.c.bf16 %v445_v21, %v445_v21 }
 0x10f   : > { %500 = vst.msk [vmem:[%s790_s18 + $0x14] sm:$0xf] %vm494_vm3, %v620_v22  ;;  %506 = vst.msk [vmem:[%s790_s18 + $0x2c] sm:$0xf] %vm494_vm3, %v626_v23 }
 0x110 PF: > { %s13_s12 = sadd.s32 1, %s691_s12  }
 0x111   : > { %p10_p4 = scmp.ge.s32.totalorder %s13_s12, 4  }
 0x113   :  { %12 = sbr.rel (!%p10_p4) target bundleno = 1 (0x1), region = 62 }

// kernel: _lambda_.38
= control target key start
LH: loop header
LB: loop body
LE: loop exit
PB: predicated region body
PF: predicated region fallthrough
CT: control target
= control target key end

     0   :  { %v205_v0 = vmov 0.0   ;;  %vm206_vm0 = vmmov 0   ;;  %vm51_vm1 = vcmask 130048   ;;  %vm148_vm2 = vcmask 125952   ;;  %s266_s1 = inlined_call_operand.vmem [shape: bf16[16,16], index: 1, kind: input, shape index: {}]   ;;  %s267_s0 = inlined_call_operand.vmem [shape: bf16[48,16], index: 0, kind: input, shape index: {}]   ;;  %s268_s2 = inlined_call_operand.vmem [shape: f32[1,16], index: 2, kind: input, shape index: {}]   ;;  %s269_s3 = inlined_call_operand.vmem [shape: bf16[48,16], index: 3, kind: output, shape index: {}]  }
   0x1   :  { %197 = vmatprep.subr.bf16.mxu1 %v205_v0  ;;  %v201_v1 = vld [vmem:[%s266_s1] sm:$0xff]   ;;  %183 = vmatprep.subr.bf16.mxu0 %v205_v0  ;;  %v202_v2 = vld [vmem:[%s267_s0 + $0x8] sm:$0xff]   ;;  %v204_v4 = vld [vmem:[%s267_s0 + $0x10] sm:$0xff]  }
   0x2   :  { %189 = vmatprep.mubr.msk.bf16.mxu1 %vm206_vm0, %v205_v0  ;;  %185 = vmatprep.mubr.msk.bf16.mxu0 %vm206_vm0, %v205_v0  ;;  %v203_v3 = vld [vmem:[%s267_s0] sm:$0xff]  }
   0x3   :  { %198 = vmatpush3.bf16.msra.mxu1 %v201_v1  ;;  %184 = vmatpush3.bf16.msra.mxu0 %v201_v1  ;;  %v159_v5 = vld [vmem:[%s268_s2] ss:$0 sm:$0xff] }
   0x6   :  { %190 = vmatmul.mubr.msk.bf16.vlgmr.msra.gmra.mxu1 %vm51_vm1, %v202_v2  ;;  %186 = vmatmul.mubr.msk.bf16.vlgmr.msra.gmra.mxu0 %vm51_vm1, %v203_v3 }
   0x7   :  { %193 = vmatprep.mubr.msk.bf16.mxu1 %vm206_vm0, %v205_v0 }
   0xe   :  { %194 = vmatmul.mubr.msk.bf16.gmra.mxu1 %vm51_vm1, %v204_v4 }
  0xc6   :  { %v103_v6 = vpop.f32.mrf.mxu1  ;;  %v95_v7 = vpop.f32.mrf.mxu0 }
  0xc7   :  { %v104_v8 = vadd.f32 %v159_v5, %v103_v6  ;;  %v96_v9 = vadd.f32 %v159_v5, %v95_v7 }
  0xc8   :  { %v191_v10 = vpop.f32.mrf.mxu1  ;;  %v187_v11 = vpop.f32.mrf.mxu0 }
  0xc9   :  { %v120_v12 = vmax.f32 %v104_v8, 0.0  ;;  %v118_v13 = vmax.f32 %v96_v9, 0.0 }
  0xca   :  { %v106_v14 = vpop.f32.mrf.mxu1  ;;  %v98_v15 = vpop.f32.mrf.mxu0 }
  0xcb   :  { %v175_v16 = vpack.c.bf16 %v120_v12, %v120_v12  ;;  %v173_v17 = vpack.c.bf16 %v118_v13, %v118_v13  ;;  %v107_v18 = vadd.f32 %v159_v5, %v106_v14  ;;  %v99_v19 = vadd.f32 %v159_v5, %v98_v15 }
  0xcc   :  { %v192_v20 = vpop.f32.mrf.mxu1  ;;  %v188_v21 = vpop.f32.mrf.mxu0 }
  0xcd   :  { %151 = vst.msk [vmem:[%s269_s3 + $0x8] sm:$0xf] %vm148_vm2, %v175_v16  ;;  %149 = vst.msk [vmem:[%s269_s3] sm:$0xf] %vm148_vm2, %v173_v17  ;;  %v121_v22 = vmax.f32 %v107_v18, 0.0  ;;  %v119_v23 = vmax.f32 %v99_v19, 0.0 }
  0xce   :  { %v111_v24 = vpop.f32.mrf.mxu1 }
  0xcf   :  { %v176_v25 = vpack.c.bf16 %v121_v22, %v121_v22  ;;  %v174_v26 = vpack.c.bf16 %v119_v23, %v119_v23  ;;  %v112_v27 = vadd.f32 %v159_v5, %v111_v24 }
  0xd0   :  { %v195_v28 = vpop.f32.mrf.mxu1 }
  0xd1   :  { %152 = vst.msk [vmem:[%s269_s3 + $0xc] sm:$0xf] %vm148_vm2, %v176_v25  ;;  %150 = vst.msk [vmem:[%s269_s3 + $0x4] sm:$0xf] %vm148_vm2, %v174_v26  ;;  %v122_v29 = vmax.f32 %v112_v27, 0.0 }
  0xd2   :  { %v114_v30 = vpop.f32.mrf.mxu1 }
  0xd3   :  { %v177_v31 = vpack.c.bf16 %v122_v29, %v122_v29  ;;  %v115_v32 = vadd.f32 %v159_v5, %v114_v30 }
  0xd4   :  { %v196_v33 = vpop.f32.mrf.mxu1 }
  0xd5   :  { %153 = vst.msk [vmem:[%s269_s3 + $0x10] sm:$0xf] %vm148_vm2, %v177_v31  ;;  %v123_v34 = vmax.f32 %v115_v32, 0.0 }
  0xd7   :  { %v178_v35 = vpack.c.bf16 %v123_v34, %v123_v34 }
  0xd9   :  { %154 = vst.msk [vmem:[%s269_s3 + $0x14] sm:$0xf] %vm148_vm2, %v178_v35 }

// kernel: _lambda_.40
= control target key start
LH: loop header
LB: loop body
LE: loop exit
PB: predicated region body
PF: predicated region fallthrough
CT: control target
= control target key end

     0   :  { %v199_v0 = vmov 0.0   ;;  %vm200_vm0 = vmmov 0   ;;  %vm51_vm1 = vcmask 130048   ;;  %vm142_vm2 = vcmask 519168   ;;  %s260_s1 = inlined_call_operand.vmem [shape: bf16[16,64], index: 1, kind: input, shape index: {}]   ;;  %s261_s0 = inlined_call_operand.vmem [shape: bf16[48,16], index: 0, kind: input, shape index: {}]   ;;  %s262_s2 = inlined_call_operand.vmem [shape: f32[1,64], index: 2, kind: input, shape index: {}]   ;;  %s263_s3 = inlined_call_operand.vmem [shape: bf16[48,64], index: 3, kind: output, shape index: {}]  }
   0x1   :  { %191 = vmatprep.subr.bf16.mxu1 %v199_v0  ;;  %v195_v1 = vld [vmem:[%s260_s1] sm:$0xff]   ;;  %177 = vmatprep.subr.bf16.mxu0 %v199_v0  ;;  %v196_v2 = vld [vmem:[%s261_s0 + $0x8] sm:$0xff]   ;;  %v198_v4 = vld [vmem:[%s261_s0 + $0x10] sm:$0xff]  }
   0x2   :  { %183 = vmatprep.mubr.msk.bf16.mxu1 %vm200_vm0, %v199_v0  ;;  %179 = vmatprep.mubr.msk.bf16.mxu0 %vm200_vm0, %v199_v0  ;;  %v197_v3 = vld [vmem:[%s261_s0] sm:$0xff]  }
   0x3   :  { %192 = vmatpush3.bf16.msra.mxu1 %v195_v1  ;;  %178 = vmatpush3.bf16.msra.mxu0 %v195_v1  ;;  %v153_v5 = vld [vmem:[%s262_s2] ss:$0 sm:$0xff] }
   0x6   :  { %184 = vmatmul.mubr.msk.bf16.vlgmr.msra.gmra.mxu1 %vm51_vm1, %v196_v2  ;;  %180 = vmatmul.mubr.msk.bf16.vlgmr.msra.gmra.mxu0 %vm51_vm1, %v197_v3 }
   0x7   :  { %187 = vmatprep.mubr.msk.bf16.mxu1 %vm200_vm0, %v199_v0 }
   0xe   :  { %188 = vmatmul.mubr.msk.bf16.gmra.mxu1 %vm51_vm1, %v198_v4 }
  0xc6   :  { %v103_v6 = vpop.f32.mrf.mxu1  ;;  %v95_v7 = vpop.f32.mrf.mxu0 }
  0xc7   :  { %v104_v8 = vadd.f32 %v153_v5, %v103_v6  ;;  %v96_v9 = vadd.f32 %v153_v5, %v95_v7 }
  0xc8   :  { %v185_v10 = vpop.f32.mrf.mxu1  ;;  %v181_v11 = vpop.f32.mrf.mxu0 }
  0xc9   :  { %v169_v12 = vpack.c.bf16 %v104_v8, %v104_v8  ;;  %v167_v13 = vpack.c.bf16 %v96_v9, %v96_v9 }
  0xca   :  { %v106_v14 = vpop.f32.mrf.mxu1  ;;  %v98_v15 = vpop.f32.mrf.mxu0 }
  0xcb   :  { %145 = vst.msk [vmem:[%s263_s3 + $0x8] sm:$0xf] %vm142_vm2, %v169_v12  ;;  %143 = vst.msk [vmem:[%s263_s3] sm:$0xf] %vm142_vm2, %v167_v13  ;;  %v107_v16 = vadd.f32 %v153_v5, %v106_v14  ;;  %v99_v17 = vadd.f32 %v153_v5, %v98_v15 }
  0xcc   :  { %v186_v18 = vpop.f32.mrf.mxu1  ;;  %v182_v19 = vpop.f32.mrf.mxu0 }
  0xcd   :  { %v170_v20 = vpack.c.bf16 %v107_v16, %v107_v16  ;;  %v168_v21 = vpack.c.bf16 %v99_v17, %v99_v17 }
  0xce   :  { %v111_v22 = vpop.f32.mrf.mxu1 }
  0xcf   :  { %146 = vst.msk [vmem:[%s263_s3 + $0xc] sm:$0xf] %vm142_vm2, %v170_v20  ;;  %144 = vst.msk [vmem:[%s263_s3 + $0x4] sm:$0xf] %vm142_vm2, %v168_v21  ;;  %v112_v23 = vadd.f32 %v153_v5, %v111_v22 }
  0xd0   :  { %v189_v24 = vpop.f32.mrf.mxu1 }
  0xd1   :  { %v171_v25 = vpack.c.bf16 %v112_v23, %v112_v23 }
  0xd2   :  { %v114_v26 = vpop.f32.mrf.mxu1 }
  0xd3   :  { %147 = vst.msk [vmem:[%s263_s3 + $0x10] sm:$0xf] %vm142_vm2, %v171_v25  ;;  %v115_v27 = vadd.f32 %v153_v5, %v114_v26 }
  0xd4   :  { %v190_v28 = vpop.f32.mrf.mxu1 }
  0xd5   :  { %v172_v29 = vpack.c.bf16 %v115_v27, %v115_v27 }
  0xd7   :  { %148 = vst.msk [vmem:[%s263_s3 + $0x14] sm:$0xf] %vm142_vm2, %v172_v29 }

// kernel: _lambda_.39
= control target key start
LH: loop header
LB: loop body
LE: loop exit
PB: predicated region body
PF: predicated region fallthrough
CT: control target
= control target key end

     0   :  { %v303_v0 = vmov 0   ;;  %vm127_vm0 = vcmask 130048   ;;  %vm224_vm1 = vcmask 125952   ;;  %s399_s1 = inlined_call_operand.vmem [shape: bf16[144,16], index: 1, kind: input, shape index: {}]   ;;  %s400_s0 = inlined_call_operand.vmem [shape: bf16[48,144], index: 0, kind: input, shape index: {}]   ;;  %s401_s2 = inlined_call_operand.vmem [shape: f32[1,16], index: 2, kind: input, shape index: {}]   ;;  %s402_s3 = inlined_call_operand.vmem [shape: bf16[48,16], index: 3, kind: output, shape index: {}]  }
   0x1   :  { %266 = vmatprep.subr.bf16.mxu1 %v303_v0  ;;  %v285_v1 = vld [vmem:[%s399_s1 + $0x38] sm:$0xff]   ;;  %137 = vmatprep.subr.bf16.mxu0 %v303_v0  ;;  %v286_v2 = vld [vmem:[%s399_s1 + $0x30] sm:$0xff]   ;;  %v287_v3 = vld [vmem:[%s399_s1 + $0x28] sm:$0xff]  }
   0x2   :  { %275 = vmatpush1.bf16.msra.mxu1 %v285_v1  ;;  %138 = vmatpush1.bf16.msra.mxu0 %v285_v1  ;;  %v288_v4 = vld [vmem:[%s399_s1 + $0x20] sm:$0xff]   ;;  %v296_v5 = vld [vmem:[%s400_s0 + $0x14] ss:$8 sps:$4 sm:$0xff]   ;;  %v291_v9 = vld [vmem:[%s399_s1 + $0x8] sm:$0xff]  }
   0x3   :  { %267 = vmatprep.subr.bf16.mxu1 %v303_v0  ;;  %139 = vmatprep.subr.bf16.mxu0 %v303_v0  ;;  %v299_v6 = vld [vmem:[%s400_s0 + $0x4] ss:$8 sps:$4 sm:$0xff]   ;;  %v289_v7 = vld [vmem:[%s399_s1 + $0x18] sm:$0xff]   ;;  %v290_v8 = vld [vmem:[%s399_s1 + $0x10] sm:$0xff]  }
   0x4   :  { %252 = vmatprep.mubr.msk.bf16.mxu1 %vm127_vm0, %v296_v5  ;;  %251 = vmatprep.mubr.msk.bf16.mxu0 %vm127_vm0, %v299_v6  ;;  %v292_v10 = vld [vmem:[%s399_s1] sm:$0xff]   ;;  %v294_v12 = vld [vmem:[%s400_s0 + $0x10] ss:$8 sps:$4 sm:$0xff]  }
   0x5   :  { %v293_v11 = vld [vmem:[%s399_s1 + $0x40] sm:$0xff]  }
   0x6   :  { %276 = vmatpush1.bf16.msra.mxu1 %v286_v2  ;;  %140 = vmatpush1.bf16.msra.mxu0 %v286_v2  ;;  %v297_v13 = vld [vmem:[%s400_s0] ss:$8 sps:$4 sm:$0xff]   ;;  %v300_v14 = vld [vmem:[%s400_s0 + $0x24] ss:$8 sps:$4 sm:$0xff]  }
   0x7   :  { %268 = vmatprep.subr.bf16.mxu1 %v303_v0  ;;  %141 = vmatprep.subr.bf16.mxu0 %v303_v0  ;;  %v302_v15 = vld [vmem:[%s400_s0 + $0x20] ss:$8 sps:$4 sm:$0xff]  }
   0x8   :  { %v235_v16 = vld [vmem:[%s401_s2] ss:$0 sm:$0xff] }
   0xa   :  { %277 = vmatpush1.bf16.msra.mxu1 %v287_v3  ;;  %142 = vmatpush1.bf16.msra.mxu0 %v287_v3 }
   0xb   :  { %269 = vmatprep.subr.bf16.mxu1 %v303_v0  ;;  %143 = vmatprep.subr.bf16.mxu0 %v303_v0 }
   0xe   :  { %278 = vmatpush1.bf16.msra.mxu1 %v288_v4  ;;  %144 = vmatpush1.bf16.msra.mxu0 %v288_v4 }
   0xf   :  { %270 = vmatprep.subr.bf16.mxu1 %v303_v0  ;;  %145 = vmatprep.subr.bf16.mxu0 %v303_v0 }
  0x12   :  { %279 = vmatpush1.bf16.msra.mxu1 %v289_v7  ;;  %146 = vmatpush1.bf16.msra.mxu0 %v289_v7 }
  0x13   :  { %271 = vmatprep.subr.bf16.mxu1 %v303_v0  ;;  %147 = vmatprep.subr.bf16.mxu0 %v303_v0 }
  0x16   :  { %280 = vmatpush1.bf16.msra.mxu1 %v290_v8  ;;  %148 = vmatpush1.bf16.msra.mxu0 %v290_v8 }
  0x17   :  { %272 = vmatprep.subr.bf16.mxu1 %v303_v0  ;;  %149 = vmatprep.subr.bf16.mxu0 %v303_v0 }
  0x1a   :  { %281 = vmatpush1.bf16.msra.mxu1 %v291_v9  ;;  %150 = vmatpush1.bf16.msra.mxu0 %v291_v9 }
  0x1b   :  { %273 = vmatprep.subr.bf16.mxu1 %v303_v0  ;;  %151 = vmatprep.subr.bf16.mxu0 %v303_v0 }
  0x1e   :  { %282 = vmatpush1.bf16.msra.mxu1 %v292_v10  ;;  %152 = vmatpush1.bf16.msra.mxu0 %v292_v10 }
  0x1f   :  { %274 = vmatprep.subr.bf16.mxu1 %v303_v0  ;;  %167 = vmatprep.subr.bf16.mxu0 %v303_v0 }
  0x22   :  { %283 = vmatpush2.bf16.msra.mxu1 %v293_v11  ;;  %168 = vmatpush2.bf16.msra.mxu0 %v293_v11 }
  0x25   :  { %178 = vmatmul.mubr.bf16.vlgmr.msra.gmra.mxu1 %v294_v12  ;;  %170 = vmatmul.mubr.bf16.vlgmr.msra.gmra.mxu0 %v297_v13 }
  0x26   :  { %253 = vmatprep.mubr.msk.bf16.mxu1 %vm127_vm0, %v300_v14 }
  0x2d   :  { %186 = vmatmul.mubr.bf16.gmra.mxu1 %v302_v15 }
  0xe5   :  { %v179_v17 = vpop.f32.mrf.mxu1  ;;  %v171_v18 = vpop.f32.mrf.mxu0 }
  0xe6   :  { %v180_v19 = vadd.f32 %v235_v16, %v179_v17  ;;  %v172_v20 = vadd.f32 %v235_v16, %v171_v18 }
  0xe7   :  { %v181_v21 = vpop.f32.mrf.mxu1  ;;  %v173_v22 = vpop.f32.mrf.mxu0 }
  0xe8   :  { %v196_v23 = vmax.f32 %v180_v19, 0.0  ;;  %v194_v24 = vmax.f32 %v172_v20, 0.0 }
  0xe9   :  { %v182_v25 = vpop.f32.mrf.mxu1  ;;  %v174_v26 = vpop.f32.mrf.mxu0 }
  0xea   :  { %v262_v27 = vpack.c.bf16 %v196_v23, %v196_v23  ;;  %v260_v28 = vpack.c.bf16 %v194_v24, %v194_v24  ;;  %v183_v29 = vadd.f32 %v235_v16, %v182_v25  ;;  %v175_v30 = vadd.f32 %v235_v16, %v174_v26 }
  0xeb   :  { %v184_v31 = vpop.f32.mrf.mxu1  ;;  %v176_v32 = vpop.f32.mrf.mxu0 }
  0xec   :  { %227 = vst.msk [vmem:[%s402_s3 + $0x8] sm:$0xf] %vm224_vm1, %v262_v27  ;;  %225 = vst.msk [vmem:[%s402_s3] sm:$0xf] %vm224_vm1, %v260_v28  ;;  %v197_v33 = vmax.f32 %v183_v29, 0.0  ;;  %v195_v34 = vmax.f32 %v175_v30, 0.0 }
  0xed   :  { %v187_v35 = vpop.f32.mrf.mxu1 }
  0xee   :  { %v263_v36 = vpack.c.bf16 %v197_v33, %v197_v33  ;;  %v261_v37 = vpack.c.bf16 %v195_v34, %v195_v34  ;;  %v188_v38 = vadd.f32 %v235_v16, %v187_v35 }
  0xef   :  { %v189_v39 = vpop.f32.mrf.mxu1 }
  0xf0   :  { %228 = vst.msk [vmem:[%s402_s3 + $0xc] sm:$0xf] %vm224_vm1, %v263_v36  ;;  %226 = vst.msk [vmem:[%s402_s3 + $0x4] sm:$0xf] %vm224_vm1, %v261_v37  ;;  %v198_v40 = vmax.f32 %v188_v38, 0.0 }
  0xf1   :  { %v190_v41 = vpop.f32.mrf.mxu1 }
  0xf2   :  { %v264_v42 = vpack.c.bf16 %v198_v40, %v198_v40  ;;  %v191_v43 = vadd.f32 %v235_v16, %v190_v41 }
  0xf3   :  { %v192_v44 = vpop.f32.mrf.mxu1 }
  0xf4   :  { %229 = vst.msk [vmem:[%s402_s3 + $0x10] sm:$0xf] %vm224_vm1, %v264_v42  ;;  %v199_v45 = vmax.f32 %v191_v43, 0.0 }
  0xf6   :  { %v265_v46 = vpack.c.bf16 %v199_v45, %v199_v45 }
  0xf8   :  { %230 = vst.msk [vmem:[%s402_s3 + $0x14] sm:$0xf] %vm224_vm1, %v265_v46 }

// kernel: _lambda_.42
= control target key start
LH: loop header
LB: loop body
LE: loop exit
PB: predicated region body
PF: predicated region fallthrough
CT: control target
= control target key end

     0   :  { %v250_v0 = vmov 0.0   ;;  %vm251_vm0 = vmmov 0   ;;  %vm75_vm1 = vcmask 523264   ;;  %vm172_vm2 = vcmask 125952   ;;  %s323_s1 = inlined_call_operand.vmem [shape: bf16[64,16], index: 1, kind: input, shape index: {}]   ;;  %s324_s0 = inlined_call_operand.vmem [shape: bf16[48,64], index: 0, kind: input, shape index: {}]   ;;  %s325_s2 = inlined_call_operand.vmem [shape: f32[1,16], index: 2, kind: input, shape index: {}]   ;;  %s326_s3 = inlined_call_operand.vmem [shape: bf16[48,16], index: 3, kind: output, shape index: {}]  }
   0x1   :  { %233 = vmatprep.subr.bf16.mxu1 %v250_v0  ;;  %v243_v1 = vld [vmem:[%s323_s1 + $0x18] sm:$0xff]   ;;  %213 = vmatprep.subr.bf16.mxu0 %v250_v0  ;;  %v244_v2 = vld [vmem:[%s323_s1 + $0x10] sm:$0xff]   ;;  %v245_v3 = vld [vmem:[%s323_s1 + $0x8] sm:$0xff]  }
   0x2   :  { %225 = vmatprep.mubr.msk.bf16.mxu1 %vm251_vm0, %v250_v0  ;;  %221 = vmatprep.mubr.msk.bf16.mxu0 %vm251_vm0, %v250_v0  ;;  %v246_v4 = vld [vmem:[%s323_s1] sm:$0xff]   ;;  %v247_v5 = vld [vmem:[%s324_s0 + $0x8] sm:$0xff]   ;;  %v249_v7 = vld [vmem:[%s324_s0 + $0x10] sm:$0xff]  }
   0x3   :  { %237 = vmatpush3.bf16.msra.mxu1 %v243_v1  ;;  %214 = vmatpush3.bf16.msra.mxu0 %v243_v1  ;;  %v248_v6 = vld [vmem:[%s324_s0] sm:$0xff]  }
   0x4   :  { %234 = vmatprep.subr.bf16.mxu1 %v250_v0  ;;  %215 = vmatprep.subr.bf16.mxu0 %v250_v0  ;;  %v183_v8 = vld [vmem:[%s325_s2] ss:$0 sm:$0xff] }
   0x7   :  { %238 = vmatpush3.bf16.msra.mxu1 %v244_v2  ;;  %216 = vmatpush3.bf16.msra.mxu0 %v244_v2 }
   0x8   :  { %235 = vmatprep.subr.bf16.mxu1 %v250_v0  ;;  %217 = vmatprep.subr.bf16.mxu0 %v250_v0 }
   0xb   :  { %239 = vmatpush3.bf16.msra.mxu1 %v245_v3  ;;  %218 = vmatpush3.bf16.msra.mxu0 %v245_v3 }
   0xc   :  { %236 = vmatprep.subr.bf16.mxu1 %v250_v0  ;;  %219 = vmatprep.subr.bf16.mxu0 %v250_v0 }
   0xf   :  { %240 = vmatpush3.bf16.msra.mxu1 %v246_v4  ;;  %220 = vmatpush3.bf16.msra.mxu0 %v246_v4 }
  0x12   :  { %226 = vmatmul.mubr.msk.bf16.vlgmr.msra.gmra.mxu1 %vm75_vm1, %v247_v5  ;;  %222 = vmatmul.mubr.msk.bf16.vlgmr.msra.gmra.mxu0 %vm75_vm1, %v248_v6 }
  0x13   :  { %229 = vmatprep.mubr.msk.bf16.mxu1 %vm251_vm0, %v250_v0 }
  0x1a   :  { %230 = vmatmul.mubr.msk.bf16.gmra.mxu1 %vm75_vm1, %v249_v7 }
  0xd2   :  { %v127_v9 = vpop.f32.mrf.mxu1  ;;  %v119_v10 = vpop.f32.mrf.mxu0 }
  0xd3   :  { %v128_v11 = vadd.f32 %v183_v8, %v127_v9  ;;  %v120_v12 = vadd.f32 %v183_v8, %v119_v10 }
  0xd4   :  { %v227_v13 = vpop.f32.mrf.mxu1  ;;  %v223_v14 = vpop.f32.mrf.mxu0 }
  0xd5   :  { %v144_v15 = vmax.f32 %v128_v11, 0.0  ;;  %v142_v16 = vmax.f32 %v120_v12, 0.0 }
  0xd6   :  { %v130_v17 = vpop.f32.mrf.mxu1  ;;  %v122_v18 = vpop.f32.mrf.mxu0 }
  0xd7   :  { %v202_v19 = vpack.c.bf16 %v144_v15, %v144_v15  ;;  %v200_v20 = vpack.c.bf16 %v142_v16, %v142_v16  ;;  %v131_v21 = vadd.f32 %v183_v8, %v130_v17  ;;  %v123_v22 = vadd.f32 %v183_v8, %v122_v18 }
  0xd8   :  { %v228_v23 = vpop.f32.mrf.mxu1  ;;  %v224_v24 = vpop.f32.mrf.mxu0 }
  0xd9   :  { %175 = vst.msk [vmem:[%s326_s3 + $0x8] sm:$0xf] %vm172_vm2, %v202_v19  ;;  %173 = vst.msk [vmem:[%s326_s3] sm:$0xf] %vm172_vm2, %v200_v20  ;;  %v145_v25 = vmax.f32 %v131_v21, 0.0  ;;  %v143_v26 = vmax.f32 %v123_v22, 0.0 }
  0xda   :  { %v135_v27 = vpop.f32.mrf.mxu1 }
  0xdb   :  { %v203_v28 = vpack.c.bf16 %v145_v25, %v145_v25  ;;  %v201_v29 = vpack.c.bf16 %v143_v26, %v143_v26  ;;  %v136_v30 = vadd.f32 %v183_v8, %v135_v27 }
  0xdc   :  { %v231_v31 = vpop.f32.mrf.mxu1 }
  0xdd   :  { %176 = vst.msk [vmem:[%s326_s3 + $0xc] sm:$0xf] %vm172_vm2, %v203_v28  ;;  %174 = vst.msk [vmem:[%s326_s3 + $0x4] sm:$0xf] %vm172_vm2, %v201_v29  ;;  %v146_v32 = vmax.f32 %v136_v30, 0.0 }
  0xde   :  { %v138_v33 = vpop.f32.mrf.mxu1 }
  0xdf   :  { %v204_v34 = vpack.c.bf16 %v146_v32, %v146_v32  ;;  %v139_v35 = vadd.f32 %v183_v8, %v138_v33 }
  0xe0   :  { %v232_v36 = vpop.f32.mrf.mxu1 }
  0xe1   :  { %177 = vst.msk [vmem:[%s326_s3 + $0x10] sm:$0xf] %vm172_vm2, %v204_v34  ;;  %v147_v37 = vmax.f32 %v139_v35, 0.0 }
  0xe3   :  { %v205_v38 = vpack.c.bf16 %v147_v37, %v147_v37 }
  0xe5   :  { %178 = vst.msk [vmem:[%s326_s3 + $0x14] sm:$0xf] %vm172_vm2, %v205_v38 }

// kernel: _lambda_.41
= control target key start
LH: loop header
LB: loop body
LE: loop exit
PB: predicated region body
PF: predicated region fallthrough
CT: control target
= control target key end

     0   :  { %v240_v0 = vmov 0.0   ;;  %vm241_vm0 = vmmov 0   ;;  %vm54_vm1 = vcmask 130048   ;;  %vm169_vm2 = vcmask 519168   ;;  %s315_s1 = inlined_call_operand.vmem [shape: bf16[16,64], index: 1, kind: input, shape index: {}]   ;;  %s316_s0 = inlined_call_operand.vmem [shape: bf16[48,16], index: 0, kind: input, shape index: {}]   ;;  %s317_s3 = inlined_call_operand.vmem [shape: bf16[48,64], index: 3, kind: input, shape index: {}]   ;;  %s318_s2 = inlined_call_operand.vmem [shape: f32[1,64], index: 2, kind: input, shape index: {}]   ;;  %s319_s4 = inlined_call_operand.vmem [shape: bf16[48,64], index: 4, kind: output, shape index: {}]  }
   0x1   :  { %232 = vmatprep.subr.bf16.mxu1 %v240_v0  ;;  %v236_v1 = vld [vmem:[%s315_s1] sm:$0xff]   ;;  %218 = vmatprep.subr.bf16.mxu0 %v240_v0  ;;  %v237_v2 = vld [vmem:[%s316_s0 + $0x8] sm:$0xff]   ;;  %v239_v4 = vld [vmem:[%s316_s0 + $0x10] sm:$0xff]  }
   0x2   :  { %224 = vmatprep.mubr.msk.bf16.mxu1 %vm241_vm0, %v240_v0  ;;  %220 = vmatprep.mubr.msk.bf16.mxu0 %vm241_vm0, %v240_v0  ;;  %v238_v3 = vld [vmem:[%s316_s0] sm:$0xff]   ;;  %v212_v5 = vld [vmem:[%s317_s3 + $0x8] sm:$0xff]   ;;  %v213_v20 = vld [vmem:[%s317_s3 + $0x10] sm:$0xff]  }
   0x3   :  { %233 = vmatpush3.bf16.msra.mxu1 %v236_v1  ;;  %219 = vmatpush3.bf16.msra.mxu0 %v236_v1  ;;  %v201_v6 = vld [vmem:[%s317_s3] sm:$0xff]   ;;  %v206_v8 = vunpack.c.l.bf16 %v212_v5  ;;  %v207_v18 = vunpack.c.h.bf16 %v212_v5  ;;  %v210_v29 = vunpack.c.l.bf16 %v213_v20  ;;  %v211_v42 = vunpack.c.h.bf16 %v213_v20 }
   0x4   :  { %v180_v7 = vld [vmem:[%s318_s2] ss:$0 sm:$0xff]  ;;  %v202_v9 = vunpack.c.l.bf16 %v201_v6  ;;  %v203_v19 = vunpack.c.h.bf16 %v201_v6 }
   0x6   :  { %225 = vmatmul.mubr.msk.bf16.vlgmr.msra.gmra.mxu1 %vm54_vm1, %v237_v2  ;;  %221 = vmatmul.mubr.msk.bf16.vlgmr.msra.gmra.mxu0 %vm54_vm1, %v238_v3 }
   0x7   :  { %228 = vmatprep.mubr.msk.bf16.mxu1 %vm241_vm0, %v240_v0 }
   0xe   :  { %229 = vmatmul.mubr.msk.bf16.gmra.mxu1 %vm54_vm1, %v239_v4 }
  0xc6   :  { %v106_v10 = vpop.f32.mrf.mxu1  ;;  %v98_v11 = vpop.f32.mrf.mxu0 }
  0xc7   :  { %v107_v12 = vadd.f32 %v180_v7, %v106_v10  ;;  %v99_v13 = vadd.f32 %v180_v7, %v98_v11 }
  0xc8   :  { %v226_v14 = vpop.f32.mrf.mxu1  ;;  %v222_v15 = vpop.f32.mrf.mxu0 }
  0xc9   :  { %v135_v16 = vadd.f32 %v206_v8, %v107_v12  ;;  %v133_v17 = vadd.f32 %v202_v9, %v99_v13 }
  0xca   :  { %v109_v21 = vpop.f32.mrf.mxu1  ;;  %v101_v22 = vpop.f32.mrf.mxu0 }
  0xcb   :  { %v141_v23 = vmax.f32 %v135_v16, 0.0  ;;  %v139_v24 = vmax.f32 %v133_v17, 0.0  ;;  %v110_v25 = vadd.f32 %v180_v7, %v109_v21  ;;  %v102_v26 = vadd.f32 %v180_v7, %v101_v22 }
  0xcc   :  { %v227_v27 = vpop.f32.mrf.mxu1  ;;  %v223_v28 = vpop.f32.mrf.mxu0 }
  0xcd   :  { %v196_v30 = vpack.c.bf16 %v141_v23, %v141_v23  ;;  %v194_v31 = vpack.c.bf16 %v139_v24, %v139_v24  ;;  %v136_v32 = vadd.f32 %v207_v18, %v110_v25  ;;  %v134_v33 = vadd.f32 %v203_v19, %v102_v26 }
  0xce   :  { %v114_v34 = vpop.f32.mrf.mxu1 }
  0xcf   :  { %172 = vst.msk [vmem:[%s319_s4 + $0x8] sm:$0xf] %vm169_vm2, %v196_v30  ;;  %170 = vst.msk [vmem:[%s319_s4] sm:$0xf] %vm169_vm2, %v194_v31  ;;  %v142_v35 = vmax.f32 %v136_v32, 0.0  ;;  %v140_v36 = vmax.f32 %v134_v33, 0.0  ;;  %v115_v37 = vadd.f32 %v180_v7, %v114_v34 }
  0xd0   :  { %v230_v38 = vpop.f32.mrf.mxu1 }
  0xd1   :  { %v197_v39 = vpack.c.bf16 %v142_v35, %v142_v35  ;;  %v195_v40 = vpack.c.bf16 %v140_v36, %v140_v36  ;;  %v137_v41 = vadd.f32 %v210_v29, %v115_v37 }
  0xd2   :  { %v117_v43 = vpop.f32.mrf.mxu1 }
  0xd3   :  { %173 = vst.msk [vmem:[%s319_s4 + $0xc] sm:$0xf] %vm169_vm2, %v197_v39  ;;  %171 = vst.msk [vmem:[%s319_s4 + $0x4] sm:$0xf] %vm169_vm2, %v195_v40  ;;  %v143_v44 = vmax.f32 %v137_v41, 0.0  ;;  %v118_v45 = vadd.f32 %v180_v7, %v117_v43 }
  0xd4   :  { %v231_v46 = vpop.f32.mrf.mxu1 }
  0xd5   :  { %v198_v47 = vpack.c.bf16 %v143_v44, %v143_v44  ;;  %v138_v48 = vadd.f32 %v211_v42, %v118_v45 }
  0xd7   :  { %174 = vst.msk [vmem:[%s319_s4 + $0x10] sm:$0xf] %vm169_vm2, %v198_v47  ;;  %v144_v49 = vmax.f32 %v138_v48, 0.0 }
  0xd9   :  { %v199_v50 = vpack.c.bf16 %v144_v49, %v144_v49 }
  0xdb   :  { %175 = vst.msk [vmem:[%s319_s4 + $0x14] sm:$0xf] %vm169_vm2, %v199_v50 }

// kernel: _lambda_.43
= control target key start
LH: loop header
LB: loop body
LE: loop exit
PB: predicated region body
PF: predicated region fallthrough
CT: control target
= control target key end

     0   :  { %8 = vsyncpa [#allocation3], 0  ;;  %s339_s12 = smov [#allocation2]   ;;  %s436_s0 = inlined_call_operand.vmem [shape: bf16[48,144], index: 0, kind: input, shape index: {}]   ;;  %s437_s1 = inlined_call_operand.vmem [shape: bf16[144,16], index: 1, kind: input, shape index: {}]   ;;  %s438_s2 = inlined_call_operand.hbm [shape: f32[1,16], index: 2, kind: input, shape index: {}]   ;;  %s439_s3 = inlined_call_operand.vmem [shape: bf16[48,16], index: 3, kind: output, shape index: {}]  }
   0x1   :  { %s19_s13 = sshll.u32 %s339_s12, 4  ;;  %s20_s13 = int_to_ptr.vmem [resolvable:$true] %s19_s13 }
   0x2   :  { %s325_s14 = scalar_lea.vmem %s20_s13, 16  ;;  %s329_s15 = scalar_lea.vmem %s20_s13, 32 }
   0x3   :  { %p326_p0 = scmp.ne.s32.totalorder %s20_s13, %s325_s14  ;;  %p330_p1 = scmp.lt.s32.totalorder %s20_s13, %s20_s13 }
   0x4   :  { %p331_p2 = scmp.lt.s32.totalorder %s329_s15, %s325_s14 }
   0x6   :  { %p332_p3 = por %p331_p2, %p330_p1 }
   0x8   :  { %p333_p4 = pnand %p332_p3, %p326_p0 }
   0xa   :  { %336 = shalt.err (!%p333_p4)
}
   0xb   :  { %22 = dma.hbm_to_vmem [thread:$0]  %s438_s2, 16, %s20_s13, [#allocation3]  }
   0xc   :  { %337 = dma.done.wait [#allocation3], 16  }
   0xd   :  { %338 = vsyncadd [#allocation3], 4294967280  ;;  %v340_v0 = vmov 0   ;;  %v299_v1 = vld [vmem:[%s437_s1 + $0x38] sm:$0xff]   ;;  %v300_v2 = vld [vmem:[%s437_s1 + $0x30] sm:$0xff]   ;;  %vm139_vm0 = vcmask 130048  }
   0xe   :  { %279 = vmatprep.subr.bf16.mxu1 %v340_v0  ;;  %149 = vmatprep.subr.bf16.mxu0 %v340_v0  ;;  %v301_v3 = vld [vmem:[%s437_s1 + $0x28] sm:$0xff]   ;;  %v302_v4 = vld [vmem:[%s437_s1 + $0x20] sm:$0xff]   ;;  %v310_v5 = vld [vmem:[%s436_s0 + $0x14] ss:$8 sps:$4 sm:$0xff]   ;;  %vm236_vm1 = vcmask 125952  }
   0xf   :  { %288 = vmatpush1.bf16.msra.mxu1 %v299_v1  ;;  %150 = vmatpush1.bf16.msra.mxu0 %v299_v1  ;;  %v313_v6 = vld [vmem:[%s436_s0 + $0x4] ss:$8 sps:$4 sm:$0xff]   ;;  %v303_v7 = vld [vmem:[%s437_s1 + $0x18] sm:$0xff]   ;;  %v304_v8 = vld [vmem:[%s437_s1 + $0x10] sm:$0xff]  }
  0x10   :  { %280 = vmatprep.subr.bf16.mxu1 %v340_v0  ;;  %151 = vmatprep.subr.bf16.mxu0 %v340_v0  ;;  %v305_v9 = vld [vmem:[%s437_s1 + $0x8] sm:$0xff]   ;;  %v306_v10 = vld [vmem:[%s437_s1] sm:$0xff]   ;;  %v308_v12 = vld [vmem:[%s436_s0 + $0x10] ss:$8 sps:$4 sm:$0xff]  }
  0x11   :  { %265 = vmatprep.mubr.msk.bf16.mxu1 %vm139_vm0, %v310_v5  ;;  %264 = vmatprep.mubr.msk.bf16.mxu0 %vm139_vm0, %v313_v6  ;;  %v307_v11 = vld [vmem:[%s437_s1 + $0x40] sm:$0xff]  }
  0x12   :  { %v311_v13 = vld [vmem:[%s436_s0] ss:$8 sps:$4 sm:$0xff]   ;;  %v314_v14 = vld [vmem:[%s436_s0 + $0x24] ss:$8 sps:$4 sm:$0xff]  }
  0x13   :  { %289 = vmatpush1.bf16.msra.mxu1 %v300_v2  ;;  %152 = vmatpush1.bf16.msra.mxu0 %v300_v2  ;;  %v316_v15 = vld [vmem:[%s436_s0 + $0x20] ss:$8 sps:$4 sm:$0xff]  }
  0x14   :  { %281 = vmatprep.subr.bf16.mxu1 %v340_v0  ;;  %153 = vmatprep.subr.bf16.mxu0 %v340_v0  ;;  %v248_v16 = vld [vmem:[#allocation2] ss:$0 sm:$0xff] }
  0x17   :  { %290 = vmatpush1.bf16.msra.mxu1 %v301_v3  ;;  %154 = vmatpush1.bf16.msra.mxu0 %v301_v3 }
  0x18   :  { %282 = vmatprep.subr.bf16.mxu1 %v340_v0  ;;  %155 = vmatprep.subr.bf16.mxu0 %v340_v0 }
  0x1b   :  { %291 = vmatpush1.bf16.msra.mxu1 %v302_v4  ;;  %156 = vmatpush1.bf16.msra.mxu0 %v302_v4 }
  0x1c   :  { %283 = vmatprep.subr.bf16.mxu1 %v340_v0  ;;  %157 = vmatprep.subr.bf16.mxu0 %v340_v0 }
  0x1f   :  { %292 = vmatpush1.bf16.msra.mxu1 %v303_v7  ;;  %158 = vmatpush1.bf16.msra.mxu0 %v303_v7 }
  0x20   :  { %284 = vmatprep.subr.bf16.mxu1 %v340_v0  ;;  %159 = vmatprep.subr.bf16.mxu0 %v340_v0 }
  0x23   :  { %293 = vmatpush1.bf16.msra.mxu1 %v304_v8  ;;  %160 = vmatpush1.bf16.msra.mxu0 %v304_v8 }
  0x24   :  { %285 = vmatprep.subr.bf16.mxu1 %v340_v0  ;;  %161 = vmatprep.subr.bf16.mxu0 %v340_v0 }
  0x27   :  { %294 = vmatpush1.bf16.msra.mxu1 %v305_v9  ;;  %162 = vmatpush1.bf16.msra.mxu0 %v305_v9 }
  0x28   :  { %286 = vmatprep.subr.bf16.mxu1 %v340_v0  ;;  %163 = vmatprep.subr.bf16.mxu0 %v340_v0 }
  0x2b   :  { %295 = vmatpush1.bf16.msra.mxu1 %v306_v10  ;;  %164 = vmatpush1.bf16.msra.mxu0 %v306_v10 }
  0x2c   :  { %287 = vmatprep.subr.bf16.mxu1 %v340_v0  ;;  %179 = vmatprep.subr.bf16.mxu0 %v340_v0 }
  0x2f   :  { %296 = vmatpush2.bf16.msra.mxu1 %v307_v11  ;;  %180 = vmatpush2.bf16.msra.mxu0 %v307_v11 }
  0x32   :  { %190 = vmatmul.mubr.bf16.vlgmr.msra.gmra.mxu1 %v308_v12  ;;  %182 = vmatmul.mubr.bf16.vlgmr.msra.gmra.mxu0 %v311_v13 }
  0x33   :  { %266 = vmatprep.mubr.msk.bf16.mxu1 %vm139_vm0, %v314_v14 }
  0x3a   :  { %198 = vmatmul.mubr.bf16.gmra.mxu1 %v316_v15 }
  0xf2   :  { %v191_v17 = vpop.f32.mrf.mxu1  ;;  %v183_v18 = vpop.f32.mrf.mxu0 }
  0xf3   :  { %v192_v19 = vadd.f32 %v248_v16, %v191_v17  ;;  %v184_v20 = vadd.f32 %v248_v16, %v183_v18 }
  0xf4   :  { %v193_v21 = vpop.f32.mrf.mxu1  ;;  %v185_v22 = vpop.f32.mrf.mxu0 }
  0xf5   :  { %v208_v23 = vmax.f32 %v192_v19, 0.0  ;;  %v206_v24 = vmax.f32 %v184_v20, 0.0 }
  0xf6   :  { %v194_v25 = vpop.f32.mrf.mxu1  ;;  %v186_v26 = vpop.f32.mrf.mxu0 }
  0xf7   :  { %v275_v27 = vpack.c.bf16 %v208_v23, %v208_v23  ;;  %v273_v28 = vpack.c.bf16 %v206_v24, %v206_v24  ;;  %v195_v29 = vadd.f32 %v248_v16, %v194_v25  ;;  %v187_v30 = vadd.f32 %v248_v16, %v186_v26 }
  0xf8   :  { %v196_v31 = vpop.f32.mrf.mxu1  ;;  %v188_v32 = vpop.f32.mrf.mxu0 }
  0xf9   :  { %239 = vst.msk [vmem:[%s439_s3 + $0x8] sm:$0xf] %vm236_vm1, %v275_v27  ;;  %237 = vst.msk [vmem:[%s439_s3] sm:$0xf] %vm236_vm1, %v273_v28  ;;  %v209_v33 = vmax.f32 %v195_v29, 0.0  ;;  %v207_v34 = vmax.f32 %v187_v30, 0.0 }
  0xfa   :  { %v199_v35 = vpop.f32.mrf.mxu1 }
  0xfb   :  { %v276_v36 = vpack.c.bf16 %v209_v33, %v209_v33  ;;  %v274_v37 = vpack.c.bf16 %v207_v34, %v207_v34  ;;  %v200_v38 = vadd.f32 %v248_v16, %v199_v35 }
  0xfc   :  { %v201_v39 = vpop.f32.mrf.mxu1 }
  0xfd   :  { %240 = vst.msk [vmem:[%s439_s3 + $0xc] sm:$0xf] %vm236_vm1, %v276_v36  ;;  %238 = vst.msk [vmem:[%s439_s3 + $0x4] sm:$0xf] %vm236_vm1, %v274_v37  ;;  %v210_v40 = vmax.f32 %v200_v38, 0.0 }
  0xfe   :  { %v202_v41 = vpop.f32.mrf.mxu1 }
  0xff   :  { %v277_v42 = vpack.c.bf16 %v210_v40, %v210_v40  ;;  %v203_v43 = vadd.f32 %v248_v16, %v202_v41 }
 0x100   :  { %v204_v44 = vpop.f32.mrf.mxu1 }
 0x101   :  { %241 = vst.msk [vmem:[%s439_s3 + $0x10] sm:$0xf] %vm236_vm1, %v277_v42  ;;  %v211_v45 = vmax.f32 %v203_v43, 0.0 }
 0x103   :  { %v278_v46 = vpack.c.bf16 %v211_v45, %v211_v45 }
 0x105   :  { %242 = vst.msk [vmem:[%s439_s3 + $0x14] sm:$0xf] %vm236_vm1, %v278_v46 }
 0x106   :  { %247 = vsyncpa [#allocation3], 1 }

// kernel: _lambda_.47
= control target key start
LH: loop header
LB: loop body
LE: loop exit
PB: predicated region body
PF: predicated region fallthrough
CT: control target
= control target key end

     0   :  { %v155_v0 = vmov 0.0   ;;  %vm156_vm0 = vmmov 0   ;;  %vm61_vm1 = vcmask 523264   ;;  %s201_s1 = inlined_call_operand.vmem [shape: bf16[64,128], index: 1, kind: input, shape index: {}]   ;;  %s202_s0 = inlined_call_operand.vmem [shape: bf16[12,64], index: 0, kind: input, shape index: {}]   ;;  %s203_s2 = inlined_call_operand.vmem [shape: f32[1,128], index: 2, kind: input, shape index: {}]   ;;  %s204_s3 = inlined_call_operand.vmem [shape: bf16[12,128], index: 3, kind: output, shape index: {}]  }
   0x1   :  { %136 = vmatprep.subr.bf16.mxu0 %v155_v0  ;;  %v150_v1 = vld [vmem:[%s201_s1 + $0x18] sm:$0xff]   ;;  %144 = vmatprep.mubr.msk.bf16.mxu0 %vm156_vm0, %v155_v0  ;;  %v151_v2 = vld [vmem:[%s201_s1 + $0x10] sm:$0xff]   ;;  %v152_v3 = vld [vmem:[%s201_s1 + $0x8] sm:$0xff]  }
   0x2   :  { %137 = vmatpush3.bf16.msra.mxu0 %v150_v1  ;;  %v153_v4 = vld [vmem:[%s201_s1] sm:$0xff]  }
   0x3   :  { %138 = vmatprep.subr.bf16.mxu0 %v155_v0  ;;  %v154_v5 = vld [vmem:[%s202_s0] sm:$0x3f]  }
   0x4   :  { %v120_v6 = vld [vmem:[%s203_s2] ss:$0 sm:$0xff] }
   0x6   :  { %139 = vmatpush3.bf16.msra.mxu0 %v151_v2 }
   0x7   :  { %140 = vmatprep.subr.bf16.mxu0 %v155_v0 }
   0xa   :  { %141 = vmatpush3.bf16.msra.mxu0 %v152_v3 }
   0xb   :  { %142 = vmatprep.subr.bf16.mxu0 %v155_v0 }
   0xe   :  { %143 = vmatpush3.bf16.msra.mxu0 %v153_v4 }
  0x11   :  { %145 = vmatmul.mubr.msk.bf16.vlgmr.msra.gmra.mxu0 %vm61_vm1, %v154_v5 }
  0xd1   :  { %v99_v7 = vpop.f32.mrf.mxu0 }
  0xd2   :  { %v100_v8 = vadd.f32 %v120_v6, %v99_v7 }
  0xd3   :  { %v146_v9 = vpop.f32.mrf.mxu0 }
  0xd4   :  { %v129_v10 = vpack.c.bf16 %v100_v8, %v100_v8 }
  0xd5   :  { %v102_v11 = vpop.f32.mrf.mxu0 }
  0xd6   :  { %114 = vst [vmem:[%s204_s3] sm:$0xf] %v129_v10  ;;  %v103_v12 = vadd.f32 %v120_v6, %v102_v11 }
  0xd7   :  { %v147_v13 = vpop.f32.mrf.mxu0 }
  0xd8   :  { %v130_v14 = vpack.c.bf16 %v103_v12, %v103_v12 }
  0xda   :  { %115 = vst [vmem:[%s204_s3 + $0x4] sm:$0x3] %v130_v14 }

// kernel: _lambda_.44
= control target key start
LH: loop header
LB: loop body
LE: loop exit
PB: predicated region body
PF: predicated region fallthrough
CT: control target
= control target key end

     0   :  { %9 = vsyncpa [#allocation3], 0  ;;  %s276_s15 = smov [#allocation2]   ;;  %s352_s0 = inlined_call_operand.vmem [shape: bf16[48,16], index: 0, kind: input, shape index: {}]   ;;  %s353_s1 = inlined_call_operand.vmem [shape: bf16[16,64], index: 1, kind: input, shape index: {}]   ;;  %s354_s2 = inlined_call_operand.hbm [shape: f32[1,64], index: 2, kind: input, shape index: {}]   ;;  %s355_s3 = inlined_call_operand.vmem [shape: bf16[48,64], index: 3, kind: input, shape index: {}]   ;;  %s356_s4 = inlined_call_operand.vmem [shape: bf16[48,64], index: 4, kind: output, shape index: {}]  }
   0x1   :  { %s20_s16 = sshll.u32 %s276_s15, 4  ;;  %s21_s16 = int_to_ptr.vmem [resolvable:$true] %s20_s16 }
   0x2   :  { %s262_s17 = scalar_lea.vmem %s21_s16, 16  ;;  %s266_s18 = scalar_lea.vmem %s21_s16, 32 }
   0x3   :  { %p263_p0 = scmp.ne.s32.totalorder %s21_s16, %s262_s17  ;;  %p267_p1 = scmp.lt.s32.totalorder %s21_s16, %s21_s16 }
   0x4   :  { %p268_p2 = scmp.lt.s32.totalorder %s266_s18, %s262_s17 }
   0x6   :  { %p269_p3 = por %p268_p2, %p267_p1 }
   0x8   :  { %p270_p4 = pnand %p269_p3, %p263_p0 }
   0xa   :  { %273 = shalt.err (!%p270_p4)
}
   0xb   :  { %23 = dma.hbm_to_vmem [thread:$0]  %s354_s2, 16, %s21_s16, [#allocation3]  }
   0xc   :  { %274 = dma.done.wait [#allocation3], 16  }
   0xd   :  { %275 = vsyncadd [#allocation3], 4294967280  ;;  %v277_v0 = vmov 0.0   ;;  %vm278_vm0 = vmmov 0   ;;  %v250_v1 = vld [vmem:[%s353_s1] sm:$0xff]   ;;  %v251_v2 = vld [vmem:[%s352_s0 + $0x8] sm:$0xff]  }
   0xe   :  { %245 = vmatprep.subr.bf16.mxu1 %v277_v0  ;;  %231 = vmatprep.subr.bf16.mxu0 %v277_v0  ;;  %vm66_vm1 = vcmask 130048   ;;  %v252_v3 = vld [vmem:[%s352_s0] sm:$0xff]   ;;  %v253_v4 = vld [vmem:[%s352_s0 + $0x10] sm:$0xff]   ;;  %v225_v5 = vld [vmem:[%s355_s3 + $0x8] sm:$0xff]   ;;  %vm181_vm2 = vcmask 519168  }
   0xf   :  { %237 = vmatprep.mubr.msk.bf16.mxu1 %vm278_vm0, %v277_v0  ;;  %233 = vmatprep.mubr.msk.bf16.mxu0 %vm278_vm0, %v277_v0  ;;  %v214_v6 = vld [vmem:[%s355_s3] sm:$0xff]   ;;  %v219_v8 = vunpack.c.l.bf16 %v225_v5  ;;  %v220_v18 = vunpack.c.h.bf16 %v225_v5  ;;  %v226_v20 = vld [vmem:[%s355_s3 + $0x10] sm:$0xff]  }
  0x10   :  { %246 = vmatpush3.bf16.msra.mxu1 %v250_v1  ;;  %232 = vmatpush3.bf16.msra.mxu0 %v250_v1  ;;  %v193_v7 = vld [vmem:[#allocation2] ss:$0 sm:$0xff]  ;;  %v215_v9 = vunpack.c.l.bf16 %v214_v6  ;;  %v216_v19 = vunpack.c.h.bf16 %v214_v6  ;;  %v223_v29 = vunpack.c.l.bf16 %v226_v20  ;;  %v224_v42 = vunpack.c.h.bf16 %v226_v20 }
  0x13   :  { %238 = vmatmul.mubr.msk.bf16.vlgmr.msra.gmra.mxu1 %vm66_vm1, %v251_v2  ;;  %234 = vmatmul.mubr.msk.bf16.vlgmr.msra.gmra.mxu0 %vm66_vm1, %v252_v3 }
  0x14   :  { %241 = vmatprep.mubr.msk.bf16.mxu1 %vm278_vm0, %v277_v0 }
  0x1b   :  { %242 = vmatmul.mubr.msk.bf16.gmra.mxu1 %vm66_vm1, %v253_v4 }
  0xd3   :  { %v118_v10 = vpop.f32.mrf.mxu1  ;;  %v110_v11 = vpop.f32.mrf.mxu0 }
  0xd4   :  { %v119_v12 = vadd.f32 %v193_v7, %v118_v10  ;;  %v111_v13 = vadd.f32 %v193_v7, %v110_v11 }
  0xd5   :  { %v239_v14 = vpop.f32.mrf.mxu1  ;;  %v235_v15 = vpop.f32.mrf.mxu0 }
  0xd6   :  { %v147_v16 = vadd.f32 %v219_v8, %v119_v12  ;;  %v145_v17 = vadd.f32 %v215_v9, %v111_v13 }
  0xd7   :  { %v121_v21 = vpop.f32.mrf.mxu1  ;;  %v113_v22 = vpop.f32.mrf.mxu0 }
  0xd8   :  { %v153_v23 = vmax.f32 %v147_v16, 0.0  ;;  %v151_v24 = vmax.f32 %v145_v17, 0.0  ;;  %v122_v25 = vadd.f32 %v193_v7, %v121_v21  ;;  %v114_v26 = vadd.f32 %v193_v7, %v113_v22 }
  0xd9   :  { %v240_v27 = vpop.f32.mrf.mxu1  ;;  %v236_v28 = vpop.f32.mrf.mxu0 }
  0xda   :  { %v209_v30 = vpack.c.bf16 %v153_v23, %v153_v23  ;;  %v207_v31 = vpack.c.bf16 %v151_v24, %v151_v24  ;;  %v148_v32 = vadd.f32 %v220_v18, %v122_v25  ;;  %v146_v33 = vadd.f32 %v216_v19, %v114_v26 }
  0xdb   :  { %v126_v34 = vpop.f32.mrf.mxu1 }
  0xdc   :  { %184 = vst.msk [vmem:[%s356_s4 + $0x8] sm:$0xf] %vm181_vm2, %v209_v30  ;;  %182 = vst.msk [vmem:[%s356_s4] sm:$0xf] %vm181_vm2, %v207_v31  ;;  %v154_v35 = vmax.f32 %v148_v32, 0.0  ;;  %v152_v36 = vmax.f32 %v146_v33, 0.0  ;;  %v127_v37 = vadd.f32 %v193_v7, %v126_v34 }
  0xdd   :  { %v243_v38 = vpop.f32.mrf.mxu1 }
  0xde   :  { %v210_v39 = vpack.c.bf16 %v154_v35, %v154_v35  ;;  %v208_v40 = vpack.c.bf16 %v152_v36, %v152_v36  ;;  %v149_v41 = vadd.f32 %v223_v29, %v127_v37 }
  0xdf   :  { %v129_v43 = vpop.f32.mrf.mxu1 }
  0xe0   :  { %185 = vst.msk [vmem:[%s356_s4 + $0xc] sm:$0xf] %vm181_vm2, %v210_v39  ;;  %183 = vst.msk [vmem:[%s356_s4 + $0x4] sm:$0xf] %vm181_vm2, %v208_v40  ;;  %v155_v44 = vmax.f32 %v149_v41, 0.0  ;;  %v130_v45 = vadd.f32 %v193_v7, %v129_v43 }
  0xe1   :  { %v244_v46 = vpop.f32.mrf.mxu1 }
  0xe2   :  { %v211_v47 = vpack.c.bf16 %v155_v44, %v155_v44  ;;  %v150_v48 = vadd.f32 %v224_v42, %v130_v45 }
  0xe4   :  { %186 = vst.msk [vmem:[%s356_s4 + $0x10] sm:$0xf] %vm181_vm2, %v211_v47  ;;  %v156_v49 = vmax.f32 %v150_v48, 0.0 }
  0xe6   :  { %v212_v50 = vpack.c.bf16 %v156_v49, %v156_v49 }
  0xe8   :  { %187 = vst.msk [vmem:[%s356_s4 + $0x14] sm:$0xf] %vm181_vm2, %v212_v50 }
  0xe9   :  { %192 = vsyncpa [#allocation3], 1 }

// kernel: _lambda_.45
= control target key start
LH: loop header
LB: loop body
LE: loop exit
PB: predicated region body
PF: predicated region fallthrough
CT: control target
= control target key end

     0   :  { %v250_v0 = vmov 0.0   ;;  %vm251_vm0 = vmmov 0   ;;  %vm75_vm1 = vcmask 523264   ;;  %vm172_vm2 = vcmask 257024   ;;  %s323_s1 = inlined_call_operand.vmem [shape: bf16[64,32], index: 1, kind: input, shape index: {}]   ;;  %s324_s0 = inlined_call_operand.vmem [shape: bf16[48,64], index: 0, kind: input, shape index: {}]   ;;  %s325_s2 = inlined_call_operand.vmem [shape: f32[1,32], index: 2, kind: input, shape index: {}]   ;;  %s326_s3 = inlined_call_operand.vmem [shape: bf16[48,32], index: 3, kind: output, shape index: {}]  }
   0x1   :  { %233 = vmatprep.subr.bf16.mxu1 %v250_v0  ;;  %v243_v1 = vld [vmem:[%s323_s1 + $0x18] sm:$0xff]   ;;  %213 = vmatprep.subr.bf16.mxu0 %v250_v0  ;;  %v244_v2 = vld [vmem:[%s323_s1 + $0x10] sm:$0xff]   ;;  %v245_v3 = vld [vmem:[%s323_s1 + $0x8] sm:$0xff]  }
   0x2   :  { %225 = vmatprep.mubr.msk.bf16.mxu1 %vm251_vm0, %v250_v0  ;;  %221 = vmatprep.mubr.msk.bf16.mxu0 %vm251_vm0, %v250_v0  ;;  %v246_v4 = vld [vmem:[%s323_s1] sm:$0xff]   ;;  %v247_v5 = vld [vmem:[%s324_s0 + $0x8] sm:$0xff]   ;;  %v249_v7 = vld [vmem:[%s324_s0 + $0x10] sm:$0xff]  }
   0x3   :  { %237 = vmatpush3.bf16.msra.mxu1 %v243_v1  ;;  %214 = vmatpush3.bf16.msra.mxu0 %v243_v1  ;;  %v248_v6 = vld [vmem:[%s324_s0] sm:$0xff]  }
   0x4   :  { %234 = vmatprep.subr.bf16.mxu1 %v250_v0  ;;  %215 = vmatprep.subr.bf16.mxu0 %v250_v0  ;;  %v183_v8 = vld [vmem:[%s325_s2] ss:$0 sm:$0xff] }
   0x7   :  { %238 = vmatpush3.bf16.msra.mxu1 %v244_v2  ;;  %216 = vmatpush3.bf16.msra.mxu0 %v244_v2 }
   0x8   :  { %235 = vmatprep.subr.bf16.mxu1 %v250_v0  ;;  %217 = vmatprep.subr.bf16.mxu0 %v250_v0 }
   0xb   :  { %239 = vmatpush3.bf16.msra.mxu1 %v245_v3  ;;  %218 = vmatpush3.bf16.msra.mxu0 %v245_v3 }
   0xc   :  { %236 = vmatprep.subr.bf16.mxu1 %v250_v0  ;;  %219 = vmatprep.subr.bf16.mxu0 %v250_v0 }
   0xf   :  { %240 = vmatpush3.bf16.msra.mxu1 %v246_v4  ;;  %220 = vmatpush3.bf16.msra.mxu0 %v246_v4 }
  0x12   :  { %226 = vmatmul.mubr.msk.bf16.vlgmr.msra.gmra.mxu1 %vm75_vm1, %v247_v5  ;;  %222 = vmatmul.mubr.msk.bf16.vlgmr.msra.gmra.mxu0 %vm75_vm1, %v248_v6 }
  0x13   :  { %229 = vmatprep.mubr.msk.bf16.mxu1 %vm251_vm0, %v250_v0 }
  0x1a   :  { %230 = vmatmul.mubr.msk.bf16.gmra.mxu1 %vm75_vm1, %v249_v7 }
  0xd2   :  { %v127_v9 = vpop.f32.mrf.mxu1  ;;  %v119_v10 = vpop.f32.mrf.mxu0 }
  0xd3   :  { %v128_v11 = vadd.f32 %v183_v8, %v127_v9  ;;  %v120_v12 = vadd.f32 %v183_v8, %v119_v10 }
  0xd4   :  { %v227_v13 = vpop.f32.mrf.mxu1  ;;  %v223_v14 = vpop.f32.mrf.mxu0 }
  0xd5   :  { %v144_v15 = vmax.f32 %v128_v11, 0.0  ;;  %v142_v16 = vmax.f32 %v120_v12, 0.0 }
  0xd6   :  { %v130_v17 = vpop.f32.mrf.mxu1  ;;  %v122_v18 = vpop.f32.mrf.mxu0 }
  0xd7   :  { %v202_v19 = vpack.c.bf16 %v144_v15, %v144_v15  ;;  %v200_v20 = vpack.c.bf16 %v142_v16, %v142_v16  ;;  %v131_v21 = vadd.f32 %v183_v8, %v130_v17  ;;  %v123_v22 = vadd.f32 %v183_v8, %v122_v18 }
  0xd8   :  { %v228_v23 = vpop.f32.mrf.mxu1  ;;  %v224_v24 = vpop.f32.mrf.mxu0 }
  0xd9   :  { %175 = vst.msk [vmem:[%s326_s3 + $0x8] sm:$0xf] %vm172_vm2, %v202_v19  ;;  %173 = vst.msk [vmem:[%s326_s3] sm:$0xf] %vm172_vm2, %v200_v20  ;;  %v145_v25 = vmax.f32 %v131_v21, 0.0  ;;  %v143_v26 = vmax.f32 %v123_v22, 0.0 }
  0xda   :  { %v135_v27 = vpop.f32.mrf.mxu1 }
  0xdb   :  { %v203_v28 = vpack.c.bf16 %v145_v25, %v145_v25  ;;  %v201_v29 = vpack.c.bf16 %v143_v26, %v143_v26  ;;  %v136_v30 = vadd.f32 %v183_v8, %v135_v27 }
  0xdc   :  { %v231_v31 = vpop.f32.mrf.mxu1 }
  0xdd   :  { %176 = vst.msk [vmem:[%s326_s3 + $0xc] sm:$0xf] %vm172_vm2, %v203_v28  ;;  %174 = vst.msk [vmem:[%s326_s3 + $0x4] sm:$0xf] %vm172_vm2, %v201_v29  ;;  %v146_v32 = vmax.f32 %v136_v30, 0.0 }
  0xde   :  { %v138_v33 = vpop.f32.mrf.mxu1 }
  0xdf   :  { %v204_v34 = vpack.c.bf16 %v146_v32, %v146_v32  ;;  %v139_v35 = vadd.f32 %v183_v8, %v138_v33 }
  0xe0   :  { %v232_v36 = vpop.f32.mrf.mxu1 }
  0xe1   :  { %177 = vst.msk [vmem:[%s326_s3 + $0x10] sm:$0xf] %vm172_vm2, %v204_v34  ;;  %v147_v37 = vmax.f32 %v139_v35, 0.0 }
  0xe3   :  { %v205_v38 = vpack.c.bf16 %v147_v37, %v147_v37 }
  0xe5   :  { %178 = vst.msk [vmem:[%s326_s3 + $0x14] sm:$0xf] %vm172_vm2, %v205_v38 }

// kernel: _lambda_.48
= control target key start
LH: loop header
LB: loop body
LE: loop exit
PB: predicated region body
PF: predicated region fallthrough
CT: control target
= control target key end

     0   :  { %9 = vsyncpa [#allocation3], 0  ;;  %s176_s15 = smov [#allocation2]   ;;  %s228_s0 = inlined_call_operand.vmem [shape: bf16[12,32], index: 0, kind: input, shape index: {}]   ;;  %s229_s1 = inlined_call_operand.vmem [shape: bf16[32,128], index: 1, kind: input, shape index: {}]   ;;  %s230_s2 = inlined_call_operand.hbm [shape: f32[1,128], index: 2, kind: input, shape index: {}]   ;;  %s231_s3 = inlined_call_operand.vmem [shape: bf16[12,128], index: 3, kind: input, shape index: {}]   ;;  %s232_s4 = inlined_call_operand.vmem [shape: bf16[12,128], index: 4, kind: output, shape index: {}]  }
   0x1   :  { %s20_s16 = sshll.u32 %s176_s15, 4  ;;  %s21_s16 = int_to_ptr.vmem [resolvable:$true] %s20_s16 }
   0x2   :  { %s162_s17 = scalar_lea.vmem %s21_s16, 16  ;;  %s166_s18 = scalar_lea.vmem %s21_s16, 32 }
   0x3   :  { %p163_p0 = scmp.ne.s32.totalorder %s21_s16, %s162_s17  ;;  %p167_p1 = scmp.lt.s32.totalorder %s21_s16, %s21_s16 }
   0x4   :  { %p168_p2 = scmp.lt.s32.totalorder %s166_s18, %s162_s17 }
   0x6   :  { %p169_p3 = por %p168_p2, %p167_p1 }
   0x8   :  { %p170_p4 = pnand %p169_p3, %p163_p0 }
   0xa   :  { %173 = shalt.err (!%p170_p4)
}
   0xb   :  { %23 = dma.hbm_to_vmem [thread:$0]  %s230_s2, 16, %s21_s16, [#allocation3]  }
   0xc   :  { %174 = dma.done.wait [#allocation3], 16  }
   0xd   :  { %175 = vsyncadd [#allocation3], 4294967280  ;;  %v177_v0 = vmov 0.0   ;;  %vm178_vm0 = vmmov 0   ;;  %v151_v1 = vld [vmem:[%s229_s1 + $0x8] sm:$0xff]   ;;  %v152_v2 = vld [vmem:[%s229_s1] sm:$0xff]  }
   0xe   :  { %140 = vmatprep.subr.bf16.mxu0 %v177_v0  ;;  %144 = vmatprep.mubr.msk.bf16.mxu0 %vm178_vm0, %v177_v0  ;;  %v153_v3 = vld [vmem:[%s228_s0] sm:$0x3f]   ;;  %vm60_vm1 = vcmask 261120  }
   0xf   :  { %141 = vmatpush3.bf16.msra.mxu0 %v151_v1  ;;  %v105_v4 = vld [vmem:[%s231_s3] sm:$0xf]  ;;  %v106_v8 = vld [vmem:[%s231_s3 + $0x4] sm:$0x3] }
  0x10   :  { %142 = vmatprep.subr.bf16.mxu0 %v177_v0  ;;  %v128_v5 = vld [vmem:[#allocation2] ss:$0 sm:$0xff]  ;;  %v107_v6 = vunpack.c.l.bf16 %v105_v4  ;;  %v108_v12 = vunpack.c.l.bf16 %v106_v8 }
  0x13   :  { %143 = vmatpush3.bf16.msra.mxu0 %v152_v2 }
  0x16   :  { %145 = vmatmul.mubr.msk.bf16.vlgmr.msra.gmra.mxu0 %vm60_vm1, %v153_v3 }
  0xd6   :  { %v98_v7 = vpop.f32.mrf.mxu0 }
  0xd7   :  { %v99_v9 = vadd.f32 %v128_v5, %v98_v7 }
  0xd8   :  { %v146_v10 = vpop.f32.mrf.mxu0 }
  0xd9   :  { %v109_v11 = vadd.f32 %v107_v6, %v99_v9 }
  0xda   :  { %v101_v13 = vpop.f32.mrf.mxu0 }
  0xdb   :  { %v111_v14 = vmax.f32 %v109_v11, 0.0  ;;  %v102_v15 = vadd.f32 %v128_v5, %v101_v13 }
  0xdc   :  { %v147_v16 = vpop.f32.mrf.mxu0 }
  0xdd   :  { %v135_v17 = vpack.c.bf16 %v111_v14, %v111_v14  ;;  %v110_v18 = vadd.f32 %v108_v12, %v102_v15 }
  0xdf   :  { %121 = vst [vmem:[%s232_s4] sm:$0xf] %v135_v17  ;;  %v112_v19 = vmax.f32 %v110_v18, 0.0 }
  0xe1   :  { %v136_v20 = vpack.c.bf16 %v112_v19, %v112_v19 }
  0xe3   :  { %122 = vst [vmem:[%s232_s4 + $0x4] sm:$0x3] %v136_v20 }
  0xe4   :  { %127 = vsyncpa [#allocation3], 1 }

// kernel: _lambda_.46
= control target key start
LH: loop header
LB: loop body
LE: loop exit
PB: predicated region body
PF: predicated region fallthrough
CT: control target
= control target key end

     0   :  { %v373_v1 = vmov 0.0   ;;  %vm374_vm0 = vmmov 0   ;;  %vm185_vm1 = vcmask 261120   ;;  %vm281_vm2 = vcmask 257024   ;;  %s467_s1 = inlined_call_operand.vmem [shape: bf16[288,32], index: 1, kind: input, shape index: {}]   ;;  %s468_s0 = inlined_call_operand.vmem [shape: bf16[12,288], index: 0, kind: input, shape index: {}]   ;;  %s469_s2 = inlined_call_operand.vmem [shape: f32[1,32], index: 2, kind: input, shape index: {}]   ;;  %s470_s3 = inlined_call_operand.vmem [shape: bf16[12,32], index: 3, kind: output, shape index: {}]  }
   0x1   :  { %v351_v0 = vld [vmem:[%s467_s1 + $0x78] sm:$0xff]   ;;  %341 = vmatprep.subr.bf16.mxu1 %v373_v1  ;;  %345 = vmatprep.mubr.msk.bf16.mxu1 %vm374_vm0, %v373_v1  ;;  %v353_v3 = vld [vmem:[%s467_s1 + $0x70] sm:$0xff]   ;;  %v355_v5 = vld [vmem:[%s467_s1 + $0x68] sm:$0xff]   ;;  %vm283_vm3 = vcmask 254976  }
   0x2   :  { %v352_v2 = vld [vmem:[%s467_s1 + $0x38] sm:$0xff]   ;;  %316 = vmatprep.subr.bf16.mxu0 %v351_v0  ;;  %v354_v4 = vld [vmem:[%s467_s1 + $0x30] sm:$0xff]   ;;  %v356_v6 = vld [vmem:[%s467_s1 + $0x28] sm:$0xff]  }
   0x3   :  { %317 = vmatpush3.bf16.msra.mxu0 %v352_v2  ;;  %v357_v7 = vld [vmem:[%s467_s1 + $0x60] sm:$0xff]   ;;  %v359_v9 = vld [vmem:[%s467_s1 + $0x58] sm:$0xff]   ;;  %v365_v10 = vld [vmem:[%s467_s1 + $0x88] sm:$0xff]  }
   0x4   :  { %318 = vmatprep.subr.bf16.mxu0 %v353_v3  ;;  %v358_v8 = vld [vmem:[%s467_s1 + $0x20] sm:$0xff]   ;;  %v360_v11 = vld [vmem:[%s467_s1 + $0x18] sm:$0xff]   ;;  %v361_v12 = vld [vmem:[%s467_s1 + $0x50] sm:$0xff]   ;;  %342 = vmatpush3.bf16.msra.mxu1 %v365_v10 }
   0x5   :  { %343 = vmatprep.subr.bf16.mxu1 %v373_v1  ;;  %v368_v13 = vld [vmem:[%s467_s1 + $0x80] sm:$0xff]   ;;  %v362_v14 = vld [vmem:[%s467_s1 + $0x10] sm:$0xff]   ;;  %v363_v16 = vld [vmem:[%s467_s1 + $0x48] sm:$0xff]  }
   0x6   :  { %v371_v15 = vld [vmem:[%s468_s0 + $0x4] ss:$12 sps:$4 sm:$0x3f]   ;;  %v372_v17 = vld [vmem:[%s468_s0 + $0x8] ss:$12 sps:$4 sm:$0x3f]  }
   0x7   :  { %319 = vmatpush3.bf16.msra.mxu0 %v354_v4  ;;  %221 = vmatprep.mubr.bf16.mxu0 %v371_v15  ;;  %v364_v18 = vld [vmem:[%s467_s1 + $0x8] sm:$0xff]   ;;  %v366_v19 = vld [vmem:[%s467_s1 + $0x40] sm:$0xff]  }
   0x8   :  { %320 = vmatprep.subr.bf16.mxu0 %v355_v5  ;;  %344 = vmatpush3.bf16.msra.mxu1 %v368_v13  ;;  %v367_v20 = vld [vmem:[%s467_s1] sm:$0xff]  }
   0x9   :  { %v369_v21 = vld [vmem:[%s468_s0] ss:$12 sps:$4 sm:$0x3f]  }
   0xa   :  { %v289_v27 = vld [vmem:[%s469_s2] ss:$0 sm:$0xff] }
   0xb   :  { %321 = vmatpush3.bf16.msra.mxu0 %v356_v6  ;;  %346 = vmatmul.mubr.msk.bf16.vlgmr.msra.gmra.mxu1 %vm185_vm1, %v372_v17 }
   0xc   :  { %322 = vmatprep.subr.bf16.mxu0 %v357_v7 }
   0xf   :  { %323 = vmatpush3.bf16.msra.mxu0 %v358_v8 }
  0x10   :  { %324 = vmatprep.subr.bf16.mxu0 %v359_v9 }
  0x13   :  { %325 = vmatpush3.bf16.msra.mxu0 %v360_v11 }
  0x14   :  { %326 = vmatprep.subr.bf16.mxu0 %v361_v12 }
  0x17   :  { %327 = vmatpush3.bf16.msra.mxu0 %v362_v14 }
  0x18   :  { %328 = vmatprep.subr.bf16.mxu0 %v363_v16 }
  0x1b   :  { %329 = vmatpush3.bf16.msra.mxu0 %v364_v18 }
  0x1c   :  { %330 = vmatprep.subr.bf16.mxu0 %v366_v19 }
  0x1f   :  { %331 = vmatpush3.bf16.msra.mxu0 %v367_v20 }
  0x22   :  { %222 = vmatmul.mubr.bf16.vlgmr.msra.gmra.mxu0 %v369_v21 }
  0xcb   :  { %v264_v22 = vpop.f32.mrf.mxu1 }
  0xcd   :  { %v347_v23 = vpop.f32.mrf.mxu1 }
  0xcf   :  { %v267_v24 = vpop.f32.mrf.mxu1 }
  0xd1   :  { %v348_v25 = vpop.f32.mrf.mxu1 }
  0xe2   :  { %v332_v26 = vpop.f32.mrf.mxu0 }
  0xe4   :  { %v333_v28 = vpop.f32.mrf.mxu0 }
  0xe5   :  { %v334_v29 = vadd.f32 %v333_v28, %v332_v26 }
  0xe6   :  { %v335_v30 = vpop.f32.mrf.mxu0 }
  0xe7   :  { %v224_v31 = vadd.f32 %v334_v29, %v289_v27 }
  0xe8   :  { %v336_v32 = vpop.f32.mrf.mxu0 }
  0xe9   :  { %v265_v33 = vadd.f32 %v264_v22, %v224_v31  ;;  %v337_v34 = vadd.f32 %v336_v32, %v335_v30 }
  0xeb   :  { %v271_v35 = vmax.f32 %v265_v33, 0.0  ;;  %v227_v36 = vadd.f32 %v337_v34, %v289_v27 }
  0xed   :  { %v314_v37 = vpack.c.bf16 %v271_v35, %v271_v35  ;;  %v268_v38 = vadd.f32 %v267_v24, %v227_v36 }
  0xef   :  { %282 = vst.msk [vmem:[%s470_s3] sm:$0xf] %vm281_vm2, %v314_v37  ;;  %v272_v39 = vmax.f32 %v268_v38, 0.0 }
  0xf1   :  { %v315_v40 = vpack.c.bf16 %v272_v39, %v272_v39 }
  0xf3   :  { %284 = vst.msk [vmem:[%s470_s3 + $0x4] sm:$0x3] %vm283_vm3, %v315_v40 }

// kernel: _lambda_.49
= control target key start
LH: loop header
LB: loop body
LE: loop exit
PB: predicated region body
PF: predicated region fallthrough
CT: control target
= control target key end

     0   :  { %8 = vsyncpa [#allocation3], 0  ;;  %s243_s12 = smov [#allocation2]   ;;  %s302_s0 = inlined_call_operand.vmem [shape: bf16[12,128], index: 0, kind: input, shape index: {}]   ;;  %s303_s1 = inlined_call_operand.vmem [shape: bf16[128,32], index: 1, kind: input, shape index: {}]   ;;  %s304_s2 = inlined_call_operand.hbm [shape: f32[1,32], index: 2, kind: input, shape index: {}]   ;;  %s305_s3 = inlined_call_operand.vmem [shape: bf16[12,32], index: 3, kind: output, shape index: {}]  }
   0x1   :  { %s19_s13 = sshll.u32 %s243_s12, 4  ;;  %s20_s13 = int_to_ptr.vmem [resolvable:$true] %s19_s13 }
   0x2   :  { %s229_s14 = scalar_lea.vmem %s20_s13, 16  ;;  %s233_s15 = scalar_lea.vmem %s20_s13, 32 }
   0x3   :  { %p230_p0 = scmp.ne.s32.totalorder %s20_s13, %s229_s14  ;;  %p234_p1 = scmp.lt.s32.totalorder %s20_s13, %s20_s13 }
   0x4   :  { %p235_p2 = scmp.lt.s32.totalorder %s233_s15, %s229_s14 }
   0x6   :  { %p236_p3 = por %p235_p2, %p234_p1 }
   0x8   :  { %p237_p4 = pnand %p236_p3, %p230_p0 }
   0xa   :  { %240 = shalt.err (!%p237_p4)
}
   0xb   :  { %22 = dma.hbm_to_vmem [thread:$0]  %s304_s2, 16, %s20_s13, [#allocation3]  }
   0xc   :  { %241 = dma.done.wait [#allocation3], 16  }
   0xd   :  { %242 = vsyncadd [#allocation3], 4294967280  ;;  %v244_v0 = vmov 0.0   ;;  %vm245_vm0 = vmmov 0   ;;  %v212_v1 = vld [vmem:[%s303_s1 + $0x38] sm:$0xff]   ;;  %v213_v2 = vld [vmem:[%s303_s1 + $0x30] sm:$0xff]  }
   0xe   :  { %189 = vmatprep.subr.bf16.mxu0 %v244_v0  ;;  %205 = vmatprep.mubr.msk.bf16.mxu0 %vm245_vm0, %v244_v0  ;;  %v214_v3 = vld [vmem:[%s303_s1 + $0x28] sm:$0xff]   ;;  %v215_v4 = vld [vmem:[%s303_s1 + $0x20] sm:$0xff]   ;;  %v216_v5 = vld [vmem:[%s303_s1 + $0x18] sm:$0xff]   ;;  %vm157_vm1 = vcmask 257024   ;;  %vm159_vm2 = vcmask 254976  }
   0xf   :  { %190 = vmatpush3.bf16.msra.mxu0 %v212_v1  ;;  %v217_v6 = vld [vmem:[%s303_s1 + $0x10] sm:$0xff]   ;;  %v218_v7 = vld [vmem:[%s303_s1 + $0x8] sm:$0xff]   ;;  %v219_v8 = vld [vmem:[%s303_s1] sm:$0xff]  }
  0x10   :  { %191 = vmatprep.subr.bf16.mxu0 %v244_v0  ;;  %v220_v9 = vld [vmem:[%s302_s0] sm:$0x3f]  }
  0x11   :  { %v166_v10 = vld [vmem:[#allocation2] ss:$0 sm:$0xff] }
  0x13   :  { %192 = vmatpush3.bf16.msra.mxu0 %v213_v2 }
  0x14   :  { %193 = vmatprep.subr.bf16.mxu0 %v244_v0 }
  0x17   :  { %194 = vmatpush3.bf16.msra.mxu0 %v214_v3 }
  0x18   :  { %195 = vmatprep.subr.bf16.mxu0 %v244_v0 }
  0x1b   :  { %196 = vmatpush3.bf16.msra.mxu0 %v215_v4 }
  0x1c   :  { %197 = vmatprep.subr.bf16.mxu0 %v244_v0 }
  0x1f   :  { %198 = vmatpush3.bf16.msra.mxu0 %v216_v5 }
  0x20   :  { %199 = vmatprep.subr.bf16.mxu0 %v244_v0 }
  0x23   :  { %200 = vmatpush3.bf16.msra.mxu0 %v217_v6 }
  0x24   :  { %201 = vmatprep.subr.bf16.mxu0 %v244_v0 }
  0x27   :  { %202 = vmatpush3.bf16.msra.mxu0 %v218_v7 }
  0x28   :  { %203 = vmatprep.subr.bf16.mxu0 %v244_v0 }
  0x2b   :  { %204 = vmatpush3.bf16.msra.mxu0 %v219_v8 }
  0x2e   :  { %206 = vmatmul.mubr.bf16.vlgmr.msra.gmra.mxu0 %v220_v9 }
  0xee   :  { %v140_v11 = vpop.f32.mrf.mxu0 }
  0xef   :  { %v141_v12 = vadd.f32 %v166_v10, %v140_v11 }
  0xf0   :  { %v207_v13 = vpop.f32.mrf.mxu0 }
  0xf1   :  { %v147_v14 = vmax.f32 %v141_v12, 0.0 }
  0xf2   :  { %v143_v15 = vpop.f32.mrf.mxu0 }
  0xf3   :  { %v178_v16 = vpack.c.bf16 %v147_v14, %v147_v14  ;;  %v144_v17 = vadd.f32 %v166_v10, %v143_v15 }
  0xf4   :  { %v208_v18 = vpop.f32.mrf.mxu0 }
  0xf5   :  { %158 = vst.msk [vmem:[%s305_s3] sm:$0xf] %vm157_vm1, %v178_v16  ;;  %v148_v19 = vmax.f32 %v144_v17, 0.0 }
  0xf7   :  { %v179_v20 = vpack.c.bf16 %v148_v19, %v148_v19 }
  0xf9   :  { %160 = vst.msk [vmem:[%s305_s3 + $0x4] sm:$0x3] %vm159_vm2, %v179_v20 }
  0xfa   :  { %165 = vsyncpa [#allocation3], 1 }

// kernel: _lambda_.51
= control target key start
LH: loop header
LB: loop body
LE: loop exit
PB: predicated region body
PF: predicated region fallthrough
CT: control target
= control target key end

     0   :  { %v140_v0 = vmov 0.0   ;;  %vm141_vm0 = vmmov 0   ;;  %vm48_vm1 = vcmask 261120   ;;  %s191_s1 = inlined_call_operand.vmem [shape: bf16[32,128], index: 1, kind: input, shape index: {}]   ;;  %s192_s0 = inlined_call_operand.vmem [shape: bf16[12,32], index: 0, kind: input, shape index: {}]   ;;  %s193_s3 = inlined_call_operand.vmem [shape: bf16[12,128], index: 3, kind: input, shape index: {}]   ;;  %s194_s2 = inlined_call_operand.vmem [shape: f32[1,128], index: 2, kind: input, shape index: {}]   ;;  %s195_s4 = inlined_call_operand.vmem [shape: bf16[12,128], index: 4, kind: output, shape index: {}]  }
   0x1   :  { %127 = vmatprep.subr.bf16.mxu0 %v140_v0  ;;  %v137_v1 = vld [vmem:[%s191_s1 + $0x8] sm:$0xff]   ;;  %131 = vmatprep.mubr.msk.bf16.mxu0 %vm141_vm0, %v140_v0  ;;  %v138_v2 = vld [vmem:[%s191_s1] sm:$0xff]  }
   0x2   :  { %128 = vmatpush3.bf16.msra.mxu0 %v137_v1  ;;  %v139_v3 = vld [vmem:[%s192_s0] sm:$0x3f]  }
   0x3   :  { %129 = vmatprep.subr.bf16.mxu0 %v140_v0  ;;  %v93_v4 = vld [vmem:[%s193_s3] sm:$0xf]  ;;  %v94_v8 = vld [vmem:[%s193_s3 + $0x4] sm:$0x3] }
   0x4   :  { %v115_v5 = vld [vmem:[%s194_s2] ss:$0 sm:$0xff]  ;;  %v95_v6 = vunpack.c.l.bf16 %v93_v4  ;;  %v96_v12 = vunpack.c.l.bf16 %v94_v8 }
   0x6   :  { %130 = vmatpush3.bf16.msra.mxu0 %v138_v2 }
   0x9   :  { %132 = vmatmul.mubr.msk.bf16.vlgmr.msra.gmra.mxu0 %vm48_vm1, %v139_v3 }
  0xc9   :  { %v86_v7 = vpop.f32.mrf.mxu0 }
  0xca   :  { %v87_v9 = vadd.f32 %v115_v5, %v86_v7 }
  0xcb   :  { %v133_v10 = vpop.f32.mrf.mxu0 }
  0xcc   :  { %v97_v11 = vadd.f32 %v95_v6, %v87_v9 }
  0xcd   :  { %v89_v13 = vpop.f32.mrf.mxu0 }
  0xce   :  { %v99_v14 = vmax.f32 %v97_v11, 0.0  ;;  %v90_v15 = vadd.f32 %v115_v5, %v89_v13 }
  0xcf   :  { %v134_v16 = vpop.f32.mrf.mxu0 }
  0xd0   :  { %v122_v17 = vpack.c.bf16 %v99_v14, %v99_v14  ;;  %v98_v18 = vadd.f32 %v96_v12, %v90_v15 }
  0xd2   :  { %109 = vst [vmem:[%s195_s4] sm:$0xf] %v122_v17  ;;  %v100_v19 = vmax.f32 %v98_v18, 0.0 }
  0xd4   :  { %v123_v20 = vpack.c.bf16 %v100_v19, %v100_v19 }
  0xd6   :  { %110 = vst [vmem:[%s195_s4 + $0x4] sm:$0x3] %v123_v20 }

// kernel: _lambda_.52
= control target key start
LH: loop header
LB: loop body
LE: loop exit
PB: predicated region body
PF: predicated region fallthrough
CT: control target
= control target key end

     0   :  { %8 = vsyncpa [#allocation3], 0  ;;  %s243_s12 = smov [#allocation2]   ;;  %s302_s0 = inlined_call_operand.vmem [shape: bf16[12,128], index: 0, kind: input, shape index: {}]   ;;  %s303_s1 = inlined_call_operand.vmem [shape: bf16[128,64], index: 1, kind: input, shape index: {}]   ;;  %s304_s2 = inlined_call_operand.hbm [shape: f32[1,64], index: 2, kind: input, shape index: {}]   ;;  %s305_s3 = inlined_call_operand.vmem [shape: bf16[12,64], index: 3, kind: output, shape index: {}]  }
   0x1   :  { %s19_s13 = sshll.u32 %s243_s12, 4  ;;  %s20_s13 = int_to_ptr.vmem [resolvable:$true] %s19_s13 }
   0x2   :  { %s229_s14 = scalar_lea.vmem %s20_s13, 16  ;;  %s233_s15 = scalar_lea.vmem %s20_s13, 32 }
   0x3   :  { %p230_p0 = scmp.ne.s32.totalorder %s20_s13, %s229_s14  ;;  %p234_p1 = scmp.lt.s32.totalorder %s20_s13, %s20_s13 }
   0x4   :  { %p235_p2 = scmp.lt.s32.totalorder %s233_s15, %s229_s14 }
   0x6   :  { %p236_p3 = por %p235_p2, %p234_p1 }
   0x8   :  { %p237_p4 = pnand %p236_p3, %p230_p0 }
   0xa   :  { %240 = shalt.err (!%p237_p4)
}
   0xb   :  { %22 = dma.hbm_to_vmem [thread:$0]  %s304_s2, 16, %s20_s13, [#allocation3]  }
   0xc   :  { %241 = dma.done.wait [#allocation3], 16  }
   0xd   :  { %242 = vsyncadd [#allocation3], 4294967280  ;;  %v244_v0 = vmov 0.0   ;;  %vm245_vm0 = vmmov 0   ;;  %v212_v1 = vld [vmem:[%s303_s1 + $0x38] sm:$0xff]   ;;  %v213_v2 = vld [vmem:[%s303_s1 + $0x30] sm:$0xff]  }
   0xe   :  { %189 = vmatprep.subr.bf16.mxu0 %v244_v0  ;;  %205 = vmatprep.mubr.msk.bf16.mxu0 %vm245_vm0, %v244_v0  ;;  %v214_v3 = vld [vmem:[%s303_s1 + $0x28] sm:$0xff]   ;;  %v215_v4 = vld [vmem:[%s303_s1 + $0x20] sm:$0xff]   ;;  %v216_v5 = vld [vmem:[%s303_s1 + $0x18] sm:$0xff]   ;;  %vm157_vm1 = vcmask 519168   ;;  %vm159_vm2 = vcmask 517120  }
   0xf   :  { %190 = vmatpush3.bf16.msra.mxu0 %v212_v1  ;;  %v217_v6 = vld [vmem:[%s303_s1 + $0x10] sm:$0xff]   ;;  %v218_v7 = vld [vmem:[%s303_s1 + $0x8] sm:$0xff]   ;;  %v219_v8 = vld [vmem:[%s303_s1] sm:$0xff]  }
  0x10   :  { %191 = vmatprep.subr.bf16.mxu0 %v244_v0  ;;  %v220_v9 = vld [vmem:[%s302_s0] sm:$0x3f]  }
  0x11   :  { %v166_v10 = vld [vmem:[#allocation2] ss:$0 sm:$0xff] }
  0x13   :  { %192 = vmatpush3.bf16.msra.mxu0 %v213_v2 }
  0x14   :  { %193 = vmatprep.subr.bf16.mxu0 %v244_v0 }
  0x17   :  { %194 = vmatpush3.bf16.msra.mxu0 %v214_v3 }
  0x18   :  { %195 = vmatprep.subr.bf16.mxu0 %v244_v0 }
  0x1b   :  { %196 = vmatpush3.bf16.msra.mxu0 %v215_v4 }
  0x1c   :  { %197 = vmatprep.subr.bf16.mxu0 %v244_v0 }
  0x1f   :  { %198 = vmatpush3.bf16.msra.mxu0 %v216_v5 }
  0x20   :  { %199 = vmatprep.subr.bf16.mxu0 %v244_v0 }
  0x23   :  { %200 = vmatpush3.bf16.msra.mxu0 %v217_v6 }
  0x24   :  { %201 = vmatprep.subr.bf16.mxu0 %v244_v0 }
  0x27   :  { %202 = vmatpush3.bf16.msra.mxu0 %v218_v7 }
  0x28   :  { %203 = vmatprep.subr.bf16.mxu0 %v244_v0 }
  0x2b   :  { %204 = vmatpush3.bf16.msra.mxu0 %v219_v8 }
  0x2e   :  { %206 = vmatmul.mubr.bf16.vlgmr.msra.gmra.mxu0 %v220_v9 }
  0xee   :  { %v140_v11 = vpop.f32.mrf.mxu0 }
  0xef   :  { %v141_v12 = vadd.f32 %v166_v10, %v140_v11 }
  0xf0   :  { %v207_v13 = vpop.f32.mrf.mxu0 }
  0xf1   :  { %v147_v14 = vmax.f32 %v141_v12, 0.0 }
  0xf2   :  { %v143_v15 = vpop.f32.mrf.mxu0 }
  0xf3   :  { %v178_v16 = vpack.c.bf16 %v147_v14, %v147_v14  ;;  %v144_v17 = vadd.f32 %v166_v10, %v143_v15 }
  0xf4   :  { %v208_v18 = vpop.f32.mrf.mxu0 }
  0xf5   :  { %158 = vst.msk [vmem:[%s305_s3] sm:$0xf] %vm157_vm1, %v178_v16  ;;  %v148_v19 = vmax.f32 %v144_v17, 0.0 }
  0xf7   :  { %v179_v20 = vpack.c.bf16 %v148_v19, %v148_v19 }
  0xf9   :  { %160 = vst.msk [vmem:[%s305_s3 + $0x4] sm:$0x3] %vm159_vm2, %v179_v20 }
  0xfa   :  { %165 = vsyncpa [#allocation3], 1 }

// kernel: _lambda_.54
= control target key start
LH: loop header
LB: loop body
LE: loop exit
PB: predicated region body
PF: predicated region fallthrough
CT: control target
= control target key end

     0   :  { %v239_v1 = vmov 0   ;;  %v35_v18 = vlaneseq  ;;  %s320_s1 = inlined_call_operand.vmem [shape: bf16[128,256], index: 1, kind: input, shape index: {}]   ;;  %s321_s0 = inlined_call_operand.vmem [shape: bf16[12,128], index: 0, kind: input, shape index: {}]   ;;  %s322_s2 = inlined_call_operand.vmem [shape: f32[1,256], index: 2, kind: input, shape index: {}]   ;;  %s323_s3 = inlined_call_operand.vmem [shape: bf16[12,256], index: 3, kind: output, shape index: {}]  }
   0x1   :  { %v214_v0 = vld [vmem:[%s320_s1 + $0x74] ss:$8 sps:$4 sm:$0xff]   ;;  %163 = vmatprep.mubr.bf16.mxu0 %v239_v1  ;;  %v216_v2 = vld [vmem:[%s320_s1 + $0x70] ss:$8 sps:$4 sm:$0xff]   ;;  %v217_v3 = vld [vmem:[%s320_s1 + $0x64] ss:$8 sps:$4 sm:$0xff]  }
   0x2   :  { %131 = vmatprep.subr.bf16.mxu0 %v214_v0  ;;  %v219_v4 = vld [vmem:[%s320_s1 + $0x60] ss:$8 sps:$4 sm:$0xff]   ;;  %v220_v5 = vld [vmem:[%s320_s1 + $0x54] ss:$8 sps:$4 sm:$0xff]   ;;  %v222_v6 = vld [vmem:[%s320_s1 + $0x50] ss:$8 sps:$4 sm:$0xff]  }
   0x3   :  { %132 = vmatpush1.bf16.msra.mxu0 %v216_v2  ;;  %v223_v7 = vld [vmem:[%s320_s1 + $0x44] ss:$8 sps:$4 sm:$0xff]   ;;  %v225_v8 = vld [vmem:[%s320_s1 + $0x40] ss:$8 sps:$4 sm:$0xff]   ;;  %v226_v9 = vld [vmem:[%s320_s1 + $0x34] ss:$8 sps:$4 sm:$0xff]  }
   0x4   :  { %133 = vmatprep.subr.bf16.mxu0 %v217_v3  ;;  %v228_v10 = vld [vmem:[%s320_s1 + $0x30] ss:$8 sps:$4 sm:$0xff]   ;;  %v229_v11 = vld [vmem:[%s320_s1 + $0x24] ss:$8 sps:$4 sm:$0xff]   ;;  %v231_v12 = vld [vmem:[%s320_s1 + $0x20] ss:$8 sps:$4 sm:$0xff]  }
   0x5   :  { %v232_v13 = vld [vmem:[%s320_s1 + $0x14] ss:$8 sps:$4 sm:$0xff]   ;;  %v234_v14 = vld [vmem:[%s320_s1 + $0x10] ss:$8 sps:$4 sm:$0xff]   ;;  %v235_v15 = vld [vmem:[%s320_s1 + $0x4] ss:$8 sps:$4 sm:$0xff]  }
   0x6   :  { %v237_v16 = vld [vmem:[%s320_s1] ss:$8 sps:$4 sm:$0xff]   ;;  %v36_v19 = vshrl.u32 %v35_v18, 7 }
   0x7   :  { %134 = vmatpush1.bf16.msra.mxu0 %v219_v4  ;;  %v238_v17 = vld [vmem:[%s321_s0] sm:$0x3f]  }
   0x8   :  { %135 = vmatprep.subr.bf16.mxu0 %v220_v5  ;;  %v37_v20 = vsub.s32 0, %v36_v19  ;;  %v41_v21 = vsub.s32 1, %v36_v19  ;;  %v33_v22 = vld [vmem:[%s322_s2] sm:$0x3] }
   0xa   :  { %v38_v23 = vrot.slane %v33_v22, %v37_v20  ;;  %v42_v24 = vrot.slane %v33_v22, %v41_v21 }
   0xb   :  { %136 = vmatpush1.bf16.msra.mxu0 %v222_v6 }
   0xc   :  { %137 = vmatprep.subr.bf16.mxu0 %v223_v7 }
   0xf   :  { %138 = vmatpush1.bf16.msra.mxu0 %v225_v8 }
  0x10   :  { %139 = vmatprep.subr.bf16.mxu0 %v226_v9 }
  0x13   :  { %140 = vmatpush1.bf16.msra.mxu0 %v228_v10 }
  0x14   :  { %141 = vmatprep.subr.bf16.mxu0 %v229_v11 }
  0x17   :  { %142 = vmatpush1.bf16.msra.mxu0 %v231_v12 }
  0x18   :  { %143 = vmatprep.subr.bf16.mxu0 %v232_v13 }
  0x1b   :  { %144 = vmatpush1.bf16.msra.mxu0 %v234_v14 }
  0x1c   :  { %145 = vmatprep.subr.bf16.mxu0 %v235_v15 }
  0x1f   :  { %146 = vmatpush1.bf16.msra.mxu0 %v237_v16 }
  0x22   :  { %164 = vmatmul.mubr.bf16.vlgmr.msra.gmra.mxu0 %v238_v17 }
  0xe2   :  { %v165_v25 = vpop.f32.mrf.mxu0 }
  0xe3   :  { %v166_v27 = vadd.f32 %v165_v25, %v38_v23 }
  0xe4   :  { %v167_v26 = vpop.f32.mrf.mxu0 }
  0xe5   :  { %v168_v28 = vadd.f32 %v167_v26, %v42_v24 }
  0xe6   :  { %v169_v29 = vpop.f32.mrf.mxu0 }
  0xe7   :  { %v211_v30 = vpack.c.bf16 %v168_v28, %v166_v27  ;;  %v170_v32 = vadd.f32 %v169_v29, %v38_v23 }
  0xe8   :  { %v171_v31 = vpop.f32.mrf.mxu0 }
  0xe9   :  { %186 = vst [vmem:[%s323_s3] sm:$0xff] %v211_v30  ;;  %v172_v33 = vadd.f32 %v171_v31, %v42_v24 }
  0xeb   :  { %v212_v34 = vpack.c.bf16 %v172_v33, %v170_v32 }
  0xed   :  { %187 = vst [vmem:[%s323_s3 + $0x8] sm:$0x33] %v212_v34 }

// kernel: _lambda_.55
= control target key start
LH: loop header
LB: loop body
LE: loop exit
PB: predicated region body
PF: predicated region fallthrough
CT: control target
= control target key end

     0   :  { %v192_v1 = vmov 0   ;;  %vm85_vm0 = vcmask 523264   ;;  %v30_v10 = vlaneseq  ;;  %s260_s1 = inlined_call_operand.vmem [shape: bf16[64,256], index: 1, kind: input, shape index: {}]   ;;  %s261_s0 = inlined_call_operand.vmem [shape: bf16[12,64], index: 0, kind: input, shape index: {}]   ;;  %s262_s2 = inlined_call_operand.vmem [shape: f32[1,256], index: 2, kind: input, shape index: {}]   ;;  %s263_s3 = inlined_call_operand.vmem [shape: bf16[12,256], index: 3, kind: input, shape index: {}]   ;;  %s264_s4 = inlined_call_operand.vmem [shape: bf16[12,256], index: 4, kind: output, shape index: {}]  }
   0x1   :  { %v179_v0 = vld [vmem:[%s260_s1 + $0x34] ss:$8 sps:$4 sm:$0xff]   ;;  %121 = vmatprep.mubr.bf16.mxu0 %v192_v1  ;;  %v181_v2 = vld [vmem:[%s260_s1 + $0x30] ss:$8 sps:$4 sm:$0xff]   ;;  %v182_v3 = vld [vmem:[%s260_s1 + $0x24] ss:$8 sps:$4 sm:$0xff]  }
   0x2   :  { %97 = vmatprep.subr.bf16.mxu0 %v179_v0  ;;  %v184_v4 = vld [vmem:[%s260_s1 + $0x20] ss:$8 sps:$4 sm:$0xff]   ;;  %v185_v5 = vld [vmem:[%s260_s1 + $0x14] ss:$8 sps:$4 sm:$0xff]   ;;  %v187_v6 = vld [vmem:[%s260_s1 + $0x10] ss:$8 sps:$4 sm:$0xff]  }
   0x3   :  { %98 = vmatpush1.bf16.msra.mxu0 %v181_v2  ;;  %v188_v7 = vld [vmem:[%s260_s1 + $0x4] ss:$8 sps:$4 sm:$0xff]   ;;  %v190_v8 = vld [vmem:[%s260_s1] ss:$8 sps:$4 sm:$0xff]   ;;  %v31_v11 = vshrl.u32 %v30_v10, 7 }
   0x4   :  { %99 = vmatprep.subr.bf16.mxu0 %v182_v3  ;;  %v191_v9 = vld [vmem:[%s261_s0] sm:$0x3f]   ;;  %v133_v20 = vld [vmem:[%s263_s3 + $0x8] sm:$0x33] }
   0x5   :  { %v32_v12 = vsub.s32 0, %v31_v11  ;;  %v28_v13 = vld [vmem:[%s262_s2] sm:$0x3]  ;;  %v36_v14 = vsub.s32 1, %v31_v11  ;;  %v136_v26 = vunpack.c.l.bf16 %v133_v20  ;;  %v137_v30 = vunpack.c.h.bf16 %v133_v20 }
   0x6   :  { %v132_v15 = vld [vmem:[%s263_s3] sm:$0xff] }
   0x7   :  { %100 = vmatpush1.bf16.msra.mxu0 %v184_v4  ;;  %v33_v16 = vrot.slane %v28_v13, %v32_v12  ;;  %v134_v17 = vunpack.c.l.bf16 %v132_v15  ;;  %v37_v18 = vrot.slane %v28_v13, %v36_v14  ;;  %v135_v22 = vunpack.c.h.bf16 %v132_v15 }
   0x8   :  { %101 = vmatprep.subr.bf16.mxu0 %v185_v5 }
   0xb   :  { %102 = vmatpush1.bf16.msra.mxu0 %v187_v6 }
   0xc   :  { %103 = vmatprep.subr.bf16.mxu0 %v188_v7 }
   0xf   :  { %104 = vmatpush1.bf16.msra.mxu0 %v190_v8 }
  0x12   :  { %173 = vmatmul.mubr.msk.bf16.vlgmr.msra.gmra.mxu0 %vm85_vm0, %v191_v9 }
  0xd2   :  { %v123_v19 = vpop.f32.mrf.mxu0 }
  0xd3   :  { %v124_v21 = vadd.f32 %v123_v19, %v33_v16 }
  0xd4   :  { %v125_v23 = vpop.f32.mrf.mxu0 }
  0xd5   :  { %v138_v24 = vadd.f32 %v134_v17, %v124_v21  ;;  %v126_v25 = vadd.f32 %v125_v23, %v37_v18 }
  0xd6   :  { %v127_v27 = vpop.f32.mrf.mxu0 }
  0xd7   :  { %v139_v28 = vadd.f32 %v135_v22, %v126_v25  ;;  %v128_v29 = vadd.f32 %v127_v27, %v33_v16  ;;  %v142_v32 = vmax.f32 %v138_v24, 0.0 }
  0xd8   :  { %v129_v31 = vpop.f32.mrf.mxu0 }
  0xd9   :  { %v143_v33 = vmax.f32 %v139_v28, 0.0  ;;  %v140_v34 = vadd.f32 %v136_v26, %v128_v29  ;;  %v130_v35 = vadd.f32 %v129_v31, %v37_v18 }
  0xdb   :  { %v176_v36 = vpack.c.bf16 %v143_v33, %v142_v32  ;;  %v141_v37 = vadd.f32 %v137_v30, %v130_v35  ;;  %v144_v38 = vmax.f32 %v140_v34, 0.0 }
  0xdd   :  { %158 = vst [vmem:[%s264_s4] sm:$0xff] %v176_v36  ;;  %v145_v39 = vmax.f32 %v141_v37, 0.0 }
  0xdf   :  { %v177_v40 = vpack.c.bf16 %v145_v39, %v144_v38 }
  0xe1   :  { %159 = vst [vmem:[%s264_s4 + $0x8] sm:$0x33] %v177_v40 }

// kernel: _lambda_.53
= control target key start
LH: loop header
LB: loop body
LE: loop exit
PB: predicated region body
PF: predicated region fallthrough
CT: control target
= control target key end

     0   :  { %v639_v34 = vmov 0.0   ;;  %vm640_vm0 = vmmov 0   ;;  %vm341_vm1 = vcmask 523264   ;;  %vm478_vm2 = vcmask 519168   ;;  %s793_s1 = inlined_call_operand.vmem [shape: bf16[576,64], index: 1, kind: input, shape index: {}]   ;;  %s794_s0 = inlined_call_operand.vmem [shape: bf16[12,576], index: 0, kind: input, shape index: {}]   ;;  %s795_s2 = inlined_call_operand.vmem [shape: f32[1,64], index: 2, kind: input, shape index: {}]   ;;  %s796_s3 = inlined_call_operand.vmem [shape: bf16[12,64], index: 3, kind: output, shape index: {}]  }
   0x1   :  { %v596_v0 = vld [vmem:[%s793_s1 + $0x78] sm:$0xff]   ;;  %v600_v4 = vld [vmem:[%s793_s1 + $0x70] sm:$0xff]   ;;  %v604_v8 = vld [vmem:[%s793_s1 + $0x68] sm:$0xff]   ;;  %vm480_vm3 = vcmask 517120  }
   0x2   :  { %v597_v1 = vld [vmem:[%s793_s1 + $0x38] sm:$0xff]   ;;  %533 = vmatprep.subr.bf16.mxu0 %v596_v0  ;;  %v601_v5 = vld [vmem:[%s793_s1 + $0x30] sm:$0xff]   ;;  %v605_v9 = vld [vmem:[%s793_s1 + $0x28] sm:$0xff]  }
   0x3   :  { %v598_v2 = vld [vmem:[%s793_s1 + $0xf8] sm:$0xff]   ;;  %534 = vmatpush3.bf16.msra.mxu0 %v597_v1  ;;  %v602_v6 = vld [vmem:[%s793_s1 + $0xf0] sm:$0xff]   ;;  %v606_v10 = vld [vmem:[%s793_s1 + $0xe8] sm:$0xff]  }
   0x4   :  { %v599_v3 = vld [vmem:[%s793_s1 + $0xb8] sm:$0xff]   ;;  %555 = vmatprep.subr.bf16.mxu1 %v598_v2  ;;  %535 = vmatprep.subr.bf16.mxu0 %v600_v4  ;;  %v603_v7 = vld [vmem:[%s793_s1 + $0xb0] sm:$0xff]   ;;  %v607_v11 = vld [vmem:[%s793_s1 + $0xa8] sm:$0xff]  }
   0x5   :  { %556 = vmatpush3.bf16.msra.mxu1 %v599_v3  ;;  %v608_v12 = vld [vmem:[%s793_s1 + $0x60] sm:$0xff]   ;;  %v612_v16 = vld [vmem:[%s793_s1 + $0x58] sm:$0xff]   ;;  %v616_v20 = vld [vmem:[%s793_s1 + $0x50] sm:$0xff]  }
   0x6   :  { %557 = vmatprep.subr.bf16.mxu1 %v602_v6  ;;  %v609_v13 = vld [vmem:[%s793_s1 + $0x20] sm:$0xff]   ;;  %v613_v17 = vld [vmem:[%s793_s1 + $0x18] sm:$0xff]   ;;  %v617_v21 = vld [vmem:[%s793_s1 + $0x10] sm:$0xff]  }
   0x7   :  { %536 = vmatpush3.bf16.msra.mxu0 %v601_v5  ;;  %v610_v14 = vld [vmem:[%s793_s1 + $0xe0] sm:$0xff]   ;;  %v614_v18 = vld [vmem:[%s793_s1 + $0xd8] sm:$0xff]   ;;  %v618_v22 = vld [vmem:[%s793_s1 + $0xd0] sm:$0xff]  }
   0x8   :  { %537 = vmatprep.subr.bf16.mxu0 %v604_v8  ;;  %v611_v15 = vld [vmem:[%s793_s1 + $0xa0] sm:$0xff]   ;;  %v615_v19 = vld [vmem:[%s793_s1 + $0x98] sm:$0xff]   ;;  %v619_v23 = vld [vmem:[%s793_s1 + $0x90] sm:$0xff]  }
   0x9   :  { %558 = vmatpush3.bf16.msra.mxu1 %v603_v7  ;;  %v620_v24 = vld [vmem:[%s793_s1 + $0x48] sm:$0xff]   ;;  %v624_v28 = vld [vmem:[%s793_s1 + $0x40] sm:$0xff]   ;;  %v634_v37 = vld [vmem:[%s793_s1 + $0x118] sm:$0xff]  }
   0xa   :  { %559 = vmatprep.subr.bf16.mxu1 %v606_v10  ;;  %v621_v25 = vld [vmem:[%s793_s1 + $0x8] sm:$0xff]   ;;  %v625_v29 = vld [vmem:[%s793_s1] sm:$0xff]   ;;  %v635_v38 = vld [vmem:[%s793_s1 + $0x110] sm:$0xff]  }
   0xb   :  { %538 = vmatpush3.bf16.msra.mxu0 %v605_v9  ;;  %v622_v26 = vld [vmem:[%s793_s1 + $0xc8] sm:$0xff]   ;;  %v626_v30 = vld [vmem:[%s793_s1 + $0xc0] sm:$0xff]  }
   0xc   :  { %539 = vmatprep.subr.bf16.mxu0 %v608_v12  ;;  %v623_v27 = vld [vmem:[%s793_s1 + $0x88] sm:$0xff]   ;;  %v627_v31 = vld [vmem:[%s794_s0] ss:$20 sps:$4 sm:$0x3f]  }
   0xd   :  { %560 = vmatpush3.bf16.msra.mxu1 %v607_v11  ;;  %v629_v32 = vld [vmem:[%s794_s0 + $0x4] ss:$20 sps:$4 sm:$0x3f]   ;;  %v631_v35 = vld [vmem:[%s794_s0 + $0x8] ss:$20 sps:$4 sm:$0x3f]  }
   0xe   :  { %561 = vmatprep.subr.bf16.mxu1 %v610_v14  ;;  %v630_v33 = vld [vmem:[%s793_s1 + $0x80] sm:$0xff]   ;;  %377 = vmatprep.mubr.bf16.mxu0 %v629_v32  ;;  %v636_v39 = vld [vmem:[%s793_s1 + $0x108] sm:$0xff]  }
   0xf   :  { %540 = vmatpush3.bf16.msra.mxu0 %v609_v13  ;;  %v633_v36 = vld [vmem:[%s794_s0 + $0xc] ss:$20 sps:$4 sm:$0x3f]   ;;  %v638_v41 = vld [vmem:[%s794_s0 + $0x10] ss:$20 sps:$4 sm:$0x3f]  }
  0x10   :  { %541 = vmatprep.subr.bf16.mxu0 %v612_v16  ;;  %418 = vmatprep.mubr.bf16.mxu1 %v633_v36  ;;  %v637_v40 = vld [vmem:[%s793_s1 + $0x100] sm:$0xff]  }
  0x11   :  { %562 = vmatpush3.bf16.msra.mxu1 %v611_v15  ;;  %v486_v48 = vld [vmem:[%s795_s2] ss:$0 sm:$0xff] }
  0x12   :  { %563 = vmatprep.subr.bf16.mxu1 %v614_v18 }
  0x13   :  { %542 = vmatpush3.bf16.msra.mxu0 %v613_v17 }
  0x14   :  { %543 = vmatprep.subr.bf16.mxu0 %v616_v20 }
  0x15   :  { %564 = vmatpush3.bf16.msra.mxu1 %v615_v19 }
  0x16   :  { %565 = vmatprep.subr.bf16.mxu1 %v618_v22 }
  0x17   :  { %544 = vmatpush3.bf16.msra.mxu0 %v617_v21 }
  0x18   :  { %545 = vmatprep.subr.bf16.mxu0 %v620_v24 }
  0x19   :  { %566 = vmatpush3.bf16.msra.mxu1 %v619_v23 }
  0x1a   :  { %567 = vmatprep.subr.bf16.mxu1 %v622_v26 }
  0x1b   :  { %546 = vmatpush3.bf16.msra.mxu0 %v621_v25 }
  0x1c   :  { %547 = vmatprep.subr.bf16.mxu0 %v624_v28 }
  0x1d   :  { %568 = vmatpush3.bf16.msra.mxu1 %v623_v27 }
  0x1e   :  { %569 = vmatprep.subr.bf16.mxu1 %v626_v30 }
  0x1f   :  { %548 = vmatpush3.bf16.msra.mxu0 %v625_v29 }
  0x20   :  { %582 = vmatprep.subr.bf16.mxu0 %v639_v34 }
  0x21   :  { %570 = vmatpush3.bf16.msra.mxu1 %v630_v33 }
  0x22   :  { %378 = vmatmul.mubr.bf16.vlgmr.msra.gmra.mxu0 %v627_v31 }
  0x23   :  { %590 = vmatprep.mubr.msk.bf16.mxu0 %vm640_vm0, %v639_v34  ;;  %583 = vmatpush3.bf16.msra.mxu0 %v634_v37 }
  0x24   :  { %419 = vmatmul.mubr.bf16.vlgmr.msra.gmra.mxu1 %v631_v35  ;;  %584 = vmatprep.subr.bf16.mxu0 %v639_v34 }
  0x27   :  { %585 = vmatpush3.bf16.msra.mxu0 %v635_v38 }
  0x28   :  { %586 = vmatprep.subr.bf16.mxu0 %v639_v34 }
  0x2b   :  { %587 = vmatpush3.bf16.msra.mxu0 %v636_v39 }
  0x2c   :  { %588 = vmatprep.subr.bf16.mxu0 %v639_v34 }
  0x2f   :  { %589 = vmatpush3.bf16.msra.mxu0 %v637_v40 }
  0x32   :  { %591 = vmatmul.mubr.msk.bf16.vlgmr.msra.gmra.mxu0 %vm341_vm1, %v638_v41 }
  0xe2   :  { %v549_v42 = vpop.f32.mrf.mxu0 }
  0xe4   :  { %v550_v43 = vpop.f32.mrf.mxu0  ;;  %v571_v44 = vpop.f32.mrf.mxu1 }
  0xe5   :  { %v551_v47 = vadd.f32 %v550_v43, %v549_v42 }
  0xe6   :  { %v552_v45 = vpop.f32.mrf.mxu0  ;;  %v572_v46 = vpop.f32.mrf.mxu1 }
  0xe7   :  { %v380_v51 = vadd.f32 %v551_v47, %v486_v48  ;;  %v573_v52 = vadd.f32 %v572_v46, %v571_v44 }
  0xe8   :  { %v553_v49 = vpop.f32.mrf.mxu0  ;;  %v574_v50 = vpop.f32.mrf.mxu1 }
  0xe9   :  { %v554_v53 = vadd.f32 %v553_v49, %v552_v45  ;;  %v421_v57 = vadd.f32 %v573_v52, %v380_v51 }
  0xea   :  { %v575_v54 = vpop.f32.mrf.mxu1 }
  0xeb   :  { %v383_v55 = vadd.f32 %v554_v53, %v486_v48  ;;  %v576_v56 = vadd.f32 %v575_v54, %v574_v50 }
  0xed   :  { %v424_v62 = vadd.f32 %v576_v56, %v383_v55 }
  0xf2   :  { %v461_v58 = vpop.f32.mrf.mxu0 }
  0xf3   :  { %v462_v59 = vadd.f32 %v461_v58, %v421_v57 }
  0xf4   :  { %v592_v60 = vpop.f32.mrf.mxu0 }
  0xf5   :  { %v468_v61 = vmax.f32 %v462_v59, 0.0 }
  0xf6   :  { %v464_v63 = vpop.f32.mrf.mxu0 }
  0xf7   :  { %v531_v0 = vpack.c.bf16 %v468_v61, %v468_v61  ;;  %v465_v1 = vadd.f32 %v464_v63, %v424_v62 }
  0xf8   :  { %v593_v2 = vpop.f32.mrf.mxu0 }
  0xf9   :  { %479 = vst.msk [vmem:[%s796_s3] sm:$0xf] %vm478_vm2, %v531_v0  ;;  %v469_v3 = vmax.f32 %v465_v1, 0.0 }
  0xfb   :  { %v532_v4 = vpack.c.bf16 %v469_v3, %v469_v3 }
  0xfd   :  { %481 = vst.msk [vmem:[%s796_s3 + $0x4] sm:$0x3] %vm480_vm3, %v532_v4 }

// kernel: _lambda_.59
= control target key start
LH: loop header
LB: loop body
LE: loop exit
PB: predicated region body
PF: predicated region fallthrough
CT: control target
= control target key end

     0   :  { %s366_s1 = inlined_call_operand.vmem [shape: bf16[256,128], index: 1, kind: input, shape index: {}]   ;;  %s367_s0 = inlined_call_operand.vmem [shape: bf16[12,256], index: 0, kind: input, shape index: {}]   ;;  %s368_s2 = inlined_call_operand.vmem [shape: f32[1,128], index: 2, kind: input, shape index: {}]   ;;  %s369_s3 = inlined_call_operand.vmem [shape: bf16[12,128], index: 3, kind: output, shape index: {}]  }
   0x1   :  { %v264_v0 = vld [vmem:[%s366_s1 + $0x78] sm:$0xff]   ;;  %v266_v2 = vld [vmem:[%s366_s1 + $0x70] sm:$0xff]   ;;  %v268_v4 = vld [vmem:[%s366_s1 + $0x68] sm:$0xff]  }
   0x2   :  { %v265_v1 = vld [vmem:[%s366_s1 + $0x38] sm:$0xff]   ;;  %242 = vmatprep.subr.bf16.mxu0 %v264_v0  ;;  %v267_v3 = vld [vmem:[%s366_s1 + $0x30] sm:$0xff]   ;;  %v269_v5 = vld [vmem:[%s366_s1 + $0x28] sm:$0xff]  }
   0x3   :  { %243 = vmatpush3.bf16.msra.mxu0 %v265_v1  ;;  %v270_v6 = vld [vmem:[%s366_s1 + $0x60] sm:$0xff]   ;;  %v272_v8 = vld [vmem:[%s366_s1 + $0x58] sm:$0xff]   ;;  %v274_v10 = vld [vmem:[%s366_s1 + $0x50] sm:$0xff]  }
   0x4   :  { %244 = vmatprep.subr.bf16.mxu0 %v266_v2  ;;  %v271_v7 = vld [vmem:[%s366_s1 + $0x20] sm:$0xff]   ;;  %v273_v9 = vld [vmem:[%s366_s1 + $0x18] sm:$0xff]   ;;  %v275_v12 = vld [vmem:[%s366_s1 + $0x10] sm:$0xff]  }
   0x5   :  { %v282_v11 = vld [vmem:[%s367_s0 + $0x4] ss:$8 sps:$4 sm:$0x3f]   ;;  %v280_v17 = vld [vmem:[%s367_s0] ss:$8 sps:$4 sm:$0x3f]  }
   0x6   :  { %194 = vmatprep.mubr.bf16.mxu0 %v282_v11  ;;  %v276_v13 = vld [vmem:[%s366_s1 + $0x48] sm:$0xff]   ;;  %v278_v15 = vld [vmem:[%s366_s1 + $0x40] sm:$0xff]  }
   0x7   :  { %245 = vmatpush3.bf16.msra.mxu0 %v267_v3  ;;  %v277_v14 = vld [vmem:[%s366_s1 + $0x8] sm:$0xff]   ;;  %v279_v16 = vld [vmem:[%s366_s1] sm:$0xff]  }
   0x8   :  { %246 = vmatprep.subr.bf16.mxu0 %v268_v4  ;;  %v219_v19 = vld [vmem:[%s368_s2] ss:$0 sm:$0xff] }
   0xb   :  { %247 = vmatpush3.bf16.msra.mxu0 %v269_v5 }
   0xc   :  { %248 = vmatprep.subr.bf16.mxu0 %v270_v6 }
   0xf   :  { %249 = vmatpush3.bf16.msra.mxu0 %v271_v7 }
  0x10   :  { %250 = vmatprep.subr.bf16.mxu0 %v272_v8 }
  0x13   :  { %251 = vmatpush3.bf16.msra.mxu0 %v273_v9 }
  0x14   :  { %252 = vmatprep.subr.bf16.mxu0 %v274_v10 }
  0x17   :  { %253 = vmatpush3.bf16.msra.mxu0 %v275_v12 }
  0x18   :  { %254 = vmatprep.subr.bf16.mxu0 %v276_v13 }
  0x1b   :  { %255 = vmatpush3.bf16.msra.mxu0 %v277_v14 }
  0x1c   :  { %256 = vmatprep.subr.bf16.mxu0 %v278_v15 }
  0x1f   :  { %257 = vmatpush3.bf16.msra.mxu0 %v279_v16 }
  0x22   :  { %195 = vmatmul.mubr.bf16.vlgmr.msra.gmra.mxu0 %v280_v17 }
  0xe2   :  { %v258_v18 = vpop.f32.mrf.mxu0 }
  0xe4   :  { %v259_v20 = vpop.f32.mrf.mxu0 }
  0xe5   :  { %v260_v21 = vadd.f32 %v259_v20, %v258_v18 }
  0xe6   :  { %v261_v22 = vpop.f32.mrf.mxu0 }
  0xe7   :  { %v197_v23 = vadd.f32 %v260_v21, %v219_v19 }
  0xe8   :  { %v262_v24 = vpop.f32.mrf.mxu0 }
  0xe9   :  { %v203_v25 = vmax.f32 %v197_v23, 0.0  ;;  %v263_v26 = vadd.f32 %v262_v24, %v261_v22 }
  0xeb   :  { %v240_v27 = vpack.c.bf16 %v203_v25, %v203_v25  ;;  %v200_v28 = vadd.f32 %v263_v26, %v219_v19 }
  0xed   :  { %213 = vst [vmem:[%s369_s3] sm:$0xf] %v240_v27  ;;  %v204_v29 = vmax.f32 %v200_v28, 0.0 }
  0xef   :  { %v241_v30 = vpack.c.bf16 %v204_v29, %v204_v29 }
  0xf1   :  { %214 = vst [vmem:[%s369_s3 + $0x4] sm:$0x3] %v241_v30 }

// kernel: _lambda_.56
= control target key start
LH: loop header
LB: loop body
LE: loop exit
PB: predicated region body
PF: predicated region fallthrough
CT: control target
= control target key end

     0   :  { %vm213_vm0 = vcmask 519168   ;;  %vm215_vm1 = vcmask 517120   ;;  %s368_s1 = inlined_call_operand.vmem [shape: bf16[256,64], index: 1, kind: input, shape index: {}]   ;;  %s369_s0 = inlined_call_operand.vmem [shape: bf16[12,256], index: 0, kind: input, shape index: {}]   ;;  %s370_s2 = inlined_call_operand.vmem [shape: f32[1,64], index: 2, kind: input, shape index: {}]   ;;  %s371_s3 = inlined_call_operand.vmem [shape: bf16[12,64], index: 3, kind: output, shape index: {}]  }
   0x1   :  { %v266_v0 = vld [vmem:[%s368_s1 + $0x78] sm:$0xff]   ;;  %v268_v2 = vld [vmem:[%s368_s1 + $0x70] sm:$0xff]   ;;  %v270_v4 = vld [vmem:[%s368_s1 + $0x68] sm:$0xff]  }
   0x2   :  { %v267_v1 = vld [vmem:[%s368_s1 + $0x38] sm:$0xff]   ;;  %244 = vmatprep.subr.bf16.mxu0 %v266_v0  ;;  %v269_v3 = vld [vmem:[%s368_s1 + $0x30] sm:$0xff]   ;;  %v271_v5 = vld [vmem:[%s368_s1 + $0x28] sm:$0xff]  }
   0x3   :  { %245 = vmatpush3.bf16.msra.mxu0 %v267_v1  ;;  %v272_v6 = vld [vmem:[%s368_s1 + $0x60] sm:$0xff]   ;;  %v274_v8 = vld [vmem:[%s368_s1 + $0x58] sm:$0xff]   ;;  %v276_v10 = vld [vmem:[%s368_s1 + $0x50] sm:$0xff]  }
   0x4   :  { %246 = vmatprep.subr.bf16.mxu0 %v268_v2  ;;  %v273_v7 = vld [vmem:[%s368_s1 + $0x20] sm:$0xff]   ;;  %v275_v9 = vld [vmem:[%s368_s1 + $0x18] sm:$0xff]   ;;  %v277_v12 = vld [vmem:[%s368_s1 + $0x10] sm:$0xff]  }
   0x5   :  { %v284_v11 = vld [vmem:[%s369_s0 + $0x4] ss:$8 sps:$4 sm:$0x3f]   ;;  %v282_v17 = vld [vmem:[%s369_s0] ss:$8 sps:$4 sm:$0x3f]  }
   0x6   :  { %194 = vmatprep.mubr.bf16.mxu0 %v284_v11  ;;  %v278_v13 = vld [vmem:[%s368_s1 + $0x48] sm:$0xff]   ;;  %v280_v15 = vld [vmem:[%s368_s1 + $0x40] sm:$0xff]  }
   0x7   :  { %247 = vmatpush3.bf16.msra.mxu0 %v269_v3  ;;  %v279_v14 = vld [vmem:[%s368_s1 + $0x8] sm:$0xff]   ;;  %v281_v16 = vld [vmem:[%s368_s1] sm:$0xff]  }
   0x8   :  { %248 = vmatprep.subr.bf16.mxu0 %v270_v4  ;;  %v221_v19 = vld [vmem:[%s370_s2] ss:$0 sm:$0xff] }
   0xb   :  { %249 = vmatpush3.bf16.msra.mxu0 %v271_v5 }
   0xc   :  { %250 = vmatprep.subr.bf16.mxu0 %v272_v6 }
   0xf   :  { %251 = vmatpush3.bf16.msra.mxu0 %v273_v7 }
  0x10   :  { %252 = vmatprep.subr.bf16.mxu0 %v274_v8 }
  0x13   :  { %253 = vmatpush3.bf16.msra.mxu0 %v275_v9 }
  0x14   :  { %254 = vmatprep.subr.bf16.mxu0 %v276_v10 }
  0x17   :  { %255 = vmatpush3.bf16.msra.mxu0 %v277_v12 }
  0x18   :  { %256 = vmatprep.subr.bf16.mxu0 %v278_v13 }
  0x1b   :  { %257 = vmatpush3.bf16.msra.mxu0 %v279_v14 }
  0x1c   :  { %258 = vmatprep.subr.bf16.mxu0 %v280_v15 }
  0x1f   :  { %259 = vmatpush3.bf16.msra.mxu0 %v281_v16 }
  0x22   :  { %195 = vmatmul.mubr.bf16.vlgmr.msra.gmra.mxu0 %v282_v17 }
  0xe2   :  { %v260_v18 = vpop.f32.mrf.mxu0 }
  0xe4   :  { %v261_v20 = vpop.f32.mrf.mxu0 }
  0xe5   :  { %v262_v21 = vadd.f32 %v261_v20, %v260_v18 }
  0xe6   :  { %v263_v22 = vpop.f32.mrf.mxu0 }
  0xe7   :  { %v197_v23 = vadd.f32 %v262_v21, %v221_v19 }
  0xe8   :  { %v264_v24 = vpop.f32.mrf.mxu0 }
  0xe9   :  { %v203_v25 = vmax.f32 %v197_v23, 0.0  ;;  %v265_v26 = vadd.f32 %v264_v24, %v263_v22 }
  0xeb   :  { %v242_v27 = vpack.c.bf16 %v203_v25, %v203_v25  ;;  %v200_v28 = vadd.f32 %v265_v26, %v221_v19 }
  0xed   :  { %214 = vst.msk [vmem:[%s371_s3] sm:$0xf] %vm213_vm0, %v242_v27  ;;  %v204_v29 = vmax.f32 %v200_v28, 0.0 }
  0xef   :  { %v243_v30 = vpack.c.bf16 %v204_v29, %v204_v29 }
  0xf1   :  { %216 = vst.msk [vmem:[%s371_s3 + $0x4] sm:$0x3] %vm215_vm1, %v243_v30 }

// kernel: _lambda_.62
= control target key start
LH: loop header
LB: loop body
LE: loop exit
PB: predicated region body
PF: predicated region fallthrough
CT: control target
= control target key end

     0   :  { %v477_v1 = vmov 0   ;;  %v54_v34 = vlaneseq  ;;  %s629_s1 = inlined_call_operand.vmem [shape: bf16[128,512], index: 1, kind: input, shape index: {}]   ;;  %s630_s0 = inlined_call_operand.vmem [shape: bf16[12,128], index: 0, kind: input, shape index: {}]   ;;  %s631_s2 = inlined_call_operand.vmem [shape: f32[1,512], index: 2, kind: input, shape index: {}]   ;;  %s632_s3 = inlined_call_operand.vmem [shape: bf16[12,512], index: 3, kind: input, shape index: {}]   ;;  %s633_s4 = inlined_call_operand.vmem [shape: bf16[12,512], index: 4, kind: output, shape index: {}]  }
   0x1   :  { %v428_v0 = vld [vmem:[%s629_s1 + $0xe4] ss:$16 sps:$4 sm:$0xff]   ;;  %272 = vmatprep.mubr.bf16.mxu0 %v477_v1  ;;  %315 = vmatprep.mubr.bf16.mxu1 %v477_v1  ;;  %v430_v2 = vld [vmem:[%s629_s1 + $0xec] ss:$16 sps:$4 sm:$0xff]   ;;  %v432_v3 = vld [vmem:[%s629_s1 + $0xe0] ss:$16 sps:$4 sm:$0xff]  }
   0x2   :  { %240 = vmatprep.subr.bf16.mxu0 %v428_v0  ;;  %v433_v4 = vld [vmem:[%s629_s1 + $0xe8] ss:$16 sps:$4 sm:$0xff]   ;;  %283 = vmatprep.subr.bf16.mxu1 %v430_v2  ;;  %v434_v5 = vld [vmem:[%s629_s1 + $0xc4] ss:$16 sps:$4 sm:$0xff]   ;;  %v436_v6 = vld [vmem:[%s629_s1 + $0xcc] ss:$16 sps:$4 sm:$0xff]  }
   0x3   :  { %241 = vmatpush1.bf16.msra.mxu0 %v432_v3  ;;  %284 = vmatpush1.bf16.msra.mxu1 %v433_v4  ;;  %v438_v7 = vld [vmem:[%s629_s1 + $0xc0] ss:$16 sps:$4 sm:$0xff]   ;;  %v439_v8 = vld [vmem:[%s629_s1 + $0xc8] ss:$16 sps:$4 sm:$0xff]   ;;  %v440_v9 = vld [vmem:[%s629_s1 + $0xa4] ss:$16 sps:$4 sm:$0xff]  }
   0x4   :  { %242 = vmatprep.subr.bf16.mxu0 %v434_v5  ;;  %285 = vmatprep.subr.bf16.mxu1 %v436_v6  ;;  %v442_v10 = vld [vmem:[%s629_s1 + $0xac] ss:$16 sps:$4 sm:$0xff]   ;;  %v444_v11 = vld [vmem:[%s629_s1 + $0xa0] ss:$16 sps:$4 sm:$0xff]   ;;  %v445_v12 = vld [vmem:[%s629_s1 + $0xa8] ss:$16 sps:$4 sm:$0xff]  }
   0x5   :  { %v446_v13 = vld [vmem:[%s629_s1 + $0x84] ss:$16 sps:$4 sm:$0xff]   ;;  %v448_v14 = vld [vmem:[%s629_s1 + $0x8c] ss:$16 sps:$4 sm:$0xff]   ;;  %v450_v15 = vld [vmem:[%s629_s1 + $0x80] ss:$16 sps:$4 sm:$0xff]  }
   0x6   :  { %v451_v16 = vld [vmem:[%s629_s1 + $0x88] ss:$16 sps:$4 sm:$0xff]   ;;  %v452_v17 = vld [vmem:[%s629_s1 + $0x64] ss:$16 sps:$4 sm:$0xff]   ;;  %v454_v18 = vld [vmem:[%s629_s1 + $0x6c] ss:$16 sps:$4 sm:$0xff]  }
   0x7   :  { %243 = vmatpush1.bf16.msra.mxu0 %v438_v7  ;;  %286 = vmatpush1.bf16.msra.mxu1 %v439_v8  ;;  %v456_v19 = vld [vmem:[%s629_s1 + $0x60] ss:$16 sps:$4 sm:$0xff]   ;;  %v457_v20 = vld [vmem:[%s629_s1 + $0x68] ss:$16 sps:$4 sm:$0xff]   ;;  %v458_v21 = vld [vmem:[%s629_s1 + $0x44] ss:$16 sps:$4 sm:$0xff]  }
   0x8   :  { %244 = vmatprep.subr.bf16.mxu0 %v440_v9  ;;  %287 = vmatprep.subr.bf16.mxu1 %v442_v10  ;;  %v460_v22 = vld [vmem:[%s629_s1 + $0x4c] ss:$16 sps:$4 sm:$0xff]   ;;  %v462_v23 = vld [vmem:[%s629_s1 + $0x40] ss:$16 sps:$4 sm:$0xff]   ;;  %v463_v24 = vld [vmem:[%s629_s1 + $0x48] ss:$16 sps:$4 sm:$0xff]  }
   0x9   :  { %v464_v25 = vld [vmem:[%s629_s1 + $0x24] ss:$16 sps:$4 sm:$0xff]   ;;  %v466_v26 = vld [vmem:[%s629_s1 + $0x2c] ss:$16 sps:$4 sm:$0xff]   ;;  %v468_v27 = vld [vmem:[%s629_s1 + $0x20] ss:$16 sps:$4 sm:$0xff]  }
   0xa   :  { %v469_v28 = vld [vmem:[%s629_s1 + $0x28] ss:$16 sps:$4 sm:$0xff]   ;;  %v470_v29 = vld [vmem:[%s629_s1 + $0x4] ss:$16 sps:$4 sm:$0xff]   ;;  %v472_v30 = vld [vmem:[%s629_s1 + $0xc] ss:$16 sps:$4 sm:$0xff]  }
   0xb   :  { %245 = vmatpush1.bf16.msra.mxu0 %v444_v11  ;;  %288 = vmatpush1.bf16.msra.mxu1 %v445_v12  ;;  %v474_v31 = vld [vmem:[%s629_s1] ss:$16 sps:$4 sm:$0xff]   ;;  %v475_v32 = vld [vmem:[%s629_s1 + $0x8] ss:$16 sps:$4 sm:$0xff]   ;;  %v55_v35 = vshrl.u32 %v54_v34, 7 }
   0xc   :  { %246 = vmatprep.subr.bf16.mxu0 %v446_v13  ;;  %289 = vmatprep.subr.bf16.mxu1 %v448_v14  ;;  %v476_v33 = vld [vmem:[%s630_s0] sm:$0x3f]   ;;  %v327_v42 = vld [vmem:[%s632_s3 + $0x8] sm:$0xff]  ;;  %v328_v55 = vld [vmem:[%s632_s3 + $0x10] sm:$0x33] }
   0xd   :  { %v56_v36 = vsub.s32 0, %v55_v35  ;;  %v64_v37 = vsub.s32 2, %v55_v35  ;;  %v52_v38 = vld [vmem:[%s631_s2] sm:$0xf]  ;;  %v60_v39 = vsub.s32 1, %v55_v35  ;;  %v68_v40 = vsub.s32 3, %v55_v35 }
   0xe   :  { %v326_v41 = vld [vmem:[%s632_s3] sm:$0xff]  ;;  %v332_v46 = vunpack.c.l.bf16 %v327_v42  ;;  %v333_v54 = vunpack.c.h.bf16 %v327_v42  ;;  %v329_v56 = vld [vmem:[%s632_s3 + $0x18] sm:$0x33]  ;;  %v334_v0 = vunpack.c.l.bf16 %v328_v55  ;;  %v335_v5 = vunpack.c.h.bf16 %v328_v55 }
   0xf   :  { %247 = vmatpush1.bf16.msra.mxu0 %v450_v15  ;;  %290 = vmatpush1.bf16.msra.mxu1 %v451_v16  ;;  %v57_v43 = vrot.slane %v52_v38, %v56_v36  ;;  %v65_v44 = vrot.slane %v52_v38, %v64_v37  ;;  %v330_v45 = vunpack.c.l.bf16 %v326_v41  ;;  %v61_v47 = vrot.slane %v52_v38, %v60_v39 }
  0x10   :  { %248 = vmatprep.subr.bf16.mxu0 %v452_v17  ;;  %291 = vmatprep.subr.bf16.mxu1 %v454_v18  ;;  %v69_v48 = vrot.slane %v52_v38, %v68_v40  ;;  %v331_v53 = vunpack.c.h.bf16 %v326_v41  ;;  %v336_v2 = vunpack.c.l.bf16 %v329_v56  ;;  %v337_v6 = vunpack.c.h.bf16 %v329_v56 }
  0x13   :  { %249 = vmatpush1.bf16.msra.mxu0 %v456_v19  ;;  %292 = vmatpush1.bf16.msra.mxu1 %v457_v20 }
  0x14   :  { %250 = vmatprep.subr.bf16.mxu0 %v458_v21  ;;  %293 = vmatprep.subr.bf16.mxu1 %v460_v22 }
  0x17   :  { %251 = vmatpush1.bf16.msra.mxu0 %v462_v23  ;;  %294 = vmatpush1.bf16.msra.mxu1 %v463_v24 }
  0x18   :  { %252 = vmatprep.subr.bf16.mxu0 %v464_v25  ;;  %295 = vmatprep.subr.bf16.mxu1 %v466_v26 }
  0x1b   :  { %253 = vmatpush1.bf16.msra.mxu0 %v468_v27  ;;  %296 = vmatpush1.bf16.msra.mxu1 %v469_v28 }
  0x1c   :  { %254 = vmatprep.subr.bf16.mxu0 %v470_v29  ;;  %297 = vmatprep.subr.bf16.mxu1 %v472_v30 }
  0x1f   :  { %255 = vmatpush1.bf16.msra.mxu0 %v474_v31  ;;  %298 = vmatpush1.bf16.msra.mxu1 %v475_v32 }
  0x22   :  { %273 = vmatmul.mubr.bf16.vlgmr.msra.gmra.mxu0 %v476_v33  ;;  %316 = vmatmul.mubr.bf16.vlgmr.msra.gmra.mxu1 %v476_v33 }
  0xe2   :  { %v274_v49 = vpop.f32.mrf.mxu0  ;;  %v317_v50 = vpop.f32.mrf.mxu1 }
  0xe3   :  { %v275_v51 = vadd.f32 %v274_v49, %v57_v43  ;;  %v318_v52 = vadd.f32 %v317_v50, %v65_v44 }
  0xe4   :  { %v276_v57 = vpop.f32.mrf.mxu0  ;;  %v319_v58 = vpop.f32.mrf.mxu1 }
  0xe5   :  { %v338_v59 = vadd.f32 %v330_v45, %v275_v51  ;;  %v340_v60 = vadd.f32 %v332_v46, %v318_v52  ;;  %v277_v61 = vadd.f32 %v276_v57, %v61_v47  ;;  %v320_v62 = vadd.f32 %v319_v58, %v69_v48 }
  0xe6   :  { %v278_v63 = vpop.f32.mrf.mxu0  ;;  %v321_v1 = vpop.f32.mrf.mxu1 }
  0xe7   :  { %v339_v3 = vadd.f32 %v331_v53, %v277_v61  ;;  %v341_v4 = vadd.f32 %v333_v54, %v320_v62  ;;  %v346_v7 = vmax.f32 %v338_v59, 0.0  ;;  %v348_v8 = vmax.f32 %v340_v60, 0.0 }
  0xe8   :  { %v279_v9 = vadd.f32 %v278_v63, %v57_v43  ;;  %v322_v10 = vadd.f32 %v321_v1, %v65_v44  ;;  %v280_v11 = vpop.f32.mrf.mxu0  ;;  %v323_v12 = vpop.f32.mrf.mxu1 }
  0xe9   :  { %v347_v13 = vmax.f32 %v339_v3, 0.0  ;;  %v349_v14 = vmax.f32 %v341_v4, 0.0  ;;  %v281_v15 = vadd.f32 %v280_v11, %v61_v47  ;;  %v324_v16 = vadd.f32 %v323_v12, %v69_v48 }
  0xea   :  { %v342_v17 = vadd.f32 %v334_v0, %v279_v9  ;;  %v344_v18 = vadd.f32 %v336_v2, %v322_v10 }
  0xeb   :  { %v423_v19 = vpack.c.bf16 %v347_v13, %v346_v7  ;;  %v424_v20 = vpack.c.bf16 %v349_v14, %v348_v8  ;;  %v343_v21 = vadd.f32 %v335_v5, %v281_v15  ;;  %v345_v22 = vadd.f32 %v337_v6, %v324_v16 }
  0xec   :  { %v350_v23 = vmax.f32 %v342_v17, 0.0  ;;  %v352_v24 = vmax.f32 %v344_v18, 0.0 }
  0xed   :  { %378 = vst [vmem:[%s633_s4] sm:$0xff] %v423_v19  ;;  %379 = vst [vmem:[%s633_s4 + $0x8] sm:$0xff] %v424_v20  ;;  %v351_v25 = vmax.f32 %v343_v21, 0.0  ;;  %v353_v26 = vmax.f32 %v345_v22, 0.0 }
  0xef   :  { %v425_v27 = vpack.c.bf16 %v351_v25, %v350_v23  ;;  %v426_v28 = vpack.c.bf16 %v353_v26, %v352_v24 }
  0xf1   :  { %380 = vst [vmem:[%s633_s4 + $0x10] sm:$0x33] %v425_v27  ;;  %381 = vst [vmem:[%s633_s4 + $0x18] sm:$0x33] %v426_v28 }

// kernel: _lambda_.63
= control target key start
LH: loop header
LB: loop body
LE: loop exit
PB: predicated region body
PF: predicated region fallthrough
CT: control target
= control target key end

     0   :  { %s660_s1 = inlined_call_operand.vmem [shape: bf16[512,128], index: 1, kind: input, shape index: {}]   ;;  %s661_s0 = inlined_call_operand.vmem [shape: bf16[12,512], index: 0, kind: input, shape index: {}]   ;;  %s662_s2 = inlined_call_operand.vmem [shape: f32[1,128], index: 2, kind: input, shape index: {}]   ;;  %s663_s3 = inlined_call_operand.vmem [shape: bf16[12,128], index: 3, kind: output, shape index: {}]  }
   0x1   :  { %v485_v0 = vld [vmem:[%s660_s1 + $0x78] sm:$0xff]   ;;  %v489_v4 = vld [vmem:[%s660_s1 + $0x70] sm:$0xff]   ;;  %v493_v8 = vld [vmem:[%s660_s1 + $0x68] sm:$0xff]  }
   0x2   :  { %v486_v1 = vld [vmem:[%s660_s1 + $0xf8] sm:$0xff]   ;;  %441 = vmatprep.subr.bf16.mxu0 %v485_v0  ;;  %v490_v5 = vld [vmem:[%s660_s1 + $0xf0] sm:$0xff]   ;;  %v494_v9 = vld [vmem:[%s660_s1 + $0xe8] sm:$0xff]  }
   0x3   :  { %v487_v2 = vld [vmem:[%s660_s1 + $0x38] sm:$0xff]   ;;  %463 = vmatprep.subr.bf16.mxu1 %v486_v1  ;;  %v491_v6 = vld [vmem:[%s660_s1 + $0x30] sm:$0xff]   ;;  %v495_v10 = vld [vmem:[%s660_s1 + $0x28] sm:$0xff]  }
   0x4   :  { %v488_v3 = vld [vmem:[%s660_s1 + $0xb8] sm:$0xff]   ;;  %442 = vmatpush3.bf16.msra.mxu0 %v487_v2  ;;  %v492_v7 = vld [vmem:[%s660_s1 + $0xb0] sm:$0xff]   ;;  %v496_v11 = vld [vmem:[%s660_s1 + $0xa8] sm:$0xff]  }
   0x5   :  { %464 = vmatpush3.bf16.msra.mxu1 %v488_v3  ;;  %443 = vmatprep.subr.bf16.mxu0 %v489_v4  ;;  %v497_v12 = vld [vmem:[%s660_s1 + $0x60] sm:$0xff]   ;;  %v501_v16 = vld [vmem:[%s660_s1 + $0x58] sm:$0xff]   ;;  %v505_v20 = vld [vmem:[%s660_s1 + $0x50] sm:$0xff]  }
   0x6   :  { %465 = vmatprep.subr.bf16.mxu1 %v490_v5  ;;  %v498_v13 = vld [vmem:[%s660_s1 + $0xe0] sm:$0xff]   ;;  %v502_v17 = vld [vmem:[%s660_s1 + $0xd8] sm:$0xff]   ;;  %v506_v21 = vld [vmem:[%s660_s1 + $0xd0] sm:$0xff]  }
   0x7   :  { %v499_v14 = vld [vmem:[%s660_s1 + $0x20] sm:$0xff]   ;;  %v503_v18 = vld [vmem:[%s660_s1 + $0x18] sm:$0xff]   ;;  %v507_v22 = vld [vmem:[%s660_s1 + $0x10] sm:$0xff]  }
   0x8   :  { %444 = vmatpush3.bf16.msra.mxu0 %v491_v6  ;;  %v500_v15 = vld [vmem:[%s660_s1 + $0xa0] sm:$0xff]   ;;  %v504_v19 = vld [vmem:[%s660_s1 + $0x98] sm:$0xff]   ;;  %v508_v23 = vld [vmem:[%s660_s1 + $0x90] sm:$0xff]  }
   0x9   :  { %466 = vmatpush3.bf16.msra.mxu1 %v492_v7  ;;  %445 = vmatprep.subr.bf16.mxu0 %v493_v8  ;;  %v509_v24 = vld [vmem:[%s660_s1 + $0x48] sm:$0xff]   ;;  %v513_v28 = vld [vmem:[%s660_s1 + $0x40] sm:$0xff]  }
   0xa   :  { %467 = vmatprep.subr.bf16.mxu1 %v494_v9  ;;  %v510_v25 = vld [vmem:[%s660_s1 + $0xc8] sm:$0xff]   ;;  %v514_v29 = vld [vmem:[%s660_s1 + $0xc0] sm:$0xff]  }
   0xb   :  { %v511_v26 = vld [vmem:[%s660_s1 + $0x8] sm:$0xff]   ;;  %v515_v30 = vld [vmem:[%s660_s1] sm:$0xff]  }
   0xc   :  { %446 = vmatpush3.bf16.msra.mxu0 %v495_v10  ;;  %v512_v27 = vld [vmem:[%s660_s1 + $0x88] sm:$0xff]   ;;  %v516_v31 = vld [vmem:[%s660_s1 + $0x80] sm:$0xff]  }
   0xd   :  { %468 = vmatpush3.bf16.msra.mxu1 %v496_v11  ;;  %447 = vmatprep.subr.bf16.mxu0 %v497_v12  ;;  %v517_v32 = vld [vmem:[%s661_s0] ss:$16 sps:$4 sm:$0x3f]   ;;  %v519_v33 = vld [vmem:[%s661_s0 + $0x4] ss:$16 sps:$4 sm:$0x3f]  }
   0xe   :  { %469 = vmatprep.subr.bf16.mxu1 %v498_v13  ;;  %v520_v34 = vld [vmem:[%s661_s0 + $0x8] ss:$16 sps:$4 sm:$0x3f]   ;;  %v522_v35 = vld [vmem:[%s661_s0 + $0xc] ss:$16 sps:$4 sm:$0x3f]   ;;  %334 = vmatprep.mubr.bf16.mxu0 %v519_v33 }
   0xf   :  { %375 = vmatprep.mubr.bf16.mxu1 %v522_v35  ;;  %v400_v38 = vld [vmem:[%s662_s2] ss:$0 sm:$0xff] }
  0x10   :  { %448 = vmatpush3.bf16.msra.mxu0 %v499_v14 }
  0x11   :  { %470 = vmatpush3.bf16.msra.mxu1 %v500_v15  ;;  %449 = vmatprep.subr.bf16.mxu0 %v501_v16 }
  0x12   :  { %471 = vmatprep.subr.bf16.mxu1 %v502_v17 }
  0x14   :  { %450 = vmatpush3.bf16.msra.mxu0 %v503_v18 }
  0x15   :  { %472 = vmatpush3.bf16.msra.mxu1 %v504_v19  ;;  %451 = vmatprep.subr.bf16.mxu0 %v505_v20 }
  0x16   :  { %473 = vmatprep.subr.bf16.mxu1 %v506_v21 }
  0x18   :  { %452 = vmatpush3.bf16.msra.mxu0 %v507_v22 }
  0x19   :  { %474 = vmatpush3.bf16.msra.mxu1 %v508_v23  ;;  %453 = vmatprep.subr.bf16.mxu0 %v509_v24 }
  0x1a   :  { %475 = vmatprep.subr.bf16.mxu1 %v510_v25 }
  0x1c   :  { %454 = vmatpush3.bf16.msra.mxu0 %v511_v26 }
  0x1d   :  { %476 = vmatpush3.bf16.msra.mxu1 %v512_v27  ;;  %455 = vmatprep.subr.bf16.mxu0 %v513_v28 }
  0x1e   :  { %477 = vmatprep.subr.bf16.mxu1 %v514_v29 }
  0x20   :  { %456 = vmatpush3.bf16.msra.mxu0 %v515_v30 }
  0x21   :  { %478 = vmatpush3.bf16.msra.mxu1 %v516_v31 }
  0x23   :  { %335 = vmatmul.mubr.bf16.vlgmr.msra.gmra.mxu0 %v517_v32 }
  0x24   :  { %376 = vmatmul.mubr.bf16.vlgmr.msra.gmra.mxu1 %v520_v34 }
  0xe3   :  { %v457_v36 = vpop.f32.mrf.mxu0 }
  0xe4   :  { %v479_v37 = vpop.f32.mrf.mxu1 }
  0xe5   :  { %v458_v39 = vpop.f32.mrf.mxu0 }
  0xe6   :  { %v459_v40 = vadd.f32 %v458_v39, %v457_v36  ;;  %v480_v41 = vpop.f32.mrf.mxu1 }
  0xe7   :  { %v460_v42 = vpop.f32.mrf.mxu0  ;;  %v481_v44 = vadd.f32 %v480_v41, %v479_v37 }
  0xe8   :  { %v337_v43 = vadd.f32 %v459_v40, %v400_v38  ;;  %v482_v45 = vpop.f32.mrf.mxu1 }
  0xe9   :  { %v461_v46 = vpop.f32.mrf.mxu0 }
  0xea   :  { %v378_v47 = vadd.f32 %v481_v44, %v337_v43  ;;  %v462_v48 = vadd.f32 %v461_v46, %v460_v42  ;;  %v483_v49 = vpop.f32.mrf.mxu1 }
  0xeb   :  { %v484_v52 = vadd.f32 %v483_v49, %v482_v45 }
  0xec   :  { %v384_v50 = vmax.f32 %v378_v47, 0.0  ;;  %v340_v51 = vadd.f32 %v462_v48, %v400_v38 }
  0xee   :  { %v439_v53 = vpack.c.bf16 %v384_v50, %v384_v50  ;;  %v381_v54 = vadd.f32 %v484_v52, %v340_v51 }
  0xf0   :  { %394 = vst [vmem:[%s663_s3] sm:$0xf] %v439_v53  ;;  %v385_v55 = vmax.f32 %v381_v54, 0.0 }
  0xf2   :  { %v440_v56 = vpack.c.bf16 %v385_v55, %v385_v55 }
  0xf4   :  { %395 = vst [vmem:[%s663_s3 + $0x4] sm:$0x3] %v440_v56 }

// kernel: _lambda_.61
= control target key start
LH: loop header
LB: loop body
LE: loop exit
PB: predicated region body
PF: predicated region fallthrough
CT: control target
= control target key end

     0   :  { %s956_s1 = inlined_call_operand.vmem [shape: bf16[256,512], index: 1, kind: input, shape index: {}]   ;;  %s957_s0 = inlined_call_operand.vmem [shape: bf16[12,256], index: 0, kind: input, shape index: {}]   ;;  %s958_s2 = inlined_call_operand.vmem [shape: f32[1,512], index: 2, kind: input, shape index: {}]   ;;  %s959_s3 = inlined_call_operand.vmem [shape: bf16[12,512], index: 3, kind: output, shape index: {}]  }
   0x1   :  { %v624_v0 = vld [vmem:[%s956_s1 + $0xe4] ss:$16 sps:$4 sm:$0xff]   ;;  %v626_v1 = vld [vmem:[%s956_s1 + $0xec] ss:$16 sps:$4 sm:$0xff]   ;;  %v628_v2 = vld [vmem:[%s956_s1 + $0xe0] ss:$16 sps:$4 sm:$0xff]  }
   0x2   :  { %432 = vmatprep.subr.bf16.mxu0 %v624_v0  ;;  %v629_v3 = vld [vmem:[%s956_s1 + $0xe8] ss:$16 sps:$4 sm:$0xff]   ;;  %475 = vmatprep.subr.bf16.mxu1 %v626_v1  ;;  %v630_v4 = vld [vmem:[%s956_s1 + $0xc4] ss:$16 sps:$4 sm:$0xff]   ;;  %v632_v5 = vld [vmem:[%s956_s1 + $0xcc] ss:$16 sps:$4 sm:$0xff]  }
   0x3   :  { %433 = vmatpush1.bf16.msra.mxu0 %v628_v2  ;;  %476 = vmatpush1.bf16.msra.mxu1 %v629_v3  ;;  %v634_v6 = vld [vmem:[%s956_s1 + $0xc0] ss:$16 sps:$4 sm:$0xff]   ;;  %v635_v7 = vld [vmem:[%s956_s1 + $0xc8] ss:$16 sps:$4 sm:$0xff]   ;;  %v636_v8 = vld [vmem:[%s956_s1 + $0xa4] ss:$16 sps:$4 sm:$0xff]   ;;  %v82_v2 = vlaneseq }
   0x4   :  { %434 = vmatprep.subr.bf16.mxu0 %v630_v4  ;;  %477 = vmatprep.subr.bf16.mxu1 %v632_v5  ;;  %v638_v9 = vld [vmem:[%s956_s1 + $0xac] ss:$16 sps:$4 sm:$0xff]   ;;  %v640_v10 = vld [vmem:[%s956_s1 + $0xa0] ss:$16 sps:$4 sm:$0xff]   ;;  %v641_v11 = vld [vmem:[%s956_s1 + $0xa8] ss:$16 sps:$4 sm:$0xff]  }
   0x5   :  { %v642_v12 = vld [vmem:[%s956_s1 + $0x84] ss:$16 sps:$4 sm:$0xff]   ;;  %v644_v13 = vld [vmem:[%s956_s1 + $0x8c] ss:$16 sps:$4 sm:$0xff]   ;;  %v646_v14 = vld [vmem:[%s956_s1 + $0x80] ss:$16 sps:$4 sm:$0xff]  }
   0x6   :  { %v647_v15 = vld [vmem:[%s956_s1 + $0x88] ss:$16 sps:$4 sm:$0xff]   ;;  %v648_v16 = vld [vmem:[%s956_s1 + $0x64] ss:$16 sps:$4 sm:$0xff]   ;;  %v650_v17 = vld [vmem:[%s956_s1 + $0x6c] ss:$16 sps:$4 sm:$0xff]  }
   0x7   :  { %435 = vmatpush1.bf16.msra.mxu0 %v634_v6  ;;  %478 = vmatpush1.bf16.msra.mxu1 %v635_v7  ;;  %v652_v18 = vld [vmem:[%s956_s1 + $0x60] ss:$16 sps:$4 sm:$0xff]   ;;  %v653_v19 = vld [vmem:[%s956_s1 + $0x68] ss:$16 sps:$4 sm:$0xff]   ;;  %v654_v20 = vld [vmem:[%s956_s1 + $0x44] ss:$16 sps:$4 sm:$0xff]  }
   0x8   :  { %436 = vmatprep.subr.bf16.mxu0 %v636_v8  ;;  %479 = vmatprep.subr.bf16.mxu1 %v638_v9  ;;  %v656_v21 = vld [vmem:[%s956_s1 + $0x4c] ss:$16 sps:$4 sm:$0xff]   ;;  %v658_v22 = vld [vmem:[%s956_s1 + $0x40] ss:$16 sps:$4 sm:$0xff]   ;;  %v659_v23 = vld [vmem:[%s956_s1 + $0x48] ss:$16 sps:$4 sm:$0xff]  }
   0x9   :  { %v660_v24 = vld [vmem:[%s956_s1 + $0x24] ss:$16 sps:$4 sm:$0xff]   ;;  %v662_v25 = vld [vmem:[%s956_s1 + $0x2c] ss:$16 sps:$4 sm:$0xff]   ;;  %v664_v26 = vld [vmem:[%s956_s1 + $0x20] ss:$16 sps:$4 sm:$0xff]  }
   0xa   :  { %v665_v27 = vld [vmem:[%s956_s1 + $0x28] ss:$16 sps:$4 sm:$0xff]   ;;  %v666_v28 = vld [vmem:[%s956_s1 + $0x4] ss:$16 sps:$4 sm:$0xff]   ;;  %v668_v29 = vld [vmem:[%s956_s1 + $0xc] ss:$16 sps:$4 sm:$0xff]  }
   0xb   :  { %437 = vmatpush1.bf16.msra.mxu0 %v640_v10  ;;  %480 = vmatpush1.bf16.msra.mxu1 %v641_v11  ;;  %v670_v30 = vld [vmem:[%s956_s1] ss:$16 sps:$4 sm:$0xff]   ;;  %v671_v31 = vld [vmem:[%s956_s1 + $0x8] ss:$16 sps:$4 sm:$0xff]   ;;  %v672_v32 = vld [vmem:[%s956_s1 + $0x1e4] ss:$16 sps:$4 sm:$0xff]  }
   0xc   :  { %438 = vmatprep.subr.bf16.mxu0 %v642_v12  ;;  %481 = vmatprep.subr.bf16.mxu1 %v644_v13  ;;  %v674_v33 = vld [vmem:[%s956_s1 + $0x1ec] ss:$16 sps:$4 sm:$0xff]   ;;  %v676_v34 = vld [vmem:[%s956_s1 + $0x1e0] ss:$16 sps:$4 sm:$0xff]   ;;  %v677_v35 = vld [vmem:[%s956_s1 + $0x1e8] ss:$16 sps:$4 sm:$0xff]  }
   0xd   :  { %v678_v36 = vld [vmem:[%s956_s1 + $0x1c4] ss:$16 sps:$4 sm:$0xff]   ;;  %v680_v37 = vld [vmem:[%s956_s1 + $0x1cc] ss:$16 sps:$4 sm:$0xff]   ;;  %v682_v38 = vld [vmem:[%s956_s1 + $0x1c0] ss:$16 sps:$4 sm:$0xff]  }
   0xe   :  { %v683_v39 = vld [vmem:[%s956_s1 + $0x1c8] ss:$16 sps:$4 sm:$0xff]   ;;  %v684_v40 = vld [vmem:[%s956_s1 + $0x1a4] ss:$16 sps:$4 sm:$0xff]   ;;  %v686_v41 = vld [vmem:[%s956_s1 + $0x1ac] ss:$16 sps:$4 sm:$0xff]  }
   0xf   :  { %439 = vmatpush1.bf16.msra.mxu0 %v646_v14  ;;  %482 = vmatpush1.bf16.msra.mxu1 %v647_v15  ;;  %v688_v42 = vld [vmem:[%s956_s1 + $0x1a0] ss:$16 sps:$4 sm:$0xff]   ;;  %v689_v43 = vld [vmem:[%s956_s1 + $0x1a8] ss:$16 sps:$4 sm:$0xff]   ;;  %v690_v44 = vld [vmem:[%s956_s1 + $0x184] ss:$16 sps:$4 sm:$0xff]  }
  0x10   :  { %440 = vmatprep.subr.bf16.mxu0 %v648_v16  ;;  %483 = vmatprep.subr.bf16.mxu1 %v650_v17  ;;  %v692_v45 = vld [vmem:[%s956_s1 + $0x18c] ss:$16 sps:$4 sm:$0xff]   ;;  %v694_v46 = vld [vmem:[%s956_s1 + $0x180] ss:$16 sps:$4 sm:$0xff]   ;;  %v695_v47 = vld [vmem:[%s956_s1 + $0x188] ss:$16 sps:$4 sm:$0xff]  }
  0x11   :  { %v722_v48 = vld [vmem:[%s957_s0 + $0x4] ss:$8 sps:$4 sm:$0x3f]   ;;  %v700_v51 = vld [vmem:[%s956_s1 + $0x160] ss:$16 sps:$4 sm:$0xff]   ;;  %v83_v3 = vshrl.u32 %v82_v2, 7 }
  0x12   :  { %v696_v49 = vld [vmem:[%s956_s1 + $0x164] ss:$16 sps:$4 sm:$0xff]   ;;  %v698_v50 = vld [vmem:[%s956_s1 + $0x16c] ss:$16 sps:$4 sm:$0xff]   ;;  %464 = vmatprep.mubr.bf16.mxu0 %v722_v48  ;;  %507 = vmatprep.mubr.bf16.mxu1 %v722_v48  ;;  %v701_v52 = vld [vmem:[%s956_s1 + $0x168] ss:$16 sps:$4 sm:$0xff]  }
  0x13   :  { %441 = vmatpush1.bf16.msra.mxu0 %v652_v18  ;;  %484 = vmatpush1.bf16.msra.mxu1 %v653_v19  ;;  %v702_v53 = vld [vmem:[%s956_s1 + $0x144] ss:$16 sps:$4 sm:$0xff]   ;;  %v704_v54 = vld [vmem:[%s956_s1 + $0x14c] ss:$16 sps:$4 sm:$0xff]   ;;  %v706_v55 = vld [vmem:[%s956_s1 + $0x140] ss:$16 sps:$4 sm:$0xff]  }
  0x14   :  { %442 = vmatprep.subr.bf16.mxu0 %v654_v20  ;;  %485 = vmatprep.subr.bf16.mxu1 %v656_v21  ;;  %v707_v56 = vld [vmem:[%s956_s1 + $0x148] ss:$16 sps:$4 sm:$0xff]   ;;  %v708_v57 = vld [vmem:[%s956_s1 + $0x124] ss:$16 sps:$4 sm:$0xff]   ;;  %v710_v58 = vld [vmem:[%s956_s1 + $0x12c] ss:$16 sps:$4 sm:$0xff]  }
  0x15   :  { %v712_v59 = vld [vmem:[%s956_s1 + $0x120] ss:$16 sps:$4 sm:$0xff]   ;;  %v713_v60 = vld [vmem:[%s956_s1 + $0x128] ss:$16 sps:$4 sm:$0xff]   ;;  %v714_v61 = vld [vmem:[%s956_s1 + $0x104] ss:$16 sps:$4 sm:$0xff]  }
  0x16   :  { %v716_v62 = vld [vmem:[%s956_s1 + $0x10c] ss:$16 sps:$4 sm:$0xff]   ;;  %v718_v63 = vld [vmem:[%s956_s1 + $0x100] ss:$16 sps:$4 sm:$0xff]   ;;  %v719_v0 = vld [vmem:[%s956_s1 + $0x108] ss:$16 sps:$4 sm:$0xff]  }
  0x17   :  { %443 = vmatpush1.bf16.msra.mxu0 %v658_v22  ;;  %486 = vmatpush1.bf16.msra.mxu1 %v659_v23  ;;  %v720_v1 = vld [vmem:[%s957_s0] ss:$8 sps:$4 sm:$0x3f]   ;;  %v84_v4 = vsub.s32 0, %v83_v3  ;;  %v92_v5 = vsub.s32 2, %v83_v3  ;;  %v88_v6 = vsub.s32 1, %v83_v3 }
  0x18   :  { %444 = vmatprep.subr.bf16.mxu0 %v660_v24  ;;  %487 = vmatprep.subr.bf16.mxu1 %v662_v25  ;;  %v96_v7 = vsub.s32 3, %v83_v3  ;;  %v80_v8 = vld [vmem:[%s958_s2] sm:$0xf] }
  0x19   :  { %v85_v9 = vrot.slane %v80_v8, %v84_v4  ;;  %v93_v10 = vrot.slane %v80_v8, %v92_v5  ;;  %v89_v11 = vrot.slane %v80_v8, %v88_v6 }
  0x1a   :  { %v97_v12 = vrot.slane %v80_v8, %v96_v7 }
  0x1b   :  { %445 = vmatpush1.bf16.msra.mxu0 %v664_v26  ;;  %488 = vmatpush1.bf16.msra.mxu1 %v665_v27 }
  0x1c   :  { %446 = vmatprep.subr.bf16.mxu0 %v666_v28  ;;  %489 = vmatprep.subr.bf16.mxu1 %v668_v29 }
  0x1f   :  { %447 = vmatpush1.bf16.msra.mxu0 %v670_v30  ;;  %490 = vmatpush1.bf16.msra.mxu1 %v671_v31 }
  0x20   :  { %448 = vmatprep.subr.bf16.mxu0 %v672_v32  ;;  %491 = vmatprep.subr.bf16.mxu1 %v674_v33 }
  0x23   :  { %449 = vmatpush2.bf16.msra.mxu0 %v676_v34  ;;  %492 = vmatpush2.bf16.msra.mxu1 %v677_v35 }
  0x24   :  { %450 = vmatprep.subr.bf16.mxu0 %v678_v36  ;;  %493 = vmatprep.subr.bf16.mxu1 %v680_v37 }
  0x27   :  { %451 = vmatpush2.bf16.msra.mxu0 %v682_v38  ;;  %494 = vmatpush2.bf16.msra.mxu1 %v683_v39 }
  0x28   :  { %452 = vmatprep.subr.bf16.mxu0 %v684_v40  ;;  %495 = vmatprep.subr.bf16.mxu1 %v686_v41 }
  0x2b   :  { %453 = vmatpush2.bf16.msra.mxu0 %v688_v42  ;;  %496 = vmatpush2.bf16.msra.mxu1 %v689_v43 }
  0x2c   :  { %454 = vmatprep.subr.bf16.mxu0 %v690_v44  ;;  %497 = vmatprep.subr.bf16.mxu1 %v692_v45 }
  0x2f   :  { %455 = vmatpush2.bf16.msra.mxu0 %v694_v46  ;;  %498 = vmatpush2.bf16.msra.mxu1 %v695_v47 }
  0x30   :  { %456 = vmatprep.subr.bf16.mxu0 %v696_v49  ;;  %499 = vmatprep.subr.bf16.mxu1 %v698_v50 }
  0x33   :  { %457 = vmatpush2.bf16.msra.mxu0 %v700_v51  ;;  %500 = vmatpush2.bf16.msra.mxu1 %v701_v52 }
  0x34   :  { %458 = vmatprep.subr.bf16.mxu0 %v702_v53  ;;  %501 = vmatprep.subr.bf16.mxu1 %v704_v54 }
  0x37   :  { %459 = vmatpush2.bf16.msra.mxu0 %v706_v55  ;;  %502 = vmatpush2.bf16.msra.mxu1 %v707_v56 }
  0x38   :  { %460 = vmatprep.subr.bf16.mxu0 %v708_v57  ;;  %503 = vmatprep.subr.bf16.mxu1 %v710_v58 }
  0x3b   :  { %461 = vmatpush2.bf16.msra.mxu0 %v712_v59  ;;  %504 = vmatpush2.bf16.msra.mxu1 %v713_v60 }
  0x3c   :  { %462 = vmatprep.subr.bf16.mxu0 %v714_v61  ;;  %505 = vmatprep.subr.bf16.mxu1 %v716_v62 }
  0x3f   :  { %463 = vmatpush2.bf16.msra.mxu0 %v718_v63  ;;  %506 = vmatpush2.bf16.msra.mxu1 %v719_v0 }
  0x42   :  { %465 = vmatmul.mubr.bf16.vlgmr.msra.gmra.mxu0 %v720_v1  ;;  %508 = vmatmul.mubr.bf16.vlgmr.msra.gmra.mxu1 %v720_v1 }
 0x102   :  { %v466_v13 = vpop.f32.mrf.mxu0  ;;  %v509_v14 = vpop.f32.mrf.mxu1 }
 0x103   :  { %v467_v17 = vadd.f32 %v466_v13, %v85_v9  ;;  %v510_v18 = vadd.f32 %v509_v14, %v93_v10 }
 0x104   :  { %v468_v15 = vpop.f32.mrf.mxu0  ;;  %v511_v16 = vpop.f32.mrf.mxu1 }
 0x105   :  { %v469_v19 = vadd.f32 %v468_v15, %v89_v11  ;;  %v512_v20 = vadd.f32 %v511_v16, %v97_v12 }
 0x106   :  { %v470_v21 = vpop.f32.mrf.mxu0  ;;  %v513_v22 = vpop.f32.mrf.mxu1 }
 0x107   :  { %v620_v23 = vpack.c.bf16 %v469_v19, %v467_v17  ;;  %v621_v24 = vpack.c.bf16 %v512_v20, %v510_v18  ;;  %v471_v27 = vadd.f32 %v470_v21, %v85_v9  ;;  %v514_v28 = vadd.f32 %v513_v22, %v93_v10 }
 0x108   :  { %v472_v25 = vpop.f32.mrf.mxu0  ;;  %v515_v26 = vpop.f32.mrf.mxu1 }
 0x109   :  { %542 = vst [vmem:[%s959_s3] sm:$0xff] %v620_v23  ;;  %543 = vst [vmem:[%s959_s3 + $0x8] sm:$0xff] %v621_v24  ;;  %v473_v29 = vadd.f32 %v472_v25, %v89_v11  ;;  %v516_v30 = vadd.f32 %v515_v26, %v97_v12 }
 0x10b   :  { %v622_v31 = vpack.c.bf16 %v473_v29, %v471_v27  ;;  %v623_v32 = vpack.c.bf16 %v516_v30, %v514_v28 }
 0x10d   :  { %544 = vst [vmem:[%s959_s3 + $0x10] sm:$0x33] %v622_v31  ;;  %545 = vst [vmem:[%s959_s3 + $0x18] sm:$0x33] %v623_v32 }

// kernel: _lambda_.60
= control target key start
LH: loop header
LB: loop body
LE: loop exit
PB: predicated region body
PF: predicated region fallthrough
CT: control target
= control target key end

     0   :  { %vm1166_vm0 = vmmov 0   ;;  %s1439_s1 = inlined_call_operand.vmem [shape: bf16[1152,128], index: 1, kind: input, shape index: {}]   ;;  %s1440_s0 = inlined_call_operand.vmem [shape: bf16[12,1152], index: 0, kind: input, shape index: {}]   ;;  %s1441_s2 = inlined_call_operand.vmem [shape: f32[1,128], index: 2, kind: input, shape index: {}]   ;;  %s1442_s3 = inlined_call_operand.vmem [shape: bf16[12,128], index: 3, kind: output, shape index: {}]  }
   0x1   :  { %v1080_v0 = vld [vmem:[%s1439_s1 + $0x78] sm:$0xff]   ;;  %v1084_v4 = vld [vmem:[%s1439_s1 + $0x70] sm:$0xff]   ;;  %v1088_v8 = vld [vmem:[%s1439_s1 + $0x68] sm:$0xff]  }
   0x2   :  { %v1081_v1 = vld [vmem:[%s1439_s1 + $0x38] sm:$0xff]   ;;  %961 = vmatprep.subr.bf16.mxu0 %v1080_v0  ;;  %v1085_v5 = vld [vmem:[%s1439_s1 + $0x30] sm:$0xff]   ;;  %v1089_v9 = vld [vmem:[%s1439_s1 + $0x28] sm:$0xff]  }
   0x3   :  { %v1082_v2 = vld [vmem:[%s1439_s1 + $0xf8] sm:$0xff]   ;;  %962 = vmatpush3.bf16.msra.mxu0 %v1081_v1  ;;  %v1086_v6 = vld [vmem:[%s1439_s1 + $0xf0] sm:$0xff]   ;;  %v1090_v10 = vld [vmem:[%s1439_s1 + $0xe8] sm:$0xff]  }
   0x4   :  { %v1083_v3 = vld [vmem:[%s1439_s1 + $0xb8] sm:$0xff]   ;;  %983 = vmatprep.subr.bf16.mxu1 %v1082_v2  ;;  %963 = vmatprep.subr.bf16.mxu0 %v1084_v4  ;;  %v1087_v7 = vld [vmem:[%s1439_s1 + $0xb0] sm:$0xff]   ;;  %v1091_v11 = vld [vmem:[%s1439_s1 + $0xa8] sm:$0xff]  }
   0x5   :  { %984 = vmatpush3.bf16.msra.mxu1 %v1083_v3  ;;  %v1092_v12 = vld [vmem:[%s1439_s1 + $0x60] sm:$0xff]   ;;  %v1096_v16 = vld [vmem:[%s1439_s1 + $0x58] sm:$0xff]   ;;  %v1100_v20 = vld [vmem:[%s1439_s1 + $0x50] sm:$0xff]  }
   0x6   :  { %985 = vmatprep.subr.bf16.mxu1 %v1086_v6  ;;  %v1093_v13 = vld [vmem:[%s1439_s1 + $0x20] sm:$0xff]   ;;  %v1097_v17 = vld [vmem:[%s1439_s1 + $0x18] sm:$0xff]   ;;  %v1101_v21 = vld [vmem:[%s1439_s1 + $0x10] sm:$0xff]   ;;  %v1165_v6 = vmov 0.0  }
   0x7   :  { %964 = vmatpush3.bf16.msra.mxu0 %v1085_v5  ;;  %v1094_v14 = vld [vmem:[%s1439_s1 + $0xe0] sm:$0xff]   ;;  %v1098_v18 = vld [vmem:[%s1439_s1 + $0xd8] sm:$0xff]   ;;  %v1102_v22 = vld [vmem:[%s1439_s1 + $0xd0] sm:$0xff]  }
   0x8   :  { %965 = vmatprep.subr.bf16.mxu0 %v1088_v8  ;;  %v1095_v15 = vld [vmem:[%s1439_s1 + $0xa0] sm:$0xff]   ;;  %v1099_v19 = vld [vmem:[%s1439_s1 + $0x98] sm:$0xff]   ;;  %v1103_v23 = vld [vmem:[%s1439_s1 + $0x90] sm:$0xff]  }
   0x9   :  { %986 = vmatpush3.bf16.msra.mxu1 %v1087_v7  ;;  %v1104_v24 = vld [vmem:[%s1439_s1 + $0x48] sm:$0xff]   ;;  %v1108_v28 = vld [vmem:[%s1439_s1 + $0x40] sm:$0xff]   ;;  %v1115_v34 = vld [vmem:[%s1439_s1 + $0x178] sm:$0xff]  }
   0xa   :  { %987 = vmatprep.subr.bf16.mxu1 %v1090_v10  ;;  %v1105_v25 = vld [vmem:[%s1439_s1 + $0x8] sm:$0xff]   ;;  %v1109_v29 = vld [vmem:[%s1439_s1] sm:$0xff]   ;;  %v1119_v37 = vld [vmem:[%s1439_s1 + $0x138] sm:$0xff]  }
   0xb   :  { %966 = vmatpush3.bf16.msra.mxu0 %v1089_v9  ;;  %v1106_v26 = vld [vmem:[%s1439_s1 + $0xc8] sm:$0xff]   ;;  %v1110_v30 = vld [vmem:[%s1439_s1 + $0xc0] sm:$0xff]   ;;  %v1120_v38 = vld [vmem:[%s1439_s1 + $0x1f8] sm:$0xff]  }
   0xc   :  { %967 = vmatprep.subr.bf16.mxu0 %v1092_v12  ;;  %v1107_v27 = vld [vmem:[%s1439_s1 + $0x88] sm:$0xff]   ;;  %v1111_v31 = vld [vmem:[%s1440_s0] ss:$36 sps:$4 sm:$0x3f]   ;;  %v1121_v39 = vld [vmem:[%s1439_s1 + $0x1b8] sm:$0xff]  }
   0xd   :  { %988 = vmatpush3.bf16.msra.mxu1 %v1091_v11  ;;  %v1113_v32 = vld [vmem:[%s1440_s0 + $0x4] ss:$36 sps:$4 sm:$0x3f]   ;;  %v1118_v36 = vld [vmem:[%s1440_s0 + $0xc] ss:$36 sps:$4 sm:$0x3f]  }
   0xe   :  { %989 = vmatprep.subr.bf16.mxu1 %v1094_v14  ;;  %v1114_v33 = vld [vmem:[%s1439_s1 + $0x80] sm:$0xff]   ;;  %686 = vmatprep.mubr.bf16.mxu0 %v1113_v32  ;;  %v1116_v35 = vld [vmem:[%s1440_s0 + $0x8] ss:$36 sps:$4 sm:$0x3f]   ;;  %v1122_v40 = vld [vmem:[%s1439_s1 + $0x170] sm:$0xff]  }
   0xf   :  { %968 = vmatpush3.bf16.msra.mxu0 %v1093_v13  ;;  %727 = vmatprep.mubr.bf16.mxu1 %v1118_v36  ;;  %v1123_v41 = vld [vmem:[%s1439_s1 + $0x130] sm:$0xff]   ;;  %v1126_v44 = vld [vmem:[%s1439_s1 + $0x168] sm:$0xff]   ;;  %v1130_v48 = vld [vmem:[%s1439_s1 + $0x160] sm:$0xff]  }
  0x10   :  { %969 = vmatprep.subr.bf16.mxu0 %v1096_v16  ;;  %v1124_v42 = vld [vmem:[%s1439_s1 + $0x1f0] sm:$0xff]   ;;  %v1127_v45 = vld [vmem:[%s1439_s1 + $0x128] sm:$0xff]   ;;  %v1131_v49 = vld [vmem:[%s1439_s1 + $0x120] sm:$0xff]  }
  0x11   :  { %990 = vmatpush3.bf16.msra.mxu1 %v1095_v15  ;;  %v1125_v43 = vld [vmem:[%s1439_s1 + $0x1b0] sm:$0xff]   ;;  %v1128_v46 = vld [vmem:[%s1439_s1 + $0x1e8] sm:$0xff]   ;;  %v1132_v50 = vld [vmem:[%s1439_s1 + $0x1e0] sm:$0xff]  }
  0x12   :  { %991 = vmatprep.subr.bf16.mxu1 %v1098_v18  ;;  %v1129_v47 = vld [vmem:[%s1439_s1 + $0x1a8] sm:$0xff]   ;;  %v1133_v51 = vld [vmem:[%s1439_s1 + $0x1a0] sm:$0xff]   ;;  %v1134_v52 = vld [vmem:[%s1439_s1 + $0x158] sm:$0xff]  }
  0x13   :  { %970 = vmatpush3.bf16.msra.mxu0 %v1097_v17  ;;  %v1135_v53 = vld [vmem:[%s1439_s1 + $0x118] sm:$0xff]   ;;  %v1138_v56 = vld [vmem:[%s1439_s1 + $0x150] sm:$0xff]   ;;  %v1142_v60 = vld [vmem:[%s1439_s1 + $0x148] sm:$0xff]  }
  0x14   :  { %971 = vmatprep.subr.bf16.mxu0 %v1100_v20  ;;  %v1136_v54 = vld [vmem:[%s1439_s1 + $0x1d8] sm:$0xff]   ;;  %v1139_v57 = vld [vmem:[%s1439_s1 + $0x110] sm:$0xff]   ;;  %v1143_v61 = vld [vmem:[%s1439_s1 + $0x108] sm:$0xff]  }
  0x15   :  { %992 = vmatpush3.bf16.msra.mxu1 %v1099_v19  ;;  %v1137_v55 = vld [vmem:[%s1439_s1 + $0x198] sm:$0xff]   ;;  %v1140_v58 = vld [vmem:[%s1439_s1 + $0x1d0] sm:$0xff]   ;;  %v1144_v62 = vld [vmem:[%s1439_s1 + $0x1c8] sm:$0xff]  }
  0x16   :  { %993 = vmatprep.subr.bf16.mxu1 %v1102_v22  ;;  %v1141_v59 = vld [vmem:[%s1439_s1 + $0x190] sm:$0xff]   ;;  %v1145_v63 = vld [vmem:[%s1439_s1 + $0x188] sm:$0xff]   ;;  %v1146_v0 = vld [vmem:[%s1439_s1 + $0x140] sm:$0xff]  }
  0x17   :  { %972 = vmatpush3.bf16.msra.mxu0 %v1101_v21  ;;  %v1147_v1 = vld [vmem:[%s1439_s1 + $0x100] sm:$0xff]   ;;  %v1149_v3 = vld [vmem:[%s1440_s0 + $0x10] ss:$36 sps:$4 sm:$0x3f]   ;;  %v1156_v9 = vld [vmem:[%s1439_s1 + $0x238] sm:$0xff]  }
  0x18   :  { %973 = vmatprep.subr.bf16.mxu0 %v1104_v24  ;;  %v1148_v2 = vld [vmem:[%s1439_s1 + $0x1c0] sm:$0xff]   ;;  %v1151_v4 = vld [vmem:[%s1440_s0 + $0x14] ss:$36 sps:$4 sm:$0x3f]   ;;  %v1158_v11 = vld [vmem:[%s1439_s1 + $0x228] sm:$0xff]  }
  0x19   :  { %994 = vmatpush3.bf16.msra.mxu1 %v1103_v23  ;;  %v1152_v5 = vld [vmem:[%s1439_s1 + $0x180] sm:$0xff]   ;;  %v1153_v7 = vld [vmem:[%s1440_s0 + $0x18] ss:$36 sps:$4 sm:$0x3f]   ;;  %v1157_v10 = vld [vmem:[%s1439_s1 + $0x230] sm:$0xff]  }
  0x1a   :  { %995 = vmatprep.subr.bf16.mxu1 %v1106_v26  ;;  %v1155_v8 = vld [vmem:[%s1440_s0 + $0x1c] ss:$36 sps:$4 sm:$0x3f]   ;;  %v1161_v14 = vld [vmem:[%s1439_s1 + $0x210] sm:$0xff]   ;;  %v1162_v15 = vld [vmem:[%s1439_s1 + $0x208] sm:$0xff]  }
  0x1b   :  { %974 = vmatpush3.bf16.msra.mxu0 %v1105_v25  ;;  %v1159_v12 = vld [vmem:[%s1439_s1 + $0x220] sm:$0xff]   ;;  %v1160_v13 = vld [vmem:[%s1439_s1 + $0x218] sm:$0xff]  }
  0x1c   :  { %975 = vmatprep.subr.bf16.mxu0 %v1108_v28  ;;  %v1163_v16 = vld [vmem:[%s1439_s1 + $0x200] sm:$0xff]  }
  0x1d   :  { %996 = vmatpush3.bf16.msra.mxu1 %v1107_v27  ;;  %v1164_v17 = vld [vmem:[%s1440_s0 + $0x20] ss:$36 sps:$4 sm:$0x3f]  }
  0x1e   :  { %997 = vmatprep.subr.bf16.mxu1 %v1110_v30  ;;  %v875_v30 = vld [vmem:[%s1441_s2] ss:$0 sm:$0xff] }
  0x1f   :  { %976 = vmatpush3.bf16.msra.mxu0 %v1109_v29 }
  0x20   :  { %1005 = vmatprep.subr.bf16.mxu0 %v1115_v34 }
  0x21   :  { %998 = vmatpush3.bf16.msra.mxu1 %v1114_v33 }
  0x22   :  { %687 = vmatmul.mubr.bf16.vlgmr.msra.gmra.mxu0 %v1111_v31  ;;  %1027 = vmatprep.subr.bf16.mxu1 %v1120_v38 }
  0x23   :  { %1006 = vmatpush3.bf16.msra.mxu0 %v1119_v37  ;;  %768 = vmatprep.mubr.bf16.mxu0 %v1151_v4 }
  0x24   :  { %728 = vmatmul.mubr.bf16.vlgmr.msra.gmra.mxu1 %v1116_v35  ;;  %1007 = vmatprep.subr.bf16.mxu0 %v1122_v40 }
  0x25   :  { %1028 = vmatpush3.bf16.msra.mxu1 %v1121_v39  ;;  %809 = vmatprep.mubr.bf16.mxu1 %v1155_v8 }
  0x26   :  { %1029 = vmatprep.subr.bf16.mxu1 %v1124_v42 }
  0x27   :  { %1008 = vmatpush3.bf16.msra.mxu0 %v1123_v41 }
  0x28   :  { %1009 = vmatprep.subr.bf16.mxu0 %v1126_v44 }
  0x29   :  { %1030 = vmatpush3.bf16.msra.mxu1 %v1125_v43 }
  0x2a   :  { %1031 = vmatprep.subr.bf16.mxu1 %v1128_v46 }
  0x2b   :  { %1010 = vmatpush3.bf16.msra.mxu0 %v1127_v45 }
  0x2c   :  { %1011 = vmatprep.subr.bf16.mxu0 %v1130_v48 }
  0x2d   :  { %1032 = vmatpush3.bf16.msra.mxu1 %v1129_v47 }
  0x2e   :  { %1033 = vmatprep.subr.bf16.mxu1 %v1132_v50 }
  0x2f   :  { %1012 = vmatpush3.bf16.msra.mxu0 %v1131_v49 }
  0x30   :  { %1013 = vmatprep.subr.bf16.mxu0 %v1134_v52 }
  0x31   :  { %1034 = vmatpush3.bf16.msra.mxu1 %v1133_v51 }
  0x32   :  { %1035 = vmatprep.subr.bf16.mxu1 %v1136_v54 }
  0x33   :  { %1014 = vmatpush3.bf16.msra.mxu0 %v1135_v53 }
  0x34   :  { %1015 = vmatprep.subr.bf16.mxu0 %v1138_v56 }
  0x35   :  { %1036 = vmatpush3.bf16.msra.mxu1 %v1137_v55 }
  0x36   :  { %1037 = vmatprep.subr.bf16.mxu1 %v1140_v58 }
  0x37   :  { %1016 = vmatpush3.bf16.msra.mxu0 %v1139_v57 }
  0x38   :  { %1017 = vmatprep.subr.bf16.mxu0 %v1142_v60 }
  0x39   :  { %1038 = vmatpush3.bf16.msra.mxu1 %v1141_v59 }
  0x3a   :  { %1039 = vmatprep.subr.bf16.mxu1 %v1144_v62 }
  0x3b   :  { %1018 = vmatpush3.bf16.msra.mxu0 %v1143_v61 }
  0x3c   :  { %1019 = vmatprep.subr.bf16.mxu0 %v1146_v0 }
  0x3d   :  { %1040 = vmatpush3.bf16.msra.mxu1 %v1145_v63 }
  0x3e   :  { %1041 = vmatprep.subr.bf16.mxu1 %v1148_v2 }
  0x3f   :  { %1020 = vmatpush3.bf16.msra.mxu0 %v1147_v1 }
  0x40   :  { %1058 = vmatprep.subr.bf16.mxu0 %v1165_v6 }
  0x41   :  { %1042 = vmatpush3.bf16.msra.mxu1 %v1152_v5 }
  0x42   :  { %769 = vmatmul.mubr.bf16.vlgmr.msra.gmra.mxu0 %v1149_v3 }
  0x43   :  { %1074 = vmatprep.mubr.msk.bf16.mxu0 %vm1166_vm0, %v1165_v6  ;;  %1059 = vmatpush3.bf16.msra.mxu0 %v1156_v9 }
  0x44   :  { %810 = vmatmul.mubr.bf16.vlgmr.msra.gmra.mxu1 %v1153_v7  ;;  %1060 = vmatprep.subr.bf16.mxu0 %v1165_v6 }
  0x47   :  { %1061 = vmatpush3.bf16.msra.mxu0 %v1157_v10 }
  0x48   :  { %1062 = vmatprep.subr.bf16.mxu0 %v1165_v6 }
  0x4b   :  { %1063 = vmatpush3.bf16.msra.mxu0 %v1158_v11 }
  0x4c   :  { %1064 = vmatprep.subr.bf16.mxu0 %v1165_v6 }
  0x4f   :  { %1065 = vmatpush3.bf16.msra.mxu0 %v1159_v12 }
  0x50   :  { %1066 = vmatprep.subr.bf16.mxu0 %v1165_v6 }
  0x53   :  { %1067 = vmatpush3.bf16.msra.mxu0 %v1160_v13 }
  0x54   :  { %1068 = vmatprep.subr.bf16.mxu0 %v1165_v6 }
  0x57   :  { %1069 = vmatpush3.bf16.msra.mxu0 %v1161_v14 }
  0x58   :  { %1070 = vmatprep.subr.bf16.mxu0 %v1165_v6 }
  0x5b   :  { %1071 = vmatpush3.bf16.msra.mxu0 %v1162_v15 }
  0x5c   :  { %1072 = vmatprep.subr.bf16.mxu0 %v1165_v6 }
  0x5f   :  { %1073 = vmatpush3.bf16.msra.mxu0 %v1163_v16 }
  0x62   :  { %1075 = vmatmul.mubr.bf16.vlgmr.msra.gmra.mxu0 %v1164_v17 }
  0xe2   :  { %v977_v18 = vpop.f32.mrf.mxu0 }
  0xe4   :  { %v978_v19 = vpop.f32.mrf.mxu0  ;;  %v999_v20 = vpop.f32.mrf.mxu1 }
  0xe5   :  { %v979_v29 = vadd.f32 %v978_v19, %v977_v18 }
  0xe6   :  { %v980_v21 = vpop.f32.mrf.mxu0  ;;  %v1000_v22 = vpop.f32.mrf.mxu1 }
  0xe7   :  { %v689_v33 = vadd.f32 %v979_v29, %v875_v30  ;;  %v1001_v34 = vadd.f32 %v1000_v22, %v999_v20 }
  0xe8   :  { %v981_v23 = vpop.f32.mrf.mxu0  ;;  %v1002_v24 = vpop.f32.mrf.mxu1 }
  0xe9   :  { %v982_v35 = vadd.f32 %v981_v23, %v980_v21  ;;  %v730_v39 = vadd.f32 %v1001_v34, %v689_v33 }
  0xea   :  { %v1003_v26 = vpop.f32.mrf.mxu1 }
  0xeb   :  { %v692_v40 = vadd.f32 %v982_v35, %v875_v30  ;;  %v1004_v41 = vadd.f32 %v1003_v26, %v1002_v24 }
  0xed   :  { %v733_v46 = vadd.f32 %v1004_v41, %v692_v40 }
 0x102   :  { %v1021_v25 = vpop.f32.mrf.mxu0 }
 0x104   :  { %v1022_v27 = vpop.f32.mrf.mxu0  ;;  %v1043_v28 = vpop.f32.mrf.mxu1 }
 0x105   :  { %v1023_v36 = vadd.f32 %v1022_v27, %v1021_v25 }
 0x106   :  { %v1024_v31 = vpop.f32.mrf.mxu0  ;;  %v1044_v32 = vpop.f32.mrf.mxu1 }
 0x107   :  { %v771_v42 = vadd.f32 %v1023_v36, %v730_v39  ;;  %v1045_v43 = vadd.f32 %v1044_v32, %v1043_v28 }
 0x108   :  { %v1025_v37 = vpop.f32.mrf.mxu0  ;;  %v1046_v38 = vpop.f32.mrf.mxu1 }
 0x109   :  { %v1026_v44 = vadd.f32 %v1025_v37, %v1024_v31  ;;  %v812_v49 = vadd.f32 %v1045_v43, %v771_v42 }
 0x10a   :  { %v1047_v45 = vpop.f32.mrf.mxu1 }
 0x10b   :  { %v774_v47 = vadd.f32 %v1026_v44, %v733_v46  ;;  %v1048_v48 = vadd.f32 %v1047_v45, %v1046_v38 }
 0x10d   :  { %v815_v54 = vadd.f32 %v1048_v48, %v774_v47 }
 0x122   :  { %v852_v50 = vpop.f32.mrf.mxu0 }
 0x123   :  { %v853_v51 = vadd.f32 %v852_v50, %v812_v49 }
 0x124   :  { %v1076_v52 = vpop.f32.mrf.mxu0 }
 0x125   :  { %v859_v53 = vmax.f32 %v853_v51, 0.0 }
 0x126   :  { %v855_v55 = vpop.f32.mrf.mxu0 }
 0x127   :  { %v959_v56 = vpack.c.bf16 %v859_v53, %v859_v53  ;;  %v856_v57 = vadd.f32 %v855_v55, %v815_v54 }
 0x128   :  { %v1077_v58 = vpop.f32.mrf.mxu0 }
 0x129   :  { %869 = vst [vmem:[%s1442_s3] sm:$0xf] %v959_v56  ;;  %v860_v59 = vmax.f32 %v856_v57, 0.0 }
 0x12b   :  { %v960_v60 = vpack.c.bf16 %v860_v59, %v860_v59 }
 0x12d   :  { %870 = vst [vmem:[%s1442_s3 + $0x4] sm:$0x3] %v960_v60 }

// kernel: _lambda_.67
= control target key start
LH: loop header
LB: loop body
LE: loop exit
PB: predicated region body
PF: predicated region fallthrough
CT: control target
= control target key end

     0   :  { %v207_v0 = vmov 0.0   ;;  %vm208_vm0 = vmmov 0   ;;  %vm145_vm1 = vcmask 3072   ;;  %vm147_vm2 = vcmask 1024   ;;  %s265_s1 = inlined_call_operand.vmem [shape: bf16[128,1], index: 1, kind: input, shape index: {}]   ;;  %s266_s2 = inlined_call_operand.<no memory space> [shape: f32[1,1], index: 2, kind: input, shape index: {}]   ;;  %s267_s0 = inlined_call_operand.vmem [shape: bf16[12,128], index: 0, kind: input, shape index: {}]   ;;  %s268_s3 = inlined_call_operand.vmem [shape: bf16[12,1], index: 3, kind: output, shape index: {}]  }
   0x1   :  { %176 = vmatprep.subr.bf16.mxu0 %v207_v0  ;;  %v198_v1 = vld [vmem:[%s265_s1 + $0x38] sm:$0xff]   ;;  %192 = vmatprep.mubr.msk.bf16.mxu0 %vm208_vm0, %v207_v0  ;;  %v8_v2 = vstv %s266_s2  ;;  %v199_v3 = vld [vmem:[%s265_s1 + $0x30] sm:$0xff]   ;;  %v200_v4 = vld [vmem:[%s265_s1 + $0x28] sm:$0xff]  }
   0x2   :  { %9 = vst [vmem:[#allocation2] sm:$0x1] %v8_v2  ;;  %177 = vmatpush3.bf16.msra.mxu0 %v198_v1  ;;  %v201_v5 = vld [vmem:[%s265_s1 + $0x20] sm:$0xff]   ;;  %v202_v6 = vld [vmem:[%s265_s1 + $0x18] sm:$0xff]   ;;  %v203_v7 = vld [vmem:[%s265_s1 + $0x10] sm:$0xff]  }
   0x3   :  { %178 = vmatprep.subr.bf16.mxu0 %v207_v0  ;;  %v204_v8 = vld [vmem:[%s265_s1 + $0x8] sm:$0xff]   ;;  %v205_v9 = vld [vmem:[%s265_s1] sm:$0xff]  }
   0x4   :  { %v206_v10 = vld [vmem:[%s267_s0] sm:$0x3f]  }
   0x6   :  { %179 = vmatpush3.bf16.msra.mxu0 %v199_v3 }
   0x7   :  { %180 = vmatprep.subr.bf16.mxu0 %v207_v0 }
   0x9   :  { %v153_v11 = vld [vmem:[#allocation2] ss:$0 sm:$0xff] }
   0xa   :  { %181 = vmatpush3.bf16.msra.mxu0 %v200_v4 }
   0xb   :  { %182 = vmatprep.subr.bf16.mxu0 %v207_v0 }
   0xe   :  { %183 = vmatpush3.bf16.msra.mxu0 %v201_v5 }
   0xf   :  { %184 = vmatprep.subr.bf16.mxu0 %v207_v0 }
  0x12   :  { %185 = vmatpush3.bf16.msra.mxu0 %v202_v6 }
  0x13   :  { %186 = vmatprep.subr.bf16.mxu0 %v207_v0 }
  0x16   :  { %187 = vmatpush3.bf16.msra.mxu0 %v203_v7 }
  0x17   :  { %188 = vmatprep.subr.bf16.mxu0 %v207_v0 }
  0x1a   :  { %189 = vmatpush3.bf16.msra.mxu0 %v204_v8 }
  0x1b   :  { %190 = vmatprep.subr.bf16.mxu0 %v207_v0 }
  0x1e   :  { %191 = vmatpush3.bf16.msra.mxu0 %v205_v9 }
  0x21   :  { %193 = vmatmul.mubr.bf16.vlgmr.msra.gmra.mxu0 %v206_v10 }
  0xe1   :  { %v130_v12 = vpop.f32.mrf.mxu0 }
  0xe2   :  { %v131_v13 = vadd.f32 %v153_v11, %v130_v12 }
  0xe3   :  { %v194_v14 = vpop.f32.mrf.mxu0 }
  0xe4   :  { %v165_v15 = vpack.c.bf16 %v131_v13, %v131_v13 }
  0xe5   :  { %v133_v16 = vpop.f32.mrf.mxu0 }
  0xe6   :  { %146 = vst.msk [vmem:[%s268_s3] sm:$0xf] %vm145_vm1, %v165_v15  ;;  %v134_v17 = vadd.f32 %v153_v11, %v133_v16 }
  0xe7   :  { %v195_v18 = vpop.f32.mrf.mxu0 }
  0xe8   :  { %v166_v19 = vpack.c.bf16 %v134_v17, %v134_v17 }
  0xea   :  { %148 = vst.msk [vmem:[%s268_s3 + $0x4] sm:$0x3] %vm147_vm2, %v166_v19 }

// kernel: _lambda_.68
= control target key start
LH: loop header
LB: loop body
LE: loop exit
PB: predicated region body
PF: predicated region fallthrough
CT: control target
= control target key end

     0   :  { %vm31_vm0 = vcmask 1040384   ;;  %vm32_vm1 = vcmask 1041408   ;;  %vm24_vm2 = vcmask 23552   ;;  %v129_v1 = vmov 65535   ;;  %s163_s1 = inlined_call_operand.vmem [shape: bf16[3,4], index: 1, kind: input, shape index: {}]   ;;  %s164_s0 = inlined_call_operand.vmem [shape: bf16[24,3], index: 0, kind: input, shape index: {}]   ;;  %s165_s2 = inlined_call_operand.vmem [shape: bf16[24,4], index: 2, kind: output, shape index: {}]  }
   0x1   :  { %v15_v0 = vld [vmem:[%s163_s1] sm:$0x3]  ;;  %v33_v2 = vsel %vm31_vm0, 4294967295, %v129_v1  ;;  %v128_v6 = vld [vmem:[%s164_s0 + $0x8] ss:$0 sps:$4 sm:$0xff]   ;;  %vm99_vm3 = vcmask 27648  }
   0x2   :  { %v127_v3 = vld [vmem:[%s164_s0] sm:$0xff]   ;;  %v34_v4 = vsel %vm32_vm1, %v33_v2, 0 }
   0x3   :  { %v36_v5 = vand.u32 %v34_v4, %v15_v0  ;;  %122 = vmatprep.mubr.msk.bf16.mxu0 %vm24_vm2, %v127_v3 }
   0x5   :  { %120 = vmatprep.subr.bf16.mxu0 %v36_v5 }
   0x6   :  { %121 = vmatpush3.bf16.msra.mxu0 %v36_v5 }
   0x9   :  { %123 = vmatmul.mubr.msk.bf16.vlgmr.msra.gmra.mxu0 %vm24_vm2, %v128_v6 }
  0xc9   :  { %v124_v7 = vpop.f32.mrf.mxu0 }
  0xca   :  { %v116_v8 = vpack.c.bf16 %v124_v7, %v124_v7 }
  0xcb   :  { %v72_v9 = vpop.f32.mrf.mxu0 }
  0xcc   :  { %102 = vst.msk [vmem:[%s165_s2 + $0x8] sm:$0xf] %vm99_vm3, %v116_v8  ;;  %v114_v10 = vpack.c.bf16 %v72_v9, %v72_v9 }
  0xcd   :  { %v125_v11 = vpop.f32.mrf.mxu0 }
  0xce   :  { %100 = vst.msk [vmem:[%s165_s2] sm:$0xf] %vm99_vm3, %v114_v10 }
  0xcf   :  { %v75_v12 = vpop.f32.mrf.mxu0 }
  0xd0   :  { %v115_v13 = vpack.c.bf16 %v75_v12, %v75_v12 }
  0xd2   :  { %101 = vst.msk [vmem:[%s165_s2 + $0x4] sm:$0xf] %vm99_vm3, %v115_v13 }

// kernel: _lambda_.69
= control target key start
LH: loop header
LB: loop body
LE: loop exit
PB: predicated region body
PF: predicated region fallthrough
CT: control target
= control target key end

     0   :  { %vm32_vm0 = vcmask 1041408   ;;  %vm25_vm1 = vcmask 31744   ;;  %s186_s0 = inlined_call_operand.vmem [shape: bf16[24,4], index: 0, kind: input, shape index: {}]   ;;  %s187_s1 = inlined_call_operand.vmem [shape: bf16[4,32], index: 1, kind: input, shape index: {}]   ;;  %s188_s2 = inlined_call_operand.hbm [shape: s32[24,32], index: 2, kind: output, shape index: {}]  }
   0x1   :  { %v16_v0 = vld [vmem:[%s187_s1] sm:$0x3]  ;;  %v129_v3 = vld [vmem:[%s186_s0 + $0x8] ss:$0 sps:$4 sm:$0xff]  }
   0x2   :  { %v128_v1 = vld [vmem:[%s186_s0] sm:$0xff]   ;;  %123 = vmatprep.subr.msk.bf16.mxu0 %vm32_vm0, %v16_v0  ;;  %v34_v2 = vsel %vm32_vm0, %v16_v0, 0 }
   0x3   :  { %118 = vmatpush3.bf16.msra.mxu0 %v34_v2  ;;  %119 = vmatprep.mubr.msk.bf16.mxu0 %vm25_vm1, %v128_v1 }
   0x4   :  { %7 = vsyncpa [#allocation3], 0  ;;  %vm90_vm2 = vcmask 261120   ;;  %v152_v5 = vmov 0   ;;  %s153_s1 = smov [#allocation2]  }
   0x5   :  { %s99_s15 = sshll.u32 %s153_s1, 4  ;;  %s100_s15 = int_to_ptr.vmem [resolvable:$true] %s99_s15 }
   0x6   :  { %120 = vmatmul.mubr.msk.bf16.vlgmr.msra.gmra.mxu0 %vm25_vm1, %v129_v3  ;;  %s130_s0 = scalar_lea.vmem %s100_s15, 384  ;;  %p135_p1 = scmp.lt.s32.totalorder %s100_s15, %s100_s15 }
   0x7   :  { %p131_p0 = scmp.ne.s32.totalorder %s100_s15, %s130_s0  ;;  %p136_p2 = scmp.lt.s32.totalorder %s130_s0, %s130_s0 }
   0x9   :  { %p137_p3 = por %p136_p2, %p135_p1 }
   0xb   :  { %p138_p4 = pnand %p137_p3, %p131_p0 }
  0xc6   :  { %v121_v4 = vpop.f32.mrf.mxu0 }
  0xc7   :  { %vm86_vm3 = vcmp.gt.f32.partialorder %v121_v4, 0.0 }
  0xc8   :  { %v89_v6 = vsel %vm86_vm3, 1, %v152_v5  ;;  %v70_v7 = vpop.f32.mrf.mxu0 }
  0xc9   :  { %93 = vst.msk [vmem:[#allocation2 + $0x10] sm:$0xff] %vm90_vm2, %v89_v6  ;;  %vm84_vm4 = vcmp.gt.f32.partialorder %v70_v7, 0.0 }
  0xca   :  { %v87_v8 = vsel %vm84_vm4, 1, %v152_v5  ;;  %v122_v9 = vpop.f32.mrf.mxu0 }
  0xcb   :  { %91 = vst.msk [vmem:[#allocation2] sm:$0xff] %vm90_vm2, %v87_v8 }
  0xcc   :  { %v73_v10 = vpop.f32.mrf.mxu0 }
  0xcd   :  { %vm85_vm5 = vcmp.gt.f32.partialorder %v73_v10, 0.0 }
  0xce   :  { %v88_v11 = vsel %vm85_vm5, 1, %v152_v5 }
  0xcf   :  { %92 = vst.msk [vmem:[#allocation2 + $0x8] sm:$0xff] %vm90_vm2, %v88_v11 }
  0xd0   :  { %141 = shalt.err (!%p138_p4)
}
  0xd1   :  { %s154_s16 = smov 128   ;;  %s155_s17 = smov 8  }
  0xd2   :  { %105 = dma.vmem_to_hbm [thread:$0]  %s100_s15, 384, %s188_s2, [#allocation3], %s154_s16, %s154_s16, %s155_s17  }
  0xd3   :  { %150 = dma.done.wait [#allocation3], 384  }
  0xd4   :  { %151 = vsyncadd [#allocation3], 4294966912 }
  0xd5   :  { %109 = vsyncpa [#allocation3], 1 }

// kernel: _lambda_.66
= control target key start
LH: loop header
LB: loop body
LE: loop exit
PB: predicated region body
PF: predicated region fallthrough
CT: control target
= control target key end

     0   :  { %s5364_s1 = inlined_call_operand.vmem [shape: bf16[4608,128], index: 1, kind: input, shape index: {}]   ;;  %s5365_s0 = inlined_call_operand.vmem [shape: bf16[12,4608], index: 0, kind: input, shape index: {}]   ;;  %s5366_s2 = inlined_call_operand.vmem [shape: f32[1,128], index: 2, kind: input, shape index: {}]   ;;  %s5367_s3 = inlined_call_operand.vmem [shape: bf16[12,128], index: 3, kind: output, shape index: {}]  }
   0x1   :  { %v4021_v0 = vld [vmem:[%s5364_s1 + $0x78] sm:$0xff]   ;;  %v4025_v4 = vld [vmem:[%s5364_s1 + $0x70] sm:$0xff]   ;;  %v4029_v8 = vld [vmem:[%s5364_s1 + $0x68] sm:$0xff]  }
   0x2   :  { %v4022_v1 = vld [vmem:[%s5364_s1 + $0xf8] sm:$0xff]   ;;  %3625 = vmatprep.subr.bf16.mxu0 %v4021_v0  ;;  %v4026_v5 = vld [vmem:[%s5364_s1 + $0xf0] sm:$0xff]   ;;  %v4030_v9 = vld [vmem:[%s5364_s1 + $0xe8] sm:$0xff]  }
   0x3   :  { %v4023_v2 = vld [vmem:[%s5364_s1 + $0x38] sm:$0xff]   ;;  %3647 = vmatprep.subr.bf16.mxu1 %v4022_v1  ;;  %v4027_v6 = vld [vmem:[%s5364_s1 + $0x30] sm:$0xff]   ;;  %v4031_v10 = vld [vmem:[%s5364_s1 + $0x28] sm:$0xff]  }
   0x4   :  { %v4024_v3 = vld [vmem:[%s5364_s1 + $0xb8] sm:$0xff]   ;;  %3626 = vmatpush3.bf16.msra.mxu0 %v4023_v2  ;;  %v4028_v7 = vld [vmem:[%s5364_s1 + $0xb0] sm:$0xff]   ;;  %v4032_v11 = vld [vmem:[%s5364_s1 + $0xa8] sm:$0xff]  }
   0x5   :  { %3648 = vmatpush3.bf16.msra.mxu1 %v4024_v3  ;;  %3627 = vmatprep.subr.bf16.mxu0 %v4025_v4  ;;  %v4033_v12 = vld [vmem:[%s5364_s1 + $0x60] sm:$0xff]   ;;  %v4037_v16 = vld [vmem:[%s5364_s1 + $0x58] sm:$0xff]   ;;  %v4041_v20 = vld [vmem:[%s5364_s1 + $0x50] sm:$0xff]  }
   0x6   :  { %3649 = vmatprep.subr.bf16.mxu1 %v4026_v5  ;;  %v4034_v13 = vld [vmem:[%s5364_s1 + $0xe0] sm:$0xff]   ;;  %v4038_v17 = vld [vmem:[%s5364_s1 + $0xd8] sm:$0xff]   ;;  %v4042_v21 = vld [vmem:[%s5364_s1 + $0xd0] sm:$0xff]  }
   0x7   :  { %v4035_v14 = vld [vmem:[%s5364_s1 + $0x20] sm:$0xff]   ;;  %v4039_v18 = vld [vmem:[%s5364_s1 + $0x18] sm:$0xff]   ;;  %v4043_v22 = vld [vmem:[%s5364_s1 + $0x10] sm:$0xff]  }
   0x8   :  { %3628 = vmatpush3.bf16.msra.mxu0 %v4027_v6  ;;  %v4036_v15 = vld [vmem:[%s5364_s1 + $0xa0] sm:$0xff]   ;;  %v4040_v19 = vld [vmem:[%s5364_s1 + $0x98] sm:$0xff]   ;;  %v4044_v23 = vld [vmem:[%s5364_s1 + $0x90] sm:$0xff]  }
   0x9   :  { %3650 = vmatpush3.bf16.msra.mxu1 %v4028_v7  ;;  %3629 = vmatprep.subr.bf16.mxu0 %v4029_v8  ;;  %v4045_v24 = vld [vmem:[%s5364_s1 + $0x48] sm:$0xff]   ;;  %v4049_v28 = vld [vmem:[%s5364_s1 + $0x40] sm:$0xff]   ;;  %v4059_v36 = vld [vmem:[%s5364_s1 + $0x178] sm:$0xff]  }
   0xa   :  { %3651 = vmatprep.subr.bf16.mxu1 %v4030_v9  ;;  %v4046_v25 = vld [vmem:[%s5364_s1 + $0xc8] sm:$0xff]   ;;  %v4050_v29 = vld [vmem:[%s5364_s1 + $0xc0] sm:$0xff]   ;;  %v4060_v37 = vld [vmem:[%s5364_s1 + $0x1f8] sm:$0xff]  }
   0xb   :  { %v4047_v26 = vld [vmem:[%s5364_s1 + $0x8] sm:$0xff]   ;;  %v4051_v30 = vld [vmem:[%s5364_s1] sm:$0xff]   ;;  %v4061_v38 = vld [vmem:[%s5364_s1 + $0x138] sm:$0xff]  }
   0xc   :  { %3630 = vmatpush3.bf16.msra.mxu0 %v4031_v10  ;;  %v4048_v27 = vld [vmem:[%s5364_s1 + $0x88] sm:$0xff]   ;;  %v4052_v31 = vld [vmem:[%s5364_s1 + $0x80] sm:$0xff]   ;;  %v4062_v39 = vld [vmem:[%s5364_s1 + $0x1b8] sm:$0xff]  }
   0xd   :  { %3652 = vmatpush3.bf16.msra.mxu1 %v4032_v11  ;;  %3631 = vmatprep.subr.bf16.mxu0 %v4033_v12  ;;  %v4053_v32 = vld [vmem:[%s5365_s0] ss:$144 sps:$4 sm:$0x3f]   ;;  %v4055_v33 = vld [vmem:[%s5365_s0 + $0x4] ss:$144 sps:$4 sm:$0x3f]  }
   0xe   :  { %3653 = vmatprep.subr.bf16.mxu1 %v4034_v13  ;;  %v4056_v34 = vld [vmem:[%s5365_s0 + $0x8] ss:$144 sps:$4 sm:$0x3f]   ;;  %v4058_v35 = vld [vmem:[%s5365_s0 + $0xc] ss:$144 sps:$4 sm:$0x3f]   ;;  %2574 = vmatprep.mubr.bf16.mxu0 %v4055_v33 }
   0xf   :  { %2615 = vmatprep.mubr.bf16.mxu1 %v4058_v35  ;;  %v4063_v40 = vld [vmem:[%s5364_s1 + $0x170] sm:$0xff]   ;;  %v4067_v44 = vld [vmem:[%s5364_s1 + $0x168] sm:$0xff]   ;;  %v4071_v48 = vld [vmem:[%s5364_s1 + $0x160] sm:$0xff]  }
  0x10   :  { %3632 = vmatpush3.bf16.msra.mxu0 %v4035_v14  ;;  %v4064_v41 = vld [vmem:[%s5364_s1 + $0x1f0] sm:$0xff]   ;;  %v4068_v45 = vld [vmem:[%s5364_s1 + $0x1e8] sm:$0xff]   ;;  %v4072_v49 = vld [vmem:[%s5364_s1 + $0x1e0] sm:$0xff]  }
  0x11   :  { %3654 = vmatpush3.bf16.msra.mxu1 %v4036_v15  ;;  %3633 = vmatprep.subr.bf16.mxu0 %v4037_v16  ;;  %v4065_v42 = vld [vmem:[%s5364_s1 + $0x130] sm:$0xff]   ;;  %v4069_v46 = vld [vmem:[%s5364_s1 + $0x128] sm:$0xff]   ;;  %v4073_v50 = vld [vmem:[%s5364_s1 + $0x120] sm:$0xff]  }
  0x12   :  { %3655 = vmatprep.subr.bf16.mxu1 %v4038_v17  ;;  %v4066_v43 = vld [vmem:[%s5364_s1 + $0x1b0] sm:$0xff]   ;;  %v4070_v47 = vld [vmem:[%s5364_s1 + $0x1a8] sm:$0xff]   ;;  %v4074_v51 = vld [vmem:[%s5364_s1 + $0x1a0] sm:$0xff]  }
  0x13   :  { %v4075_v52 = vld [vmem:[%s5364_s1 + $0x158] sm:$0xff]   ;;  %v4079_v56 = vld [vmem:[%s5364_s1 + $0x150] sm:$0xff]   ;;  %v4083_v60 = vld [vmem:[%s5364_s1 + $0x148] sm:$0xff]  }
  0x14   :  { %3634 = vmatpush3.bf16.msra.mxu0 %v4039_v18  ;;  %v4076_v53 = vld [vmem:[%s5364_s1 + $0x1d8] sm:$0xff]   ;;  %v4080_v57 = vld [vmem:[%s5364_s1 + $0x1d0] sm:$0xff]   ;;  %v4084_v61 = vld [vmem:[%s5364_s1 + $0x1c8] sm:$0xff]  }
  0x15   :  { %3656 = vmatpush3.bf16.msra.mxu1 %v4040_v19  ;;  %3635 = vmatprep.subr.bf16.mxu0 %v4041_v20  ;;  %v4077_v54 = vld [vmem:[%s5364_s1 + $0x118] sm:$0xff]   ;;  %v4081_v58 = vld [vmem:[%s5364_s1 + $0x110] sm:$0xff]   ;;  %v4085_v62 = vld [vmem:[%s5364_s1 + $0x108] sm:$0xff]  }
  0x16   :  { %3657 = vmatprep.subr.bf16.mxu1 %v4042_v21  ;;  %v4078_v55 = vld [vmem:[%s5364_s1 + $0x198] sm:$0xff]   ;;  %v4082_v59 = vld [vmem:[%s5364_s1 + $0x190] sm:$0xff]   ;;  %v4086_v63 = vld [vmem:[%s5364_s1 + $0x188] sm:$0xff]  }
  0x17   :  { %v4087_v0 = vld [vmem:[%s5364_s1 + $0x140] sm:$0xff]   ;;  %v4094_v6 = vld [vmem:[%s5365_s0 + $0x18] ss:$144 sps:$4 sm:$0x3f]   ;;  %v4101_v12 = vld [vmem:[%s5364_s1 + $0x270] sm:$0xff]  }
  0x18   :  { %3636 = vmatpush3.bf16.msra.mxu0 %v4043_v22  ;;  %v4088_v1 = vld [vmem:[%s5364_s1 + $0x1c0] sm:$0xff]   ;;  %v4096_v7 = vld [vmem:[%s5365_s0 + $0x1c] ss:$144 sps:$4 sm:$0x3f]   ;;  %v4102_v13 = vld [vmem:[%s5364_s1 + $0x2f0] sm:$0xff]  }
  0x19   :  { %3658 = vmatpush3.bf16.msra.mxu1 %v4044_v23  ;;  %3637 = vmatprep.subr.bf16.mxu0 %v4045_v24  ;;  %v4089_v2 = vld [vmem:[%s5364_s1 + $0x100] sm:$0xff]   ;;  %v4097_v8 = vld [vmem:[%s5364_s1 + $0x278] sm:$0xff]   ;;  %v4103_v14 = vld [vmem:[%s5364_s1 + $0x230] sm:$0xff]  }
  0x1a   :  { %3659 = vmatprep.subr.bf16.mxu1 %v4046_v25  ;;  %v4090_v3 = vld [vmem:[%s5364_s1 + $0x180] sm:$0xff]   ;;  %v4098_v9 = vld [vmem:[%s5364_s1 + $0x2f8] sm:$0xff]   ;;  %v4104_v15 = vld [vmem:[%s5364_s1 + $0x2b0] sm:$0xff]  }
  0x1b   :  { %v4091_v4 = vld [vmem:[%s5365_s0 + $0x10] ss:$144 sps:$4 sm:$0x3f]   ;;  %v4093_v5 = vld [vmem:[%s5365_s0 + $0x14] ss:$144 sps:$4 sm:$0x3f]  }
  0x1c   :  { %3638 = vmatpush3.bf16.msra.mxu0 %v4047_v26  ;;  %v4099_v10 = vld [vmem:[%s5364_s1 + $0x238] sm:$0xff]   ;;  %v4105_v16 = vld [vmem:[%s5364_s1 + $0x268] sm:$0xff]   ;;  %v4109_v20 = vld [vmem:[%s5364_s1 + $0x260] sm:$0xff]  }
  0x1d   :  { %3660 = vmatpush3.bf16.msra.mxu1 %v4048_v27  ;;  %3639 = vmatprep.subr.bf16.mxu0 %v4049_v28  ;;  %v4100_v11 = vld [vmem:[%s5364_s1 + $0x2b8] sm:$0xff]   ;;  %v4106_v17 = vld [vmem:[%s5364_s1 + $0x2e8] sm:$0xff]   ;;  %v4110_v21 = vld [vmem:[%s5364_s1 + $0x2e0] sm:$0xff]  }
  0x1e   :  { %3661 = vmatprep.subr.bf16.mxu1 %v4050_v29  ;;  %v4107_v18 = vld [vmem:[%s5364_s1 + $0x228] sm:$0xff]   ;;  %v4111_v22 = vld [vmem:[%s5364_s1 + $0x220] sm:$0xff]   ;;  %v4113_v24 = vld [vmem:[%s5364_s1 + $0x258] sm:$0xff]  }
  0x1f   :  { %v4108_v19 = vld [vmem:[%s5364_s1 + $0x2a8] sm:$0xff]   ;;  %v4112_v23 = vld [vmem:[%s5364_s1 + $0x2a0] sm:$0xff]   ;;  %v4114_v25 = vld [vmem:[%s5364_s1 + $0x2d8] sm:$0xff]  }
  0x20   :  { %3640 = vmatpush3.bf16.msra.mxu0 %v4051_v30  ;;  %v4115_v26 = vld [vmem:[%s5364_s1 + $0x218] sm:$0xff]   ;;  %v4117_v28 = vld [vmem:[%s5364_s1 + $0x250] sm:$0xff]   ;;  %v4122_v33 = vld [vmem:[%s5364_s1 + $0x2c8] sm:$0xff]  }
  0x21   :  { %3662 = vmatpush3.bf16.msra.mxu1 %v4052_v31  ;;  %3669 = vmatprep.subr.bf16.mxu0 %v4059_v36  ;;  %v4116_v27 = vld [vmem:[%s5364_s1 + $0x298] sm:$0xff]   ;;  %v4118_v29 = vld [vmem:[%s5364_s1 + $0x2d0] sm:$0xff]   ;;  %v4124_v35 = vld [vmem:[%s5364_s1 + $0x288] sm:$0xff]  }
  0x22   :  { %3691 = vmatprep.subr.bf16.mxu1 %v4060_v37  ;;  %v4119_v30 = vld [vmem:[%s5364_s1 + $0x210] sm:$0xff]   ;;  %v4125_v36 = vld [vmem:[%s5364_s1 + $0x240] sm:$0xff]  }
  0x23   :  { %2575 = vmatmul.mubr.bf16.vlgmr.msra.gmra.mxu0 %v4053_v32  ;;  %v4120_v31 = vld [vmem:[%s5364_s1 + $0x290] sm:$0xff]   ;;  %v4121_v32 = vld [vmem:[%s5364_s1 + $0x248] sm:$0xff]   ;;  %v4126_v37 = vld [vmem:[%s5364_s1 + $0x2c0] sm:$0xff]  }
  0x24   :  { %2616 = vmatmul.mubr.bf16.vlgmr.msra.gmra.mxu1 %v4056_v34  ;;  %3670 = vmatpush3.bf16.msra.mxu0 %v4061_v38  ;;  %v4123_v34 = vld [vmem:[%s5364_s1 + $0x208] sm:$0xff]   ;;  %v4127_v38 = vld [vmem:[%s5364_s1 + $0x200] sm:$0xff]  }
  0x25   :  { %3692 = vmatpush3.bf16.msra.mxu1 %v4062_v39  ;;  %3671 = vmatprep.subr.bf16.mxu0 %v4063_v40  ;;  %v4128_v39 = vld [vmem:[%s5364_s1 + $0x280] sm:$0xff]  }
  0x26   :  { %3693 = vmatprep.subr.bf16.mxu1 %v4064_v41  ;;  %2656 = vmatprep.mubr.bf16.mxu0 %v4093_v5  ;;  %v4129_v40 = vld [vmem:[%s5365_s0 + $0x20] ss:$144 sps:$4 sm:$0x3f]   ;;  %v4131_v41 = vld [vmem:[%s5365_s0 + $0x24] ss:$144 sps:$4 sm:$0x3f]  }
  0x27   :  { %2697 = vmatprep.mubr.bf16.mxu1 %v4096_v7  ;;  %v4160_v5 = vld [vmem:[%s5364_s1 + $0x3c8] sm:$0xff]  }
  0x28   :  { %3672 = vmatpush3.bf16.msra.mxu0 %v4065_v42  ;;  %v4132_v42 = vld [vmem:[%s5365_s0 + $0x28] ss:$144 sps:$4 sm:$0x3f]  }
  0x29   :  { %3694 = vmatpush3.bf16.msra.mxu1 %v4066_v43  ;;  %3673 = vmatprep.subr.bf16.mxu0 %v4067_v44  ;;  %v4134_v43 = vld [vmem:[%s5365_s0 + $0x2c] ss:$144 sps:$4 sm:$0x3f]  }
  0x2a   :  { %3695 = vmatprep.subr.bf16.mxu1 %v4068_v45  ;;  %v4135_v44 = vld [vmem:[%s5364_s1 + $0x378] sm:$0xff]   ;;  %v4162_v7 = vld [vmem:[%s5364_s1 + $0x388] sm:$0xff]  }
  0x2b   :  { %v4136_v45 = vld [vmem:[%s5364_s1 + $0x3f8] sm:$0xff]  }
  0x2c   :  { %3674 = vmatpush3.bf16.msra.mxu0 %v4069_v46  ;;  %v4137_v46 = vld [vmem:[%s5364_s1 + $0x338] sm:$0xff]  }
  0x2d   :  { %3696 = vmatpush3.bf16.msra.mxu1 %v4070_v47  ;;  %3675 = vmatprep.subr.bf16.mxu0 %v4071_v48  ;;  %v4138_v47 = vld [vmem:[%s5364_s1 + $0x3b8] sm:$0xff]   ;;  %v4139_v48 = vld [vmem:[%s5364_s1 + $0x370] sm:$0xff]  }
  0x2e   :  { %3697 = vmatprep.subr.bf16.mxu1 %v4072_v49  ;;  %v4140_v49 = vld [vmem:[%s5364_s1 + $0x3f0] sm:$0xff]  }
  0x30   :  { %3676 = vmatpush3.bf16.msra.mxu0 %v4073_v50  ;;  %v4141_v50 = vld [vmem:[%s5364_s1 + $0x330] sm:$0xff]  }
  0x31   :  { %3698 = vmatpush3.bf16.msra.mxu1 %v4074_v51  ;;  %3677 = vmatprep.subr.bf16.mxu0 %v4075_v52  ;;  %v4142_v51 = vld [vmem:[%s5364_s1 + $0x3b0] sm:$0xff]   ;;  %v4143_v52 = vld [vmem:[%s5364_s1 + $0x368] sm:$0xff]  }
  0x32   :  { %3699 = vmatprep.subr.bf16.mxu1 %v4076_v53  ;;  %v4144_v53 = vld [vmem:[%s5364_s1 + $0x3e8] sm:$0xff]  }
  0x34   :  { %3678 = vmatpush3.bf16.msra.mxu0 %v4077_v54  ;;  %v4145_v54 = vld [vmem:[%s5364_s1 + $0x328] sm:$0xff]  }
  0x35   :  { %3700 = vmatpush3.bf16.msra.mxu1 %v4078_v55  ;;  %3679 = vmatprep.subr.bf16.mxu0 %v4079_v56  ;;  %v4146_v55 = vld [vmem:[%s5364_s1 + $0x3a8] sm:$0xff]   ;;  %v4147_v56 = vld [vmem:[%s5364_s1 + $0x360] sm:$0xff]  }
  0x36   :  { %3701 = vmatprep.subr.bf16.mxu1 %v4080_v57  ;;  %v4148_v57 = vld [vmem:[%s5364_s1 + $0x3e0] sm:$0xff]  }
  0x38   :  { %3680 = vmatpush3.bf16.msra.mxu0 %v4081_v58  ;;  %v4149_v58 = vld [vmem:[%s5364_s1 + $0x320] sm:$0xff]  }
  0x39   :  { %3702 = vmatpush3.bf16.msra.mxu1 %v4082_v59  ;;  %3681 = vmatprep.subr.bf16.mxu0 %v4083_v60  ;;  %v4150_v59 = vld [vmem:[%s5364_s1 + $0x3a0] sm:$0xff]   ;;  %v4151_v60 = vld [vmem:[%s5364_s1 + $0x358] sm:$0xff]  }
  0x3a   :  { %3703 = vmatprep.subr.bf16.mxu1 %v4084_v61  ;;  %v4152_v61 = vld [vmem:[%s5364_s1 + $0x3d8] sm:$0xff]  }
  0x3c   :  { %3682 = vmatpush3.bf16.msra.mxu0 %v4085_v62  ;;  %v4153_v62 = vld [vmem:[%s5364_s1 + $0x318] sm:$0xff]  }
  0x3d   :  { %3704 = vmatpush3.bf16.msra.mxu1 %v4086_v63  ;;  %3683 = vmatprep.subr.bf16.mxu0 %v4087_v0  ;;  %v4154_v63 = vld [vmem:[%s5364_s1 + $0x398] sm:$0xff]   ;;  %v4155_v0 = vld [vmem:[%s5364_s1 + $0x350] sm:$0xff]  }
  0x3e   :  { %3705 = vmatprep.subr.bf16.mxu1 %v4088_v1  ;;  %v4156_v1 = vld [vmem:[%s5364_s1 + $0x3d0] sm:$0xff]  }
  0x40   :  { %3684 = vmatpush3.bf16.msra.mxu0 %v4089_v2  ;;  %v4157_v2 = vld [vmem:[%s5364_s1 + $0x310] sm:$0xff]  }
  0x41   :  { %3706 = vmatpush3.bf16.msra.mxu1 %v4090_v3  ;;  %3713 = vmatprep.subr.bf16.mxu0 %v4097_v8  ;;  %v4158_v3 = vld [vmem:[%s5364_s1 + $0x390] sm:$0xff]   ;;  %v4163_v8 = vld [vmem:[%s5364_s1 + $0x340] sm:$0xff]  }
  0x42   :  { %3735 = vmatprep.subr.bf16.mxu1 %v4098_v9  ;;  %v4164_v9 = vld [vmem:[%s5364_s1 + $0x3c0] sm:$0xff]  }
  0x43   :  { %2657 = vmatmul.mubr.bf16.vlgmr.msra.gmra.mxu0 %v4091_v4  ;;  %v4159_v4 = vld [vmem:[%s5364_s1 + $0x348] sm:$0xff]  }
  0x44   :  { %2698 = vmatmul.mubr.bf16.vlgmr.msra.gmra.mxu1 %v4094_v6  ;;  %3714 = vmatpush3.bf16.msra.mxu0 %v4099_v10  ;;  %v4161_v6 = vld [vmem:[%s5364_s1 + $0x308] sm:$0xff]   ;;  %v4165_v10 = vld [vmem:[%s5364_s1 + $0x300] sm:$0xff]  }
  0x45   :  { %3736 = vmatpush3.bf16.msra.mxu1 %v4100_v11  ;;  %3715 = vmatprep.subr.bf16.mxu0 %v4101_v12  ;;  %v4166_v11 = vld [vmem:[%s5364_s1 + $0x380] sm:$0xff]  }
  0x46   :  { %3737 = vmatprep.subr.bf16.mxu1 %v4102_v13  ;;  %2738 = vmatprep.mubr.bf16.mxu0 %v4131_v41  ;;  %v4167_v12 = vld [vmem:[%s5365_s0 + $0x30] ss:$144 sps:$4 sm:$0x3f]   ;;  %v4169_v13 = vld [vmem:[%s5365_s0 + $0x34] ss:$144 sps:$4 sm:$0x3f]  }
  0x47   :  { %2779 = vmatprep.mubr.bf16.mxu1 %v4134_v43  ;;  %v4198_v41 = vld [vmem:[%s5364_s1 + $0x4c8] sm:$0xff]  }
  0x48   :  { %3716 = vmatpush3.bf16.msra.mxu0 %v4103_v14  ;;  %v4170_v14 = vld [vmem:[%s5365_s0 + $0x38] ss:$144 sps:$4 sm:$0x3f]  }
  0x49   :  { %3738 = vmatpush3.bf16.msra.mxu1 %v4104_v15  ;;  %3717 = vmatprep.subr.bf16.mxu0 %v4105_v16  ;;  %v4172_v15 = vld [vmem:[%s5365_s0 + $0x3c] ss:$144 sps:$4 sm:$0x3f]  }
  0x4a   :  { %3739 = vmatprep.subr.bf16.mxu1 %v4106_v17  ;;  %v4173_v16 = vld [vmem:[%s5364_s1 + $0x478] sm:$0xff]   ;;  %v4200_v43 = vld [vmem:[%s5364_s1 + $0x488] sm:$0xff]  }
  0x4b   :  { %v4174_v17 = vld [vmem:[%s5364_s1 + $0x4f8] sm:$0xff]  }
  0x4c   :  { %3718 = vmatpush3.bf16.msra.mxu0 %v4107_v18  ;;  %v4175_v18 = vld [vmem:[%s5364_s1 + $0x438] sm:$0xff]  }
  0x4d   :  { %3740 = vmatpush3.bf16.msra.mxu1 %v4108_v19  ;;  %3719 = vmatprep.subr.bf16.mxu0 %v4109_v20  ;;  %v4176_v19 = vld [vmem:[%s5364_s1 + $0x4b8] sm:$0xff]   ;;  %v4177_v20 = vld [vmem:[%s5364_s1 + $0x470] sm:$0xff]  }
  0x4e   :  { %3741 = vmatprep.subr.bf16.mxu1 %v4110_v21  ;;  %v4178_v21 = vld [vmem:[%s5364_s1 + $0x4f0] sm:$0xff]  }
  0x50   :  { %3720 = vmatpush3.bf16.msra.mxu0 %v4111_v22  ;;  %v4179_v22 = vld [vmem:[%s5364_s1 + $0x430] sm:$0xff]  }
  0x51   :  { %3742 = vmatpush3.bf16.msra.mxu1 %v4112_v23  ;;  %3721 = vmatprep.subr.bf16.mxu0 %v4113_v24  ;;  %v4180_v23 = vld [vmem:[%s5364_s1 + $0x4b0] sm:$0xff]   ;;  %v4181_v24 = vld [vmem:[%s5364_s1 + $0x468] sm:$0xff]  }
  0x52   :  { %3743 = vmatprep.subr.bf16.mxu1 %v4114_v25  ;;  %v4182_v25 = vld [vmem:[%s5364_s1 + $0x4e8] sm:$0xff]  }
  0x54   :  { %3722 = vmatpush3.bf16.msra.mxu0 %v4115_v26  ;;  %v4183_v26 = vld [vmem:[%s5364_s1 + $0x428] sm:$0xff]  }
  0x55   :  { %3744 = vmatpush3.bf16.msra.mxu1 %v4116_v27  ;;  %3723 = vmatprep.subr.bf16.mxu0 %v4117_v28  ;;  %v4184_v27 = vld [vmem:[%s5364_s1 + $0x4a8] sm:$0xff]   ;;  %v4185_v28 = vld [vmem:[%s5364_s1 + $0x460] sm:$0xff]  }
  0x56   :  { %3745 = vmatprep.subr.bf16.mxu1 %v4118_v29  ;;  %v4186_v29 = vld [vmem:[%s5364_s1 + $0x4e0] sm:$0xff]  }
  0x58   :  { %3724 = vmatpush3.bf16.msra.mxu0 %v4119_v30  ;;  %v4187_v30 = vld [vmem:[%s5364_s1 + $0x420] sm:$0xff]  }
  0x59   :  { %3746 = vmatpush3.bf16.msra.mxu1 %v4120_v31  ;;  %3725 = vmatprep.subr.bf16.mxu0 %v4121_v32  ;;  %v4188_v31 = vld [vmem:[%s5364_s1 + $0x4a0] sm:$0xff]   ;;  %v4189_v32 = vld [vmem:[%s5364_s1 + $0x458] sm:$0xff]  }
  0x5a   :  { %3747 = vmatprep.subr.bf16.mxu1 %v4122_v33  ;;  %v4190_v33 = vld [vmem:[%s5364_s1 + $0x4d8] sm:$0xff]  }
  0x5c   :  { %3726 = vmatpush3.bf16.msra.mxu0 %v4123_v34  ;;  %v4191_v34 = vld [vmem:[%s5364_s1 + $0x418] sm:$0xff]  }
  0x5d   :  { %3748 = vmatpush3.bf16.msra.mxu1 %v4124_v35  ;;  %3727 = vmatprep.subr.bf16.mxu0 %v4125_v36  ;;  %v4192_v35 = vld [vmem:[%s5364_s1 + $0x498] sm:$0xff]   ;;  %v4193_v36 = vld [vmem:[%s5364_s1 + $0x450] sm:$0xff]  }
  0x5e   :  { %3749 = vmatprep.subr.bf16.mxu1 %v4126_v37  ;;  %v4194_v37 = vld [vmem:[%s5364_s1 + $0x4d0] sm:$0xff]  }
  0x60   :  { %3728 = vmatpush3.bf16.msra.mxu0 %v4127_v38  ;;  %v4195_v38 = vld [vmem:[%s5364_s1 + $0x410] sm:$0xff]  }
  0x61   :  { %3750 = vmatpush3.bf16.msra.mxu1 %v4128_v39  ;;  %3757 = vmatprep.subr.bf16.mxu0 %v4135_v44  ;;  %v4196_v39 = vld [vmem:[%s5364_s1 + $0x490] sm:$0xff]   ;;  %v4201_v44 = vld [vmem:[%s5364_s1 + $0x440] sm:$0xff]  }
  0x62   :  { %3779 = vmatprep.subr.bf16.mxu1 %v4136_v45  ;;  %v4202_v45 = vld [vmem:[%s5364_s1 + $0x4c0] sm:$0xff]  }
  0x63   :  { %2739 = vmatmul.mubr.bf16.vlgmr.msra.gmra.mxu0 %v4129_v40  ;;  %v4197_v40 = vld [vmem:[%s5364_s1 + $0x448] sm:$0xff]  }
  0x64   :  { %2780 = vmatmul.mubr.bf16.vlgmr.msra.gmra.mxu1 %v4132_v42  ;;  %3758 = vmatpush3.bf16.msra.mxu0 %v4137_v46  ;;  %v4199_v42 = vld [vmem:[%s5364_s1 + $0x408] sm:$0xff]   ;;  %v4203_v46 = vld [vmem:[%s5364_s1 + $0x400] sm:$0xff]  }
  0x65   :  { %3780 = vmatpush3.bf16.msra.mxu1 %v4138_v47  ;;  %3759 = vmatprep.subr.bf16.mxu0 %v4139_v48  ;;  %v4204_v47 = vld [vmem:[%s5364_s1 + $0x480] sm:$0xff]  }
  0x66   :  { %3781 = vmatprep.subr.bf16.mxu1 %v4140_v49  ;;  %2820 = vmatprep.mubr.bf16.mxu0 %v4169_v13  ;;  %v4205_v48 = vld [vmem:[%s5365_s0 + $0x40] ss:$144 sps:$4 sm:$0x3f]   ;;  %v4207_v49 = vld [vmem:[%s5365_s0 + $0x44] ss:$144 sps:$4 sm:$0x3f]  }
  0x67   :  { %2861 = vmatprep.mubr.bf16.mxu1 %v4172_v15  ;;  %v4236_v13 = vld [vmem:[%s5364_s1 + $0x5c8] sm:$0xff]  }
  0x68   :  { %3760 = vmatpush3.bf16.msra.mxu0 %v4141_v50  ;;  %v4208_v50 = vld [vmem:[%s5365_s0 + $0x48] ss:$144 sps:$4 sm:$0x3f]  }
  0x69   :  { %3782 = vmatpush3.bf16.msra.mxu1 %v4142_v51  ;;  %3761 = vmatprep.subr.bf16.mxu0 %v4143_v52  ;;  %v4210_v51 = vld [vmem:[%s5365_s0 + $0x4c] ss:$144 sps:$4 sm:$0x3f]  }
  0x6a   :  { %3783 = vmatprep.subr.bf16.mxu1 %v4144_v53  ;;  %v4211_v52 = vld [vmem:[%s5364_s1 + $0x578] sm:$0xff]   ;;  %v4238_v15 = vld [vmem:[%s5364_s1 + $0x588] sm:$0xff]  }
  0x6b   :  { %v4212_v53 = vld [vmem:[%s5364_s1 + $0x5f8] sm:$0xff]  }
  0x6c   :  { %3762 = vmatpush3.bf16.msra.mxu0 %v4145_v54  ;;  %v4213_v54 = vld [vmem:[%s5364_s1 + $0x538] sm:$0xff]  }
  0x6d   :  { %3784 = vmatpush3.bf16.msra.mxu1 %v4146_v55  ;;  %3763 = vmatprep.subr.bf16.mxu0 %v4147_v56  ;;  %v4214_v55 = vld [vmem:[%s5364_s1 + $0x5b8] sm:$0xff]   ;;  %v4215_v56 = vld [vmem:[%s5364_s1 + $0x570] sm:$0xff]  }
  0x6e   :  { %3785 = vmatprep.subr.bf16.mxu1 %v4148_v57  ;;  %v4216_v57 = vld [vmem:[%s5364_s1 + $0x5f0] sm:$0xff]  }
  0x70   :  { %3764 = vmatpush3.bf16.msra.mxu0 %v4149_v58  ;;  %v4217_v58 = vld [vmem:[%s5364_s1 + $0x530] sm:$0xff]  }
  0x71   :  { %3786 = vmatpush3.bf16.msra.mxu1 %v4150_v59  ;;  %3765 = vmatprep.subr.bf16.mxu0 %v4151_v60  ;;  %v4218_v59 = vld [vmem:[%s5364_s1 + $0x5b0] sm:$0xff]   ;;  %v4219_v60 = vld [vmem:[%s5364_s1 + $0x568] sm:$0xff]  }
  0x72   :  { %3787 = vmatprep.subr.bf16.mxu1 %v4152_v61  ;;  %v4220_v61 = vld [vmem:[%s5364_s1 + $0x5e8] sm:$0xff]  }
  0x74   :  { %3766 = vmatpush3.bf16.msra.mxu0 %v4153_v62  ;;  %v4221_v62 = vld [vmem:[%s5364_s1 + $0x528] sm:$0xff]  }
  0x75   :  { %3788 = vmatpush3.bf16.msra.mxu1 %v4154_v63  ;;  %3767 = vmatprep.subr.bf16.mxu0 %v4155_v0  ;;  %v4222_v63 = vld [vmem:[%s5364_s1 + $0x5a8] sm:$0xff]   ;;  %v4223_v0 = vld [vmem:[%s5364_s1 + $0x560] sm:$0xff]  }
  0x76   :  { %3789 = vmatprep.subr.bf16.mxu1 %v4156_v1  ;;  %v4224_v1 = vld [vmem:[%s5364_s1 + $0x5e0] sm:$0xff]  }
  0x78   :  { %3768 = vmatpush3.bf16.msra.mxu0 %v4157_v2  ;;  %v4225_v2 = vld [vmem:[%s5364_s1 + $0x520] sm:$0xff]  }
  0x79   :  { %3790 = vmatpush3.bf16.msra.mxu1 %v4158_v3  ;;  %3769 = vmatprep.subr.bf16.mxu0 %v4159_v4  ;;  %v4226_v3 = vld [vmem:[%s5364_s1 + $0x5a0] sm:$0xff]   ;;  %v4227_v4 = vld [vmem:[%s5364_s1 + $0x558] sm:$0xff]  }
  0x7a   :  { %3791 = vmatprep.subr.bf16.mxu1 %v4160_v5  ;;  %v4228_v5 = vld [vmem:[%s5364_s1 + $0x5d8] sm:$0xff]  }
  0x7c   :  { %3770 = vmatpush3.bf16.msra.mxu0 %v4161_v6  ;;  %v4229_v6 = vld [vmem:[%s5364_s1 + $0x518] sm:$0xff]  }
  0x7d   :  { %3792 = vmatpush3.bf16.msra.mxu1 %v4162_v7  ;;  %3771 = vmatprep.subr.bf16.mxu0 %v4163_v8  ;;  %v4230_v7 = vld [vmem:[%s5364_s1 + $0x598] sm:$0xff]   ;;  %v4231_v8 = vld [vmem:[%s5364_s1 + $0x550] sm:$0xff]  }
  0x7e   :  { %3793 = vmatprep.subr.bf16.mxu1 %v4164_v9  ;;  %v4232_v9 = vld [vmem:[%s5364_s1 + $0x5d0] sm:$0xff]  }
  0x80   :  { %3772 = vmatpush3.bf16.msra.mxu0 %v4165_v10  ;;  %v4233_v10 = vld [vmem:[%s5364_s1 + $0x510] sm:$0xff]  }
  0x81   :  { %3794 = vmatpush3.bf16.msra.mxu1 %v4166_v11  ;;  %3801 = vmatprep.subr.bf16.mxu0 %v4173_v16  ;;  %v4234_v11 = vld [vmem:[%s5364_s1 + $0x590] sm:$0xff]   ;;  %v4239_v16 = vld [vmem:[%s5364_s1 + $0x540] sm:$0xff]  }
  0x82   :  { %3823 = vmatprep.subr.bf16.mxu1 %v4174_v17  ;;  %v4240_v17 = vld [vmem:[%s5364_s1 + $0x5c0] sm:$0xff]  }
  0x83   :  { %2821 = vmatmul.mubr.bf16.vlgmr.msra.gmra.mxu0 %v4167_v12  ;;  %v4235_v12 = vld [vmem:[%s5364_s1 + $0x548] sm:$0xff]  }
  0x84   :  { %2862 = vmatmul.mubr.bf16.vlgmr.msra.gmra.mxu1 %v4170_v14  ;;  %3802 = vmatpush3.bf16.msra.mxu0 %v4175_v18  ;;  %v4237_v14 = vld [vmem:[%s5364_s1 + $0x508] sm:$0xff]   ;;  %v4241_v18 = vld [vmem:[%s5364_s1 + $0x500] sm:$0xff]  }
  0x85   :  { %3824 = vmatpush3.bf16.msra.mxu1 %v4176_v19  ;;  %3803 = vmatprep.subr.bf16.mxu0 %v4177_v20  ;;  %v4242_v19 = vld [vmem:[%s5364_s1 + $0x580] sm:$0xff]  }
  0x86   :  { %3825 = vmatprep.subr.bf16.mxu1 %v4178_v21  ;;  %2902 = vmatprep.mubr.bf16.mxu0 %v4207_v49  ;;  %v4243_v20 = vld [vmem:[%s5365_s0 + $0x50] ss:$144 sps:$4 sm:$0x3f]   ;;  %v4245_v21 = vld [vmem:[%s5365_s0 + $0x54] ss:$144 sps:$4 sm:$0x3f]  }
  0x87   :  { %2943 = vmatprep.mubr.bf16.mxu1 %v4210_v51  ;;  %v4274_v49 = vld [vmem:[%s5364_s1 + $0x6c8] sm:$0xff]  }
  0x88   :  { %3804 = vmatpush3.bf16.msra.mxu0 %v4179_v22  ;;  %v4246_v22 = vld [vmem:[%s5365_s0 + $0x58] ss:$144 sps:$4 sm:$0x3f]  }
  0x89   :  { %3826 = vmatpush3.bf16.msra.mxu1 %v4180_v23  ;;  %3805 = vmatprep.subr.bf16.mxu0 %v4181_v24  ;;  %v4248_v23 = vld [vmem:[%s5365_s0 + $0x5c] ss:$144 sps:$4 sm:$0x3f]  }
  0x8a   :  { %3827 = vmatprep.subr.bf16.mxu1 %v4182_v25  ;;  %v4249_v24 = vld [vmem:[%s5364_s1 + $0x678] sm:$0xff]   ;;  %v4276_v51 = vld [vmem:[%s5364_s1 + $0x688] sm:$0xff]  }
  0x8b   :  { %v4250_v25 = vld [vmem:[%s5364_s1 + $0x6f8] sm:$0xff]  }
  0x8c   :  { %3806 = vmatpush3.bf16.msra.mxu0 %v4183_v26  ;;  %v4251_v26 = vld [vmem:[%s5364_s1 + $0x638] sm:$0xff]  }
  0x8d   :  { %3828 = vmatpush3.bf16.msra.mxu1 %v4184_v27  ;;  %3807 = vmatprep.subr.bf16.mxu0 %v4185_v28  ;;  %v4252_v27 = vld [vmem:[%s5364_s1 + $0x6b8] sm:$0xff]   ;;  %v4253_v28 = vld [vmem:[%s5364_s1 + $0x670] sm:$0xff]  }
  0x8e   :  { %3829 = vmatprep.subr.bf16.mxu1 %v4186_v29  ;;  %v4254_v29 = vld [vmem:[%s5364_s1 + $0x6f0] sm:$0xff]  }
  0x90   :  { %3808 = vmatpush3.bf16.msra.mxu0 %v4187_v30  ;;  %v4255_v30 = vld [vmem:[%s5364_s1 + $0x630] sm:$0xff]  }
  0x91   :  { %3830 = vmatpush3.bf16.msra.mxu1 %v4188_v31  ;;  %3809 = vmatprep.subr.bf16.mxu0 %v4189_v32  ;;  %v4256_v31 = vld [vmem:[%s5364_s1 + $0x6b0] sm:$0xff]   ;;  %v4257_v32 = vld [vmem:[%s5364_s1 + $0x668] sm:$0xff]  }
  0x92   :  { %3831 = vmatprep.subr.bf16.mxu1 %v4190_v33  ;;  %v4258_v33 = vld [vmem:[%s5364_s1 + $0x6e8] sm:$0xff]  }
  0x94   :  { %3810 = vmatpush3.bf16.msra.mxu0 %v4191_v34  ;;  %v4259_v34 = vld [vmem:[%s5364_s1 + $0x628] sm:$0xff]  }
  0x95   :  { %3832 = vmatpush3.bf16.msra.mxu1 %v4192_v35  ;;  %3811 = vmatprep.subr.bf16.mxu0 %v4193_v36  ;;  %v4260_v35 = vld [vmem:[%s5364_s1 + $0x6a8] sm:$0xff]   ;;  %v4261_v36 = vld [vmem:[%s5364_s1 + $0x660] sm:$0xff]  }
  0x96   :  { %3833 = vmatprep.subr.bf16.mxu1 %v4194_v37  ;;  %v4262_v37 = vld [vmem:[%s5364_s1 + $0x6e0] sm:$0xff]  }
  0x98   :  { %3812 = vmatpush3.bf16.msra.mxu0 %v4195_v38  ;;  %v4263_v38 = vld [vmem:[%s5364_s1 + $0x620] sm:$0xff]  }
  0x99   :  { %3834 = vmatpush3.bf16.msra.mxu1 %v4196_v39  ;;  %3813 = vmatprep.subr.bf16.mxu0 %v4197_v40  ;;  %v4264_v39 = vld [vmem:[%s5364_s1 + $0x6a0] sm:$0xff]   ;;  %v4265_v40 = vld [vmem:[%s5364_s1 + $0x658] sm:$0xff]  }
  0x9a   :  { %3835 = vmatprep.subr.bf16.mxu1 %v4198_v41  ;;  %v4266_v41 = vld [vmem:[%s5364_s1 + $0x6d8] sm:$0xff]  }
  0x9c   :  { %3814 = vmatpush3.bf16.msra.mxu0 %v4199_v42  ;;  %v4267_v42 = vld [vmem:[%s5364_s1 + $0x618] sm:$0xff]  }
  0x9d   :  { %3836 = vmatpush3.bf16.msra.mxu1 %v4200_v43  ;;  %3815 = vmatprep.subr.bf16.mxu0 %v4201_v44  ;;  %v4268_v43 = vld [vmem:[%s5364_s1 + $0x698] sm:$0xff]   ;;  %v4269_v44 = vld [vmem:[%s5364_s1 + $0x650] sm:$0xff]  }
  0x9e   :  { %3837 = vmatprep.subr.bf16.mxu1 %v4202_v45  ;;  %v4270_v45 = vld [vmem:[%s5364_s1 + $0x6d0] sm:$0xff]  }
  0xa0   :  { %3816 = vmatpush3.bf16.msra.mxu0 %v4203_v46  ;;  %v4271_v46 = vld [vmem:[%s5364_s1 + $0x610] sm:$0xff]  }
  0xa1   :  { %3838 = vmatpush3.bf16.msra.mxu1 %v4204_v47  ;;  %3845 = vmatprep.subr.bf16.mxu0 %v4211_v52  ;;  %v4272_v47 = vld [vmem:[%s5364_s1 + $0x690] sm:$0xff]   ;;  %v4277_v52 = vld [vmem:[%s5364_s1 + $0x640] sm:$0xff]  }
  0xa2   :  { %3867 = vmatprep.subr.bf16.mxu1 %v4212_v53  ;;  %v4278_v53 = vld [vmem:[%s5364_s1 + $0x6c0] sm:$0xff]  }
  0xa3   :  { %2903 = vmatmul.mubr.bf16.vlgmr.msra.gmra.mxu0 %v4205_v48  ;;  %v4273_v48 = vld [vmem:[%s5364_s1 + $0x648] sm:$0xff]  }
  0xa4   :  { %2944 = vmatmul.mubr.bf16.vlgmr.msra.gmra.mxu1 %v4208_v50  ;;  %3846 = vmatpush3.bf16.msra.mxu0 %v4213_v54  ;;  %v4275_v50 = vld [vmem:[%s5364_s1 + $0x608] sm:$0xff]   ;;  %v4279_v54 = vld [vmem:[%s5364_s1 + $0x600] sm:$0xff]  }
  0xa5   :  { %3868 = vmatpush3.bf16.msra.mxu1 %v4214_v55  ;;  %3847 = vmatprep.subr.bf16.mxu0 %v4215_v56  ;;  %v4280_v55 = vld [vmem:[%s5364_s1 + $0x680] sm:$0xff]  }
  0xa6   :  { %3869 = vmatprep.subr.bf16.mxu1 %v4216_v57  ;;  %2984 = vmatprep.mubr.bf16.mxu0 %v4245_v21  ;;  %v4281_v56 = vld [vmem:[%s5365_s0 + $0x60] ss:$144 sps:$4 sm:$0x3f]   ;;  %v4283_v57 = vld [vmem:[%s5365_s0 + $0x64] ss:$144 sps:$4 sm:$0x3f]  }
  0xa7   :  { %3025 = vmatprep.mubr.bf16.mxu1 %v4248_v23  ;;  %v4312_v21 = vld [vmem:[%s5364_s1 + $0x7c8] sm:$0xff]  }
  0xa8   :  { %3848 = vmatpush3.bf16.msra.mxu0 %v4217_v58  ;;  %v4284_v58 = vld [vmem:[%s5365_s0 + $0x68] ss:$144 sps:$4 sm:$0x3f]  }
  0xa9   :  { %3870 = vmatpush3.bf16.msra.mxu1 %v4218_v59  ;;  %3849 = vmatprep.subr.bf16.mxu0 %v4219_v60  ;;  %v4286_v59 = vld [vmem:[%s5365_s0 + $0x6c] ss:$144 sps:$4 sm:$0x3f]  }
  0xaa   :  { %3871 = vmatprep.subr.bf16.mxu1 %v4220_v61  ;;  %v4287_v60 = vld [vmem:[%s5364_s1 + $0x778] sm:$0xff]   ;;  %v4314_v23 = vld [vmem:[%s5364_s1 + $0x788] sm:$0xff]  }
  0xab   :  { %v4288_v61 = vld [vmem:[%s5364_s1 + $0x7f8] sm:$0xff]  }
  0xac   :  { %3850 = vmatpush3.bf16.msra.mxu0 %v4221_v62  ;;  %v4289_v62 = vld [vmem:[%s5364_s1 + $0x738] sm:$0xff]  }
  0xad   :  { %3872 = vmatpush3.bf16.msra.mxu1 %v4222_v63  ;;  %3851 = vmatprep.subr.bf16.mxu0 %v4223_v0  ;;  %v4290_v63 = vld [vmem:[%s5364_s1 + $0x7b8] sm:$0xff]   ;;  %v4291_v0 = vld [vmem:[%s5364_s1 + $0x770] sm:$0xff]  }
  0xae   :  { %3873 = vmatprep.subr.bf16.mxu1 %v4224_v1  ;;  %v4292_v1 = vld [vmem:[%s5364_s1 + $0x7f0] sm:$0xff]  }
  0xb0   :  { %3852 = vmatpush3.bf16.msra.mxu0 %v4225_v2  ;;  %v4293_v2 = vld [vmem:[%s5364_s1 + $0x730] sm:$0xff]  }
  0xb1   :  { %3874 = vmatpush3.bf16.msra.mxu1 %v4226_v3  ;;  %3853 = vmatprep.subr.bf16.mxu0 %v4227_v4  ;;  %v4294_v3 = vld [vmem:[%s5364_s1 + $0x7b0] sm:$0xff]   ;;  %v4295_v4 = vld [vmem:[%s5364_s1 + $0x768] sm:$0xff]  }
  0xb2   :  { %3875 = vmatprep.subr.bf16.mxu1 %v4228_v5  ;;  %v4296_v5 = vld [vmem:[%s5364_s1 + $0x7e8] sm:$0xff]  }
  0xb4   :  { %3854 = vmatpush3.bf16.msra.mxu0 %v4229_v6  ;;  %v4297_v6 = vld [vmem:[%s5364_s1 + $0x728] sm:$0xff]  }
  0xb5   :  { %3876 = vmatpush3.bf16.msra.mxu1 %v4230_v7  ;;  %3855 = vmatprep.subr.bf16.mxu0 %v4231_v8  ;;  %v4298_v7 = vld [vmem:[%s5364_s1 + $0x7a8] sm:$0xff]   ;;  %v4299_v8 = vld [vmem:[%s5364_s1 + $0x760] sm:$0xff]  }
  0xb6   :  { %3877 = vmatprep.subr.bf16.mxu1 %v4232_v9  ;;  %v4300_v9 = vld [vmem:[%s5364_s1 + $0x7e0] sm:$0xff]  }
  0xb8   :  { %3856 = vmatpush3.bf16.msra.mxu0 %v4233_v10  ;;  %v4301_v10 = vld [vmem:[%s5364_s1 + $0x720] sm:$0xff]  }
  0xb9   :  { %3878 = vmatpush3.bf16.msra.mxu1 %v4234_v11  ;;  %3857 = vmatprep.subr.bf16.mxu0 %v4235_v12  ;;  %v4302_v11 = vld [vmem:[%s5364_s1 + $0x7a0] sm:$0xff]   ;;  %v4303_v12 = vld [vmem:[%s5364_s1 + $0x758] sm:$0xff]  }
  0xba   :  { %3879 = vmatprep.subr.bf16.mxu1 %v4236_v13  ;;  %v4304_v13 = vld [vmem:[%s5364_s1 + $0x7d8] sm:$0xff]  }
  0xbc   :  { %3858 = vmatpush3.bf16.msra.mxu0 %v4237_v14  ;;  %v4305_v14 = vld [vmem:[%s5364_s1 + $0x718] sm:$0xff]  }
  0xbd   :  { %3880 = vmatpush3.bf16.msra.mxu1 %v4238_v15  ;;  %3859 = vmatprep.subr.bf16.mxu0 %v4239_v16  ;;  %v4306_v15 = vld [vmem:[%s5364_s1 + $0x798] sm:$0xff]   ;;  %v4307_v16 = vld [vmem:[%s5364_s1 + $0x750] sm:$0xff]  }
  0xbe   :  { %3881 = vmatprep.subr.bf16.mxu1 %v4240_v17  ;;  %v4308_v17 = vld [vmem:[%s5364_s1 + $0x7d0] sm:$0xff]  }
  0xc0   :  { %3860 = vmatpush3.bf16.msra.mxu0 %v4241_v18  ;;  %v4309_v18 = vld [vmem:[%s5364_s1 + $0x710] sm:$0xff]  }
  0xc1   :  { %3882 = vmatpush3.bf16.msra.mxu1 %v4242_v19  ;;  %3889 = vmatprep.subr.bf16.mxu0 %v4249_v24  ;;  %v4310_v19 = vld [vmem:[%s5364_s1 + $0x790] sm:$0xff]   ;;  %v4315_v24 = vld [vmem:[%s5364_s1 + $0x740] sm:$0xff]  }
  0xc2   :  { %3911 = vmatprep.subr.bf16.mxu1 %v4250_v25  ;;  %v4316_v25 = vld [vmem:[%s5364_s1 + $0x7c0] sm:$0xff]  }
  0xc3   :  { %2985 = vmatmul.mubr.bf16.vlgmr.msra.gmra.mxu0 %v4243_v20  ;;  %v4311_v20 = vld [vmem:[%s5364_s1 + $0x748] sm:$0xff]  }
  0xc4   :  { %3026 = vmatmul.mubr.bf16.vlgmr.msra.gmra.mxu1 %v4246_v22  ;;  %3890 = vmatpush3.bf16.msra.mxu0 %v4251_v26  ;;  %v4313_v22 = vld [vmem:[%s5364_s1 + $0x708] sm:$0xff]   ;;  %v4317_v26 = vld [vmem:[%s5364_s1 + $0x700] sm:$0xff]  }
  0xc5   :  { %3912 = vmatpush3.bf16.msra.mxu1 %v4252_v27  ;;  %3891 = vmatprep.subr.bf16.mxu0 %v4253_v28  ;;  %v4318_v27 = vld [vmem:[%s5364_s1 + $0x780] sm:$0xff]  }
  0xc6   :  { %3913 = vmatprep.subr.bf16.mxu1 %v4254_v29  ;;  %3066 = vmatprep.mubr.bf16.mxu0 %v4283_v57  ;;  %v4319_v28 = vld [vmem:[%s5365_s0 + $0x70] ss:$144 sps:$4 sm:$0x3f]   ;;  %v4321_v29 = vld [vmem:[%s5365_s0 + $0x74] ss:$144 sps:$4 sm:$0x3f]  }
  0xc7   :  { %3107 = vmatprep.mubr.bf16.mxu1 %v4286_v59  ;;  %v4350_v57 = vld [vmem:[%s5364_s1 + $0x8c8] sm:$0xff]  }
  0xc8   :  { %3892 = vmatpush3.bf16.msra.mxu0 %v4255_v30  ;;  %v4322_v30 = vld [vmem:[%s5365_s0 + $0x78] ss:$144 sps:$4 sm:$0x3f]  }
  0xc9   :  { %3914 = vmatpush3.bf16.msra.mxu1 %v4256_v31  ;;  %3893 = vmatprep.subr.bf16.mxu0 %v4257_v32  ;;  %v4324_v31 = vld [vmem:[%s5365_s0 + $0x7c] ss:$144 sps:$4 sm:$0x3f]  }
  0xca   :  { %3915 = vmatprep.subr.bf16.mxu1 %v4258_v33  ;;  %v4325_v32 = vld [vmem:[%s5364_s1 + $0x878] sm:$0xff]   ;;  %v4352_v59 = vld [vmem:[%s5364_s1 + $0x888] sm:$0xff]  }
  0xcb   :  { %v4326_v33 = vld [vmem:[%s5364_s1 + $0x8f8] sm:$0xff]  }
  0xcc   :  { %3894 = vmatpush3.bf16.msra.mxu0 %v4259_v34  ;;  %v4327_v34 = vld [vmem:[%s5364_s1 + $0x838] sm:$0xff]  }
  0xcd   :  { %3916 = vmatpush3.bf16.msra.mxu1 %v4260_v35  ;;  %3895 = vmatprep.subr.bf16.mxu0 %v4261_v36  ;;  %v4328_v35 = vld [vmem:[%s5364_s1 + $0x8b8] sm:$0xff]   ;;  %v4329_v36 = vld [vmem:[%s5364_s1 + $0x870] sm:$0xff]  }
  0xce   :  { %3917 = vmatprep.subr.bf16.mxu1 %v4262_v37  ;;  %v4330_v37 = vld [vmem:[%s5364_s1 + $0x8f0] sm:$0xff]  }
  0xd0   :  { %3896 = vmatpush3.bf16.msra.mxu0 %v4263_v38  ;;  %v4331_v38 = vld [vmem:[%s5364_s1 + $0x830] sm:$0xff]  }
  0xd1   :  { %3918 = vmatpush3.bf16.msra.mxu1 %v4264_v39  ;;  %3897 = vmatprep.subr.bf16.mxu0 %v4265_v40  ;;  %v4332_v39 = vld [vmem:[%s5364_s1 + $0x8b0] sm:$0xff]   ;;  %v4333_v40 = vld [vmem:[%s5364_s1 + $0x868] sm:$0xff]  }
  0xd2   :  { %3919 = vmatprep.subr.bf16.mxu1 %v4266_v41  ;;  %v4334_v41 = vld [vmem:[%s5364_s1 + $0x8e8] sm:$0xff]  }
  0xd4   :  { %3898 = vmatpush3.bf16.msra.mxu0 %v4267_v42  ;;  %v4335_v42 = vld [vmem:[%s5364_s1 + $0x828] sm:$0xff]  }
  0xd5   :  { %3920 = vmatpush3.bf16.msra.mxu1 %v4268_v43  ;;  %3899 = vmatprep.subr.bf16.mxu0 %v4269_v44  ;;  %v4336_v43 = vld [vmem:[%s5364_s1 + $0x8a8] sm:$0xff]   ;;  %v4337_v44 = vld [vmem:[%s5364_s1 + $0x860] sm:$0xff]  }
  0xd6   :  { %3921 = vmatprep.subr.bf16.mxu1 %v4270_v45  ;;  %v4338_v45 = vld [vmem:[%s5364_s1 + $0x8e0] sm:$0xff]  }
  0xd8   :  { %3900 = vmatpush3.bf16.msra.mxu0 %v4271_v46  ;;  %v4339_v46 = vld [vmem:[%s5364_s1 + $0x820] sm:$0xff]  }
  0xd9   :  { %3922 = vmatpush3.bf16.msra.mxu1 %v4272_v47  ;;  %3901 = vmatprep.subr.bf16.mxu0 %v4273_v48  ;;  %v4340_v47 = vld [vmem:[%s5364_s1 + $0x8a0] sm:$0xff]   ;;  %v4341_v48 = vld [vmem:[%s5364_s1 + $0x858] sm:$0xff]  }
  0xda   :  { %3923 = vmatprep.subr.bf16.mxu1 %v4274_v49  ;;  %v4342_v49 = vld [vmem:[%s5364_s1 + $0x8d8] sm:$0xff]  }
  0xdc   :  { %3902 = vmatpush3.bf16.msra.mxu0 %v4275_v50  ;;  %v4343_v50 = vld [vmem:[%s5364_s1 + $0x818] sm:$0xff]  }
  0xdd   :  { %3924 = vmatpush3.bf16.msra.mxu1 %v4276_v51  ;;  %3903 = vmatprep.subr.bf16.mxu0 %v4277_v52  ;;  %v4344_v51 = vld [vmem:[%s5364_s1 + $0x898] sm:$0xff]   ;;  %v4345_v52 = vld [vmem:[%s5364_s1 + $0x850] sm:$0xff]  }
  0xde   :  { %3925 = vmatprep.subr.bf16.mxu1 %v4278_v53  ;;  %v4346_v53 = vld [vmem:[%s5364_s1 + $0x8d0] sm:$0xff]  }
  0xe0   :  { %3904 = vmatpush3.bf16.msra.mxu0 %v4279_v54  ;;  %v4347_v54 = vld [vmem:[%s5364_s1 + $0x810] sm:$0xff]  }
  0xe1   :  { %3926 = vmatpush3.bf16.msra.mxu1 %v4280_v55  ;;  %3933 = vmatprep.subr.bf16.mxu0 %v4287_v60  ;;  %v4348_v55 = vld [vmem:[%s5364_s1 + $0x890] sm:$0xff]   ;;  %v4353_v60 = vld [vmem:[%s5364_s1 + $0x840] sm:$0xff]  }
  0xe2   :  { %3955 = vmatprep.subr.bf16.mxu1 %v4288_v61  ;;  %v4354_v61 = vld [vmem:[%s5364_s1 + $0x8c0] sm:$0xff]  }
  0xe3   :  { %3067 = vmatmul.mubr.bf16.vlgmr.msra.gmra.mxu0 %v4281_v56  ;;  %v4349_v56 = vld [vmem:[%s5364_s1 + $0x848] sm:$0xff]  }
  0xe4   :  { %3108 = vmatmul.mubr.bf16.vlgmr.msra.gmra.mxu1 %v4284_v58  ;;  %3934 = vmatpush3.bf16.msra.mxu0 %v4289_v62  ;;  %v4351_v58 = vld [vmem:[%s5364_s1 + $0x808] sm:$0xff]   ;;  %v4355_v62 = vld [vmem:[%s5364_s1 + $0x800] sm:$0xff]  }
  0xe5   :  { %3956 = vmatpush3.bf16.msra.mxu1 %v4290_v63  ;;  %3935 = vmatprep.subr.bf16.mxu0 %v4291_v0  ;;  %v4356_v63 = vld [vmem:[%s5364_s1 + $0x880] sm:$0xff]  }
  0xe6   :  { %3957 = vmatprep.subr.bf16.mxu1 %v4292_v1  ;;  %3148 = vmatprep.mubr.bf16.mxu0 %v4321_v29  ;;  %v4357_v0 = vld [vmem:[%s5365_s0 + $0x80] ss:$144 sps:$4 sm:$0x3f]   ;;  %v4359_v1 = vld [vmem:[%s5365_s0 + $0x84] ss:$144 sps:$4 sm:$0x3f]  }
  0xe7   :  { %3189 = vmatprep.mubr.bf16.mxu1 %v4324_v31 }
  0xe8   :  { %3936 = vmatpush3.bf16.msra.mxu0 %v4293_v2  ;;  %v4360_v2 = vld [vmem:[%s5365_s0 + $0x88] ss:$144 sps:$4 sm:$0x3f]  }
  0xe9   :  { %3958 = vmatpush3.bf16.msra.mxu1 %v4294_v3  ;;  %3937 = vmatprep.subr.bf16.mxu0 %v4295_v4  ;;  %v4362_v3 = vld [vmem:[%s5365_s0 + $0x8c] ss:$144 sps:$4 sm:$0x3f]   ;;  %v3641_v4 = vpop.f32.mrf.mxu0 }
  0xea   :  { %3959 = vmatprep.subr.bf16.mxu1 %v4296_v5  ;;  %v3663_v5 = vpop.f32.mrf.mxu1 }
  0xec   :  { %3938 = vmatpush3.bf16.msra.mxu0 %v4297_v6  ;;  %v3642_v6 = vpop.f32.mrf.mxu0 }
  0xed   :  { %3960 = vmatpush3.bf16.msra.mxu1 %v4298_v7  ;;  %3939 = vmatprep.subr.bf16.mxu0 %v4299_v8  ;;  %v3664_v7 = vpop.f32.mrf.mxu1 }
  0xee   :  { %3961 = vmatprep.subr.bf16.mxu1 %v4300_v9  ;;  %v3644_v8 = vpop.f32.mrf.mxu0 }
  0xef   :  { %v3666_v9 = vpop.f32.mrf.mxu1 }
  0xf0   :  { %3940 = vmatpush3.bf16.msra.mxu0 %v4301_v10  ;;  %v3645_v10 = vpop.f32.mrf.mxu0 }
  0xf1   :  { %3962 = vmatpush3.bf16.msra.mxu1 %v4302_v11  ;;  %3941 = vmatprep.subr.bf16.mxu0 %v4303_v12  ;;  %v3667_v12 = vpop.f32.mrf.mxu1 }
  0xf2   :  { %3963 = vmatprep.subr.bf16.mxu1 %v4304_v13 }
  0xf4   :  { %3942 = vmatpush3.bf16.msra.mxu0 %v4305_v14 }
  0xf5   :  { %3964 = vmatpush3.bf16.msra.mxu1 %v4306_v15  ;;  %3943 = vmatprep.subr.bf16.mxu0 %v4307_v16 }
  0xf6   :  { %3965 = vmatprep.subr.bf16.mxu1 %v4308_v17 }
  0xf8   :  { %3944 = vmatpush3.bf16.msra.mxu0 %v4309_v18 }
  0xf9   :  { %3966 = vmatpush3.bf16.msra.mxu1 %v4310_v19  ;;  %3945 = vmatprep.subr.bf16.mxu0 %v4311_v20 }
  0xfa   :  { %3967 = vmatprep.subr.bf16.mxu1 %v4312_v21 }
  0xfc   :  { %3946 = vmatpush3.bf16.msra.mxu0 %v4313_v22 }
  0xfd   :  { %3968 = vmatpush3.bf16.msra.mxu1 %v4314_v23  ;;  %3947 = vmatprep.subr.bf16.mxu0 %v4315_v24 }
  0xfe   :  { %3969 = vmatprep.subr.bf16.mxu1 %v4316_v25 }
 0x100   :  { %3948 = vmatpush3.bf16.msra.mxu0 %v4317_v26 }
 0x101   :  { %3970 = vmatpush3.bf16.msra.mxu1 %v4318_v27  ;;  %3977 = vmatprep.subr.bf16.mxu0 %v4325_v32 }
 0x102   :  { %3999 = vmatprep.subr.bf16.mxu1 %v4326_v33 }
 0x103   :  { %3149 = vmatmul.mubr.bf16.vlgmr.msra.gmra.mxu0 %v4319_v28  ;;  %v3685_v11 = vpop.f32.mrf.mxu0 }
 0x104   :  { %3190 = vmatmul.mubr.bf16.vlgmr.msra.gmra.mxu1 %v4322_v30  ;;  %3978 = vmatpush3.bf16.msra.mxu0 %v4327_v34  ;;  %v3707_v13 = vpop.f32.mrf.mxu1 }
 0x105   :  { %4000 = vmatpush3.bf16.msra.mxu1 %v4328_v35  ;;  %3979 = vmatprep.subr.bf16.mxu0 %v4329_v36  ;;  %v3686_v14 = vpop.f32.mrf.mxu0 }
 0x106   :  { %4001 = vmatprep.subr.bf16.mxu1 %v4330_v37  ;;  %3230 = vmatprep.mubr.bf16.mxu0 %v4359_v1  ;;  %v3708_v15 = vpop.f32.mrf.mxu1 }
 0x107   :  { %3271 = vmatprep.mubr.bf16.mxu1 %v4362_v3  ;;  %v3688_v16 = vpop.f32.mrf.mxu0 }
 0x108   :  { %3980 = vmatpush3.bf16.msra.mxu0 %v4331_v38  ;;  %v3710_v17 = vpop.f32.mrf.mxu1 }
 0x109   :  { %4002 = vmatpush3.bf16.msra.mxu1 %v4332_v39  ;;  %3981 = vmatprep.subr.bf16.mxu0 %v4333_v40  ;;  %v3689_v18 = vpop.f32.mrf.mxu0 }
 0x10a   :  { %4003 = vmatprep.subr.bf16.mxu1 %v4334_v41  ;;  %v3711_v20 = vpop.f32.mrf.mxu1  ;;  %v3643_v41 = vadd.f32 %v3642_v6, %v3641_v4 }
 0x10b   :  { %v3712_v3 = vadd.f32 %v3711_v20, %v3710_v17 }
 0x10c   :  { %3982 = vmatpush3.bf16.msra.mxu0 %v4335_v42  ;;  %v3296_v42 = vld [vmem:[%s5366_s2] ss:$0 sm:$0xff] }
 0x10d   :  { %4004 = vmatpush3.bf16.msra.mxu1 %v4336_v43  ;;  %3983 = vmatprep.subr.bf16.mxu0 %v4337_v44 }
 0x10e   :  { %4005 = vmatprep.subr.bf16.mxu1 %v4338_v45 }
 0x110   :  { %3984 = vmatpush3.bf16.msra.mxu0 %v4339_v46  ;;  %v2577_v46 = vadd.f32 %v3643_v41, %v3296_v42 }
 0x111   :  { %4006 = vmatpush3.bf16.msra.mxu1 %v4340_v47  ;;  %3985 = vmatprep.subr.bf16.mxu0 %v4341_v48  ;;  %v3665_v47 = vadd.f32 %v3664_v7, %v3663_v5  ;;  %v3646_v48 = vadd.f32 %v3645_v10, %v3644_v8 }
 0x112   :  { %4007 = vmatprep.subr.bf16.mxu1 %v4342_v49 }
 0x114   :  { %3986 = vmatpush3.bf16.msra.mxu0 %v4343_v50  ;;  %v3687_v50 = vadd.f32 %v3686_v14, %v3685_v11 }
 0x115   :  { %4008 = vmatpush3.bf16.msra.mxu1 %v4344_v51  ;;  %3987 = vmatprep.subr.bf16.mxu0 %v4345_v52 }
 0x116   :  { %4009 = vmatprep.subr.bf16.mxu1 %v4346_v53  ;;  %v2618_v53 = vadd.f32 %v3665_v47, %v2577_v46 }
 0x118   :  { %3988 = vmatpush3.bf16.msra.mxu0 %v4347_v54  ;;  %v2580_v54 = vadd.f32 %v3646_v48, %v3296_v42 }
 0x119   :  { %4010 = vmatpush3.bf16.msra.mxu1 %v4348_v55  ;;  %3989 = vmatprep.subr.bf16.mxu0 %v4349_v56  ;;  %v3668_v55 = vadd.f32 %v3667_v12, %v3666_v9  ;;  %v2659_v56 = vadd.f32 %v3687_v50, %v2618_v53 }
 0x11a   :  { %4011 = vmatprep.subr.bf16.mxu1 %v4350_v57  ;;  %v3709_v57 = vadd.f32 %v3708_v15, %v3707_v13 }
 0x11c   :  { %3990 = vmatpush3.bf16.msra.mxu0 %v4351_v58  ;;  %v3690_v58 = vadd.f32 %v3689_v18, %v3688_v16 }
 0x11d   :  { %4012 = vmatpush3.bf16.msra.mxu1 %v4352_v59  ;;  %3991 = vmatprep.subr.bf16.mxu0 %v4353_v60 }
 0x11e   :  { %4013 = vmatprep.subr.bf16.mxu1 %v4354_v61  ;;  %v2621_v61 = vadd.f32 %v3668_v55, %v2580_v54 }
 0x120   :  { %3992 = vmatpush3.bf16.msra.mxu0 %v4355_v62 }
 0x121   :  { %4014 = vmatpush3.bf16.msra.mxu1 %v4356_v63  ;;  %v2700_v63 = vadd.f32 %v3709_v57, %v2659_v56 }
 0x123   :  { %3231 = vmatmul.mubr.bf16.vlgmr.msra.gmra.mxu0 %v4357_v0  ;;  %v3729_v19 = vpop.f32.mrf.mxu0  ;;  %v2662_v0 = vadd.f32 %v3690_v58, %v2621_v61 }
 0x124   :  { %3272 = vmatmul.mubr.bf16.vlgmr.msra.gmra.mxu1 %v4360_v2  ;;  %v3751_v21 = vpop.f32.mrf.mxu1 }
 0x125   :  { %v3730_v22 = vpop.f32.mrf.mxu0  ;;  %v2703_v8 = vadd.f32 %v3712_v3, %v2662_v0 }
 0x126   :  { %v3752_v23 = vpop.f32.mrf.mxu1  ;;  %v3731_v62 = vadd.f32 %v3730_v22, %v3729_v19 }
 0x127   :  { %v3732_v24 = vpop.f32.mrf.mxu0  ;;  %v3753_v5 = vadd.f32 %v3752_v23, %v3751_v21 }
 0x128   :  { %v3754_v25 = vpop.f32.mrf.mxu1  ;;  %v2741_v4 = vadd.f32 %v3731_v62, %v2700_v63 }
 0x129   :  { %v3733_v26 = vpop.f32.mrf.mxu0 }
 0x12a   :  { %v3755_v28 = vpop.f32.mrf.mxu1  ;;  %v3734_v6 = vadd.f32 %v3733_v26, %v3732_v24  ;;  %v2782_v9 = vadd.f32 %v3753_v5, %v2741_v4 }
 0x12b   :  { %v3756_v15 = vadd.f32 %v3755_v28, %v3754_v25 }
 0x12c   :  { %v2744_v12 = vadd.f32 %v3734_v6, %v2703_v8 }
 0x12e   :  { %v2785_v22 = vadd.f32 %v3756_v15, %v2744_v12 }
 0x143   :  { %v3773_v27 = vpop.f32.mrf.mxu0 }
 0x144   :  { %v3795_v29 = vpop.f32.mrf.mxu1 }
 0x145   :  { %v3774_v30 = vpop.f32.mrf.mxu0 }
 0x146   :  { %v3796_v31 = vpop.f32.mrf.mxu1  ;;  %v3775_v10 = vadd.f32 %v3774_v30, %v3773_v27 }
 0x147   :  { %v3776_v32 = vpop.f32.mrf.mxu0  ;;  %v3797_v18 = vadd.f32 %v3796_v31, %v3795_v29 }
 0x148   :  { %v3798_v33 = vpop.f32.mrf.mxu1  ;;  %v2823_v16 = vadd.f32 %v3775_v10, %v2782_v9 }
 0x149   :  { %v3777_v34 = vpop.f32.mrf.mxu0 }
 0x14a   :  { %v3799_v36 = vpop.f32.mrf.mxu1  ;;  %v3778_v19 = vadd.f32 %v3777_v34, %v3776_v32  ;;  %v2864_v17 = vadd.f32 %v3797_v18, %v2823_v16 }
 0x14b   :  { %v3800_v21 = vadd.f32 %v3799_v36, %v3798_v33 }
 0x14c   :  { %v2826_v20 = vadd.f32 %v3778_v19, %v2785_v22 }
 0x14e   :  { %v2867_v47 = vadd.f32 %v3800_v21, %v2826_v20 }
 0x163   :  { %v3817_v35 = vpop.f32.mrf.mxu0 }
 0x164   :  { %v3839_v37 = vpop.f32.mrf.mxu1 }
 0x165   :  { %v3818_v38 = vpop.f32.mrf.mxu0 }
 0x166   :  { %v3840_v39 = vpop.f32.mrf.mxu1  ;;  %v3819_v41 = vadd.f32 %v3818_v38, %v3817_v35 }
 0x167   :  { %v3820_v40 = vpop.f32.mrf.mxu0  ;;  %v3841_v24 = vadd.f32 %v3840_v39, %v3839_v37 }
 0x168   :  { %v3842_v43 = vpop.f32.mrf.mxu1  ;;  %v2905_v23 = vadd.f32 %v3819_v41, %v2864_v17 }
 0x169   :  { %v3821_v44 = vpop.f32.mrf.mxu0 }
 0x16a   :  { %v3843_v49 = vpop.f32.mrf.mxu1  ;;  %v3822_v26 = vadd.f32 %v3821_v44, %v3820_v40  ;;  %v2946_v53 = vadd.f32 %v3841_v24, %v2905_v23 }
 0x16b   :  { %v3844_v29 = vadd.f32 %v3843_v49, %v3842_v43 }
 0x16c   :  { %v2908_v25 = vadd.f32 %v3822_v26, %v2867_v47 }
 0x16e   :  { %v2949_v54 = vadd.f32 %v3844_v29, %v2908_v25 }
 0x183   :  { %v3861_v45 = vpop.f32.mrf.mxu0 }
 0x184   :  { %v3883_v51 = vpop.f32.mrf.mxu1 }
 0x185   :  { %v3862_v52 = vpop.f32.mrf.mxu0 }
 0x186   :  { %v3884_v59 = vpop.f32.mrf.mxu1  ;;  %v3863_v48 = vadd.f32 %v3862_v52, %v3861_v45 }
 0x187   :  { %v3864_v60 = vpop.f32.mrf.mxu0  ;;  %v3885_v32 = vadd.f32 %v3884_v59, %v3883_v51 }
 0x188   :  { %v3886_v1 = vpop.f32.mrf.mxu1  ;;  %v2987_v31 = vadd.f32 %v3863_v48, %v2946_v53 }
 0x189   :  { %v3865_v2 = vpop.f32.mrf.mxu0 }
 0x18a   :  { %v3887_v11 = vpop.f32.mrf.mxu1  ;;  %v3866_v34 = vadd.f32 %v3865_v2, %v3864_v60  ;;  %v3028_v33 = vadd.f32 %v3885_v32, %v2987_v31 }
 0x18b   :  { %v3888_v40 = vadd.f32 %v3887_v11, %v3886_v1 }
 0x18c   :  { %v2990_v36 = vadd.f32 %v3866_v34, %v2949_v54 }
 0x18e   :  { %v3031_v52 = vadd.f32 %v3888_v40, %v2990_v36 }
 0x1a3   :  { %v3905_v7 = vpop.f32.mrf.mxu0 }
 0x1a4   :  { %v3927_v13 = vpop.f32.mrf.mxu1 }
 0x1a5   :  { %v3906_v14 = vpop.f32.mrf.mxu0 }
 0x1a6   :  { %v3928_v42 = vpop.f32.mrf.mxu1  ;;  %v3907_v55 = vadd.f32 %v3906_v14, %v3905_v7 }
 0x1a7   :  { %v3908_v46 = vpop.f32.mrf.mxu0  ;;  %v3929_v56 = vadd.f32 %v3928_v42, %v3927_v13 }
 0x1a8   :  { %v3930_v27 = vpop.f32.mrf.mxu1  ;;  %v3069_v44 = vadd.f32 %v3907_v55, %v3028_v33 }
 0x1a9   :  { %v3909_v30 = vpop.f32.mrf.mxu0 }
 0x1aa   :  { %v3931_v28 = vpop.f32.mrf.mxu1  ;;  %v3910_v45 = vadd.f32 %v3909_v30, %v3908_v46  ;;  %v3110_v43 = vadd.f32 %v3929_v56, %v3069_v44 }
 0x1ab   :  { %v3932_v51 = vadd.f32 %v3931_v28, %v3930_v27 }
 0x1ac   :  { %v3072_v49 = vadd.f32 %v3910_v45, %v3031_v52 }
 0x1ae   :  { %v3113_v2 = vadd.f32 %v3932_v51, %v3072_v49 }
 0x1c3   :  { %v3949_v50 = vpop.f32.mrf.mxu0 }
 0x1c4   :  { %v3971_v35 = vpop.f32.mrf.mxu1 }
 0x1c5   :  { %v3950_v38 = vpop.f32.mrf.mxu0 }
 0x1c6   :  { %v3972_v37 = vpop.f32.mrf.mxu1  ;;  %v3951_v57 = vadd.f32 %v3950_v38, %v3949_v50 }
 0x1c7   :  { %v3952_v39 = vpop.f32.mrf.mxu0  ;;  %v3973_v60 = vadd.f32 %v3972_v37, %v3971_v35 }
 0x1c8   :  { %v3974_v58 = vpop.f32.mrf.mxu1  ;;  %v3151_v59 = vadd.f32 %v3951_v57, %v3110_v43 }
 0x1c9   :  { %v3953_v61 = vpop.f32.mrf.mxu0 }
 0x1ca   :  { %v3954_v62 = vadd.f32 %v3953_v61, %v3952_v39  ;;  %v3975_v63 = vpop.f32.mrf.mxu1  ;;  %v3192_v5 = vadd.f32 %v3973_v60, %v3151_v59 }
 0x1cb   :  { %v3976_v10 = vadd.f32 %v3975_v63, %v3974_v58 }
 0x1cc   :  { %v3154_v1 = vadd.f32 %v3954_v62, %v3113_v2 }
 0x1ce   :  { %v3195_v14 = vadd.f32 %v3976_v10, %v3154_v1 }
 0x1e3   :  { %v3993_v0 = vpop.f32.mrf.mxu0 }
 0x1e4   :  { %v4015_v3 = vpop.f32.mrf.mxu1 }
 0x1e5   :  { %v3994_v4 = vpop.f32.mrf.mxu0 }
 0x1e6   :  { %v3995_v6 = vadd.f32 %v3994_v4, %v3993_v0  ;;  %v4016_v7 = vpop.f32.mrf.mxu1 }
 0x1e7   :  { %v3996_v8 = vpop.f32.mrf.mxu0  ;;  %v4017_v9 = vadd.f32 %v4016_v7, %v4015_v3 }
 0x1e8   :  { %v3233_v11 = vadd.f32 %v3995_v6, %v3192_v5  ;;  %v4018_v12 = vpop.f32.mrf.mxu1 }
 0x1e9   :  { %v3997_v13 = vpop.f32.mrf.mxu0 }
 0x1ea   :  { %v3274_v15 = vadd.f32 %v4017_v9, %v3233_v11  ;;  %v3998_v16 = vadd.f32 %v3997_v13, %v3996_v8  ;;  %v4019_v18 = vpop.f32.mrf.mxu1 }
 0x1eb   :  { %v4020_v41 = vadd.f32 %v4019_v18, %v4018_v12 }
 0x1ec   :  { %v3280_v19 = vmax.f32 %v3274_v15, 0.0  ;;  %v3236_v22 = vadd.f32 %v3998_v16, %v3195_v14 }
 0x1ee   :  { %v3623_v42 = vpack.c.bf16 %v3280_v19, %v3280_v19  ;;  %v3277_v46 = vadd.f32 %v4020_v41, %v3236_v22 }
 0x1f0   :  { %3290 = vst [vmem:[%s5367_s3] sm:$0xf] %v3623_v42  ;;  %v3281_v17 = vmax.f32 %v3277_v46, 0.0 }
 0x1f2   :  { %v3624_v20 = vpack.c.bf16 %v3281_v17, %v3281_v17 }
 0x1f4   :  { %3291 = vst [vmem:[%s5367_s3 + $0x4] sm:$0x3] %v3624_v20 }

</bundles_post_ra>
